<compile_context>
chip_gen: v7x
topology: tpu7x:2x2x1
jax: 0.10.0
libtpu: 0.0.40
codegen_flags: <defaults>
</compile_context>

<pallas_src>
import functools

import jax
import jax.numpy as jnp
from jax.experimental import pallas as pl
from jax.experimental.pallas import tpu as pltpu

LANE = 128            # TPU lane width — every channel dim is padded to this
NEG_INF = -1e30
LEAKY_SLOPE = 0.2     # PyG GATConv default negative_slope
HEADS = 8
HID = 8

# contract the last dim of both operands: a[m,k] x b[n,k] -> [m,n]
_TRANS_B = (((1,), (1,)), ((), ()))


def make_fused_gat_kernel(n_pad: int, heads: int):
    """Fully fused 2-layer GAT forward (inference mode).

    refs (inputs):
      cnt_ref     [N, N]    bf16  edge multiplicity j->i (incl. one self loop)
      x_ref       [N, 128]  bf16  node features (lane padded)
      w1_ref      [128,128] bf16  layer-1 transform, head h occupies cols h*8:(h+1)*8
      a1srcT_ref  [8, 128]  bf16  row h = a_src1[h] folded through head-h weights
      a1dst_ref   [128, 8]  bf16  col h = a_dst1[h] folded through head-h weights
      masks1_ref  [8, 128]  bf16  row h = column mask of head h
      w2_ref      [128,128] bf16  layer-2 transform
      a2srcT_ref  [8, 128]  bf16  row 0 = folded a_src2
      a2dst_ref   [128, 8]  bf16  col 0 = folded a_dst2
      auxf_ref    [3, 128]  f32   row0 bias1, row1 bias2, row2 class mask
    output:
      out_ref     [N, 128]  f32   log-probs (padded lanes meaningless)
    scratch:
      alpha_scr   [N, heads*N] bf16   per-head attention, concatenated on lanes
      vals_scr    [heads*N, 128] bf16 per-head masked transformed features
    """
    N = n_pad

    def kernel(cnt_ref, x_ref, w1_ref, a1srcT_ref, a1dst_ref, masks1_ref,
               w2_ref, a2srcT_ref, a2dst_ref, auxf_ref,
               out_ref, alpha_scr, vals_scr):
        f32, bf16 = jnp.float32, jnp.bfloat16

        cnt = cnt_ref[...].astype(f32)                     # [N, N]
        neighbor = cnt > 0.0

        # ----------------- layer 1: GATConv(F, 8, heads=8) + ELU -----------------
        x = x_ref[...]                                                  # [N,128] bf16
        # per-head transform, computed once (hoisted out of the head loop)
        xw_bf = jnp.dot(x, w1_ref[...], preferred_element_type=f32).astype(bf16)
        # source scores (nodes along lanes): st1[h, j] = a_src1[h] . (W_h x_j)
        st1 = jax.lax.dot_general(a1srcT_ref[...], x, _TRANS_B,
                                  preferred_element_type=f32)           # [8, N]
        # destination scores: dt1[i, h] = a_dst1[h] . (W_h x_i)
        dt1 = jnp.dot(x, a1dst_ref[...], preferred_element_type=f32)    # [N, 8]

        for h in range(heads):                     # static unroll over 8 heads
            e = dt1[:, h:h + 1] + st1[h:h + 1, :]                       # [N, N]
            e = jnp.maximum(e, LEAKY_SLOPE * e)                         # LeakyReLU(0.2)
            e = jnp.where(neighbor, e, NEG_INF)                         # mask non-edges
            row_max = jnp.max(e, axis=-1, keepdims=True)
            w = cnt * jnp.exp(e - row_max)      # multiplicity-weighted softmax
            alpha = w * pl.reciprocal(jnp.sum(w, axis=-1, keepdims=True), approx=True)
            # attention dropout (p=0.6) is identity in eval/inference mode
            alpha_scr[:, h * N:(h + 1) * N] = alpha.astype(bf16)
            vals_scr[h * N:(h + 1) * N, :] = xw_bf * masks1_ref[h:h + 1, :]

        # fused aggregation: one K = heads*N MXU pass instead of 8 small ones
        h1 = jnp.dot(alpha_scr[...], vals_scr[...], preferred_element_type=f32)
        h1 = h1 + auxf_ref[0:1, :]                                      # bias1
        h1 = jnp.where(h1 > 0.0, h1, jnp.exp(jnp.minimum(h1, 0.0)) - 1.0)  # ELU
        # inter-layer dropout (p=0.6) is identity in eval/inference mode
        h1_bf = h1.astype(bf16)                                         # [N,128]

        # ----------------- layer 2: GATConv(64, C, heads=1) -----------------
        h1w = jnp.dot(h1_bf, w2_ref[...], preferred_element_type=f32).astype(bf16)
        st2 = jax.lax.dot_general(a2srcT_ref[...], h1_bf, _TRANS_B,
                                  preferred_element_type=f32)           # [8, N] (row 0)
        dt2 = jnp.dot(h1_bf, a2dst_ref[...], preferred_element_type=f32)  # [N, 8]

        e = dt2[:, 0:1] + st2[0:1, :]
        e = jnp.maximum(e, LEAKY_SLOPE * e)
        e = jnp.where(neighbor, e, NEG_INF)
        row_max = jnp.max(e, axis=-1, keepdims=True)
        w = cnt * jnp.exp(e - row_max)
        alpha = w * pl.reciprocal(jnp.sum(w, axis=-1, keepdims=True), approx=True)
        logits = jnp.dot(alpha.astype(bf16), h1w, preferred_element_type=f32)
        logits = logits + auxf_ref[1:2, :]                              # bias2

        # exact masked log_softmax over the real class columns (padded -> -inf)
        cls_mask = auxf_ref[2:3, :] > 0.0
        logits = jnp.where(cls_mask, logits, NEG_INF)
        lmax = jnp.max(logits, axis=-1, keepdims=True)
        lse = lmax + jnp.log(jnp.sum(jnp.exp(logits - lmax), axis=-1, keepdims=True))
        out_ref[...] = (logits - lse).astype(out_ref.dtype)

    return kernel


def _fused_gat_call(cnt, x_pad, w1, a1srcT, a1dst, masks1, w2, a2srcT, a2dst, auxf,
                    *, n_pad, heads):
    N = n_pad
    kernel = make_fused_gat_kernel(n_pad=n_pad, heads=heads)

    flops = int(
        2 * N * LANE * LANE                 # x @ W1
        + 2 * 8 * LANE * N                  # layer-1 src scores
        + 2 * N * LANE * 8                  # layer-1 dst scores
        + heads * 10 * N * N                # layer-1 per-head elementwise
        + 2 * N * (heads * N) * LANE        # fused aggregation matmul
        + 2 * N * LANE * LANE               # h1 @ W2
        + 2 * 8 * LANE * N + 2 * N * LANE * 8
        + 10 * N * N                        # layer-2 elementwise
        + 2 * N * N * LANE                  # layer-2 aggregation
        + 8 * N * LANE)                     # bias / ELU / log_softmax
    transcendentals = int((heads + 1) * N * N + 3 * N * LANE)
    bytes_accessed = int(N * N * 2 + N * LANE * 2 + 2 * LANE * LANE * 2
                         + 2 * (8 * LANE * 2) + 2 * (LANE * 8 * 2)
                         + 8 * LANE * 2 + 3 * LANE * 4 + N * LANE * 4)

    return pl.pallas_call(
        kernel,
        out_shape=jax.ShapeDtypeStruct((N, LANE), jnp.float32),
        grid=(1,),
        in_specs=[
            pl.BlockSpec((N, N), lambda i: (0, 0)),        # cnt        (bf16)
            pl.BlockSpec((N, LANE), lambda i: (0, 0)),     # x          (bf16)
            pl.BlockSpec((LANE, LANE), lambda i: (0, 0)),  # W1         (bf16)
            pl.BlockSpec((8, LANE), lambda i: (0, 0)),     # a1srcT     (bf16)
            pl.BlockSpec((LANE, 8), lambda i: (0, 0)),     # a1dst      (bf16)
            pl.BlockSpec((8, LANE), lambda i: (0, 0)),     # head masks (bf16)
            pl.BlockSpec((LANE, LANE), lambda i: (0, 0)),  # W2         (bf16)
            pl.BlockSpec((8, LANE), lambda i: (0, 0)),     # a2srcT     (bf16)
            pl.BlockSpec((LANE, 8), lambda i: (0, 0)),     # a2dst      (bf16)
            pl.BlockSpec((3, LANE), lambda i: (0, 0)),     # bias1/bias2/cls mask (f32)
        ],
        out_specs=pl.BlockSpec((N, LANE), lambda i: (0, 0)),
        scratch_shapes=[
            pltpu.VMEM((N, heads * N), jnp.bfloat16),      # per-head alphas
            pltpu.VMEM((heads * N, LANE), jnp.bfloat16),   # per-head masked values
        ],
        compiler_params=pltpu.CompilerParams(
            dimension_semantics=("arbitrary",),
            vmem_limit_bytes=32 * 1024 * 1024,
        ),
        cost_estimate=pl.CostEstimate(flops=flops, transcendentals=transcendentals,
                                      bytes_accessed=bytes_accessed),
    )(cnt, x_pad, w1, a1srcT, a1dst, masks1, w2, a2srcT, a2dst, auxf)


def _pad2(a, rows, cols, dtype):
    out = jnp.zeros((rows, cols), dtype)
    return out.at[:a.shape[0], :a.shape[1]].set(a.astype(dtype))


@functools.partial(jax.jit, static_argnums=(3,))
def gat_net_forward(x, edge_index, params, num_classes):
    """GATNet forward (inference mode). Returns log-probs [N, num_classes]."""
    N, F = x.shape
    heads, hid = HEADS, HID
    HIDDEN = heads * hid                                   # 64
    assert F <= LANE and HIDDEN <= LANE and num_classes <= HIDDEN

    # pad node count to a lane multiple; dummy nodes only get a self loop
    n_pad = max(LANE, ((N + LANE - 1) // LANE) * LANE)

    # Dense edge-count matrix cnt[i, j] = #edges j->i, with PyG GATConv's default
    # self-loop handling (remove existing self loops, add exactly one per node).
    eye = jnp.eye(n_pad, dtype=jnp.float32)
    cnt = jnp.zeros((n_pad, n_pad), jnp.float32)
    cnt = cnt.at[edge_index[1], edge_index[0]].add(1.0)
    cnt = (cnt * (1.0 - eye) + eye).astype(jnp.bfloat16)   # counts <= 256 exact in bf16

    # input dropout (p=0.6) is identity in eval/inference mode
    x_pad = _pad2(x, n_pad, LANE, jnp.bfloat16)

    # ---- layer 1 packed params (heads=8, out=8, concat -> 64) -------------
    w1 = params["w1"]                                      # [F, 64]
    w1h = w1.reshape(F, heads, hid)
    w1_pad = _pad2(w1, LANE, LANE, jnp.bfloat16)
    a1srcT = _pad2(jnp.einsum("fhc,hc->hf", w1h, params["a_src1"]), 8, LANE, jnp.bfloat16)
    a1dst = _pad2(jnp.einsum("fhc,hc->fh", w1h, params["a_dst1"]), LANE, 8, jnp.bfloat16)
    masks1 = jnp.zeros((8, LANE), jnp.bfloat16)
    for h in range(heads):
        masks1 = masks1.at[h, h * hid:(h + 1) * hid].set(1.0)

    # ---- layer 2 packed params (heads=1, out=num_classes) -----------------
    w2 = params["w2"]                                      # [64, C]
    w2_pad = _pad2(w2, LANE, LANE, jnp.bfloat16)
    a2srcT = _pad2((w2 @ params["a_src2"])[None, :], 8, LANE, jnp.bfloat16)
    a2dst = _pad2((w2 @ params["a_dst2"])[:, None], LANE, 8, jnp.bfloat16)

    auxf = (jnp.zeros((3, LANE), jnp.float32)
            .at[0, :HIDDEN].set(params["b1"])
            .at[1, :num_classes].set(params["b2"])
            .at[2, :num_classes].set(1.0))

    logp = _fused_gat_call(cnt, x_pad, w1_pad, a1srcT, a1dst, masks1,
                           w2_pad, a2srcT, a2dst, auxf,
                           n_pad=n_pad, heads=heads)
    return logp[:N, :num_classes]


def init_params(key, num_features, num_classes, heads=HEADS, hid=HID):
    ks = jax.random.split(key, 6)
    g = lambda k, shape, s=0.3: s * jax.random.normal(k, shape, jnp.float32)
    return dict(
        w1=g(ks[0], (num_features, heads * hid)),
        a_src1=g(ks[1], (heads, hid)),
        a_dst1=g(ks[2], (heads, hid)),
        b1=jnp.zeros((heads * hid,), jnp.float32),
        w2=g(ks[3], (heads * hid, num_classes)),
        a_src2=g(ks[4], (num_classes,)),
        a_dst2=g(ks[5], (num_classes,)),
        b2=jnp.zeros((num_classes,), jnp.float32),
    )


if __name__ == "__main__":
    NUM_NODES = 128
    NUM_EDGES = 512
    NUM_FEATURES = 16
    NUM_CLASSES = 7

    key = jax.random.PRNGKey(0)
    k_x, k_e, k_p = jax.random.split(key, 3)

    x = jax.random.normal(k_x, (NUM_NODES, NUM_FEATURES), jnp.float32)
    edge_index = jax.random.randint(k_e, (2, NUM_EDGES), 0, NUM_NODES, jnp.int32)
    params = init_params(k_p, NUM_FEATURES, NUM_CLASSES)

    out = gat_net_forward(x, edge_index, params, NUM_CLASSES)
    out = jax.block_until_ready(out)

    assert out.shape == (NUM_NODES, NUM_CLASSES)
    assert bool(jnp.all(jnp.isfinite(out)))
    # rows of log_softmax must exp-sum to 1
    assert bool(jnp.allclose(jnp.sum(jnp.exp(out), axis=-1), 1.0, atol=1e-3))
    print("KERNEL_OK")
</pallas_src>

<mosaic_0001>
module attributes {stable_mosaic.version = 11 : i64} {
  func.func private @main(%arg0: i32) attributes {dimension_semantics = [#tpu.dimension_semantics<core_parallel>], iteration_bounds = array<i64: 2>, tpu.core_type = #tpu.core_type<sc_scalar_subcore>, window_params = []} {
    return
  }
}

module attributes {stable_mosaic.version = 11 : i64} {
  func.func private @main(%arg0: i32) attributes {dimension_semantics = [#tpu.dimension_semantics<core_parallel>], iteration_bounds = array<i64: 2>, tpu.core_type = #tpu.core_type<sc_scalar_subcore>, window_params = []} {
    return
  }
}

module attributes {stable_mosaic.version = 11 : i64} {
  func.func @kernel(%arg0: i32, %arg1: memref<128x128xbf16, #tpu.memory_space<vmem>>, %arg2: memref<128x128xbf16, #tpu.memory_space<vmem>>, %arg3: memref<128x128xbf16, #tpu.memory_space<vmem>>, %arg4: memref<8x128xbf16, #tpu.memory_space<vmem>>, %arg5: memref<128x8xbf16, #tpu.memory_space<vmem>>, %arg6: memref<8x128xbf16, #tpu.memory_space<vmem>>, %arg7: memref<128x128xbf16, #tpu.memory_space<vmem>>, %arg8: memref<8x128xbf16, #tpu.memory_space<vmem>>, %arg9: memref<128x8xbf16, #tpu.memory_space<vmem>>, %arg10: memref<3x128xf32, #tpu.memory_space<vmem>>, %arg11: memref<128x128xf32, #tpu.memory_space<vmem>>, %arg12: memref<128x1024xbf16, #tpu.memory_space<vmem>>, %arg13: memref<1024x128xbf16, #tpu.memory_space<vmem>>) attributes {dimension_semantics = [#tpu.dimension_semantics<arbitrary>], iteration_bounds = array<i64: 1>, scalar_prefetch = 0 : i64, scratch_operands = 2 : i64, tpu.core_type = #tpu.core_type<tc>, window_params = [{pipeline_mode = #tpu.pipeline_mode<synchronous>, transform_indices = @transform_0, window_bounds = array<i64: 128, 128>}, {pipeline_mode = #tpu.pipeline_mode<synchronous>, transform_indices = @transform_1, window_bounds = array<i64: 128, 128>}, {pipeline_mode = #tpu.pipeline_mode<synchronous>, transform_indices = @transform_2, window_bounds = array<i64: 128, 128>}, {pipeline_mode = #tpu.pipeline_mode<synchronous>, transform_indices = @transform_3, window_bounds = array<i64: 8, 128>}, {pipeline_mode = #tpu.pipeline_mode<synchronous>, transform_indices = @transform_4, window_bounds = array<i64: 128, 8>}, {pipeline_mode = #tpu.pipeline_mode<synchronous>, transform_indices = @transform_5, window_bounds = array<i64: 8, 128>}, {pipeline_mode = #tpu.pipeline_mode<synchronous>, transform_indices = @transform_6, window_bounds = array<i64: 128, 128>}, {pipeline_mode = #tpu.pipeline_mode<synchronous>, transform_indices = @transform_7, window_bounds = array<i64: 8, 128>}, {pipeline_mode = #tpu.pipeline_mode<synchronous>, transform_indices = @transform_8, window_bounds = array<i64: 128, 8>}, {pipeline_mode = #tpu.pipeline_mode<synchronous>, transform_indices = @transform_9, window_bounds = array<i64: 3, 128>}, {pipeline_mode = #tpu.pipeline_mode<synchronous>, transform_indices = @transform_10, window_bounds = array<i64: 128, 128>}]} {
    %c0 = arith.constant 0 : index
    %c0_0 = arith.constant 0 : index
    %0 = vector.load %arg1[%c0, %c0_0] : memref<128x128xbf16, #tpu.memory_space<vmem>>, vector<128x128xbf16>
    %1 = arith.extf %0 : vector<128x128xbf16> to vector<128x128xf32>
    %cst = arith.constant 0.000000e+00 : f32
    %2 = vector.broadcast %cst : f32 to vector<128x128xf32>
    %3 = arith.cmpf ogt, %1, %2 : vector<128x128xf32>
    %c0_1 = arith.constant 0 : index
    %c0_2 = arith.constant 0 : index
    %4 = vector.load %arg2[%c0_1, %c0_2] : memref<128x128xbf16, #tpu.memory_space<vmem>>, vector<128x128xbf16>
    %c0_3 = arith.constant 0 : index
    %c0_4 = arith.constant 0 : index
    %5 = vector.load %arg3[%c0_3, %c0_4] : memref<128x128xbf16, #tpu.memory_space<vmem>>, vector<128x128xbf16>
    %cst_5 = arith.constant dense<0.000000e+00> : vector<128x128xf32>
    %6 = tpu.matmul %4, %5, %cst_5 {dimension_numbers = #tpu.dot_dimension_numbers<[1], [0], [0], [1], [0, 0, 1, 1], [], []>} : vector<128x128xbf16>, vector<128x128xbf16>, vector<128x128xf32> -> vector<128x128xf32>
    %7 = arith.truncf %6 : vector<128x128xf32> to vector<128x128xbf16>
    %c0_6 = arith.constant 0 : index
    %c0_7 = arith.constant 0 : index
    %8 = vector.load %arg4[%c0_6, %c0_7] : memref<8x128xbf16, #tpu.memory_space<vmem>>, vector<8x128xbf16>
    %cst_8 = arith.constant dense<0.000000e+00> : vector<8x128xf32>
    %9 = tpu.matmul %8, %4, %cst_8 {dimension_numbers = #tpu.dot_dimension_numbers<[1], [1], [0], [0], [0, 0, 1, 0], [], []>} : vector<8x128xbf16>, vector<128x128xbf16>, vector<8x128xf32> -> vector<8x128xf32>
    %c0_9 = arith.constant 0 : index
    %c0_10 = arith.constant 0 : index
    %10 = vector.load %arg5[%c0_9, %c0_10] : memref<128x8xbf16, #tpu.memory_space<vmem>>, vector<128x8xbf16>
    %cst_11 = arith.constant dense<0.000000e+00> : vector<128x8xf32>
    %11 = tpu.matmul %4, %10, %cst_11 {dimension_numbers = #tpu.dot_dimension_numbers<[1], [0], [0], [1], [0, 0, 1, 1], [], []>} : vector<128x128xbf16>, vector<128x8xbf16>, vector<128x8xf32> -> vector<128x8xf32>
    %12 = vector.extract_strided_slice %11 {offsets = [0, 0], sizes = [128, 1], strides = [1, 1]} : vector<128x8xf32> to vector<128x1xf32>
    %13 = vector.extract_strided_slice %9 {offsets = [0, 0], sizes = [1, 128], strides = [1, 1]} : vector<8x128xf32> to vector<1x128xf32>
    %14 = vector.broadcast %12 : vector<128x1xf32> to vector<128x128xf32>
    %15 = vector.broadcast %13 : vector<1x128xf32> to vector<128x128xf32>
    %16 = arith.addf %14, %15 : vector<128x128xf32>
    %cst_12 = arith.constant 2.000000e-01 : f32
    %17 = vector.broadcast %cst_12 : f32 to vector<128x128xf32>
    %18 = arith.mulf %17, %16 : vector<128x128xf32>
    %19 = arith.maximumf %16, %18 : vector<128x128xf32>
    %cst_13 = arith.constant -1.000000e+30 : f32
    %20 = vector.broadcast %cst_13 : f32 to vector<128x128xf32>
    %21 = arith.select %3, %19, %20 : vector<128x128xi1>, vector<128x128xf32>
    %cst_14 = arith.constant dense<0xFF800000> : vector<128xf32>
    %22 = vector.multi_reduction <maximumf>, %21, %cst_14 [1] : vector<128x128xf32> to vector<128xf32>
    %23 = vector.shape_cast %22 : vector<128xf32> to vector<128x1xf32>
    %24 = vector.broadcast %23 : vector<128x1xf32> to vector<128x128xf32>
    %25 = arith.subf %21, %24 : vector<128x128xf32>
    %26 = math.exp %25 : vector<128x128xf32>
    %27 = arith.mulf %1, %26 : vector<128x128xf32>
    %cst_15 = arith.constant dense<0.000000e+00> : vector<128xf32>
    %28 = vector.multi_reduction <add>, %27, %cst_15 [1] : vector<128x128xf32> to vector<128xf32>
    %29 = vector.shape_cast %28 : vector<128xf32> to vector<128x1xf32>
    %30 = tpu.reciprocal %29 {approx = true} : vector<128x1xf32> -> vector<128x1xf32>
    %31 = vector.broadcast %30 : vector<128x1xf32> to vector<128x128xf32>
    %32 = arith.mulf %27, %31 : vector<128x128xf32>
    %33 = arith.truncf %32 : vector<128x128xf32> to vector<128x128xbf16>
    %c0_16 = arith.constant 0 : index
    %c0_17 = arith.constant 0 : index
    %34 = vector.load %arg12[%c0_16, %c0_17] : memref<128x1024xbf16, #tpu.memory_space<vmem>>, vector<128x128xbf16>
    tpu.vector_store %arg12[%c0_16, %c0_17], %33 {strides = array<i32>} : memref<128x1024xbf16, #tpu.memory_space<vmem>>, vector<128x128xbf16>,
    %c0_18 = arith.constant 0 : index
    %c0_19 = arith.constant 0 : index
    %35 = vector.load %arg6[%c0_18, %c0_19] : memref<8x128xbf16, #tpu.memory_space<vmem>>, vector<1x128xbf16>
    %36 = vector.broadcast %35 : vector<1x128xbf16> to vector<128x128xbf16>
    %37 = arith.mulf %7, %36 : vector<128x128xbf16>
    %c0_20 = arith.constant 0 : index
    %c0_21 = arith.constant 0 : index
    %38 = vector.load %arg13[%c0_20, %c0_21] : memref<1024x128xbf16, #tpu.memory_space<vmem>>, vector<128x128xbf16>
    tpu.vector_store %arg13[%c0_20, %c0_21], %37 {strides = array<i32>} : memref<1024x128xbf16, #tpu.memory_space<vmem>>, vector<128x128xbf16>,
    %39 = vector.extract_strided_slice %11 {offsets = [0, 1], sizes = [128, 1], strides = [1, 1]} : vector<128x8xf32> to vector<128x1xf32>
    %40 = vector.extract_strided_slice %9 {offsets = [1, 0], sizes = [1, 128], strides = [1, 1]} : vector<8x128xf32> to vector<1x128xf32>
    %41 = vector.broadcast %39 : vector<128x1xf32> to vector<128x128xf32>
    %42 = vector.broadcast %40 : vector<1x128xf32> to vector<128x128xf32>
    %43 = arith.addf %41, %42 : vector<128x128xf32>
    %cst_22 = arith.constant 2.000000e-01 : f32
    %44 = vector.broadcast %cst_22 : f32 to vector<128x128xf32>
    %45 = arith.mulf %44, %43 : vector<128x128xf32>
    %46 = arith.maximumf %43, %45 : vector<128x128xf32>
    %cst_23 = arith.constant -1.000000e+30 : f32
    %47 = vector.broadcast %cst_23 : f32 to vector<128x128xf32>
    %48 = arith.select %3, %46, %47 : vector<128x128xi1>, vector<128x128xf32>
    %cst_24 = arith.constant dense<0xFF800000> : vector<128xf32>
    %49 = vector.multi_reduction <maximumf>, %48, %cst_24 [1] : vector<128x128xf32> to vector<128xf32>
    %50 = vector.shape_cast %49 : vector<128xf32> to vector<128x1xf32>
    %51 = vector.broadcast %50 : vector<128x1xf32> to vector<128x128xf32>
    %52 = arith.subf %48, %51 : vector<128x128xf32>
    %53 = math.exp %52 : vector<128x128xf32>
    %54 = arith.mulf %1, %53 : vector<128x128xf32>
    %cst_25 = arith.constant dense<0.000000e+00> : vector<128xf32>
    %55 = vector.multi_reduction <add>, %54, %cst_25 [1] : vector<128x128xf32> to vector<128xf32>
    %56 = vector.shape_cast %55 : vector<128xf32> to vector<128x1xf32>
    %57 = tpu.reciprocal %56 {approx = true} : vector<128x1xf32> -> vector<128x1xf32>
    %58 = vector.broadcast %57 : vector<128x1xf32> to vector<128x128xf32>
    %59 = arith.mulf %54, %58 : vector<128x128xf32>
    %60 = arith.truncf %59 : vector<128x128xf32> to vector<128x128xbf16>
    %c0_26 = arith.constant 0 : index
    %c128 = arith.constant 128 : index
    %61 = vector.load %arg12[%c0_26, %c128] : memref<128x1024xbf16, #tpu.memory_space<vmem>>, vector<128x128xbf16>
    tpu.vector_store %arg12[%c0_26, %c128], %60 {strides = array<i32>} : memref<128x1024xbf16, #tpu.memory_space<vmem>>, vector<128x128xbf16>,
    %c1 = arith.constant 1 : index
    %c0_27 = arith.constant 0 : index
    %62 = vector.load %arg6[%c1, %c0_27] : memref<8x128xbf16, #tpu.memory_space<vmem>>, vector<1x128xbf16>
    %63 = vector.broadcast %62 : vector<1x128xbf16> to vector<128x128xbf16>
    %64 = arith.mulf %7, %63 : vector<128x128xbf16>
    %c128_28 = arith.constant 128 : index
    %c0_29 = arith.constant 0 : index
    %65 = vector.load %arg13[%c128_28, %c0_29] : memref<1024x128xbf16, #tpu.memory_space<vmem>>, vector<128x128xbf16>
    tpu.vector_store %arg13[%c128_28, %c0_29], %64 {strides = array<i32>} : memref<1024x128xbf16, #tpu.memory_space<vmem>>, vector<128x128xbf16>,
    %66 = vector.extract_strided_slice %11 {offsets = [0, 2], sizes = [128, 1], strides = [1, 1]} : vector<128x8xf32> to vector<128x1xf32>
    %67 = vector.extract_strided_slice %9 {offsets = [2, 0], sizes = [1, 128], strides = [1, 1]} : vector<8x128xf32> to vector<1x128xf32>
    %68 = vector.broadcast %66 : vector<128x1xf32> to vector<128x128xf32>
    %69 = vector.broadcast %67 : vector<1x128xf32> to vector<128x128xf32>
    %70 = arith.addf %68, %69 : vector<128x128xf32>
    %cst_30 = arith.constant 2.000000e-01 : f32
    %71 = vector.broadcast %cst_30 : f32 to vector<128x128xf32>
    %72 = arith.mulf %71, %70 : vector<128x128xf32>
    %73 = arith.maximumf %70, %72 : vector<128x128xf32>
    %cst_31 = arith.constant -1.000000e+30 : f32
    %74 = vector.broadcast %cst_31 : f32 to vector<128x128xf32>
    %75 = arith.select %3, %73, %74 : vector<128x128xi1>, vector<128x128xf32>
    %cst_32 = arith.constant dense<0xFF800000> : vector<128xf32>
    %76 = vector.multi_reduction <maximumf>, %75, %cst_32 [1] : vector<128x128xf32> to vector<128xf32>
    %77 = vector.shape_cast %76 : vector<128xf32> to vector<128x1xf32>
    %78 = vector.broadcast %77 : vector<128x1xf32> to vector<128x128xf32>
    %79 = arith.subf %75, %78 : vector<128x128xf32>
    %80 = math.exp %79 : vector<128x128xf32>
    %81 = arith.mulf %1, %80 : vector<128x128xf32>
    %cst_33 = arith.constant dense<0.000000e+00> : vector<128xf32>
    %82 = vector.multi_reduction <add>, %81, %cst_33 [1] : vector<128x128xf32> to vector<128xf32>
    %83 = vector.shape_cast %82 : vector<128xf32> to vector<128x1xf32>
    %84 = tpu.reciprocal %83 {approx = true} : vector<128x1xf32> -> vector<128x1xf32>
    %85 = vector.broadcast %84 : vector<128x1xf32> to vector<128x128xf32>
    %86 = arith.mulf %81, %85 : vector<128x128xf32>
    %87 = arith.truncf %86 : vector<128x128xf32> to vector<128x128xbf16>
    %c0_34 = arith.constant 0 : index
    %c256 = arith.constant 256 : index
    %88 = vector.load %arg12[%c0_34, %c256] : memref<128x1024xbf16, #tpu.memory_space<vmem>>, vector<128x128xbf16>
    tpu.vector_store %arg12[%c0_34, %c256], %87 {strides = array<i32>} : memref<128x1024xbf16, #tpu.memory_space<vmem>>, vector<128x128xbf16>,
    %c2 = arith.constant 2 : index
    %c0_35 = arith.constant 0 : index
    %89 = vector.load %arg6[%c2, %c0_35] : memref<8x128xbf16, #tpu.memory_space<vmem>>, vector<1x128xbf16>
    %90 = vector.broadcast %89 : vector<1x128xbf16> to vector<128x128xbf16>
    %91 = arith.mulf %7, %90 : vector<128x128xbf16>
    %c256_36 = arith.constant 256 : index
    %c0_37 = arith.constant 0 : index
    %92 = vector.load %arg13[%c256_36, %c0_37] : memref<1024x128xbf16, #tpu.memory_space<vmem>>, vector<128x128xbf16>
    tpu.vector_store %arg13[%c256_36, %c0_37], %91 {strides = array<i32>} : memref<1024x128xbf16, #tpu.memory_space<vmem>>, vector<128x128xbf16>,
    %93 = vector.extract_strided_slice %11 {offsets = [0, 3], sizes = [128, 1], strides = [1, 1]} : vector<128x8xf32> to vector<128x1xf32>
    %94 = vector.extract_strided_slice %9 {offsets = [3, 0], sizes = [1, 128], strides = [1, 1]} : vector<8x128xf32> to vector<1x128xf32>
    %95 = vector.broadcast %93 : vector<128x1xf32> to vector<128x128xf32>
    %96 = vector.broadcast %94 : vector<1x128xf32> to vector<128x128xf32>
    %97 = arith.addf %95, %96 : vector<128x128xf32>
    %cst_38 = arith.constant 2.000000e-01 : f32
    %98 = vector.broadcast %cst_38 : f32 to vector<128x128xf32>
    %99 = arith.mulf %98, %97 : vector<128x128xf32>
    %100 = arith.maximumf %97, %99 : vector<128x128xf32>
    %cst_39 = arith.constant -1.000000e+30 : f32
    %101 = vector.broadcast %cst_39 : f32 to vector<128x128xf32>
    %102 = arith.select %3, %100, %101 : vector<128x128xi1>, vector<128x128xf32>
    %cst_40 = arith.constant dense<0xFF800000> : vector<128xf32>
    %103 = vector.multi_reduction <maximumf>, %102, %cst_40 [1] : vector<128x128xf32> to vector<128xf32>
    %104 = vector.shape_cast %103 : vector<128xf32> to vector<128x1xf32>
    %105 = vector.broadcast %104 : vector<128x1xf32> to vector<128x128xf32>
    %106 = arith.subf %102, %105 : vector<128x128xf32>
    %107 = math.exp %106 : vector<128x128xf32>
    %108 = arith.mulf %1, %107 : vector<128x128xf32>
    %cst_41 = arith.constant dense<0.000000e+00> : vector<128xf32>
    %109 = vector.multi_reduction <add>, %108, %cst_41 [1] : vector<128x128xf32> to vector<128xf32>
    %110 = vector.shape_cast %109 : vector<128xf32> to vector<128x1xf32>
    %111 = tpu.reciprocal %110 {approx = true} : vector<128x1xf32> -> vector<128x1xf32>
    %112 = vector.broadcast %111 : vector<128x1xf32> to vector<128x128xf32>
    %113 = arith.mulf %108, %112 : vector<128x128xf32>
    %114 = arith.truncf %113 : vector<128x128xf32> to vector<128x128xbf16>
    %c0_42 = arith.constant 0 : index
    %c384 = arith.constant 384 : index
    %115 = vector.load %arg12[%c0_42, %c384] : memref<128x1024xbf16, #tpu.memory_space<vmem>>, vector<128x128xbf16>
    tpu.vector_store %arg12[%c0_42, %c384], %114 {strides = array<i32>} : memref<128x1024xbf16, #tpu.memory_space<vmem>>, vector<128x128xbf16>,
    %c3 = arith.constant 3 : index
    %c0_43 = arith.constant 0 : index
    %116 = vector.load %arg6[%c3, %c0_43] : memref<8x128xbf16, #tpu.memory_space<vmem>>, vector<1x128xbf16>
    %117 = vector.broadcast %116 : vector<1x128xbf16> to vector<128x128xbf16>
    %118 = arith.mulf %7, %117 : vector<128x128xbf16>
    %c384_44 = arith.constant 384 : index
    %c0_45 = arith.constant 0 : index
    %119 = vector.load %arg13[%c384_44, %c0_45] : memref<1024x128xbf16, #tpu.memory_space<vmem>>, vector<128x128xbf16>
    tpu.vector_store %arg13[%c384_44, %c0_45], %118 {strides = array<i32>} : memref<1024x128xbf16, #tpu.memory_space<vmem>>, vector<128x128xbf16>,
    %120 = vector.extract_strided_slice %11 {offsets = [0, 4], sizes = [128, 1], strides = [1, 1]} : vector<128x8xf32> to vector<128x1xf32>
    %121 = vector.extract_strided_slice %9 {offsets = [4, 0], sizes = [1, 128], strides = [1, 1]} : vector<8x128xf32> to vector<1x128xf32>
    %122 = vector.broadcast %120 : vector<128x1xf32> to vector<128x128xf32>
    %123 = vector.broadcast %121 : vector<1x128xf32> to vector<128x128xf32>
    %124 = arith.addf %122, %123 : vector<128x128xf32>
    %cst_46 = arith.constant 2.000000e-01 : f32
    %125 = vector.broadcast %cst_46 : f32 to vector<128x128xf32>
    %126 = arith.mulf %125, %124 : vector<128x128xf32>
    %127 = arith.maximumf %124, %126 : vector<128x128xf32>
    %cst_47 = arith.constant -1.000000e+30 : f32
    %128 = vector.broadcast %cst_47 : f32 to vector<128x128xf32>
    %129 = arith.select %3, %127, %128 : vector<128x128xi1>, vector<128x128xf32>
    %cst_48 = arith.constant dense<0xFF800000> : vector<128xf32>
    %130 = vector.multi_reduction <maximumf>, %129, %cst_48 [1] : vector<128x128xf32> to vector<128xf32>
    %131 = vector.shape_cast %130 : vector<128xf32> to vector<128x1xf32>
    %132 = vector.broadcast %131 : vector<128x1xf32> to vector<128x128xf32>
    %133 = arith.subf %129, %132 : vector<128x128xf32>
    %134 = math.exp %133 : vector<128x128xf32>
    %135 = arith.mulf %1, %134 : vector<128x128xf32>
    %cst_49 = arith.constant dense<0.000000e+00> : vector<128xf32>
    %136 = vector.multi_reduction <add>, %135, %cst_49 [1] : vector<128x128xf32> to vector<128xf32>
    %137 = vector.shape_cast %136 : vector<128xf32> to vector<128x1xf32>
    %138 = tpu.reciprocal %137 {approx = true} : vector<128x1xf32> -> vector<128x1xf32>
    %139 = vector.broadcast %138 : vector<128x1xf32> to vector<128x128xf32>
    %140 = arith.mulf %135, %139 : vector<128x128xf32>
    %141 = arith.truncf %140 : vector<128x128xf32> to vector<128x128xbf16>
    %c0_50 = arith.constant 0 : index
    %c512 = arith.constant 512 : index
    %142 = vector.load %arg12[%c0_50, %c512] : memref<128x1024xbf16, #tpu.memory_space<vmem>>, vector<128x128xbf16>
    tpu.vector_store %arg12[%c0_50, %c512], %141 {strides = array<i32>} : memref<128x1024xbf16, #tpu.memory_space<vmem>>, vector<128x128xbf16>,
    %c4 = arith.constant 4 : index
    %c0_51 = arith.constant 0 : index
    %143 = vector.load %arg6[%c4, %c0_51] : memref<8x128xbf16, #tpu.memory_space<vmem>>, vector<1x128xbf16>
    %144 = vector.broadcast %143 : vector<1x128xbf16> to vector<128x128xbf16>
    %145 = arith.mulf %7, %144 : vector<128x128xbf16>
    %c512_52 = arith.constant 512 : index
    %c0_53 = arith.constant 0 : index
    %146 = vector.load %arg13[%c512_52, %c0_53] : memref<1024x128xbf16, #tpu.memory_space<vmem>>, vector<128x128xbf16>
    tpu.vector_store %arg13[%c512_52, %c0_53], %145 {strides = array<i32>} : memref<1024x128xbf16, #tpu.memory_space<vmem>>, vector<128x128xbf16>,
    %147 = vector.extract_strided_slice %11 {offsets = [0, 5], sizes = [128, 1], strides = [1, 1]} : vector<128x8xf32> to vector<128x1xf32>
    %148 = vector.extract_strided_slice %9 {offsets = [5, 0], sizes = [1, 128], strides = [1, 1]} : vector<8x128xf32> to vector<1x128xf32>
    %149 = vector.broadcast %147 : vector<128x1xf32> to vector<128x128xf32>
    %150 = vector.broadcast %148 : vector<1x128xf32> to vector<128x128xf32>
    %151 = arith.addf %149, %150 : vector<128x128xf32>
    %cst_54 = arith.constant 2.000000e-01 : f32
    %152 = vector.broadcast %cst_54 : f32 to vector<128x128xf32>
    %153 = arith.mulf %152, %151 : vector<128x128xf32>
    %154 = arith.maximumf %151, %153 : vector<128x128xf32>
    %cst_55 = arith.constant -1.000000e+30 : f32
    %155 = vector.broadcast %cst_55 : f32 to vector<128x128xf32>
    %156 = arith.select %3, %154, %155 : vector<128x128xi1>, vector<128x128xf32>
    %cst_56 = arith.constant dense<0xFF800000> : vector<128xf32>
    %157 = vector.multi_reduction <maximumf>, %156, %cst_56 [1] : vector<128x128xf32> to vector<128xf32>
    %158 = vector.shape_cast %157 : vector<128xf32> to vector<128x1xf32>
    %159 = vector.broadcast %158 : vector<128x1xf32> to vector<128x128xf32>
    %160 = arith.subf %156, %159 : vector<128x128xf32>
    %161 = math.exp %160 : vector<128x128xf32>
    %162 = arith.mulf %1, %161 : vector<128x128xf32>
    %cst_57 = arith.constant dense<0.000000e+00> : vector<128xf32>
    %163 = vector.multi_reduction <add>, %162, %cst_57 [1] : vector<128x128xf32> to vector<128xf32>
    %164 = vector.shape_cast %163 : vector<128xf32> to vector<128x1xf32>
    %165 = tpu.reciprocal %164 {approx = true} : vector<128x1xf32> -> vector<128x1xf32>
    %166 = vector.broadcast %165 : vector<128x1xf32> to vector<128x128xf32>
    %167 = arith.mulf %162, %166 : vector<128x128xf32>
    %168 = arith.truncf %167 : vector<128x128xf32> to vector<128x128xbf16>
    %c0_58 = arith.constant 0 : index
    %c640 = arith.constant 640 : index
    %169 = vector.load %arg12[%c0_58, %c640] : memref<128x1024xbf16, #tpu.memory_space<vmem>>, vector<128x128xbf16>
    tpu.vector_store %arg12[%c0_58, %c640], %168 {strides = array<i32>} : memref<128x1024xbf16, #tpu.memory_space<vmem>>, vector<128x128xbf16>,
    %c5 = arith.constant 5 : index
    %c0_59 = arith.constant 0 : index
    %170 = vector.load %arg6[%c5, %c0_59] : memref<8x128xbf16, #tpu.memory_space<vmem>>, vector<1x128xbf16>
    %171 = vector.broadcast %170 : vector<1x128xbf16> to vector<128x128xbf16>
    %172 = arith.mulf %7, %171 : vector<128x128xbf16>
    %c640_60 = arith.constant 640 : index
    %c0_61 = arith.constant 0 : index
    %173 = vector.load %arg13[%c640_60, %c0_61] : memref<1024x128xbf16, #tpu.memory_space<vmem>>, vector<128x128xbf16>
    tpu.vector_store %arg13[%c640_60, %c0_61], %172 {strides = array<i32>} : memref<1024x128xbf16, #tpu.memory_space<vmem>>, vector<128x128xbf16>,
    %174 = vector.extract_strided_slice %11 {offsets = [0, 6], sizes = [128, 1], strides = [1, 1]} : vector<128x8xf32> to vector<128x1xf32>
    %175 = vector.extract_strided_slice %9 {offsets = [6, 0], sizes = [1, 128], strides = [1, 1]} : vector<8x128xf32> to vector<1x128xf32>
    %176 = vector.broadcast %174 : vector<128x1xf32> to vector<128x128xf32>
    %177 = vector.broadcast %175 : vector<1x128xf32> to vector<128x128xf32>
    %178 = arith.addf %176, %177 : vector<128x128xf32>
    %cst_62 = arith.constant 2.000000e-01 : f32
    %179 = vector.broadcast %cst_62 : f32 to vector<128x128xf32>
    %180 = arith.mulf %179, %178 : vector<128x128xf32>
    %181 = arith.maximumf %178, %180 : vector<128x128xf32>
    %cst_63 = arith.constant -1.000000e+30 : f32
    %182 = vector.broadcast %cst_63 : f32 to vector<128x128xf32>
    %183 = arith.select %3, %181, %182 : vector<128x128xi1>, vector<128x128xf32>
    %cst_64 = arith.constant dense<0xFF800000> : vector<128xf32>
    %184 = vector.multi_reduction <maximumf>, %183, %cst_64 [1] : vector<128x128xf32> to vector<128xf32>
    %185 = vector.shape_cast %184 : vector<128xf32> to vector<128x1xf32>
    %186 = vector.broadcast %185 : vector<128x1xf32> to vector<128x128xf32>
    %187 = arith.subf %183, %186 : vector<128x128xf32>
    %188 = math.exp %187 : vector<128x128xf32>
    %189 = arith.mulf %1, %188 : vector<128x128xf32>
    %cst_65 = arith.constant dense<0.000000e+00> : vector<128xf32>
    %190 = vector.multi_reduction <add>, %189, %cst_65 [1] : vector<128x128xf32> to vector<128xf32>
    %191 = vector.shape_cast %190 : vector<128xf32> to vector<128x1xf32>
    %192 = tpu.reciprocal %191 {approx = true} : vector<128x1xf32> -> vector<128x1xf32>
    %193 = vector.broadcast %192 : vector<128x1xf32> to vector<128x128xf32>
    %194 = arith.mulf %189, %193 : vector<128x128xf32>
    %195 = arith.truncf %194 : vector<128x128xf32> to vector<128x128xbf16>
    %c0_66 = arith.constant 0 : index
    %c768 = arith.constant 768 : index
    %196 = vector.load %arg12[%c0_66, %c768] : memref<128x1024xbf16, #tpu.memory_space<vmem>>, vector<128x128xbf16>
    tpu.vector_store %arg12[%c0_66, %c768], %195 {strides = array<i32>} : memref<128x1024xbf16, #tpu.memory_space<vmem>>, vector<128x128xbf16>,
    %c6 = arith.constant 6 : index
    %c0_67 = arith.constant 0 : index
    %197 = vector.load %arg6[%c6, %c0_67] : memref<8x128xbf16, #tpu.memory_space<vmem>>, vector<1x128xbf16>
    %198 = vector.broadcast %197 : vector<1x128xbf16> to vector<128x128xbf16>
    %199 = arith.mulf %7, %198 : vector<128x128xbf16>
    %c768_68 = arith.constant 768 : index
    %c0_69 = arith.constant 0 : index
    %200 = vector.load %arg13[%c768_68, %c0_69] : memref<1024x128xbf16, #tpu.memory_space<vmem>>, vector<128x128xbf16>
    tpu.vector_store %arg13[%c768_68, %c0_69], %199 {strides = array<i32>} : memref<1024x128xbf16, #tpu.memory_space<vmem>>, vector<128x128xbf16>,
    %201 = vector.extract_strided_slice %11 {offsets = [0, 7], sizes = [128, 1], strides = [1, 1]} : vector<128x8xf32> to vector<128x1xf32>
    %202 = vector.extract_strided_slice %9 {offsets = [7, 0], sizes = [1, 128], strides = [1, 1]} : vector<8x128xf32> to vector<1x128xf32>
    %203 = vector.broadcast %201 : vector<128x1xf32> to vector<128x128xf32>
    %204 = vector.broadcast %202 : vector<1x128xf32> to vector<128x128xf32>
    %205 = arith.addf %203, %204 : vector<128x128xf32>
    %cst_70 = arith.constant 2.000000e-01 : f32
    %206 = vector.broadcast %cst_70 : f32 to vector<128x128xf32>
    %207 = arith.mulf %206, %205 : vector<128x128xf32>
    %208 = arith.maximumf %205, %207 : vector<128x128xf32>
    %cst_71 = arith.constant -1.000000e+30 : f32
    %209 = vector.broadcast %cst_71 : f32 to vector<128x128xf32>
    %210 = arith.select %3, %208, %209 : vector<128x128xi1>, vector<128x128xf32>
    %cst_72 = arith.constant dense<0xFF800000> : vector<128xf32>
    %211 = vector.multi_reduction <maximumf>, %210, %cst_72 [1] : vector<128x128xf32> to vector<128xf32>
    %212 = vector.shape_cast %211 : vector<128xf32> to vector<128x1xf32>
    %213 = vector.broadcast %212 : vector<128x1xf32> to vector<128x128xf32>
    %214 = arith.subf %210, %213 : vector<128x128xf32>
    %215 = math.exp %214 : vector<128x128xf32>
    %216 = arith.mulf %1, %215 : vector<128x128xf32>
    %cst_73 = arith.constant dense<0.000000e+00> : vector<128xf32>
    %217 = vector.multi_reduction <add>, %216, %cst_73 [1] : vector<128x128xf32> to vector<128xf32>
    %218 = vector.shape_cast %217 : vector<128xf32> to vector<128x1xf32>
    %219 = tpu.reciprocal %218 {approx = true} : vector<128x1xf32> -> vector<128x1xf32>
    %220 = vector.broadcast %219 : vector<128x1xf32> to vector<128x128xf32>
    %221 = arith.mulf %216, %220 : vector<128x128xf32>
    %222 = arith.truncf %221 : vector<128x128xf32> to vector<128x128xbf16>
    %c0_74 = arith.constant 0 : index
    %c896 = arith.constant 896 : index
    %223 = vector.load %arg12[%c0_74, %c896] : memref<128x1024xbf16, #tpu.memory_space<vmem>>, vector<128x128xbf16>
    tpu.vector_store %arg12[%c0_74, %c896], %222 {strides = array<i32>} : memref<128x1024xbf16, #tpu.memory_space<vmem>>, vector<128x128xbf16>,
    %c7 = arith.constant 7 : index
    %c0_75 = arith.constant 0 : index
    %224 = vector.load %arg6[%c7, %c0_75] : memref<8x128xbf16, #tpu.memory_space<vmem>>, vector<1x128xbf16>
    %225 = vector.broadcast %224 : vector<1x128xbf16> to vector<128x128xbf16>
    %226 = arith.mulf %7, %225 : vector<128x128xbf16>
    %c896_76 = arith.constant 896 : index
    %c0_77 = arith.constant 0 : index
    %227 = vector.load %arg13[%c896_76, %c0_77] : memref<1024x128xbf16, #tpu.memory_space<vmem>>, vector<128x128xbf16>
    tpu.vector_store %arg13[%c896_76, %c0_77], %226 {strides = array<i32>} : memref<1024x128xbf16, #tpu.memory_space<vmem>>, vector<128x128xbf16>,
    %c0_78 = arith.constant 0 : index
    %c0_79 = arith.constant 0 : index
    %228 = vector.load %arg12[%c0_78, %c0_79] : memref<128x1024xbf16, #tpu.memory_space<vmem>>, vector<128x1024xbf16>
    %c0_80 = arith.constant 0 : index
    %c0_81 = arith.constant 0 : index
    %229 = vector.load %arg13[%c0_80, %c0_81] : memref<1024x128xbf16, #tpu.memory_space<vmem>>, vector<1024x128xbf16>
    %cst_82 = arith.constant dense<0.000000e+00> : vector<128x128xf32>
    %230 = tpu.matmul %228, %229, %cst_82 {dimension_numbers = #tpu.dot_dimension_numbers<[1], [0], [0], [1], [0, 0, 1, 1], [], []>} : vector<128x1024xbf16>, vector<1024x128xbf16>, vector<128x128xf32> -> vector<128x128xf32>
    %c0_83 = arith.constant 0 : index
    %c0_84 = arith.constant 0 : index
    %231 = vector.load %arg10[%c0_83, %c0_84] : memref<3x128xf32, #tpu.memory_space<vmem>>, vector<1x128xf32>
    %232 = vector.broadcast %231 : vector<1x128xf32> to vector<128x128xf32>
    %233 = arith.addf %230, %232 : vector<128x128xf32>
    %cst_85 = arith.constant 0.000000e+00 : f32
    %234 = vector.broadcast %cst_85 : f32 to vector<128x128xf32>
    %235 = arith.cmpf ogt, %233, %234 : vector<128x128xf32>
    %cst_86 = arith.constant 0.000000e+00 : f32
    %236 = vector.broadcast %cst_86 : f32 to vector<128x128xf32>
    %237 = arith.minimumf %233, %236 : vector<128x128xf32>
    %238 = math.exp %237 : vector<128x128xf32>
    %cst_87 = arith.constant 1.000000e+00 : f32
    %239 = vector.broadcast %cst_87 : f32 to vector<128x128xf32>
    %240 = arith.subf %238, %239 : vector<128x128xf32>
    %241 = arith.select %235, %233, %240 : vector<128x128xi1>, vector<128x128xf32>
    %242 = arith.truncf %241 : vector<128x128xf32> to vector<128x128xbf16>
    %c0_88 = arith.constant 0 : index
    %c0_89 = arith.constant 0 : index
    %243 = vector.load %arg7[%c0_88, %c0_89] : memref<128x128xbf16, #tpu.memory_space<vmem>>, vector<128x128xbf16>
    %cst_90 = arith.constant dense<0.000000e+00> : vector<128x128xf32>
    %244 = tpu.matmul %242, %243, %cst_90 {dimension_numbers = #tpu.dot_dimension_numbers<[1], [0], [0], [1], [0, 0, 1, 1], [], []>} : vector<128x128xbf16>, vector<128x128xbf16>, vector<128x128xf32> -> vector<128x128xf32>
    %245 = arith.truncf %244 : vector<128x128xf32> to vector<128x128xbf16>
    %c0_91 = arith.constant 0 : index
    %c0_92 = arith.constant 0 : index
    %246 = vector.load %arg8[%c0_91, %c0_92] : memref<8x128xbf16, #tpu.memory_space<vmem>>, vector<8x128xbf16>
    %cst_93 = arith.constant dense<0.000000e+00> : vector<8x128xf32>
    %247 = tpu.matmul %246, %242, %cst_93 {dimension_numbers = #tpu.dot_dimension_numbers<[1], [1], [0], [0], [0, 0, 1, 0], [], []>} : vector<8x128xbf16>, vector<128x128xbf16>, vector<8x128xf32> -> vector<8x128xf32>
    %c0_94 = arith.constant 0 : index
    %c0_95 = arith.constant 0 : index
    %248 = vector.load %arg9[%c0_94, %c0_95] : memref<128x8xbf16, #tpu.memory_space<vmem>>, vector<128x8xbf16>
    %cst_96 = arith.constant dense<0.000000e+00> : vector<128x8xf32>
    %249 = tpu.matmul %242, %248, %cst_96 {dimension_numbers = #tpu.dot_dimension_numbers<[1], [0], [0], [1], [0, 0, 1, 1], [], []>} : vector<128x128xbf16>, vector<128x8xbf16>, vector<128x8xf32> -> vector<128x8xf32>
    %250 = vector.extract_strided_slice %249 {offsets = [0, 0], sizes = [128, 1], strides = [1, 1]} : vector<128x8xf32> to vector<128x1xf32>
    %251 = vector.extract_strided_slice %247 {offsets = [0, 0], sizes = [1, 128], strides = [1, 1]} : vector<8x128xf32> to vector<1x128xf32>
    %252 = vector.broadcast %250 : vector<128x1xf32> to vector<128x128xf32>
    %253 = vector.broadcast %251 : vector<1x128xf32> to vector<128x128xf32>
    %254 = arith.addf %252, %253 : vector<128x128xf32>
    %cst_97 = arith.constant 2.000000e-01 : f32
    %255 = vector.broadcast %cst_97 : f32 to vector<128x128xf32>
    %256 = arith.mulf %255, %254 : vector<128x128xf32>
    %257 = arith.maximumf %254, %256 : vector<128x128xf32>
    %cst_98 = arith.constant -1.000000e+30 : f32
    %258 = vector.broadcast %cst_98 : f32 to vector<128x128xf32>
    %259 = arith.select %3, %257, %258 : vector<128x128xi1>, vector<128x128xf32>
    %cst_99 = arith.constant dense<0xFF800000> : vector<128xf32>
    %260 = vector.multi_reduction <maximumf>, %259, %cst_99 [1] : vector<128x128xf32> to vector<128xf32>
    %261 = vector.shape_cast %260 : vector<128xf32> to vector<128x1xf32>
    %262 = vector.broadcast %261 : vector<128x1xf32> to vector<128x128xf32>
    %263 = arith.subf %259, %262 : vector<128x128xf32>
    %264 = math.exp %263 : vector<128x128xf32>
    %265 = arith.mulf %1, %264 : vector<128x128xf32>
    %cst_100 = arith.constant dense<0.000000e+00> : vector<128xf32>
    %266 = vector.multi_reduction <add>, %265, %cst_100 [1] : vector<128x128xf32> to vector<128xf32>
    %267 = vector.shape_cast %266 : vector<128xf32> to vector<128x1xf32>
    %268 = tpu.reciprocal %267 {approx = true} : vector<128x1xf32> -> vector<128x1xf32>
    %269 = vector.broadcast %268 : vector<128x1xf32> to vector<128x128xf32>
    %270 = arith.mulf %265, %269 : vector<128x128xf32>
    %271 = arith.truncf %270 : vector<128x128xf32> to vector<128x128xbf16>
    %cst_101 = arith.constant dense<0.000000e+00> : vector<128x128xf32>
    %272 = tpu.matmul %271, %245, %cst_101 {dimension_numbers = #tpu.dot_dimension_numbers<[1], [0], [0], [1], [0, 0, 1, 1], [], []>} : vector<128x128xbf16>, vector<128x128xbf16>, vector<128x128xf32> -> vector<128x128xf32>
    %c1_102 = arith.constant 1 : index
    %c0_103 = arith.constant 0 : index
    %273 = vector.load %arg10[%c1_102, %c0_103] : memref<3x128xf32, #tpu.memory_space<vmem>>, vector<1x128xf32>
    %274 = vector.broadcast %273 : vector<1x128xf32> to vector<128x128xf32>
    %275 = arith.addf %272, %274 : vector<128x128xf32>
    %c2_104 = arith.constant 2 : index
    %c0_105 = arith.constant 0 : index
    %276 = vector.load %arg10[%c2_104, %c0_105] : memref<3x128xf32, #tpu.memory_space<vmem>>, vector<1x128xf32>
    %cst_106 = arith.constant 0.000000e+00 : f32
    %277 = vector.broadcast %cst_106 : f32 to vector<1x128xf32>
    %278 = arith.cmpf ogt, %276, %277 : vector<1x128xf32>
    %cst_107 = arith.constant -1.000000e+30 : f32
    %279 = vector.shape_cast %278 : vector<1x128xi1> to vector<1x128xi1>
    %280 = vector.broadcast %279 : vector<1x128xi1> to vector<128x128xi1>
    %281 = vector.broadcast %cst_107 : f32 to vector<128x128xf32>
    %282 = arith.select %280, %275, %281 : vector<128x128xi1>, vector<128x128xf32>
    %cst_108 = arith.constant dense<0xFF800000> : vector<128xf32>
    %283 = vector.multi_reduction <maximumf>, %282, %cst_108 [1] : vector<128x128xf32> to vector<128xf32>
    %284 = vector.shape_cast %283 : vector<128xf32> to vector<128x1xf32>
    %285 = vector.broadcast %284 : vector<128x1xf32> to vector<128x128xf32>
    %286 = arith.subf %282, %285 : vector<128x128xf32>
    %287 = math.exp %286 : vector<128x128xf32>
    %cst_109 = arith.constant dense<0.000000e+00> : vector<128xf32>
    %288 = vector.multi_reduction <add>, %287, %cst_109 [1] : vector<128x128xf32> to vector<128xf32>
    %289 = vector.shape_cast %288 : vector<128xf32> to vector<128x1xf32>
    %290 = math.log %289 : vector<128x1xf32>
    %291 = arith.addf %284, %290 : vector<128x1xf32>
    %292 = vector.broadcast %291 : vector<128x1xf32> to vector<128x128xf32>
    %293 = arith.subf %282, %292 : vector<128x128xf32>
    %c0_110 = arith.constant 0 : index
    %c0_111 = arith.constant 0 : index
    %294 = vector.load %arg11[%c0_110, %c0_111] : memref<128x128xf32, #tpu.memory_space<vmem>>, vector<128x128xf32>
    tpu.vector_store %arg11[%c0_110, %c0_111], %293 {strides = array<i32>} : memref<128x128xf32, #tpu.memory_space<vmem>>, vector<128x128xf32>,
    return
  }
  func.func @transform_0(%arg0: i32) -> (i32, i32) {
    %c0_i32 = arith.constant 0 : i32
    %c0_i32_0 = arith.constant 0 : i32
    %c0_i32_1 = arith.constant 0 : i32
    return %c0_i32, %c0_i32_0 : i32, i32
  }
  func.func @transform_1(%arg0: i32) -> (i32, i32) {
    %c0_i32 = arith.constant 0 : i32
    %c0_i32_0 = arith.constant 0 : i32
    %c0_i32_1 = arith.constant 0 : i32
    return %c0_i32, %c0_i32_0 : i32, i32
  }
  func.func @transform_2(%arg0: i32) -> (i32, i32) {
    %c0_i32 = arith.constant 0 : i32
    %c0_i32_0 = arith.constant 0 : i32
    %c0_i32_1 = arith.constant 0 : i32
    return %c0_i32, %c0_i32_0 : i32, i32
  }
  func.func @transform_3(%arg0: i32) -> (i32, i32) {
    %c0_i32 = arith.constant 0 : i32
    %c0_i32_0 = arith.constant 0 : i32
    %c0_i32_1 = arith.constant 0 : i32
    return %c0_i32, %c0_i32_0 : i32, i32
  }
  func.func @transform_4(%arg0: i32) -> (i32, i32) {
    %c0_i32 = arith.constant 0 : i32
    %c0_i32_0 = arith.constant 0 : i32
    %c0_i32_1 = arith.constant 0 : i32
    return %c0_i32, %c0_i32_0 : i32, i32
  }
  func.func @transform_5(%arg0: i32) -> (i32, i32) {
    %c0_i32 = arith.constant 0 : i32
    %c0_i32_0 = arith.constant 0 : i32
    %c0_i32_1 = arith.constant 0 : i32
    return %c0_i32, %c0_i32_0 : i32, i32
  }
  func.func @transform_6(%arg0: i32) -> (i32, i32) {
    %c0_i32 = arith.constant 0 : i32
    %c0_i32_0 = arith.constant 0 : i32
    %c0_i32_1 = arith.constant 0 : i32
    return %c0_i32, %c0_i32_0 : i32, i32
  }
  func.func @transform_7(%arg0: i32) -> (i32, i32) {
    %c0_i32 = arith.constant 0 : i32
    %c0_i32_0 = arith.constant 0 : i32
    %c0_i32_1 = arith.constant 0 : i32
    return %c0_i32, %c0_i32_0 : i32, i32
  }
  func.func @transform_8(%arg0: i32) -> (i32, i32) {
    %c0_i32 = arith.constant 0 : i32
    %c0_i32_0 = arith.constant 0 : i32
    %c0_i32_1 = arith.constant 0 : i32
    return %c0_i32, %c0_i32_0 : i32, i32
  }
  func.func @transform_9(%arg0: i32) -> (i32, i32) {
    %c0_i32 = arith.constant 0 : i32
    %c0_i32_0 = arith.constant 0 : i32
    %c0_i32_1 = arith.constant 0 : i32
    return %c0_i32, %c0_i32_0 : i32, i32
  }
  func.func @transform_10(%arg0: i32) -> (i32, i32) {
    %c0_i32 = arith.constant 0 : i32
    %c0_i32_0 = arith.constant 0 : i32
    %c0_i32_1 = arith.constant 0 : i32
    return %c0_i32, %c0_i32_0 : i32, i32
  }
}

</mosaic_0001>

<bundles_post_ra>
// kernel: gat_net_forward.1
= control target key start
LH: loop header
LB: loop body
LE: loop exit
PB: predicated region body
PF: predicated region fallthrough
CT: control target
= control target key end

     0   :  { %v9989_v1 = vmov 0.0   ;;  %vm10107_vm0 = vmmov 0   ;;  %v10013_v26 = vmov 0   ;;  %v9992_v27 = vmov 1   ;;  %s9978_s2 = inlined_call_operand.vmem [shape: bf16[128,128], index: 2, kind: input, shape index: {}]   ;;  %s9979_s1 = inlined_call_operand.vmem [shape: bf16[128,128], index: 1, kind: input, shape index: {}]   ;;  %s9980_s4 = inlined_call_operand.vmem [shape: bf16[128,8], index: 4, kind: input, shape index: {}]   ;;  %s9981_s3 = inlined_call_operand.vmem [shape: bf16[8,128], index: 3, kind: input, shape index: {}]   ;;  %s9982_s5 = inlined_call_operand.vmem [shape: bf16[8,128], index: 5, kind: input, shape index: {}]   ;;  %s9983_s0 = inlined_call_operand.vmem [shape: bf16[128,128], index: 0, kind: input, shape index: {}]   ;;  %s9984_s9 = inlined_call_operand.vmem [shape: f32[3,128], index: 9, kind: input, shape index: {}]   ;;  %s9985_s6 = inlined_call_operand.vmem [shape: bf16[128,128], index: 6, kind: input, shape index: {}]   ;;  %s9986_s8 = inlined_call_operand.vmem [shape: bf16[128,8], index: 8, kind: input, shape index: {}]   ;;  %s9987_s7 = inlined_call_operand.vmem [shape: bf16[8,128], index: 7, kind: input, shape index: {}]   ;;  %s9988_s10 = inlined_call_operand.vmem [shape: f32[128,128], index: 10, kind: output, shape index: {}]  }
   0x1   :  { %v5559_v0 = vld [vmem:[%s9978_s2] sm:$0xff]   ;;  %5312 = vmatprep.subr.bf16.mxu1 %v9989_v1  ;;  %5328 = vmatprep.mubr.msk.bf16.mxu1 %vm10107_vm0, %v9989_v1  ;;  %v5560_v2 = vld [vmem:[%s9978_s2 + $0x8] sm:$0xff]   ;;  %v5561_v3 = vld [vmem:[%s9978_s2 + $0x10] sm:$0xff]   ;;  %v599_v28 = vlaneseq }
   0x2   :  { %5280 = vmatprep.subr.bf16.mxu0 %v5559_v0  ;;  %v5562_v4 = vld [vmem:[%s9978_s2 + $0x18] sm:$0xff]   ;;  %v6354_v5 = vld [vmem:[%s9979_s1] sm:$0xff]   ;;  %v5564_v7 = vld [vmem:[%s9978_s2 + $0x28] sm:$0xff]   ;;  %5491 = vset.pattern.permute.xlu0 %v10013_v26 }
   0x3   :  { %5281 = vmatpush3.bf16.msra.mxu0 %v5559_v0  ;;  %5296 = vmatprep.mubr.bf16.mxu0 %v6354_v5  ;;  %v5563_v6 = vld [vmem:[%s9978_s2 + $0x20] sm:$0xff]   ;;  %v5568_v8 = vld [vmem:[%s9979_s1 + $0x8] sm:$0xff]   ;;  %v5565_v9 = vld [vmem:[%s9978_s2 + $0x30] sm:$0xff]   ;;  %v6437_v32 = vshrl.u32 %v599_v28, 7 }
   0x4   :  { %5282 = vmatprep.subr.bf16.mxu0 %v5560_v2  ;;  %5313 = vmatpush3.bf16.xpose.msra.mxu1 %v6354_v5  ;;  %v5566_v10 = vld [vmem:[%s9978_s2 + $0x38] sm:$0xff]   ;;  %v5571_v11 = vld [vmem:[%s9979_s1 + $0x10] sm:$0xff]   ;;  %v5569_v12 = vld [vmem:[%s9980_s4] sm:$0xff]  }
   0x5   :  { %5314 = vmatprep.subr.bf16.mxu1 %v9989_v1  ;;  %v5570_v13 = vld [vmem:[%s9980_s4 + $0x8] sm:$0xff]   ;;  %v5572_v14 = vld [vmem:[%s9979_s1 + $0x18] sm:$0xff]   ;;  %v5573_v15 = vld [vmem:[%s9980_s4 + $0x10] sm:$0xff]   ;;  %5490 = vset.pattern.permute.xlu1 %v9992_v27  ;;  %10288 = vst [vmem:[#allocation4_spill] sm:$0xff] %v6437_v32  ;;  %v6452_v41 = vsub.s32 0, %v6437_v32  ;;  %v6458_v44 = vsub.s32 1, %v6437_v32 }
   0x6   :  { %v5575_v16 = vld [vmem:[%s9979_s1 + $0x20] sm:$0xff]   ;;  %v5574_v17 = vld [vmem:[%s9980_s4 + $0x18] sm:$0xff]   ;;  %v5576_v19 = vld [vmem:[%s9979_s1 + $0x28] sm:$0xff]   ;;  %v6461_v48 = vsub.s32 2, %v6437_v32  ;;  %v6464_v52 = vsub.s32 3, %v6437_v32 }
   0x7   :  { %5283 = vmatpush3.bf16.msra.mxu0 %v5560_v2  ;;  %v5577_v18 = vld [vmem:[%s9980_s4 + $0x20] sm:$0xff]   ;;  %v5579_v20 = vld [vmem:[%s9979_s1 + $0x30] sm:$0xff]   ;;  %v5578_v21 = vld [vmem:[%s9980_s4 + $0x28] sm:$0xff]   ;;  %10289 = vst [vmem:[#allocation5_spill] sm:$0xff] %v6452_v41 }
   0x8   :  { %5284 = vmatprep.subr.bf16.mxu0 %v5561_v3  ;;  %v5581_v22 = vld [vmem:[%s9980_s4 + $0x30] sm:$0xff]   ;;  %v5580_v23 = vld [vmem:[%s9979_s1 + $0x38] sm:$0xff]   ;;  %v317_v25 = vld [vmem:[%s9981_s3] sm:$0xf] }
   0x9   :  { %v5582_v24 = vld [vmem:[%s9980_s4 + $0x38] sm:$0xff]   ;;  %v1175_v29 = vld [vmem:[%s9982_s5] sm:$0x1]  ;;  %v1840_v30 = vld [vmem:[%s9982_s5] sm:$0x2] }
   0xa   :  { %v2505_v31 = vld [vmem:[%s9982_s5] sm:$0x4]  ;;  %v1177_v33 = vshrl.u32 %v1175_v29, 16  ;;  %v3170_v34 = vld [vmem:[%s9982_s5] sm:$0x8]  ;;  %v1842_v35 = vshrl.u32 %v1840_v30, 16 }
   0xb   :  { %5285 = vmatpush3.bf16.msra.mxu0 %v5561_v3  ;;  %v843_v36 = vld [vmem:[%s9982_s5] sm:$0x1]  ;;  %v1508_v37 = vld [vmem:[%s9982_s5] sm:$0x2]  ;;  %v2507_v38 = vshrl.u32 %v2505_v31, 16  ;;  %v3172_v39 = vshrl.u32 %v3170_v34, 16 }
   0xc   :  { %5286 = vmatprep.subr.bf16.mxu0 %v5562_v4  ;;  %5315 = vmatpush3.bf16.xpose.msra.mxu1 %v5568_v8  ;;  %v2173_v40 = vld [vmem:[%s9982_s5] sm:$0x4]  ;;  %v1178_v42 = vpack.i.b16 %v1177_v33, %v1177_v33  ;;  %v2838_v43 = vld [vmem:[%s9982_s5] sm:$0x8]  ;;  %v1843_v45 = vpack.i.b16 %v1842_v35, %v1842_v35  ;;  %v845_v46 = vpack.i.b16 %v843_v36, %v843_v36 }
   0xd   :  { %5316 = vmatprep.subr.bf16.mxu1 %v9989_v1  ;;  %v1510_v47 = vpack.i.b16 %v1508_v37, %v1508_v37  ;;  %v2508_v49 = vpack.i.b16 %v2507_v38, %v2507_v38  ;;  %v2175_v50 = vpack.i.b16 %v2173_v40, %v2173_v40  ;;  %v3173_v53 = vpack.i.b16 %v3172_v39, %v3172_v39 }
   0xe   :  { %v2840_v54 = vpack.i.b16 %v2838_v43, %v2838_v43  ;;  %v6467_v57 = vrot.slane %v1178_v42, %v6452_v41  ;;  %v6470_v58 = vrot.slane %v1843_v45, %v6458_v44  ;;  %v6473_v59 = vrot.slane %v845_v46, %v6452_v41 }
   0xf   :  { %5287 = vmatpush3.bf16.msra.mxu0 %v5562_v4  ;;  %v6476_v60 = vrot.slane %v1510_v47, %v6458_v44  ;;  %v6481_v63 = vrot.slane %v2508_v49, %v6461_v48  ;;  %v6484_v0 = vrot.slane %v2175_v50, %v6461_v48  ;;  %v6489_v3 = vrot.slane %v3173_v53, %v6464_v52 }
  0x10   :  { %5288 = vmatprep.subr.bf16.mxu0 %v5563_v6  ;;  %v6492_v4 = vrot.slane %v2840_v54, %v6464_v52 }
  0x11   :  { %10291 = vst [vmem:[#allocation7_spill] sm:$0xff] %v6481_v63  ;;  %10292 = vst [vmem:[#allocation8_spill] sm:$0xff] %v6484_v0 }
  0x12   :  { %10294 = vst [vmem:[#allocation10_spill] sm:$0xff] %v6489_v3  ;;  %10295 = vst [vmem:[#allocation11_spill] sm:$0xff] %v6492_v4  ;;  %v10316_v4 = vmov 3  }
  0x13   :  { %5289 = vmatpush3.bf16.msra.mxu0 %v5563_v6 }
  0x14   :  { %5290 = vmatprep.subr.bf16.mxu0 %v5564_v7  ;;  %5317 = vmatpush3.bf16.xpose.msra.mxu1 %v5571_v11 }
  0x15   :  { %5318 = vmatprep.subr.bf16.mxu1 %v9989_v1 }
  0x17   :  { %5291 = vmatpush3.bf16.msra.mxu0 %v5564_v7 }
  0x18   :  { %5292 = vmatprep.subr.bf16.mxu0 %v5565_v9 }
  0x1b   :  { %5293 = vmatpush3.bf16.msra.mxu0 %v5565_v9 }
  0x1c   :  { %5294 = vmatprep.subr.bf16.mxu0 %v5566_v10  ;;  %5319 = vmatpush3.bf16.xpose.msra.mxu1 %v5572_v14 }
  0x1d   :  { %5320 = vmatprep.subr.bf16.mxu1 %v9989_v1 }
  0x1f   :  { %5295 = vmatpush3.bf16.msra.mxu0 %v5566_v10 }
  0x20   :  { %5332 = vmatprep.subr.bf16.mxu0 %v5569_v12 }
  0x22   :  { %5297 = vmatmul.mubr.bf16.vlgmr.msra.gmra.mrb[0].mxu0 %v5568_v8 }
  0x23   :  { %5333 = vmatpush3.bf16.msra.mxu0 %v5569_v12  ;;  %5300 = vmatprep.mubr.bf16.mxu0 %v5571_v11 }
  0x24   :  { %5334 = vmatprep.subr.bf16.mxu0 %v5570_v13  ;;  %5321 = vmatpush3.bf16.xpose.msra.mxu1 %v5575_v16 }
  0x25   :  { %5322 = vmatprep.subr.bf16.mxu1 %v9989_v1 }
  0x27   :  { %5335 = vmatpush3.bf16.msra.mxu0 %v5570_v13 }
  0x28   :  { %5336 = vmatprep.subr.bf16.mxu0 %v5573_v15 }
  0x2a   :  { %5301 = vmatmul.mubr.bf16.gmra.mrb[4].mxu0 %v5572_v14 }
  0x2b   :  { %5337 = vmatpush3.bf16.msra.mxu0 %v5573_v15  ;;  %5304 = vmatprep.mubr.bf16.mxu0 %v5575_v16 }
  0x2c   :  { %5338 = vmatprep.subr.bf16.mxu0 %v5574_v17  ;;  %5323 = vmatpush3.bf16.xpose.msra.mxu1 %v5576_v19 }
  0x2d   :  { %5324 = vmatprep.subr.bf16.mxu1 %v9989_v1 }
  0x2f   :  { %5339 = vmatpush3.bf16.msra.mxu0 %v5574_v17 }
  0x30   :  { %5340 = vmatprep.subr.bf16.mxu0 %v5577_v18 }
  0x32   :  { %5305 = vmatmul.mubr.bf16.gmra.mrb[8].mxu0 %v5576_v19 }
  0x33   :  { %5341 = vmatpush3.bf16.msra.mxu0 %v5577_v18  ;;  %5308 = vmatprep.mubr.bf16.mxu0 %v5579_v20 }
  0x34   :  { %5342 = vmatprep.subr.bf16.mxu0 %v5578_v21  ;;  %5325 = vmatpush3.bf16.xpose.msra.mxu1 %v5579_v20 }
  0x35   :  { %5326 = vmatprep.subr.bf16.mxu1 %v9989_v1  ;;  %v9993_v1 = vmov 2  }
  0x37   :  { %5343 = vmatpush3.bf16.msra.mxu0 %v5578_v21 }
  0x38   :  { %5344 = vmatprep.subr.bf16.mxu0 %v5581_v22 }
  0x3a   :  { %5309 = vmatmul.mubr.bf16.gmra.mrb[12].mxu0 %v5580_v23 }
  0x3b   :  { %5345 = vmatpush3.bf16.msra.mxu0 %v5581_v22  ;;  %5348 = vmatprep.mubr.bf16.mxu0 %v6354_v5 }
  0x3c   :  { %5346 = vmatprep.subr.bf16.mxu0 %v5582_v24  ;;  %5327 = vmatpush3.bf16.xpose.msra.mxu1 %v5580_v23 }
  0x3f   :  { %5347 = vmatpush3.bf16.msra.mxu0 %v5582_v24 }
  0x42   :  { %5349 = vmatmul.mubr.bf16.vlgmr.msra.gmra.mrb[16].mxu0 %v5568_v8 }
  0x43   :  { %5352 = vmatprep.mubr.bf16.mxu0 %v5571_v11  ;;  %5329 = vmatmul.mubr.bf16.vlgmr.msra.gmra.mrb[0].mxu1 %v317_v25 }
  0x4a   :  { %5353 = vmatmul.mubr.bf16.gmra.mrb[20].mxu0 %v5572_v14 }
  0x4b   :  { %5356 = vmatprep.mubr.bf16.mxu0 %v5575_v16 }
  0x52   :  { %5357 = vmatmul.mubr.bf16.gmra.mrb[24].mxu0 %v5576_v19 }
  0x53   :  { %5360 = vmatprep.mubr.bf16.mxu0 %v5579_v20 }
  0x5a   :  { %5361 = vmatmul.mubr.bf16.gmra.mrb[28].mxu0 %v5580_v23 }
  0xf5   :  { %v5298_v51 = vpop.f32.mrb[0].mxu0 }
  0xf6   :  { %v246_v55 = vpop.f32.mrb[1].mxu0 }
  0xf7   :  { %v5299_v56 = vpop.f32.mrb[2].mxu0 }
  0xf8   :  { %v6478_v61 = vpack.c.bf16 %v5299_v56, %v5298_v51  ;;  %v249_v62 = vpop.f32.mrb[3].mxu0 }
  0xf9   :  { %v6486_v2 = vpack.c.bf16 %v249_v62, %v246_v55 }
  0xfa   :  { %10290 = vst [vmem:[#allocation6_spill] sm:$0xff] %v6478_v61  ;;  %v1185_v9 = vmul.bf16 %v6467_v57, %v6478_v61  ;;  %v1850_v10 = vmul.bf16 %v6470_v58, %v6478_v61  ;;  %v852_v22 = vmul.bf16 %v6473_v59, %v6478_v61  ;;  %v1517_v23 = vmul.bf16 %v6476_v60, %v6478_v61  ;;  %v6905_v61 = vld [vmem:[%s9983_s0 + $0x10] sm:$0xff]  }
  0xfb   :  { %10293 = vst [vmem:[#allocation9_spill] sm:$0xff] %v6486_v2  ;;  %v1184_v5 = vmul.bf16 %v6467_v57, %v6486_v2  ;;  %v1849_v6 = vmul.bf16 %v6470_v58, %v6486_v2  ;;  %v851_v7 = vmul.bf16 %v6473_v59, %v6486_v2  ;;  %v1516_v8 = vmul.bf16 %v6476_v60, %v6486_v2 }
  0xfd   :  { %v5302_v13 = vpop.f32.mrb[4].mxu0  ;;  %4967 = vmatprep.subr.bf16.mxu0 %v1184_v5  ;;  %5031 = vmatprep.subr.bf16.mxu1 %v1849_v6 }
  0xfe   :  { %v262_v17 = vpop.f32.mrb[5].mxu0  ;;  %4968 = vmatpush3.bf16.msra.mxu0 %v851_v7  ;;  %5032 = vmatpush3.bf16.msra.mxu1 %v1516_v8 }
  0xff   :  { %v5303_v19 = vpop.f32.mrb[6].mxu0  ;;  %4969 = vmatprep.subr.bf16.mxu0 %v1185_v9  ;;  %5033 = vmatprep.subr.bf16.mxu1 %v1850_v10 }
 0x100   :  { %v6518_v20 = vpack.c.bf16 %v5303_v19, %v5302_v13  ;;  %v265_v21 = vpop.f32.mrb[7].mxu0 }
 0x101   :  { %v6524_v24 = vpack.c.bf16 %v265_v21, %v262_v17  ;;  %v4919_v17 = vld [vmem:[%s9983_s0 + $0x8] sm:$0xff]  }
 0x102   :  { %10296 = vst [vmem:[#allocation12_spill] sm:$0xff] %v6518_v20  ;;  %4970 = vmatpush3.bf16.msra.mxu0 %v852_v22  ;;  %5034 = vmatpush3.bf16.msra.mxu1 %v1517_v23  ;;  %v1187_v25 = vmul.bf16 %v6467_v57, %v6518_v20  ;;  %v1852_v33 = vmul.bf16 %v6470_v58, %v6518_v20  ;;  %v6822_v35 = vunpack.c.h.bf16 %v4919_v17 }
 0x103   :  { %10297 = vst [vmem:[#allocation13_spill] sm:$0xff] %v6524_v24  ;;  %v1186_v28 = vmul.bf16 %v6467_v57, %v6524_v24  ;;  %v1851_v29 = vmul.bf16 %v6470_v58, %v6524_v24  ;;  %v853_v30 = vmul.bf16 %v6473_v59, %v6524_v24  ;;  %v1518_v31 = vmul.bf16 %v6476_v60, %v6524_v24 }
 0x104   :  { %v854_v50 = vmul.bf16 %v6473_v59, %v6518_v20  ;;  %v1519_v51 = vmul.bf16 %v6476_v60, %v6518_v20  ;;  %10308 = vst [vmem:[#allocation24_spill] sm:$0xff] %v6822_v35  ;;  %vm71_vm3 = vcmp.gt.f32.partialorder %v6822_v35, 0.0 }
 0x105   :  { %v5306_v37 = vpop.f32.mrb[8].mxu0  ;;  %4971 = vmatprep.subr.bf16.mxu0 %v1186_v28  ;;  %5035 = vmatprep.subr.bf16.mxu1 %v1851_v29 }
 0x106   :  { %v278_v42 = vpop.f32.mrb[9].mxu0  ;;  %4972 = vmatpush3.bf16.msra.mxu0 %v853_v30  ;;  %5036 = vmatpush3.bf16.msra.mxu1 %v1518_v31 }
 0x107   :  { %v5307_v46 = vpop.f32.mrb[10].mxu0  ;;  %4973 = vmatprep.subr.bf16.mxu0 %v1187_v25  ;;  %5037 = vmatprep.subr.bf16.mxu1 %v1852_v33 }
 0x108   :  { %v6554_v47 = vpack.c.bf16 %v5307_v46, %v5306_v37  ;;  %v281_v49 = vpop.f32.mrb[11].mxu0 }
 0x109   :  { %v6560_v53 = vpack.c.bf16 %v281_v49, %v278_v42 }
 0x10a   :  { %10298 = vst [vmem:[#allocation14_spill] sm:$0xff] %v6554_v47  ;;  %4974 = vmatpush3.bf16.msra.mxu0 %v854_v50  ;;  %5038 = vmatpush3.bf16.msra.mxu1 %v1519_v51  ;;  %v1189_v54 = vmul.bf16 %v6467_v57, %v6554_v47  ;;  %v1854_v6 = vmul.bf16 %v6470_v58, %v6554_v47 }
 0x10b   :  { %10299 = vst [vmem:[#allocation15_spill] sm:$0xff] %v6560_v53  ;;  %v1188_v55 = vmul.bf16 %v6467_v57, %v6560_v53  ;;  %v1853_v56 = vmul.bf16 %v6470_v58, %v6560_v53  ;;  %v855_v62 = vmul.bf16 %v6473_v59, %v6560_v53  ;;  %v1520_v5 = vmul.bf16 %v6476_v60, %v6560_v53 }
 0x10c   :  { %v856_v30 = vmul.bf16 %v6473_v59, %v6554_v47  ;;  %v1521_v31 = vmul.bf16 %v6476_v60, %v6554_v47  ;;  %v6277_v47 = vmov 5  }
 0x10d   :  { %v5310_v10 = vpop.f32.mrb[12].mxu0  ;;  %4975 = vmatprep.subr.bf16.mxu0 %v1188_v55  ;;  %5039 = vmatprep.subr.bf16.mxu1 %v1853_v56 }
 0x10e   :  { %v294_v21 = vpop.f32.mrb[13].mxu0  ;;  %4976 = vmatpush3.bf16.msra.mxu0 %v855_v62  ;;  %5040 = vmatpush3.bf16.msra.mxu1 %v1520_v5  ;;  %v6773_v62 = vunpack.c.l.bf16 %v4919_v17 }
 0x10f   :  { %v5311_v25 = vpop.f32.mrb[14].mxu0  ;;  %4977 = vmatprep.subr.bf16.mxu0 %v1189_v54  ;;  %5041 = vmatprep.subr.bf16.mxu1 %v1854_v6 }
 0x110   :  { %v6590_v28 = vpack.c.bf16 %v5311_v25, %v5310_v10  ;;  %v297_v29 = vpop.f32.mrb[15].mxu0  ;;  %10303 = vst [vmem:[#allocation19_spill] sm:$0xff] %v6773_v62  ;;  %vm70_vm1 = vcmp.gt.f32.partialorder %v6773_v62, 0.0 }
 0x111   :  { %v6596_v33 = vpack.c.bf16 %v297_v29, %v294_v21 }
 0x112   :  { %10300 = vst [vmem:[#allocation16_spill] sm:$0xff] %v6590_v28  ;;  %4978 = vmatpush3.bf16.msra.mxu0 %v856_v30  ;;  %5042 = vmatpush3.bf16.msra.mxu1 %v1521_v31  ;;  %v1191_v50 = vmul.bf16 %v6467_v57, %v6590_v28  ;;  %v1856_v51 = vmul.bf16 %v6470_v58, %v6590_v28 }
 0x113   :  { %10301 = vst [vmem:[#allocation17_spill] sm:$0xff] %v6596_v33  ;;  %v1190_v37 = vmul.bf16 %v6467_v57, %v6596_v33  ;;  %v1855_v42 = vmul.bf16 %v6470_v58, %v6596_v33  ;;  %v857_v46 = vmul.bf16 %v6473_v59, %v6596_v33  ;;  %v1522_v49 = vmul.bf16 %v6476_v60, %v6596_v33 }
 0x114   :  { %v858_v30 = vmul.bf16 %v6473_v59, %v6590_v28  ;;  %v1523_v31 = vmul.bf16 %v6476_v60, %v6590_v28 }
 0x115   :  { %v6610_v54 = vpop.f32.mrb[16].mxu0  ;;  %4979 = vmatprep.subr.bf16.mxu0 %v1190_v37  ;;  %5043 = vmatprep.subr.bf16.mxu1 %v1855_v42  ;;  %v9991_v37 = vmov 3   ;;  %v2514_v42 = vmul.bf16 %v6481_v63, %v6486_v2  ;;  %v6908_v63 = vunpack.c.h.bf16 %v6905_v61 }
 0x116   :  { %531 = vperm.xlu0 %5491, %v6610_v54   ;;  %876 = vperm.xlu1 %5490, %v6610_v54   ;;  %v6620_v57 = vpop.f32.mrb[17].mxu0  ;;  %v6648_v59 = vpop.f32.mrb[0].mxu1 }
 0x117   :  { %4980 = vmatpush3.bf16.msra.mxu0 %v857_v46  ;;  %5044 = vmatpush3.bf16.msra.mxu1 %v1522_v49  ;;  %v6628_v10 = vpop.f32.mrb[18].mxu0  ;;  %v3179_v46 = vmul.bf16 %v6489_v3, %v6486_v2  ;;  %10302 = vst [vmem:[#allocation18_spill] sm:$0xff] %v6648_v59  ;;  %v5330_v49 = vpop.f32.mrb[1].mxu1  ;;  %v6762_v19 = vrot.slane %v6648_v59, %v6464_v52  ;;  %v4888_v52 = vld [vmem:[%s9983_s0] sm:$0xff]   ;;  %10317 = vst [vmem:[#allocation30_spill] sm:$0xff] %v6908_v63  ;;  %vm73_vm5 = vcmp.gt.f32.partialorder %v6908_v63, 0.0 }
 0x118   :  { %4981 = vmatprep.subr.bf16.mxu0 %v1191_v50  ;;  %5045 = vmatprep.subr.bf16.mxu1 %v1856_v51  ;;  %v6634_v29 = vpop.f32.mrb[19].mxu0  ;;  %v355_v51 = vpop.f32.mrb[2].mxu1  ;;  %v6788_v13 = vunpack.c.l.bf16 %v4888_v52  ;;  %v6826_v14 = vunpack.c.h.bf16 %v4888_v52 }
 0x11a   :  { %5494 = vset.pattern.permute.xlu0 %v9992_v27  ;;  %5492 = vset.pattern.permute.xlu1 %v9991_v37  ;;  %10305 = vst [vmem:[#allocation21_spill] sm:$0xff] %v6788_v13  ;;  %vm68_vm2 = vcmp.gt.f32.partialorder %v6788_v13, 0.0  ;;  %10309 = vst [vmem:[#allocation25_spill] sm:$0xff] %v6826_v14  ;;  %vm69_vm4 = vcmp.gt.f32.partialorder %v6826_v14, 0.0 }
 0x11b   :  { %4982 = vmatpush3.bf16.msra.mxu0 %v858_v30  ;;  %5046 = vmatpush3.bf16.msra.mxu1 %v1523_v31  ;;  %v5331_v31 = vpop.f32.mrb[3].mxu1 }
 0x11c   :  { %1541 = vperm.xlu1 %5492, %v6610_v54   ;;  %868 = vperm.xlu0 %5494, %v6620_v57  }
 0x11d   :  { %5095 = vmatprep.subr.bf16.mxu0 %v2514_v42  ;;  %5159 = vmatprep.subr.bf16.mxu1 %v3179_v46  ;;  %v6650_v60 = vpop.f32.mrb[20].mxu0 }
 0x11e   :  { %v6652_v50 = vpop.f32.mrb[21].mxu0 }
 0x11f   :  { %v6654_v30 = vpop.f32.mrb[22].mxu0 }
 0x120   :  { %5493 = vset.pattern.permute.xlu1 %v9993_v1  ;;  %5496 = vset.pattern.permute.xlu0 %v9991_v37  ;;  %v6658_v25 = vpop.f32.mrb[23].mxu0 }
 0x121   :  { %1209 = vperm.xlu1 %5493, %v6610_v54   ;;  %1533 = vperm.xlu0 %5496, %v6620_v57  }
 0x125   :  { %5495 = vset.pattern.permute.xlu1 %v10013_v26  ;;  %1545 = vperm.xlu0 %5496, %v6628_v10   ;;  %v6664_v42 = vpop.f32.mrb[24].mxu0 }
 0x126   :  { %521 = vperm.xlu1 %5495, %v6620_v57   ;;  %v6667_v46 = vpop.f32.mrb[25].mxu0 }
 0x127   :  { %v6669_v49 = vpop.f32.mrb[26].mxu0 }
 0x128   :  { %v6671_v51 = vpop.f32.mrb[27].mxu0 }
 0x129   :  { %5501 = vset.pattern.permute.xlu0 %v9992_v27 }
 0x12a   :  { %5497 = vset.pattern.permute.xlu1 %v9993_v1  ;;  %872 = vperm.xlu0 %5501, %v6634_v29  }
 0x12b   :  { %1201 = vperm.xlu1 %5497, %v6620_v57  }
 0x12d   :  { %v6677_v31 = vpop.f32.mrb[28].mxu0 }
 0x12e   :  { %5504 = vset.pattern.permute.xlu0 %v9993_v1  ;;  %v6680_v21 = vpop.f32.mrb[29].mxu0 }
 0x12f   :  { %5498 = vset.pattern.permute.xlu1 %v9992_v27  ;;  %1205 = vperm.xlu0 %5504, %v6634_v29   ;;  %v6684_v6 = vpop.f32.mrb[30].mxu0 }
 0x130   :  { %880 = vperm.xlu1 %5498, %v6628_v10   ;;  %v6687_v5 = vpop.f32.mrb[31].mxu0 }
 0x133   :  { %5507 = vset.pattern.permute.xlu0 %v9991_v37 }
 0x134   :  { %5499 = vset.pattern.permute.xlu1 %v10013_v26  ;;  %1557 = vperm.xlu0 %5507, %v6650_v60  }
 0x135   :  { %536 = vperm.xlu1 %5499, %v6628_v10  }
 0x138   :  { %5509 = vset.pattern.permute.xlu0 %v9992_v27 }
 0x139   :  { %5500 = vset.pattern.permute.xlu1 %v9993_v1  ;;  %884 = vperm.xlu0 %5509, %v6652_v50  }
 0x13a   :  { %1213 = vperm.xlu1 %5500, %v6628_v10  }
 0x13d   :  { %5512 = vset.pattern.permute.xlu0 %v9993_v1 }
 0x13e   :  { %5502 = vset.pattern.permute.xlu1 %v10013_v26  ;;  %1217 = vperm.xlu0 %5512, %v6652_v50  }
 0x13f   :  { %526 = vperm.xlu1 %5502, %v6634_v29  }
 0x142   :  { %5513 = vset.pattern.permute.xlu0 %v9992_v27 }
 0x143   :  { %5503 = vset.pattern.permute.xlu1 %v9991_v37  ;;  %896 = vperm.xlu0 %5513, %v6654_v30  }
 0x144   :  { %1537 = vperm.xlu1 %5503, %v6634_v29  }
 0x147   :  { %5516 = vset.pattern.permute.xlu0 %v9993_v1 }
 0x148   :  { %5505 = vset.pattern.permute.xlu1 %v9992_v27  ;;  %1229 = vperm.xlu0 %5516, %v6654_v30  }
 0x149   :  { %892 = vperm.xlu1 %5505, %v6650_v60  }
 0x14c   :  { %5518 = vset.pattern.permute.xlu0 %v10013_v26 }
 0x14d   :  { %5506 = vset.pattern.permute.xlu1 %v10013_v26  ;;  %546 = vperm.xlu0 %5518, %v6658_v25  }
 0x14e   :  { %551 = vperm.xlu1 %5506, %v6650_v60  }
 0x151   :  { %5521 = vset.pattern.permute.xlu0 %v9992_v27 }
 0x152   :  { %5508 = vset.pattern.permute.xlu1 %v9993_v1  ;;  %908 = vperm.xlu0 %5521, %v6664_v42  }
 0x153   :  { %1225 = vperm.xlu1 %5508, %v6650_v60  }
 0x156   :  { %5524 = vset.pattern.permute.xlu0 %v9993_v1 }
 0x157   :  { %5510 = vset.pattern.permute.xlu1 %v10013_v26  ;;  %1241 = vperm.xlu0 %5524, %v6664_v42  }
 0x158   :  { %541 = vperm.xlu1 %5510, %v6652_v50  }
 0x15b   :  { %5526 = vset.pattern.permute.xlu0 %v10013_v26 }
 0x15c   :  { %5511 = vset.pattern.permute.xlu1 %v9991_v37  ;;  %561 = vperm.xlu0 %5526, %v6667_v46  }
 0x15d   :  { %1549 = vperm.xlu1 %5511, %v6652_v50  }
 0x160   :  { %576 = vperm.xlu0 %5526, %v6669_v49  }
 0x161   :  { %5514 = vset.pattern.permute.xlu1 %v10013_v26 }
 0x162   :  { %556 = vperm.xlu1 %5514, %v6654_v30  }
 0x164   :  { %5534 = vset.pattern.permute.xlu0 %v9991_v37 }
 0x165   :  { %1569 = vperm.xlu0 %5534, %v6671_v51  }
 0x166   :  { %5515 = vset.pattern.permute.xlu1 %v9991_v37 }
 0x167   :  { %1561 = vperm.xlu1 %5515, %v6654_v30  }
 0x169   :  { %1581 = vperm.xlu0 %5534, %v6680_v21  }
 0x16b   :  { %5517 = vset.pattern.permute.xlu1 %v9992_v27 }
 0x16c   :  { %888 = vperm.xlu1 %5517, %v6658_v25  }
 0x16d   :  { %1593 = vperm.xlu0 %5534, %v6684_v6  }
 0x170   :  { %5519 = vset.pattern.permute.xlu1 %v9991_v37 }
 0x171   :  { %1553 = vperm.xlu1 %5519, %v6658_v25   ;;  %5545 = vset.pattern.permute.xlu0 %v9992_v27 }
 0x172   :  { %920 = vperm.xlu0 %5545, %v6687_v5  }
 0x175   :  { %5520 = vset.pattern.permute.xlu1 %v9993_v1 }
 0x176   :  { %1221 = vperm.xlu1 %5520, %v6658_v25   ;;  %5548 = vset.pattern.permute.xlu0 %v9993_v1 }
 0x177   :  { %1253 = vperm.xlu0 %5548, %v6687_v5  }
 0x17a   :  { %5522 = vset.pattern.permute.xlu1 %v10013_v26 }
 0x17b   :  { %571 = vperm.xlu1 %5522, %v6664_v42   ;;  %5550 = vset.pattern.permute.xlu0 %v6277_v47 }
 0x17f   :  { %5523 = vset.pattern.permute.xlu1 %v9991_v37 }
 0x180   :  { %1573 = vperm.xlu1 %5523, %v6664_v42  }
 0x184   :  { %5525 = vset.pattern.permute.xlu1 %v9992_v27 }
 0x185   :  { %900 = vperm.xlu1 %5525, %v6667_v46  }
 0x189   :  { %5527 = vset.pattern.permute.xlu1 %v9991_v37 }
 0x18a   :  { %1565 = vperm.xlu1 %5527, %v6667_v46  }
 0x18e   :  { %5528 = vset.pattern.permute.xlu1 %v9993_v1 }
 0x18f   :  { %1233 = vperm.xlu1 %5528, %v6667_v46  }
 0x193   :  { %5529 = vset.pattern.permute.xlu1 %v9992_v27 }
 0x194   :  { %912 = vperm.xlu1 %5529, %v6669_v49  }
 0x195   :  { %v6756_v23 = vpop.permute.xlu0 %531  ;;  %v6758_v22 = vpop.permute.xlu1 %876 }
 0x198   :  { %5530 = vset.pattern.permute.xlu1 %v9991_v37 }
 0x199   :  { %1577 = vperm.xlu1 %5530, %v6669_v49  }
 0x19b   :  { %v1542_v45 = vpop.permute.xlu1 %1541  ;;  %v6769_v58 = vpop.permute.xlu0 %868 }
 0x19c   :  { %v1602_v43 = vadd.f32 %v6762_v19, %v1542_v45 }
 0x19d   :  { %5531 = vset.pattern.permute.xlu1 %v9993_v1 }
 0x19e   :  { %v1618_v40 = vmul.f32 0.2, %v1602_v43  ;;  %1245 = vperm.xlu1 %5531, %v6669_v49  }
 0x1a0   :  { %v6779_v56 = vpop.permute.xlu1 %1209  ;;  %v1534_v39 = vpop.permute.xlu0 %1533  ;;  %v1634_v55 = vmax.f32 %v1602_v43, %v1618_v40 }
 0x1a1   :  { %v1600_v18 = vadd.f32 %v6762_v19, %v1534_v39 }
 0x1a2   :  { %5532 = vset.pattern.permute.xlu1 %v9992_v27  ;;  %v6786_v45 = vsel %vm70_vm1, %v1634_v55, -1e+30  ;;  %v6806_v55 = vrot.slane %v6648_v59, %v6461_v48 }
 0x1a3   :  { %10304 = vst [vmem:[#allocation20_spill] sm:$0xff] %v6786_v45  ;;  %v1616_v16 = vmul.f32 0.2, %v1600_v18  ;;  %904 = vperm.xlu1 %5532, %v6671_v51   ;;  %1668 = vmax.xlane.f32.xlu0 %v6786_v45 }
 0x1a4   :  { %v6792_v9 = vpop.permute.xlu0 %1545 }
 0x1a5   :  { %v6794_v40 = vpop.permute.xlu1 %521  ;;  %v1632_v39 = vmax.f32 %v1600_v18, %v1616_v16  ;;  %v6811_v18 = vrot.slane %v6648_v59, %v6458_v44 }
 0x1a7   :  { %5533 = vset.pattern.permute.xlu1 %v10013_v26  ;;  %v6800_v43 = vsel %vm68_vm2, %v1632_v39, -1e+30 }
 0x1a8   :  { %10306 = vst [vmem:[#allocation22_spill] sm:$0xff] %v6800_v43  ;;  %566 = vperm.xlu1 %5533, %v6671_v51   ;;  %1664 = vmax.xlane.f32.xlu0 %v6800_v43 }
 0x1a9   :  { %v873_v8 = vpop.permute.xlu0 %872 }
 0x1aa   :  { %v1202_v15 = vpop.permute.xlu1 %1201  ;;  %v936_v7 = vadd.f32 %v6811_v18, %v873_v8 }
 0x1ab   :  { %v1268_v16 = vadd.f32 %v6806_v55, %v1202_v15 }
 0x1ac   :  { %5535 = vset.pattern.permute.xlu1 %v9993_v1  ;;  %v952_v44 = vmul.f32 0.2, %v936_v7 }
 0x1ad   :  { %v1284_v39 = vmul.f32 0.2, %v1268_v16  ;;  %1237 = vperm.xlu1 %5535, %v6671_v51  }
 0x1ae   :  { %v6856_v11 = vpop.permute.xlu0 %1205 }
 0x1af   :  { %v881_v38 = vpop.permute.xlu1 %880  ;;  %v1300_v36 = vmax.f32 %v1268_v16, %v1284_v39 }
 0x1b0   :  { %v938_v48 = vadd.f32 %v6811_v18, %v881_v38  ;;  %v968_v38 = vmax.f32 %v936_v7, %v952_v44 }
 0x1b1   :  { %5536 = vset.pattern.permute.xlu1 %v9992_v27  ;;  %v6820_v15 = vsel %vm68_vm2, %v1300_v36, -1e+30 }
 0x1b2   :  { %10307 = vst [vmem:[#allocation23_spill] sm:$0xff] %v6820_v15  ;;  %v954_v34 = vmul.f32 0.2, %v938_v48  ;;  %924 = vperm.xlu1 %5536, %v6677_v31   ;;  %1332 = vmax.xlane.f32.xlu0 %v6820_v15  ;;  %v6841_v52 = vsel %vm69_vm4, %v968_v38, -1e+30 }
 0x1b3   :  { %10311 = vst [vmem:[#allocation27_spill] sm:$0xff] %v6841_v52 }
 0x1b4   :  { %v6828_v8 = vpop.permute.xlu1 %536  ;;  %v970_v16 = vmax.f32 %v938_v48, %v954_v34  ;;  %v6848_v34 = vrot.slane %v6648_v59, %v6452_v41 }
 0x1b6   :  { %5537 = vset.pattern.permute.xlu1 %v9991_v37  ;;  %v6834_v36 = vsel %vm71_vm3, %v970_v16, -1e+30 }
 0x1b7   :  { %10310 = vst [vmem:[#allocation26_spill] sm:$0xff] %v6834_v36  ;;  %1589 = vperm.xlu1 %5537, %v6677_v31   ;;  %1005 = vmax.xlane.f32.xlu0 %v6834_v36 }
 0x1b9   :  { %v1214_v17 = vpop.permute.xlu1 %1213 }
 0x1ba   :  { %v1271_v7 = vadd.f32 %v6806_v55, %v1214_v17 }
 0x1bb   :  { %5538 = vset.pattern.permute.xlu1 %v9993_v1  ;;  %1001 = vmax.xlane.f32.xlu0 %v6841_v52 }
 0x1bc   :  { %1257 = vperm.xlu1 %5538, %v6677_v31   ;;  %v1287_v44 = vmul.f32 0.2, %v1271_v7 }
 0x1be   :  { %v527_v39 = vpop.permute.xlu1 %526  ;;  %v1303_v17 = vmax.f32 %v1271_v7, %v1287_v44  ;;  %v10315_v7 = vmov 1  }
 0x1bf   :  { %v604_v48 = vadd.f32 %v6848_v34, %v527_v39 }
 0x1c0   :  { %5539 = vset.pattern.permute.xlu1 %v9992_v27  ;;  %v6865_v27 = vpop.permute.xlu0 %1557  ;;  %v6869_v1 = vsel %vm71_vm3, %v1303_v17, -1e+30 }
 0x1c1   :  { %v620_v16 = vmul.f32 0.2, %v604_v48  ;;  %916 = vperm.xlu1 %5539, %v6680_v21   ;;  %10313 = vst [vmem:[#allocation29_spill] sm:$0xff] %v6869_v1 }
 0x1c3   :  { %v6854_v38 = vpop.permute.xlu1 %1537  ;;  %v636_v12 = vmax.f32 %v604_v48, %v620_v16  ;;  %v10314_v48 = vmov 2  }
 0x1c4   :  { %v6874_v16 = vpop.permute.xlu0 %884 }
 0x1c5   :  { %5540 = vset.pattern.permute.xlu1 %v10013_v26  ;;  %v6861_v37 = vsel %vm69_vm4, %v636_v12, -1e+30 }
 0x1c6   :  { %10312 = vst [vmem:[#allocation28_spill] sm:$0xff] %v6861_v37  ;;  %581 = vperm.xlu1 %5540, %v6680_v21   ;;  %669 = vmax.xlane.f32.xlu0 %v6861_v37 }
 0x1c8   :  { %v893_v39 = vpop.permute.xlu1 %892  ;;  %v6881_v41 = vpop.permute.xlu0 %1217 }
 0x1c9   :  { %v941_v37 = vadd.f32 %v6811_v18, %v893_v39 }
 0x1ca   :  { %5541 = vset.pattern.permute.xlu1 %v10314_v48  ;;  %1338 = vmax.xlane.f32.xlu0 %v6869_v1 }
 0x1cb   :  { %1249 = vperm.xlu1 %5541, %v6680_v21   ;;  %v957_v15 = vmul.f32 0.2, %v941_v37 }
 0x1cc   :  { %v6888_v28 = vpop.permute.xlu0 %896 }
 0x1cd   :  { %v552_v12 = vpop.permute.xlu1 %551 }
 0x1cf   :  { %5542 = vset.pattern.permute.xlu1 %v10315_v7 }
 0x1d0   :  { %928 = vperm.xlu1 %5542, %v6684_v6   ;;  %v6894_v7 = vpop.permute.xlu0 %1229 }
 0x1d2   :  { %v6878_v44 = vpop.permute.xlu1 %1225 }
 0x1d4   :  { %5543 = vset.pattern.permute.xlu1 %v10013_v26  ;;  %v547_v53 = vpop.permute.xlu0 %546 }
 0x1d5   :  { %596 = vperm.xlu1 %5543, %v6684_v6   ;;  %v608_v20 = vadd.f32 %v6848_v34, %v547_v53 }
 0x1d7   :  { %v6884_v17 = vpop.permute.xlu1 %541  ;;  %v624_v2 = vmul.f32 0.2, %v608_v20 }
 0x1d9   :  { %5544 = vset.pattern.permute.xlu1 %v10314_v48 }
 0x1da   :  { %1261 = vperm.xlu1 %5544, %v6684_v6  }
 0x1dc   :  { %v6890_v33 = vpop.permute.xlu1 %1549 }
 0x1de   :  { %5546 = vset.pattern.permute.xlu1 %v10013_v26 }
 0x1df   :  { %586 = vperm.xlu1 %5546, %v6687_v5  }
 0x1e1   :  { %v6896_v3 = vpop.permute.xlu1 %556 }
 0x1e3   :  { %5547 = vset.pattern.permute.xlu1 %v10316_v4 }
 0x1e4   :  { %1585 = vperm.xlu1 %5547, %v6687_v5  }
 0x1e6   :  { %v1562_v48 = vpop.permute.xlu1 %1561 }
 0x1e8   :  { %5549 = vset.pattern.permute.xlu1 %v6277_v47 }
 0x1eb   :  { %v889_v24 = vpop.permute.xlu1 %888 }
 0x1ec   :  { %v940_v26 = vadd.f32 %v6811_v18, %v889_v24  ;;  %v640_v24 = vmax.f32 %v608_v20, %v624_v2 }
 0x1ee   :  { %v956_v4 = vmul.f32 0.2, %v940_v26 }
 0x1f0   :  { %v1554_v0 = vpop.permute.xlu1 %1553  ;;  %v972_v1 = vmax.f32 %v940_v26, %v956_v4  ;;  %v6921_v26 = vsel %vm73_vm5, %v640_v24, -1e+30  ;;  %v605_v24 = vadd.f32 %v6848_v34, %v6756_v23 }
 0x1f1   :  { %v1605_v36 = vadd.f32 %v6762_v19, %v1554_v0  ;;  %10319 = vst [vmem:[#allocation32_spill] sm:$0xff] %v6921_v26 }
 0x1f2   :  { %v6914_v47 = vsel %vm73_vm5, %v972_v1, -1e+30  ;;  %v609_v1 = vadd.f32 %v6848_v34, %v552_v12 }
 0x1f3   :  { %10318 = vst [vmem:[#allocation31_spill] sm:$0xff] %v6914_v47  ;;  %v1621_v53 = vmul.f32 0.2, %v1605_v36  ;;  %1009 = vmax.xlane.f32.xlu0 %v6914_v47 }
 0x1f5   :  { %v1222_v45 = vpop.permute.xlu1 %1221  ;;  %v1637_v0 = vmax.f32 %v1605_v36, %v1621_v53  ;;  %v937_v36 = vadd.f32 %v6811_v18, %v6758_v22  ;;  %v625_v53 = vmul.f32 0.2, %v609_v1  ;;  %v621_v22 = vmul.f32 0.2, %v605_v24 }
 0x1f6   :  { %v1273_v52 = vadd.f32 %v6806_v55, %v1222_v45  ;;  %v4921_v45 = vld [vmem:[%s9983_s0 + $0x18] sm:$0xff]  }
 0x1f7   :  { %677 = vmax.xlane.f32.xlu0 %v6921_v26  ;;  %v6929_v20 = vsel %vm73_vm5, %v1637_v0, -1e+30  ;;  %v6939_v12 = vunpack.c.l.bf16 %v4921_v45  ;;  %v1607_v26 = vadd.f32 %v6762_v19, %v1562_v48  ;;  %v973_v0 = vmax.f32 %v941_v37, %v957_v15 }
 0x1f8   :  { %v1289_v4 = vmul.f32 0.2, %v1273_v52  ;;  %10320 = vst [vmem:[#allocation33_spill] sm:$0xff] %v6929_v20  ;;  %v641_v43 = vmax.f32 %v609_v1, %v625_v53  ;;  %v935_v48 = vadd.f32 %v6811_v18, %v6769_v58  ;;  %v6958_v63 = vunpack.c.h.bf16 %v4921_v45  ;;  %v6967_v1 = vld [vmem:[%s9983_s0 + $0x20] sm:$0xff]  }
 0x1f9   :  { %10321 = vst [vmem:[#allocation34_spill] sm:$0xff] %v6939_v12  ;;  %vm74_vm6 = vcmp.gt.f32.partialorder %v6939_v12, 0.0  ;;  %v637_v32 = vmax.f32 %v605_v24, %v621_v22 }
 0x1fa   :  { %v6925_v2 = vpop.permute.xlu1 %571  ;;  %v1305_v39 = vmax.f32 %v1273_v52, %v1289_v4  ;;  %v953_v4 = vmul.f32 0.2, %v937_v36  ;;  %v6952_v23 = vsel %vm74_vm6, %v973_v0, -1e+30  ;;  %10324 = vst [vmem:[#allocation37_spill] sm:$0xff] %v6958_v63  ;;  %vm75_vm7 = vcmp.gt.f32.partialorder %v6958_v63, 0.0 }
 0x1fb   :  { %1674 = vmax.xlane.f32.xlu0 %v6929_v20  ;;  %v1623_v20 = vmul.f32 0.2, %v1607_v26  ;;  %10323 = vst [vmem:[#allocation36_spill] sm:$0xff] %v6952_v23  ;;  %v951_v58 = vmul.f32 0.2, %v935_v48  ;;  %v606_v0 = vadd.f32 %v6848_v34, %v6828_v8 }
 0x1fc   :  { %v6944_v52 = vsel %vm73_vm5, %v1305_v39, -1e+30  ;;  %v969_v37 = vmax.f32 %v937_v36, %v953_v4  ;;  %v603_v36 = vadd.f32 %v6848_v34, %v6794_v40  ;;  %v6992_v4 = vsel %vm70_vm1, %v637_v32, -1e+30 }
 0x1fd   :  { %10322 = vst [vmem:[#allocation35_spill] sm:$0xff] %v6944_v52  ;;  %v1639_v59 = vmax.f32 %v1607_v26, %v1623_v20  ;;  %v6981_v26 = vunpack.c.l.bf16 %v6967_v1  ;;  %10329 = vst [vmem:[#allocation42_spill] sm:$0xff] %v6992_v4  ;;  %v967_v22 = vmax.f32 %v935_v48, %v951_v58  ;;  %v622_v8 = vmul.f32 0.2, %v606_v0 }
 0x1fe   :  { %v6974_v45 = vsel %vm70_vm1, %v969_v37, -1e+30  ;;  %v619_v24 = vmul.f32 0.2, %v603_v36  ;;  %v6995_v37 = vpop.permute.xlu0 %908  ;;  %v1269_v58 = vadd.f32 %v6806_v55, %v6856_v11 }
 0x1ff   :  { %v6946_v47 = vpop.permute.xlu1 %1573  ;;  %1342 = vmax.xlane.f32.xlu0 %v6944_v52  ;;  %v6962_v52 = vsel %vm74_vm6, %v641_v43, -1e+30  ;;  %10326 = vst [vmem:[#allocation39_spill] sm:$0xff] %v6974_v45  ;;  %10327 = vst [vmem:[#allocation40_spill] sm:$0xff] %v6981_v26  ;;  %v6985_v20 = vsel %vm75_vm7, %v1639_v59, -1e+30 }
 0x200   :  { %10325 = vst [vmem:[#allocation38_spill] sm:$0xff] %v6962_v52  ;;  %10328 = vst [vmem:[#allocation41_spill] sm:$0xff] %v6985_v20  ;;  %vm76_vm8 = vcmp.gt.f32.partialorder %v6981_v26, 0.0  ;;  %v7009_v32 = vsel %vm68_vm2, %v967_v22, -1e+30  ;;  %v635_v48 = vmax.f32 %v603_v36, %v619_v24  ;;  %v1603_v22 = vadd.f32 %v6762_v19, %v6792_v9 }
 0x201   :  { %10331 = vst [vmem:[#allocation44_spill] sm:$0xff] %v7009_v32  ;;  %v1285_v36 = vmul.f32 0.2, %v1269_v58 }
 0x203   :  { %1011 = vmax.xlane.f32.xlu0 %v6952_v23  ;;  %v1301_v9 = vmax.f32 %v1269_v58, %v1285_v36  ;;  %v607_v58 = vadd.f32 %v6848_v34, %v6884_v17 }
 0x204   :  { %v901_v15 = vpop.permute.xlu1 %900 }
 0x205   :  { %v943_v39 = vadd.f32 %v6811_v18, %v901_v15 }
 0x207   :  { %v959_v53 = vmul.f32 0.2, %v943_v39  ;;  %679 = vmax.xlane.f32.xlu0 %v6962_v52  ;;  %v7018_v52 = vsel %vm68_vm2, %v635_v48, -1e+30 }
 0x208   :  { %1003 = vmax.xlane.f32.xlu1 %v6974_v45  ;;  %10332 = vst [vmem:[#allocation45_spill] sm:$0xff] %v7018_v52 }
 0x209   :  { %v6977_v43 = vpop.permute.xlu1 %1565  ;;  %v975_v40 = vmax.f32 %v943_v39, %v959_v53  ;;  %v1601_v39 = vadd.f32 %v6762_v19, %v6854_v38  ;;  %v638_v38 = vmax.f32 %v606_v0, %v622_v8  ;;  %v1270_v0 = vadd.f32 %v6806_v55, %v6779_v56 }
 0x20a   :  { %v1619_v8 = vmul.f32 0.2, %v1603_v22 }
 0x20b   :  { %1678 = vmax.xlane.f32.xlu0 %v6985_v20  ;;  %v7002_v15 = vsel %vm76_vm8, %v975_v40, -1e+30  ;;  %v1617_v53 = vmul.f32 0.2, %v1601_v39  ;;  %v7014_v20 = vpop.permute.xlu0 %1241  ;;  %v7025_v24 = vsel %vm71_vm3, %v638_v38, -1e+30 }
 0x20c   :  { %671 = vmax.xlane.f32.xlu1 %v6992_v4  ;;  %10330 = vst [vmem:[#allocation43_spill] sm:$0xff] %v7002_v15  ;;  %10333 = vst [vmem:[#allocation46_spill] sm:$0xff] %v7025_v24  ;;  %v7045_v4 = vsel %vm69_vm4, %v1301_v9, -1e+30  ;;  %v1635_v56 = vmax.f32 %v1603_v22, %v1619_v8  ;;  %v623_v8 = vmul.f32 0.2, %v607_v58 }
 0x20d   :  { %v1633_v11 = vmax.f32 %v1601_v39, %v1617_v53  ;;  %v1286_v39 = vmul.f32 0.2, %v1270_v0  ;;  %v939_v53 = vadd.f32 %v6811_v18, %v6874_v16  ;;  %10335 = vst [vmem:[#allocation48_spill] sm:$0xff] %v7045_v4  ;;  %v7058_v16 = vunpack.c.l.bf16 %v6905_v61 }
 0x20e   :  { %v6998_v59 = vpop.permute.xlu1 %1233  ;;  %v7054_v36 = vsel %vm71_vm3, %v1635_v56, -1e+30  ;;  %v7071_v61 = vunpack.c.h.bf16 %v6967_v1 }
 0x20f   :  { %1015 = vmax.xlane.f32.xlu0 %v7002_v15  ;;  %v7030_v23 = vpop.permute.xlu0 %561  ;;  %v7036_v48 = vsel %vm69_vm4, %v1633_v11, -1e+30  ;;  %v955_v11 = vmul.f32 0.2, %v939_v53  ;;  %10336 = vst [vmem:[#allocation49_spill] sm:$0xff] %v7054_v36  ;;  %10337 = vst [vmem:[#allocation50_spill] sm:$0xff] %v7058_v16 }
 0x210   :  { %999 = vmax.xlane.f32.xlu1 %v7009_v32  ;;  %10334 = vst [vmem:[#allocation47_spill] sm:$0xff] %v7036_v48  ;;  %vm72_vm9 = vcmp.gt.f32.partialorder %v7058_v16, 0.0  ;;  %10339 = vst [vmem:[#allocation52_spill] sm:$0xff] %v7071_v61  ;;  %vm77_vm10 = vcmp.gt.f32.partialorder %v7071_v61, 0.0 }
 0x211   :  { %v971_v56 = vmax.f32 %v939_v53, %v955_v11  ;;  %v639_v53 = vmax.f32 %v607_v58, %v623_v8 }
 0x213   :  { %v913_v40 = vpop.permute.xlu1 %912  ;;  %v7092_v8 = vsel %vm72_vm9, %v639_v53, -1e+30  ;;  %v1610_v53 = vadd.f32 %v6762_v19, %v6946_v47 }
 0x214   :  { %667 = vmax.xlane.f32.xlu1 %v7018_v52  ;;  %v946_v35 = vadd.f32 %v6811_v18, %v913_v40  ;;  %10342 = vst [vmem:[#allocation55_spill] sm:$0xff] %v7092_v8 }
 0x215   :  { %v1626_v47 = vmul.f32 0.2, %v1610_v53 }
 0x218   :  { %v7027_v15 = vpop.permute.xlu1 %1577  ;;  %673 = vmax.xlane.f32.xlu1 %v7025_v24  ;;  %v577_v24 = vpop.permute.xlu0 %576 }
 0x219   :  { %v614_v40 = vadd.f32 %v6848_v34, %v577_v24 }
 0x21c   :  { %1666 = vmax.xlane.f32.xlu1 %v7036_v48  ;;  %v1302_v48 = vmax.f32 %v1270_v0, %v1286_v39  ;;  %v1570_v9 = vpop.permute.xlu0 %1569  ;;  %v1272_v39 = vadd.f32 %v6806_v55, %v6881_v41 }
 0x21d   :  { %v7039_v38 = vpop.permute.xlu1 %1245  ;;  %v1609_v22 = vadd.f32 %v6762_v19, %v1570_v9 }
 0x21e   :  { %v7065_v17 = vsel %vm70_vm1, %v1302_v48, -1e+30  ;;  %v7077_v48 = vsel %vm72_vm9, %v971_v56, -1e+30  ;;  %v1288_v1 = vmul.f32 0.2, %v1272_v39  ;;  %v942_v56 = vadd.f32 %v6811_v18, %v6888_v28 }
 0x21f   :  { %10338 = vst [vmem:[#allocation51_spill] sm:$0xff] %v7065_v17  ;;  %v1625_v9 = vmul.f32 0.2, %v1609_v22  ;;  %10340 = vst [vmem:[#allocation53_spill] sm:$0xff] %v7077_v48 }
 0x220   :  { %1334 = vmax.xlane.f32.xlu1 %v7045_v4  ;;  %v1604_v4 = vadd.f32 %v6762_v19, %v6890_v33  ;;  %v1304_v24 = vmax.f32 %v1272_v39, %v1288_v1 }
 0x221   :  { %v1641_v32 = vmax.f32 %v1609_v22, %v1625_v9  ;;  %v4923_v9 = vld [vmem:[%s9983_s0 + $0x28] sm:$0xff]  }
 0x222   :  { %v7048_v45 = vpop.permute.xlu1 %904  ;;  %v7128_v39 = vsel %vm72_vm9, %v1304_v24, -1e+30  ;;  %v7146_v24 = vunpack.c.l.bf16 %v4923_v9 }
 0x223   :  { %v7100_v22 = vsel %vm77_vm10, %v1641_v32, -1e+30  ;;  %v7113_v32 = vunpack.c.h.bf16 %v4923_v9  ;;  %10347 = vst [vmem:[#allocation60_spill] sm:$0xff] %v7128_v39 }
 0x224   :  { %1670 = vmax.xlane.f32.xlu1 %v7054_v36  ;;  %v1620_v36 = vmul.f32 0.2, %v1604_v4  ;;  %10343 = vst [vmem:[#allocation56_spill] sm:$0xff] %v7100_v22  ;;  %10350 = vst [vmem:[#allocation63_spill] sm:$0xff] %v7146_v24  ;;  %vm78_vm12 = vcmp.gt.f32.partialorder %v7146_v24, 0.0 }
 0x225   :  { %10345 = vst [vmem:[#allocation58_spill] sm:$0xff] %v7113_v32  ;;  %vm79_vm11 = vcmp.gt.f32.partialorder %v7113_v32, 0.0 }
 0x227   :  { %v567_v52 = vpop.permute.xlu1 %566 }
 0x228   :  { %v612_v0 = vadd.f32 %v6848_v34, %v567_v52  ;;  %1336 = vmax.xlane.f32.xlu1 %v7065_v17 }
 0x22a   :  { %v628_v33 = vmul.f32 0.2, %v612_v0 }
 0x22c   :  { %v1238_v11 = vpop.permute.xlu1 %1237  ;;  %1007 = vmax.xlane.f32.xlu1 %v7077_v48  ;;  %v644_v52 = vmax.f32 %v612_v0, %v628_v33  ;;  %v1636_v0 = vmax.f32 %v1604_v4, %v1620_v36  ;;  %v7095_v33 = vpop.permute.xlu0 %1581  ;;  %v610_v4 = vadd.f32 %v6848_v34, %v6896_v3 }
 0x22d   :  { %v1277_v17 = vadd.f32 %v6806_v55, %v1238_v11  ;;  %v962_v11 = vmul.f32 0.2, %v946_v35 }
 0x22e   :  { %v7085_v41 = vsel %vm77_vm10, %v644_v52, -1e+30  ;;  %v958_v52 = vmul.f32 0.2, %v942_v56  ;;  %v7110_v36 = vsel %vm72_vm9, %v1636_v0, -1e+30 }
 0x22f   :  { %10341 = vst [vmem:[#allocation54_spill] sm:$0xff] %v7085_v41  ;;  %v1293_v58 = vmul.f32 0.2, %v1277_v17  ;;  %685 = vmax.xlane.f32.xlu0 %v7085_v41  ;;  %10344 = vst [vmem:[#allocation57_spill] sm:$0xff] %v7110_v36  ;;  %v978_v3 = vmax.f32 %v946_v35, %v962_v11  ;;  %v626_v41 = vmul.f32 0.2, %v610_v4  ;;  %v1278_v35 = vadd.f32 %v6806_v55, %v7014_v20 }
 0x230   :  { %675 = vmax.xlane.f32.xlu1 %v7092_v8  ;;  %v7123_v0 = vpop.permute.xlu0 %1593  ;;  %v974_v1 = vmax.f32 %v942_v56, %v958_v52 }
 0x231   :  { %v1309_v28 = vmax.f32 %v1277_v17, %v1293_v58  ;;  %v630_v17 = vmul.f32 0.2, %v614_v40  ;;  %v642_v52 = vmax.f32 %v610_v4, %v626_v41  ;;  %v7163_v4 = vld [vmem:[%s9983_s0 + $0x30] sm:$0xff]  }
 0x232   :  { %v7143_v56 = vsel %vm75_vm7, %v974_v1, -1e+30 }
 0x233   :  { %1682 = vmax.xlane.f32.xlu0 %v7100_v22  ;;  %v7119_v58 = vsel %vm77_vm10, %v1309_v28, -1e+30  ;;  %v1606_v22 = vadd.f32 %v6762_v19, %v6865_v27  ;;  %v7136_v27 = vsel %vm79_vm11, %v978_v3, -1e+30  ;;  %v646_v11 = vmax.f32 %v614_v40, %v630_v17  ;;  %10349 = vst [vmem:[#allocation62_spill] sm:$0xff] %v7143_v56 }
 0x234   :  { %1672 = vmax.xlane.f32.xlu1 %v7110_v36  ;;  %10346 = vst [vmem:[#allocation59_spill] sm:$0xff] %v7119_v58  ;;  %10348 = vst [vmem:[#allocation61_spill] sm:$0xff] %v7136_v27  ;;  %v921_v20 = vpop.permute.xlu0 %920  ;;  %v1275_v17 = vadd.f32 %v6806_v55, %v6894_v7  ;;  %v7158_v41 = vsel %vm75_vm7, %v642_v52, -1e+30 }
 0x235   :  { %v1622_v28 = vmul.f32 0.2, %v1606_v22  ;;  %v948_v3 = vadd.f32 %v6811_v18, %v921_v20  ;;  %v7151_v40 = vsel %vm79_vm11, %v646_v11, -1e+30  ;;  %10352 = vst [vmem:[#allocation65_spill] sm:$0xff] %v7158_v41 }
 0x236   :  { %10351 = vst [vmem:[#allocation64_spill] sm:$0xff] %v7151_v40  ;;  %v1291_v11 = vmul.f32 0.2, %v1275_v17 }
 0x237   :  { %1350 = vmax.xlane.f32.xlu0 %v7119_v58  ;;  %v1274_v58 = vadd.f32 %v6806_v55, %v6878_v44  ;;  %v1642_v44 = vmax.f32 %v1610_v53, %v1626_v47  ;;  %v1638_v9 = vmax.f32 %v1606_v22, %v1622_v28  ;;  %v964_v53 = vmul.f32 0.2, %v948_v3 }
 0x238   :  { %1340 = vmax.xlane.f32.xlu1 %v7128_v39  ;;  %v1294_v39 = vmul.f32 0.2, %v1278_v35  ;;  %v7172_v47 = vunpack.c.h.bf16 %v7163_v4  ;;  %v944_v22 = vadd.f32 %v6811_v18, %v7048_v45 }
 0x239   :  { %v7169_v7 = vsel %vm78_vm12, %v1642_v44, -1e+30  ;;  %v7179_v28 = vsel %vm74_vm6, %v1638_v9, -1e+30 }
 0x23a   :  { %10353 = vst [vmem:[#allocation66_spill] sm:$0xff] %v7169_v7  ;;  %v1310_v1 = vmax.f32 %v1278_v35, %v1294_v39  ;;  %10354 = vst [vmem:[#allocation67_spill] sm:$0xff] %v7172_v47  ;;  %vm10285_vm13 = vcmp.gt.f32.partialorder %v7172_v47, 0.0  ;;  %v980_v39 = vmax.f32 %v948_v3, %v964_v53  ;;  %v611_v35 = vadd.f32 %v6848_v34, %v7030_v23 }
 0x23b   :  { %1021 = vmax.xlane.f32.xlu0 %v7136_v27  ;;  %v1290_v27 = vmul.f32 0.2, %v1274_v58  ;;  %10355 = vst [vmem:[#allocation68_spill] sm:$0xff] %v7179_v28  ;;  %v960_v45 = vmul.f32 0.2, %v944_v22  ;;  %v1608_v3 = vadd.f32 %v6762_v19, %v6977_v43 }
 0x23c   :  { %1013 = vmax.xlane.f32.xlu1 %v7143_v56  ;;  %v7184_v20 = vsel %vm78_vm12, %v1310_v1, -1e+30  ;;  %v627_v9 = vmul.f32 0.2, %v611_v35 }
 0x23d   :  { %v1306_v52 = vmax.f32 %v1274_v58, %v1290_v27  ;;  %10356 = vst [vmem:[#allocation69_spill] sm:$0xff] %v7184_v20  ;;  %v1307_v58 = vmax.f32 %v1275_v17, %v1291_v11  ;;  %v7197_v27 = vsel %vm10285_vm13, %v980_v39, -1e+30  ;;  %v976_v53 = vmax.f32 %v944_v22, %v960_v45  ;;  %v7207_v17 = vpop.permute.xlu1 %924 }
 0x23e   :  { %10358 = vst [vmem:[#allocation71_spill] sm:$0xff] %v7197_v27  ;;  %v1624_v1 = vmul.f32 0.2, %v1608_v3  ;;  %v1276_v11 = vadd.f32 %v6806_v55, %v6998_v59  ;;  %v643_v43 = vmax.f32 %v611_v35, %v627_v9  ;;  %v945_v39 = vadd.f32 %v6811_v18, %v6995_v37 }
 0x23f   :  { %689 = vmax.xlane.f32.xlu0 %v7151_v40  ;;  %v7192_v44 = vsel %vm74_vm6, %v1306_v52, -1e+30  ;;  %v7204_v23 = vsel %vm75_vm7, %v1307_v58, -1e+30  ;;  %v7213_v52 = vsel %vm77_vm10, %v976_v53, -1e+30  ;;  %v613_v53 = vadd.f32 %v6848_v34, %v6925_v2 }
 0x240   :  { %681 = vmax.xlane.f32.xlu1 %v7158_v41  ;;  %10357 = vst [vmem:[#allocation70_spill] sm:$0xff] %v7192_v44  ;;  %10359 = vst [vmem:[#allocation72_spill] sm:$0xff] %v7204_v23  ;;  %v1292_v58 = vmul.f32 0.2, %v1276_v11  ;;  %v7220_v22 = vsel %vm76_vm8, %v643_v43, -1e+30  ;;  %v1640_v45 = vmax.f32 %v1608_v3, %v1624_v1  ;;  %v1611_v3 = vadd.f32 %v6762_v19, %v7027_v15 }
 0x241   :  { %10360 = vst [vmem:[#allocation73_spill] sm:$0xff] %v7213_v52  ;;  %10361 = vst [vmem:[#allocation74_spill] sm:$0xff] %v7220_v22  ;;  %v961_v59 = vmul.f32 0.2, %v945_v39  ;;  %v629_v43 = vmul.f32 0.2, %v613_v53 }
 0x242   :  { %v7229_v35 = vsel %vm76_vm8, %v1640_v45, -1e+30  ;;  %v1308_v9 = vmax.f32 %v1276_v11, %v1292_v58  ;;  %v1627_v2 = vmul.f32 0.2, %v1611_v3  ;;  %v1279_v45 = vadd.f32 %v6806_v55, %v7039_v38 }
 0x243   :  { %1684 = vmax.xlane.f32.xlu0 %v7169_v7  ;;  %10362 = vst [vmem:[#allocation75_spill] sm:$0xff] %v7229_v35  ;;  %v977_v40 = vmax.f32 %v945_v39, %v961_v59  ;;  %v645_v58 = vmax.f32 %v613_v53, %v629_v43 }
 0x244   :  { %1676 = vmax.xlane.f32.xlu1 %v7179_v28  ;;  %v7238_v1 = vsel %vm76_vm8, %v1308_v9, -1e+30  ;;  %v1295_v15 = vmul.f32 0.2, %v1279_v45  ;;  %v1643_v59 = vmax.f32 %v1611_v3, %v1627_v2 }
 0x245   :  { %10363 = vst [vmem:[#allocation76_spill] sm:$0xff] %v7238_v1  ;;  %v7245_v11 = vsel %vm78_vm12, %v977_v40, -1e+30  ;;  %v7252_v39 = vsel %vm78_vm12, %v645_v58, -1e+30 }
 0x246   :  { %10364 = vst [vmem:[#allocation77_spill] sm:$0xff] %v7245_v11  ;;  %10365 = vst [vmem:[#allocation78_spill] sm:$0xff] %v7252_v39  ;;  %v7258_v40 = vsel %vm79_vm11, %v1643_v59, -1e+30  ;;  %v1311_v53 = vmax.f32 %v1279_v45, %v1295_v15  ;;  %v6278_v15 = vmov 4  }
 0x247   :  { %1352 = vmax.xlane.f32.xlu0 %v7184_v20  ;;  %10366 = vst [vmem:[#allocation79_spill] sm:$0xff] %v7258_v40 }
 0x248   :  { %1344 = vmax.xlane.f32.xlu1 %v7192_v44  ;;  %v7267_v43 = vsel %vm79_vm11, %v1311_v53, -1e+30 }
 0x249   :  { %10368 = vst [vmem:[#allocation81_spill] sm:$0xff] %v7267_v43 }
 0x24b   :  { %1025 = vmax.xlane.f32.xlu0 %v7197_v27  ;;  %v7222_v27 = vpop.permute.xlu1 %1589 }
 0x24c   :  { %1346 = vmax.xlane.f32.xlu1 %v7204_v23 }
 0x24f   :  { %v7232_v37 = vpop.permute.xlu1 %1257 }
 0x250   :  { %1017 = vmax.xlane.f32.xlu1 %v7213_v52 }
 0x253   :  { %v917_v20 = vpop.permute.xlu1 %916 }
 0x254   :  { %683 = vmax.xlane.f32.xlu1 %v7220_v22  ;;  %v947_v9 = vadd.f32 %v6811_v18, %v917_v20  ;;  %v7263_v20 = vunpack.c.l.bf16 %v7163_v4 }
 0x256   :  { %v963_v38 = vmul.f32 0.2, %v947_v9  ;;  %10367 = vst [vmem:[#allocation80_spill] sm:$0xff] %v7263_v20  ;;  %vm10287_vm14 = vcmp.gt.f32.partialorder %v7263_v20, 0.0 }
 0x257   :  { %v582_v2 = vpop.permute.xlu1 %581 }
 0x258   :  { %1680 = vmax.xlane.f32.xlu1 %v7229_v35  ;;  %v979_v3 = vmax.f32 %v947_v9, %v963_v38 }
 0x25a   :  { %v7274_v45 = vsel %vm10287_vm14, %v979_v3, -1e+30 }
 0x25b   :  { %10369 = vst [vmem:[#allocation82_spill] sm:$0xff] %v7274_v45  ;;  %v7278_v4 = vpop.permute.xlu1 %1249 }
 0x25c   :  { %1348 = vmax.xlane.f32.xlu1 %v7238_v1  ;;  %v1612_v1 = vadd.f32 %v6762_v19, %v7095_v33 }
 0x25e   :  { %v1628_v35 = vmul.f32 0.2, %v1612_v1 }
 0x25f   :  { %v7281_v58 = vpop.permute.xlu1 %928 }
 0x260   :  { %1019 = vmax.xlane.f32.xlu1 %v7245_v11  ;;  %v1644_v41 = vmax.f32 %v1612_v1, %v1628_v35 }
 0x261   :  { %2198 = vperm.xlu0 %5550, %v6620_v57  }
 0x262   :  { %v7332_v56 = vsel %vm10287_vm14, %v1644_v41, -1e+30 }
 0x263   :  { %v7285_v9 = vpop.permute.xlu1 %596  ;;  %10373 = vst [vmem:[#allocation86_spill] sm:$0xff] %v7332_v56 }
 0x264   :  { %687 = vmax.xlane.f32.xlu1 %v7252_v39 }
 0x265   :  { %2206 = vperm.xlu0 %5550, %v6610_v54  }
 0x267   :  { %v7289_v59 = vpop.permute.xlu1 %1261 }
 0x268   :  { %1686 = vmax.xlane.f32.xlu1 %v7258_v40  ;;  %v10071_v40 = vmov 7  }
 0x269   :  { %2218 = vperm.xlu0 %5550, %v6658_v25  }
 0x26b   :  { %v587_v38 = vpop.permute.xlu1 %586 }
 0x26c   :  { %1354 = vmax.xlane.f32.xlu1 %v7267_v43  ;;  %v7304_v43 = vpop.permute.xlu0 %1253  ;;  %v616_v35 = vadd.f32 %v6848_v34, %v587_v38 }
 0x26d   :  { %2230 = vperm.xlu0 %5550, %v6667_v46  }
 0x26e   :  { %v632_v41 = vmul.f32 0.2, %v616_v35 }
 0x26f   :  { %v7297_v53 = vpop.permute.xlu1 %1585 }
 0x270   :  { %1023 = vmax.xlane.f32.xlu1 %v7274_v45  ;;  %v7310_v7 = vpop.xlane.xlu0 %1668 }
 0x271   :  { %2238 = vperm.xlu0 %5550, %v6664_v42   ;;  %10370 = vst [vmem:[#allocation83_spill] sm:$0xff] %v7310_v7 }
 0x274   :  { %v7315_v11 = vpop.xlane.xlu0 %1664 }
 0x275   :  { %2246 = vperm.xlu0 %5550, %v6680_v21  }
 0x278   :  { %v7320_v52 = vpop.xlane.xlu0 %1332 }
 0x279   :  { %2258 = vperm.xlu0 %5550, %v6684_v6  }
 0x27c   :  { %v7324_v23 = vpop.xlane.xlu0 %1005 }
 0x27d   :  { %5551 = vset.pattern.permute.xlu0 %v6278_v15  ;;  %10371 = vst [vmem:[#allocation84_spill] sm:$0xff] %v7324_v23 }
 0x27e   :  { %1870 = vperm.xlu0 %5551, %v6634_v29  }
 0x280   :  { %v7328_v44 = vpop.xlane.xlu0 %1001 }
 0x281   :  { %2202 = vperm.xlu1 %5549, %v6634_v29  }
 0x282   :  { %1882 = vperm.xlu0 %5551, %v6652_v50  }
 0x284   :  { %v7337_v33 = vpop.xlane.xlu0 %669 }
 0x285   :  { %2210 = vperm.xlu1 %5549, %v6628_v10  }
 0x286   :  { %1890 = vperm.xlu0 %5551, %v6650_v60  }
 0x288   :  { %v7342_v24 = vpop.xlane.xlu0 %1338 }
 0x289   :  { %2214 = vperm.xlu1 %5549, %v6652_v50   ;;  %10375 = vst [vmem:[#allocation88_spill] sm:$0xff] %v7342_v24  ;;  %v10422_v24 = vld [vmem:[#allocation18_spill] sm:$0xff] }
 0x28a   :  { %1898 = vperm.xlu0 %5551, %v6667_v46  }
 0x28c   :  { %v7347_v61 = vpop.xlane.xlu0 %1009 }
 0x28d   :  { %2222 = vperm.xlu1 %5549, %v6650_v60   ;;  %10377 = vst [vmem:[#allocation90_spill] sm:$0xff] %v7347_v61 }
 0x28e   :  { %1910 = vperm.xlu0 %5551, %v6669_v49  }
 0x291   :  { %2226 = vperm.xlu1 %5549, %v6654_v30  }
 0x292   :  { %1922 = vperm.xlu0 %5551, %v6677_v31  }
 0x295   :  { %v7301_v3 = vpop.xlane.xlu1 %1003  ;;  %2234 = vperm.xlu1 %5549, %v6671_v51  }
 0x296   :  { %5553 = vset.pattern.permute.xlu0 %v10071_v40 }
 0x299   :  { %v7307_v45 = vpop.xlane.xlu1 %671  ;;  %2242 = vperm.xlu1 %5549, %v6669_v49  }
 0x29d   :  { %2250 = vperm.xlu1 %5549, %v6687_v5   ;;  %v7313_v39 = vpop.xlane.xlu1 %999 }
 0x2a1   :  { %2254 = vperm.xlu1 %5549, %v6677_v31   ;;  %v7322_v40 = vpop.xlane.xlu1 %667 }
 0x2a5   :  { %5552 = vset.pattern.permute.xlu1 %v6278_v15  ;;  %v7326_v22 = vpop.xlane.xlu1 %673  ;;  %v615_v15 = vadd.f32 %v6848_v34, %v582_v2  ;;  %v648_v2 = vmax.f32 %v616_v35, %v632_v41 }
 0x2a6   :  { %10372 = vst [vmem:[#allocation85_spill] sm:$0xff] %v7326_v22 }
 0x2a7   :  { %v631_v36 = vmul.f32 0.2, %v615_v15  ;;  %v7361_v38 = vsel %vm10285_vm13, %v648_v2, -1e+30 }
 0x2a8   :  { %10381 = vst [vmem:[#allocation94_spill] sm:$0xff] %v7361_v38 }
 0x2a9   :  { %v7334_v28 = vpop.xlane.xlu1 %1666  ;;  %v647_v8 = vmax.f32 %v615_v15, %v631_v36 }
 0x2ab   :  { %v7355_v22 = vsel %vm10287_vm14, %v647_v8, -1e+30 }
 0x2ac   :  { %10380 = vst [vmem:[#allocation93_spill] sm:$0xff] %v7355_v22 }
 0x2ad   :  { %v7339_v32 = vpop.xlane.xlu1 %1334 }
 0x2ae   :  { %10374 = vst [vmem:[#allocation87_spill] sm:$0xff] %v7339_v32 }
 0x2b1   :  { %1688 = vmax.xlane.f32.xlu0 %v7332_v56  ;;  %v7345_v1 = vpop.xlane.xlu1 %1670  ;;  %v7351_v56 = vpop.xlane.xlu0 %677 }
 0x2b2   :  { %10376 = vst [vmem:[#allocation89_spill] sm:$0xff] %v7345_v1  ;;  %10379 = vst [vmem:[#allocation92_spill] sm:$0xff] %v7351_v56 }
 0x2b5   :  { %v7349_v48 = vpop.xlane.xlu1 %1336  ;;  %v7366_v36 = vpop.xlane.xlu0 %1674 }
 0x2b6   :  { %10378 = vst [vmem:[#allocation91_spill] sm:$0xff] %v7349_v48  ;;  %10383 = vst [vmem:[#allocation96_spill] sm:$0xff] %v7366_v36 }
 0x2b9   :  { %v7363_v61 = vpop.xlane.xlu1 %1007  ;;  %v7372_v8 = vpop.xlane.xlu0 %1342 }
 0x2ba   :  { %10382 = vst [vmem:[#allocation95_spill] sm:$0xff] %v7363_v61  ;;  %10385 = vst [vmem:[#allocation98_spill] sm:$0xff] %v7372_v8 }
 0x2bd   :  { %v7369_v15 = vpop.xlane.xlu1 %675  ;;  %v7377_v41 = vpop.xlane.xlu0 %1011 }
 0x2be   :  { %10384 = vst [vmem:[#allocation97_spill] sm:$0xff] %v7369_v15  ;;  %10387 = vst [vmem:[#allocation100_spill] sm:$0xff] %v7377_v41 }
 0x2c1   :  { %v7375_v35 = vpop.xlane.xlu1 %1672 }
 0x2c2   :  { %10386 = vst [vmem:[#allocation99_spill] sm:$0xff] %v7375_v35 }
 0x2c5   :  { %691 = vmax.xlane.f32.xlu1 %v7355_v22  ;;  %v7381_v2 = vpop.xlane.xlu1 %1340  ;;  %v10091_v22 = vmov 6  }
 0x2c6   :  { %10388 = vst [vmem:[#allocation101_spill] sm:$0xff] %v7381_v2  ;;  %v1281_v2 = vadd.f32 %v6806_v55, %v7304_v43 }
 0x2c7   :  { %2871 = vperm.xlu0 %5553, %v6610_v54  }
 0x2c9   :  { %693 = vmax.xlane.f32.xlu1 %v7361_v38  ;;  %v7384_v38 = vpop.xlane.xlu0 %679  ;;  %v7388_v8 = vpop.xlane.xlu1 %1013 }
 0x2ca   :  { %10389 = vst [vmem:[#allocation102_spill] sm:$0xff] %v7384_v38  ;;  %10390 = vst [vmem:[#allocation103_spill] sm:$0xff] %v7388_v8 }
 0x2cb   :  { %2879 = vperm.xlu0 %5553, %v6652_v50  }
 0x2cd   :  { %v7390_v36 = vpop.xlane.xlu0 %1678  ;;  %v7394_v41 = vpop.xlane.xlu1 %681 }
 0x2ce   :  { %10391 = vst [vmem:[#allocation104_spill] sm:$0xff] %v7390_v36  ;;  %10392 = vst [vmem:[#allocation105_spill] sm:$0xff] %v7394_v41  ;;  %v1297_v36 = vmul.f32 0.2, %v1281_v2 }
 0x2cf   :  { %2887 = vperm.xlu0 %5553, %v6650_v60  }
 0x2d0   :  { %v1313_v41 = vmax.f32 %v1281_v2, %v1297_v36  ;;  %v10403_v36 = vmov 7  }
 0x2d1   :  { %v7396_v56 = vpop.xlane.xlu0 %1015 }
 0x2d2   :  { %10393 = vst [vmem:[#allocation106_spill] sm:$0xff] %v7396_v56  ;;  %v7418_v43 = vsel %vm10285_vm13, %v1313_v41, -1e+30 }
 0x2d3   :  { %2899 = vperm.xlu0 %5553, %v6671_v51   ;;  %10400 = vst [vmem:[#allocation113_spill] sm:$0xff] %v7418_v43 }
 0x2d5   :  { %v7399_v38 = vpop.xlane.xlu0 %685 }
 0x2d6   :  { %10394 = vst [vmem:[#allocation107_spill] sm:$0xff] %v7399_v38 }
 0x2d7   :  { %2911 = vperm.xlu0 %5553, %v6680_v21  }
 0x2d9   :  { %v7406_v8 = vpop.xlane.xlu0 %1682 }
 0x2da   :  { %1866 = vperm.xlu1 %5552, %v6620_v57   ;;  %10396 = vst [vmem:[#allocation109_spill] sm:$0xff] %v7406_v8 }
 0x2db   :  { %2919 = vperm.xlu0 %5553, %v6677_v31  }
 0x2dd   :  { %v7412_v56 = vpop.xlane.xlu0 %1350 }
 0x2de   :  { %1874 = vperm.xlu1 %5552, %v6610_v54   ;;  %10398 = vst [vmem:[#allocation111_spill] sm:$0xff] %v7412_v56 }
 0x2df   :  { %5556 = vset.pattern.permute.xlu0 %v10091_v22  ;;  %v7403_v22 = vpop.xlane.xlu1 %1676 }
 0x2e0   :  { %10395 = vst [vmem:[#allocation108_spill] sm:$0xff] %v7403_v22 }
 0x2e1   :  { %v7422_v8 = vpop.xlane.xlu0 %1021 }
 0x2e2   :  { %1878 = vperm.xlu1 %5552, %v6628_v10   ;;  %10401 = vst [vmem:[#allocation114_spill] sm:$0xff] %v7422_v8  ;;  %v1613_v8 = vadd.f32 %v6762_v19, %v7297_v53 }
 0x2e3   :  { %v7409_v35 = vpop.xlane.xlu1 %1344 }
 0x2e4   :  { %10397 = vst [vmem:[#allocation110_spill] sm:$0xff] %v7409_v35 }
 0x2e5   :  { %v7428_v2 = vpop.xlane.xlu0 %689 }
 0x2e6   :  { %1886 = vperm.xlu1 %5552, %v6658_v25   ;;  %10404 = vst [vmem:[#allocation116_spill] sm:$0xff] %v7428_v2 }
 0x2e7   :  { %v7414_v38 = vpop.xlane.xlu1 %1346 }
 0x2e8   :  { %10399 = vst [vmem:[#allocation112_spill] sm:$0xff] %v7414_v38 }
 0x2e9   :  { %v7432_v38 = vpop.xlane.xlu0 %1684 }
 0x2ea   :  { %1894 = vperm.xlu1 %5552, %v6654_v30   ;;  %10406 = vst [vmem:[#allocation118_spill] sm:$0xff] %v7432_v38  ;;  %v1629_v38 = vmul.f32 0.2, %v1613_v8 }
 0x2eb   :  { %v7425_v35 = vpop.xlane.xlu1 %1017 }
 0x2ec   :  { %10402 = vst [vmem:[#allocation115_spill] sm:$0xff] %v7425_v35 }
 0x2ed   :  { %v7436_v22 = vpop.xlane.xlu0 %1352 }
 0x2ee   :  { %1902 = vperm.xlu1 %5552, %v6671_v51   ;;  %10408 = vst [vmem:[#allocation120_spill] sm:$0xff] %v7436_v22 }
 0x2ef   :  { %v7430_v56 = vpop.xlane.xlu1 %683 }
 0x2f0   :  { %10405 = vst [vmem:[#allocation117_spill] sm:$0xff] %v7430_v56 }
 0x2f2   :  { %1906 = vperm.xlu1 %5552, %v6664_v42  }
 0x2f3   :  { %v7434_v41 = vpop.xlane.xlu1 %1680 }
 0x2f4   :  { %10407 = vst [vmem:[#allocation119_spill] sm:$0xff] %v7434_v41  ;;  %v1645_v41 = vmax.f32 %v1613_v8, %v1629_v38  ;;  %v10416_v8 = vmov 0  }
 0x2f6   :  { %1914 = vperm.xlu1 %5552, %v6680_v21  }
 0x2fa   :  { %1358 = vmax.xlane.f32.xlu0 %v7418_v43  ;;  %1918 = vperm.xlu1 %5552, %v6687_v5   ;;  %v7439_v43 = vpop.xlane.xlu1 %1348 }
 0x2fb   :  { %10409 = vst [vmem:[#allocation121_spill] sm:$0xff] %v7439_v43 }
 0x2fe   :  { %1926 = vperm.xlu1 %5552, %v6684_v6   ;;  %v7446_v2 = vpop.xlane.xlu1 %1019 }
 0x2ff   :  { %10411 = vst [vmem:[#allocation123_spill] sm:$0xff] %v7446_v2 }
 0x302   :  { %5554 = vset.pattern.permute.xlu1 %v10403_v36  ;;  %v7444_v36 = vpop.xlane.xlu0 %1025  ;;  %v7452_v22 = vpop.xlane.xlu1 %687 }
 0x303   :  { %10410 = vst [vmem:[#allocation122_spill] sm:$0xff] %v7444_v36  ;;  %10412 = vst [vmem:[#allocation124_spill] sm:$0xff] %v7452_v22 }
 0x306   :  { %v7449_v35 = vpop.permute.xlu0 %2198  ;;  %v7462_v53 = vpop.xlane.xlu1 %1686 }
 0x307   :  { %10414 = vst [vmem:[#allocation126_spill] sm:$0xff] %v7462_v53 }
 0x30a   :  { %v7454_v43 = vpop.permute.xlu0 %2206  ;;  %v7468_v22 = vpop.xlane.xlu1 %1354 }
 0x30b   :  { %10415 = vst [vmem:[#allocation127_spill] sm:$0xff] %v7468_v22  ;;  %v10420_v22 = vld [vmem:[#allocation4_spill] sm:$0xff] }
 0x30c   :  { %v2263_v47 = vsub.s32 5, %v10420_v22 }
 0x30e   :  { %v7465_v36 = vpop.permute.xlu0 %2218  ;;  %v7493_v15 = vrot.slane %v10422_v24, %v2263_v47 }
 0x310   :  { %2531 = vperm.xlu0 %5556, %v6620_v57  }
 0x312   :  { %v7470_v38 = vpop.permute.xlu0 %2230 }
 0x314   :  { %2539 = vperm.xlu0 %5556, %v6610_v54   ;;  %v7459_v54 = vsel %vm10285_vm13, %v1645_v41, -1e+30  ;;  %v7474_v41 = vpop.xlane.xlu1 %1023 }
 0x315   :  { %10413 = vst [vmem:[#allocation125_spill] sm:$0xff] %v7459_v54  ;;  %10417 = vst [vmem:[#allocation128_spill] sm:$0xff] %v7474_v41  ;;  %v950_v41 = vadd.f32 %v6811_v18, %v7281_v58 }
 0x316   :  { %v7476_v2 = vpop.permute.xlu0 %2238 }
 0x317   :  { %10418 = vst [vmem:[#allocation129_spill] sm:$0xff] %v7476_v2 }
 0x318   :  { %2551 = vperm.xlu0 %5556, %v6658_v25  }
 0x31c   :  { %2563 = vperm.xlu0 %5556, %v6667_v46  }
 0x320   :  { %2571 = vperm.xlu0 %5556, %v6664_v42  }
 0x322   :  { %1690 = vmax.xlane.f32.xlu1 %v7459_v54  ;;  %v2203_v54 = vpop.permute.xlu1 %2202 }
 0x323   :  { %v2266_v2 = vadd.f32 %v7493_v15, %v2203_v54 }
 0x324   :  { %2579 = vperm.xlu0 %5556, %v6680_v21   ;;  %v7480_v21 = vpop.permute.xlu0 %2246 }
 0x325   :  { %10419 = vst [vmem:[#allocation130_spill] sm:$0xff] %v7480_v21  ;;  %v966_v21 = vmul.f32 0.2, %v950_v41  ;;  %v2282_v48 = vmul.f32 0.2, %v2266_v2 }
 0x326   :  { %v7482_v53 = vpop.permute.xlu1 %2210 }
 0x327   :  { %v982_v54 = vmax.f32 %v950_v41, %v966_v21  ;;  %v2298_v32 = vmax.f32 %v2266_v2, %v2282_v48 }
 0x328   :  { %2591 = vperm.xlu0 %5556, %v6684_v6   ;;  %v7486_v56 = vpop.permute.xlu0 %2258 }
 0x329   :  { %10421 = vst [vmem:[#allocation4_spill] sm:$0xff] %v7486_v56  ;;  %v7502_v56 = vld [vmem:[%s9983_s0 + $0x38] sm:$0xff]  }
 0x32a   :  { %v7495_v1 = vpop.permute.xlu1 %2214  ;;  %v7508_v61 = vunpack.c.h.bf16 %v7502_v56 }
 0x32c   :  { %5557 = vset.pattern.permute.xlu0 %v10416_v8  ;;  %v1871_v58 = vpop.permute.xlu0 %1870  ;;  %10423 = vst [vmem:[#allocation18_spill] sm:$0xff] %v7508_v61  ;;  %vm10284_vm15 = vcmp.gt.f32.partialorder %v7508_v61, 0.0 }
 0x32d   :  { %591 = vperm.xlu0 %5557, %v6677_v31  }
 0x32e   :  { %v7511_v23 = vpop.permute.xlu1 %2222 }
 0x330   :  { %v7536_v48 = vpop.permute.xlu0 %1882 }
 0x332   :  { %v7521_v7 = vpop.permute.xlu1 %2226 }
 0x333   :  { %2863 = vperm.xlu1 %5554, %v6620_v57   ;;  %v1931_v57 = vsub.s32 4, %v10420_v22 }
 0x336   :  { %v7529_v21 = vpop.permute.xlu1 %2234 }
 0x337   :  { %2867 = vperm.xlu1 %5554, %v6634_v29   ;;  %10426 = vst [vmem:[#allocation133_spill] sm:$0xff] %v7529_v21 }
 0x33a   :  { %v7540_v2 = vpop.permute.xlu1 %2242 }
 0x33b   :  { %2875 = vperm.xlu1 %5554, %v6628_v10   ;;  %10428 = vst [vmem:[#allocation135_spill] sm:$0xff] %v7540_v2 }
 0x33f   :  { %2883 = vperm.xlu1 %5554, %v6658_v25   ;;  %v7505_v25 = vrot.slane %v10422_v24, %v1931_v57  ;;  %v7518_v57 = vsel %vm10284_vm15, %v982_v54, -1e+30 }
 0x340   :  { %10424 = vst [vmem:[#allocation131_spill] sm:$0xff] %v7518_v57 }
 0x341   :  { %v1934_v47 = vadd.f32 %v7505_v25, %v1871_v58  ;;  %v7545_v58 = vpop.permute.xlu1 %2250 }
 0x342   :  { %10430 = vst [vmem:[#allocation136_spill] sm:$0xff] %v7545_v58 }
 0x343   :  { %2891 = vperm.xlu1 %5554, %v6654_v30   ;;  %v1950_v26 = vmul.f32 0.2, %v1934_v47 }
 0x345   :  { %v1966_v41 = vmax.f32 %v1934_v47, %v1950_v26  ;;  %v10429_v26 = vmov 6   ;;  %v7549_v54 = vpop.permute.xlu1 %2254 }
 0x346   :  { %10432 = vst [vmem:[#allocation138_spill] sm:$0xff] %v7549_v54 }
 0x347   :  { %2895 = vperm.xlu1 %5554, %v6667_v46   ;;  %v7526_v46 = vsel %vm69_vm4, %v2298_v32, -1e+30  ;;  %v7542_v32 = vpop.permute.xlu0 %1890 }
 0x348   :  { %10425 = vst [vmem:[#allocation132_spill] sm:$0xff] %v7526_v46 }
 0x34b   :  { %2903 = vperm.xlu1 %5554, %v6664_v42   ;;  %v7534_v42 = vsel %vm69_vm4, %v1966_v41, -1e+30  ;;  %v7547_v47 = vpop.permute.xlu0 %1898 }
 0x34c   :  { %1029 = vmax.xlane.f32.xlu0 %v7518_v57  ;;  %10427 = vst [vmem:[#allocation134_spill] sm:$0xff] %v7534_v42  ;;  %10431 = vst [vmem:[#allocation137_spill] sm:$0xff] %v7547_v47 }
 0x34f   :  { %2907 = vperm.xlu1 %5554, %v6669_v49   ;;  %v7551_v41 = vpop.permute.xlu0 %1910 }
 0x350   :  { %2331 = vmax.xlane.f32.xlu0 %v7526_v46  ;;  %10433 = vst [vmem:[#allocation139_spill] sm:$0xff] %v7551_v41 }
 0x352   :  { %v7553_v46 = vpop.xlane.xlu1 %691 }
 0x353   :  { %2915 = vperm.xlu1 %5554, %v6687_v5   ;;  %10434 = vst [vmem:[#allocation140_spill] sm:$0xff] %v7553_v46  ;;  %v7555_v57 = vpop.permute.xlu0 %1922 }
 0x354   :  { %1999 = vmax.xlane.f32.xlu0 %v7534_v42  ;;  %10435 = vst [vmem:[#allocation141_spill] sm:$0xff] %v7555_v57 }
 0x356   :  { %v7559_v42 = vpop.xlane.xlu1 %693 }
 0x357   :  { %2923 = vperm.xlu1 %5554, %v6684_v6   ;;  %v1280_v6 = vadd.f32 %v6806_v55, %v7278_v4  ;;  %10436 = vst [vmem:[#allocation142_spill] sm:$0xff] %v7559_v42  ;;  %v7561_v2 = vpop.xlane.xlu0 %1688 }
 0x358   :  { %10437 = vst [vmem:[#allocation143_spill] sm:$0xff] %v7561_v2 }
 0x35a   :  { %v7565_v58 = vpop.permute.xlu1 %1866 }
 0x35b   :  { %5555 = vset.pattern.permute.xlu1 %v10429_v26  ;;  %v1296_v26 = vmul.f32 0.2, %v1280_v6  ;;  %v7563_v21 = vpop.permute.xlu0 %2871 }
 0x35d   :  { %v1312_v47 = vmax.f32 %v1280_v6, %v1296_v26 }
 0x35e   :  { %v7573_v57 = vpop.permute.xlu1 %1874 }
 0x35f   :  { %v7567_v54 = vpop.permute.xlu0 %2879  ;;  %v7571_v46 = vsel %vm10287_vm14, %v1312_v47, -1e+30 }
 0x360   :  { %10438 = vst [vmem:[#allocation144_spill] sm:$0xff] %v7571_v46 }
 0x362   :  { %v7578_v42 = vpop.permute.xlu1 %1878 }
 0x363   :  { %v7576_v4 = vpop.permute.xlu0 %2887 }
 0x366   :  { %v7582_v41 = vpop.permute.xlu1 %1886 }
 0x367   :  { %v7580_v2 = vpop.permute.xlu0 %2899 }
 0x368   :  { %10439 = vst [vmem:[#allocation145_spill] sm:$0xff] %v7580_v2 }
 0x36a   :  { %v7587_v6 = vpop.permute.xlu1 %1894 }
 0x36b   :  { %v7584_v63 = vpop.permute.xlu0 %2911 }
 0x36c   :  { %10440 = vst [vmem:[#allocation146_spill] sm:$0xff] %v7584_v63 }
 0x36e   :  { %v7592_v26 = vpop.permute.xlu1 %1902 }
 0x36f   :  { %v7590_v47 = vpop.permute.xlu0 %2919  ;;  %10442 = vst [vmem:[#allocation148_spill] sm:$0xff] %v7592_v26 }
 0x370   :  { %10441 = vst [vmem:[#allocation147_spill] sm:$0xff] %v7590_v47 }
 0x372   :  { %v7598_v20 = vpop.permute.xlu1 %1906 }
 0x373   :  { %10444 = vst [vmem:[#allocation150_spill] sm:$0xff] %v7598_v20 }
 0x37b   :  { %1356 = vmax.xlane.f32.xlu1 %v7571_v46 }
 0x387   :  { %v7595_v46 = vpop.xlane.xlu0 %1358 }
 0x388   :  { %10443 = vst [vmem:[#allocation149_spill] sm:$0xff] %v7595_v46 }
 0x38c   :  { %2535 = vperm.xlu1 %5555, %v6634_v29   ;;  %v7603_v29 = vpop.permute.xlu1 %1914 }
 0x38d   :  { %10445 = vst [vmem:[#allocation151_spill] sm:$0xff] %v7603_v29 }
 0x38f   :  { %v7600_v2 = vpop.permute.xlu0 %2531 }
 0x390   :  { %2543 = vperm.xlu1 %5555, %v6628_v10   ;;  %v7609_v10 = vpop.permute.xlu1 %1918 }
 0x391   :  { %10446 = vst [vmem:[#allocation152_spill] sm:$0xff] %v7609_v10 }
 0x393   :  { %v7605_v63 = vpop.permute.xlu0 %2539 }
 0x394   :  { %2547 = vperm.xlu1 %5555, %v6652_v50  }
 0x397   :  { %v7611_v50 = vpop.permute.xlu0 %2551 }
 0x398   :  { %2555 = vperm.xlu1 %5555, %v6650_v60   ;;  %v7614_v60 = vpop.permute.xlu1 %1926 }
 0x399   :  { %10447 = vst [vmem:[#allocation153_spill] sm:$0xff] %v7614_v60 }
 0x39b   :  { %v7616_v46 = vpop.permute.xlu0 %2563 }
 0x39c   :  { %2559 = vperm.xlu1 %5555, %v6654_v30   ;;  %10448 = vst [vmem:[#allocation154_spill] sm:$0xff] %v7616_v46 }
 0x39f   :  { %v7623_v47 = vpop.permute.xlu0 %2571 }
 0x3a0   :  { %2567 = vperm.xlu1 %5555, %v6671_v51   ;;  %v2928_v51 = vsub.s32 7, %v10420_v22  ;;  %10450 = vst [vmem:[#allocation156_spill] sm:$0xff] %v7623_v47 }
 0x3a2   :  { %v7626_v10 = vrot.slane %v10422_v24, %v2928_v51 }
 0x3a4   :  { %2575 = vperm.xlu1 %5555, %v6669_v49  }
 0x3a8   :  { %2583 = vperm.xlu1 %5555, %v6687_v5   ;;  %v7628_v5 = vpop.permute.xlu0 %2579 }
 0x3a9   :  { %10451 = vst [vmem:[#allocation157_spill] sm:$0xff] %v7628_v5  ;;  %v7642_v5 = vunpack.c.l.bf16 %v7502_v56  ;;  %v1615_v56 = vadd.f32 %v6762_v19, %v7123_v0 }
 0x3ab   :  { %10453 = vst [vmem:[#allocation159_spill] sm:$0xff] %v7642_v5  ;;  %vm10286_vm0 = vcmp.gt.f32.partialorder %v7642_v5, 0.0 }
 0x3ac   :  { %2587 = vperm.xlu1 %5555, %v6677_v31   ;;  %v7631_v31 = vpop.permute.xlu0 %2591 }
 0x3af   :  { %v7619_v30 = vpop.xlane.xlu1 %1690 }
 0x3b0   :  { %10449 = vst [vmem:[#allocation155_spill] sm:$0xff] %v7619_v30  ;;  %5558 = vset.pattern.permute.xlu1 %v10416_v8  ;;  %v949_v30 = vadd.f32 %v6811_v18, %v7207_v17  ;;  %v592_v51 = vpop.permute.xlu0 %591 }
 0x3b1   :  { %v617_v46 = vadd.f32 %v6848_v34, %v592_v51 }
 0x3b2   :  { %v965_v47 = vmul.f32 0.2, %v949_v30 }
 0x3b3   :  { %v2864_v49 = vpop.permute.xlu1 %2863 }
 0x3b7   :  { %v2868_v29 = vpop.permute.xlu1 %2867 }
 0x3b8   :  { %v2931_v60 = vadd.f32 %v7626_v10, %v2868_v29  ;;  %v633_v29 = vmul.f32 0.2, %v617_v46 }
 0x3ba   :  { %v2947_v20 = vmul.f32 0.2, %v2931_v60  ;;  %v649_v17 = vmax.f32 %v617_v46, %v633_v29  ;;  %v1283_v29 = vadd.f32 %v6806_v55, %v7289_v59  ;;  %v1933_v59 = vadd.f32 %v7505_v25, %v7565_v58 }
 0x3bc   :  { %v2963_v26 = vmax.f32 %v2931_v60, %v2947_v20  ;;  %v618_v20 = vadd.f32 %v6848_v34, %v7285_v9  ;;  %v981_v60 = vmax.f32 %v949_v30, %v965_v47  ;;  %v7658_v34 = vsel %vm10286_vm0, %v649_v17, -1e+30 }
 0x3bd   :  { %v1282_v47 = vadd.f32 %v6806_v55, %v7232_v37  ;;  %v1299_v37 = vmul.f32 0.2, %v1283_v29 }
 0x3be   :  { %v7635_v8 = vsel %vm69_vm4, %v2963_v26, -1e+30  ;;  %v1614_v26 = vadd.f32 %v6762_v19, %v7222_v27  ;;  %v7651_v18 = vsel %vm10286_vm0, %v981_v60, -1e+30  ;;  %v1631_v27 = vmul.f32 0.2, %v1615_v56  ;;  %v7668_v19 = vpop.permute.xlu1 %2875 }
 0x3bf   :  { %10452 = vst [vmem:[#allocation158_spill] sm:$0xff] %v7635_v8  ;;  %2996 = vmax.xlane.f32.xlu0 %v7635_v8  ;;  %v634_v8 = vmul.f32 0.2, %v618_v20  ;;  %v1298_v0 = vmul.f32 0.2, %v1282_v47  ;;  %v2265_v60 = vadd.f32 %v7493_v15, %v7449_v35  ;;  %v2596_v35 = vsub.s32 6, %v10420_v22 }
 0x3c0   :  { %v1630_v51 = vmul.f32 0.2, %v1614_v26 }
 0x3c1   :  { %v650_v9 = vmax.f32 %v618_v20, %v634_v8  ;;  %v1647_v20 = vmax.f32 %v1615_v56, %v1631_v27  ;;  %v1314_v17 = vmax.f32 %v1282_v47, %v1298_v0  ;;  %v2281_v55 = vmul.f32 0.2, %v2265_v60 }
 0x3c2   :  { %v1646_v30 = vmax.f32 %v1614_v26, %v1630_v51  ;;  %v7683_v51 = vpop.permute.xlu1 %2883  ;;  %v1949_v47 = vmul.f32 0.2, %v1933_v59  ;;  %v7703_v58 = vrot.slane %v10422_v24, %v2596_v35 }
 0x3c3   :  { %v7665_v46 = vsel %vm10284_vm15, %v650_v9, -1e+30  ;;  %v7681_v26 = vsel %vm10284_vm15, %v1647_v20, -1e+30  ;;  %v7690_v56 = vsel %vm10286_vm0, %v1314_v17, -1e+30  ;;  %v1315_v9 = vmax.f32 %v1283_v29, %v1299_v37 }
 0x3c4   :  { %10454 = vst [vmem:[#allocation160_spill] sm:$0xff] %v7665_v46  ;;  %v7674_v8 = vsel %vm10286_vm0, %v1646_v30, -1e+30  ;;  %10455 = vst [vmem:[#allocation161_spill] sm:$0xff] %v7681_v26  ;;  %v2930_v30 = vadd.f32 %v7626_v10, %v2864_v49  ;;  %v2297_v20 = vmax.f32 %v2265_v60, %v2281_v55  ;;  %v2598_v29 = vadd.f32 %v7703_v58, %v7600_v2 }
 0x3c5   :  { %v7699_v0 = vsel %vm10284_vm15, %v1315_v9, -1e+30  ;;  %v1965_v17 = vmax.f32 %v1933_v59, %v1949_v47  ;;  %v2267_v60 = vadd.f32 %v7493_v15, %v7454_v43  ;;  %v1935_v59 = vadd.f32 %v7505_v25, %v7573_v57 }
 0x3c6   :  { %v7694_v27 = vpop.permute.xlu1 %2891  ;;  %10456 = vst [vmem:[#allocation162_spill] sm:$0xff] %v7699_v0  ;;  %v2946_v37 = vmul.f32 0.2, %v2930_v30  ;;  %v7709_v22 = vsel %vm68_vm2, %v2297_v20, -1e+30  ;;  %v2932_v43 = vadd.f32 %v7626_v10, %v7563_v21 }
 0x3c7   :  { %v2614_v55 = vmul.f32 0.2, %v2598_v29  ;;  %v7718_v24 = vsel %vm68_vm2, %v1965_v17, -1e+30  ;;  %v2283_v35 = vmul.f32 0.2, %v2267_v60 }
 0x3c8   :  { %v2962_v9 = vmax.f32 %v2930_v30, %v2946_v37  ;;  %v1951_v17 = vmul.f32 0.2, %v1935_v59  ;;  %v2948_v57 = vmul.f32 0.2, %v2932_v43 }
 0x3c9   :  { %v2630_v20 = vmax.f32 %v2598_v29, %v2614_v55  ;;  %v2299_v37 = vmax.f32 %v2267_v60, %v2283_v35  ;;  %v2269_v60 = vadd.f32 %v7493_v15, %v7495_v1 }
 0x3ca   :  { %v7711_v49 = vpop.permute.xlu1 %2895  ;;  %v7727_v47 = vsel %vm68_vm2, %v2962_v9, -1e+30  ;;  %v2600_v9 = vadd.f32 %v7703_v58, %v7605_v63  ;;  %v1967_v55 = vmax.f32 %v1935_v59, %v1951_v17  ;;  %v1937_v63 = vadd.f32 %v7505_v25, %v7536_v48 }
 0x3cb   :  { %v7734_v30 = vsel %vm68_vm2, %v2630_v20, -1e+30  ;;  %v7743_v29 = vsel %vm70_vm1, %v2299_v37, -1e+30  ;;  %v2285_v37 = vmul.f32 0.2, %v2269_v60 }
 0x3cc   :  { %10457 = vst [vmem:[#allocation163_spill] sm:$0xff] %v7734_v30  ;;  %10458 = vst [vmem:[#allocation164_spill] sm:$0xff] %v7743_v29  ;;  %v2616_v35 = vmul.f32 0.2, %v2600_v9  ;;  %v7752_v20 = vsel %vm70_vm1, %v1967_v55, -1e+30  ;;  %v2934_v55 = vadd.f32 %v7626_v10, %v7567_v54 }
 0x3cd   :  { %10459 = vst [vmem:[#allocation165_spill] sm:$0xff] %v7752_v20  ;;  %v1953_v1 = vmul.f32 0.2, %v1937_v63 }
 0x3ce   :  { %v7721_v2 = vpop.permute.xlu1 %2903  ;;  %v2632_v17 = vmax.f32 %v2600_v9, %v2616_v35  ;;  %v2950_v9 = vmul.f32 0.2, %v2934_v55 }
 0x3d0   :  { %1027 = vmax.xlane.f32.xlu1 %v7651_v18 }
 0x3d4   :  { %695 = vmax.xlane.f32.xlu1 %v7658_v34 }
 0x3d8   :  { %697 = vmax.xlane.f32.xlu1 %v7665_v46  ;;  %v2933_v46 = vadd.f32 %v7626_v10, %v7668_v19 }
 0x3dc   :  { %1692 = vmax.xlane.f32.xlu1 %v7674_v8 }
 0x3e0   :  { %1694 = vmax.xlane.f32.xlu1 %v7681_v26  ;;  %v2964_v26 = vmax.f32 %v2932_v43, %v2948_v57  ;;  %v7768_v43 = vsel %vm70_vm1, %v2632_v17, -1e+30  ;;  %v2301_v57 = vmax.f32 %v2269_v60, %v2285_v37  ;;  %v10463_v17 = vld [vmem:[#allocation44_spill] sm:$0xff] }
 0x3e1   :  { %10461 = vst [vmem:[#allocation167_spill] sm:$0xff] %v7768_v43 }
 0x3e2   :  { %v7759_v59 = vsel %vm70_vm1, %v2964_v26, -1e+30  ;;  %v2268_v26 = vadd.f32 %v7493_v15, %v7482_v53  ;;  %v7777_v35 = vsel %vm72_vm9, %v2301_v57, -1e+30  ;;  %v2966_v57 = vmax.f32 %v2934_v55, %v2950_v9 }
 0x3e3   :  { %10460 = vst [vmem:[#allocation166_spill] sm:$0xff] %v7759_v59  ;;  %10462 = vst [vmem:[#allocation168_spill] sm:$0xff] %v7777_v35 }
 0x3e4   :  { %1360 = vmax.xlane.f32.xlu1 %v7690_v56  ;;  %v2284_v37 = vmul.f32 0.2, %v2268_v26 }
 0x3e8   :  { %1362 = vmax.xlane.f32.xlu1 %v7699_v0  ;;  %v7736_v0 = vpop.permute.xlu1 %2907 }
 0x3ec   :  { %2329 = vmax.xlane.f32.xlu1 %v7709_v22  ;;  %v7746_v21 = vpop.permute.xlu1 %2915 }
 0x3f0   :  { %1997 = vmax.xlane.f32.xlu1 %v7718_v24 }
 0x3f4   :  { %2994 = vmax.xlane.f32.xlu1 %v7727_v47 }
 0x3f8   :  { %2662 = vmax.xlane.f32.xlu1 %v7734_v30 }
 0x3fc   :  { %2333 = vmax.xlane.f32.xlu1 %v7743_v29  ;;  %v7761_v29 = vpop.permute.xlu1 %2923 }
 0x400   :  { %2001 = vmax.xlane.f32.xlu1 %v7752_v20  ;;  %v1031_v20 = vsub.f32 %v10463_v17, %v7313_v39  ;;  %v2271_v39 = vadd.f32 %v7493_v15, %v7511_v23  ;;  %v2300_v17 = vmax.f32 %v2268_v26, %v2284_v37  ;;  %v10467_v23 = vld [vmem:[#allocation45_spill] sm:$0xff]  ;;  %v10468_v26 = vld [vmem:[#allocation24_spill] sm:$0xff] }
 0x402   :  { %v2287_v19 = vmul.f32 0.2, %v2271_v39  ;;  %v7809_v9 = vsel %vm71_vm3, %v2300_v17, -1e+30 }
 0x403   :  { %10469 = vst [vmem:[#allocation45_spill] sm:$0xff] %v7809_v9 }
 0x404   :  { %2998 = vmax.xlane.f32.xlu1 %v7759_v59  ;;  %v1969_v59 = vmax.f32 %v1937_v63, %v1953_v1  ;;  %v1047_v1 = vmul.f32 1.442695, %v1031_v20  ;;  %v699_v20 = vsub.f32 %v10467_v23, %v7322_v40  ;;  %v1939_v40 = vadd.f32 %v7505_v25, %v7542_v32 }
 0x406   :  { %v7787_v53 = vsel %vm72_vm9, %v1969_v59, -1e+30  ;;  %5599 = vpow2.f32 %v1047_v1  ;;  %v2270_v1 = vadd.f32 %v7493_v15, %v7465_v36  ;;  %v10472_v36 = vld [vmem:[#allocation22_spill] sm:$0xff] }
 0x407   :  { %10464 = vst [vmem:[#allocation44_spill] sm:$0xff] %v7787_v53 }
 0x408   :  { %2666 = vmax.xlane.f32.xlu1 %v7768_v43  ;;  %v7771_v48 = vpop.xlane.xlu1 %1356  ;;  %v1936_v43 = vadd.f32 %v7505_v25, %v7578_v42  ;;  %v7796_v42 = vsel %vm72_vm9, %v2966_v57, -1e+30  ;;  %v2286_v32 = vmul.f32 0.2, %v2270_v1 }
 0x409   :  { %10465 = vst [vmem:[#allocation169_spill] sm:$0xff] %v7796_v42 }
 0x40c   :  { %2337 = vmax.xlane.f32.xlu1 %v7777_v35  ;;  %v2536_v54 = vpop.permute.xlu1 %2535 }
 0x40d   :  { %v2599_v60 = vadd.f32 %v7703_v58, %v2536_v54  ;;  %v1952_v54 = vmul.f32 0.2, %v1936_v43 }
 0x40f   :  { %v2615_v30 = vmul.f32 0.2, %v2599_v60  ;;  %v1968_v57 = vmax.f32 %v1936_v43, %v1952_v54  ;;  %v1696_v54 = vsub.f32 %v10472_v36, %v7315_v11 }
 0x410   :  { %2005 = vmax.xlane.f32.xlu1 %v7787_v53  ;;  %v2544_v63 = vpop.permute.xlu1 %2543  ;;  %v10555_v53 = vld [vmem:[#allocation36_spill] sm:$0xff] }
 0x411   :  { %v2631_v35 = vmax.f32 %v2599_v60, %v2615_v30  ;;  %v2949_v60 = vmul.f32 0.2, %v2933_v46  ;;  %v7819_v17 = vsel %vm71_vm3, %v1968_v57, -1e+30  ;;  %v1712_v11 = vmul.f32 1.442695, %v1696_v54 }
 0x412   :  { %10470 = vst [vmem:[#allocation171_spill] sm:$0xff] %v7819_v17  ;;  %v2935_v57 = vadd.f32 %v7626_v10, %v7683_v51  ;;  %v10478_v54 = vld [vmem:[#allocation30_spill] sm:$0xff] }
 0x413   :  { %v7800_v59 = vsel %vm69_vm4, %v2631_v35, -1e+30  ;;  %v2601_v35 = vadd.f32 %v7703_v58, %v2544_v63  ;;  %v2965_v43 = vmax.f32 %v2933_v46, %v2949_v60 }
 0x414   :  { %10466 = vst [vmem:[#allocation170_spill] sm:$0xff] %v7800_v59  ;;  %3002 = vmax.xlane.f32.xlu1 %v7796_v42  ;;  %2664 = vmax.xlane.f32.xlu0 %v7800_v59  ;;  %v2548_v30 = vpop.permute.xlu1 %2547  ;;  %v715_v42 = vmul.f32 1.442695, %v699_v20  ;;  %v5600_v20 = vpop.eup %5599 }
 0x415   :  { %v2602_v55 = vadd.f32 %v7703_v58, %v2548_v30  ;;  %v2303_v30 = vmax.f32 %v2271_v39, %v2287_v19  ;;  %v2617_v23 = vmul.f32 0.2, %v2601_v35  ;;  %v1955_v39 = vmul.f32 0.2, %v1939_v40 }
 0x416   :  { %5601 = vpow2.f32 %v715_v42  ;;  %v7833_v19 = vsel %vm71_vm3, %v2965_v43, -1e+30  ;;  %v2936_v42 = vadd.f32 %v7626_v10, %v7576_v4  ;;  %v7844_v60 = vmul.f32 %v5600_v20, %v6788_v13  ;;  %v10477_v4 = vld [vmem:[#allocation27_spill] sm:$0xff] }
 0x417   :  { %v2618_v37 = vmul.f32 0.2, %v2602_v55  ;;  %10473 = vst [vmem:[#allocation22_spill] sm:$0xff] %v7833_v19  ;;  %v7837_v46 = vsel %vm74_vm6, %v2303_v30, -1e+30  ;;  %5603 = vpow2.f32 %v1712_v11 }
 0x418   :  { %2335 = vmax.xlane.f32.xlu0 %v7809_v9  ;;  %10474 = vst [vmem:[#allocation173_spill] sm:$0xff] %v7837_v46  ;;  %v2952_v36 = vmul.f32 0.2, %v2936_v42  ;;  %v2556_v11 = vpop.permute.xlu1 %2555 }
 0x419   :  { %v2634_v59 = vmax.f32 %v2602_v55, %v2618_v37  ;;  %v1938_v55 = vadd.f32 %v7505_v25, %v7582_v41  ;;  %v2302_v41 = vmax.f32 %v2270_v1, %v2286_v32  ;;  %v1032_v1 = vsub.f32 %v10477_v4, %v7328_v44 }
 0x41b   :  { %v7823_v63 = vsel %vm72_vm9, %v2634_v59, -1e+30  ;;  %v2633_v59 = vmax.f32 %v2601_v35, %v2617_v23  ;;  %v1954_v37 = vmul.f32 0.2, %v1938_v55  ;;  %v1971_v35 = vmax.f32 %v1939_v40, %v1955_v39  ;;  %v10476_v23 = vld [vmem:[#allocation23_spill] sm:$0xff] }
 0x41c   :  { %10471 = vst [vmem:[#allocation172_spill] sm:$0xff] %v7823_v63  ;;  %2003 = vmax.xlane.f32.xlu0 %v7819_v17  ;;  %2670 = vmax.xlane.f32.xlu1 %v7823_v63  ;;  %v1364_v43 = vsub.f32 %v10476_v23, %v7320_v52  ;;  %v7860_v51 = vsel %vm73_vm5, %v2302_v41, -1e+30  ;;  %v2603_v40 = vadd.f32 %v7703_v58, %v7611_v50  ;;  %v2951_v39 = vmul.f32 0.2, %v2935_v57  ;;  %v10534_v17 = vld [vmem:[#allocation29_spill] sm:$0xff] }
 0x41d   :  { %v7850_v30 = vsel %vm71_vm3, %v2633_v59, -1e+30  ;;  %10479 = vst [vmem:[#allocation23_spill] sm:$0xff] %v7860_v51  ;;  %v7866_v52 = vsel %vm74_vm6, %v1971_v35, -1e+30  ;;  %v1970_v20 = vmax.f32 %v1938_v55, %v1954_v37  ;;  %v2272_v41 = vadd.f32 %v7493_v15, %v7521_v7  ;;  %v10482_v35 = vld [vmem:[#allocation28_spill] sm:$0xff] }
 0x41e   :  { %10475 = vst [vmem:[#allocation174_spill] sm:$0xff] %v7850_v30  ;;  %10480 = vst [vmem:[#allocation27_spill] sm:$0xff] %v7866_v52  ;;  %v1380_v59 = vmul.f32 1.442695, %v1364_v43  ;;  %v1049_v44 = vmul.f32 1.442695, %v1032_v1  ;;  %v2968_v50 = vmax.f32 %v2936_v42, %v2952_v36  ;;  %v2967_v37 = vmax.f32 %v2935_v57, %v2951_v39 }
 0x41f   :  { %v2619_v4 = vmul.f32 0.2, %v2603_v40  ;;  %v7878_v55 = vsel %vm73_vm5, %v1970_v20, -1e+30  ;;  %v700_v43 = vsub.f32 %v10482_v35, %v7337_v33  ;;  %v10483_v7 = vld [vmem:[#allocation39_spill] sm:$0xff] }
 0x420   :  { %3000 = vmax.xlane.f32.xlu0 %v7833_v19  ;;  %2341 = vmax.xlane.f32.xlu1 %v7837_v46  ;;  %v5602_v32 = vpop.eup %5601  ;;  %10481 = vst [vmem:[#allocation175_spill] sm:$0xff] %v7878_v55  ;;  %5605 = vpow2.f32 %v1380_v59  ;;  %v1033_v42 = vsub.f32 %v10483_v7, %v7301_v3  ;;  %v2288_v1 = vmul.f32 0.2, %v2272_v41  ;;  %v7888_v20 = vsel %vm73_vm5, %v2967_v37, -1e+30  ;;  %v10487_v37 = vld [vmem:[#allocation42_spill] sm:$0xff] }
 0x421   :  { %v7873_v23 = vmul.f32 %v5602_v32, %v6788_v13  ;;  %5607 = vpow2.f32 %v1049_v44  ;;  %v5604_v36 = vpop.eup %5603  ;;  %10484 = vst [vmem:[#allocation28_spill] sm:$0xff] %v7888_v20  ;;  %v7892_v57 = vsel %vm74_vm6, %v2968_v50, -1e+30  ;;  %v2635_v33 = vmax.f32 %v2603_v40, %v2619_v4 }
 0x422   :  { %10485 = vst [vmem:[#allocation39_spill] sm:$0xff] %v7892_v57  ;;  %v717_v39 = vmul.f32 1.442695, %v700_v43  ;;  %v1051_v59 = vmul.f32 1.442695, %v1033_v42  ;;  %v2273_v3 = vadd.f32 %v7493_v15, %v7470_v38  ;;  %v1940_v44 = vadd.f32 %v7505_v25, %v7587_v6  ;;  %v10488_v38 = vld [vmem:[#allocation47_spill] sm:$0xff] }
 0x423   :  { %v7905_v50 = vsel %vm73_vm5, %v2635_v33, -1e+30  ;;  %v2304_v40 = vmax.f32 %v2272_v41, %v2288_v1  ;;  %v701_v35 = vsub.f32 %v10487_v37, %v7307_v45  ;;  %v1697_v43 = vsub.f32 %v10488_v38, %v7334_v28  ;;  %v10489_v33 = vld [vmem:[#allocation37_spill] sm:$0xff]  ;;  %v10495_v38 = vld [vmem:[#allocation20_spill] sm:$0xff] }
 0x424   :  { %2668 = vmax.xlane.f32.xlu0 %v7850_v30  ;;  %1095 = vadd.xlane.f32.xlu1 %v7844_v60  ;;  %v2604_v30 = vadd.f32 %v7703_v58, %v2556_v11  ;;  %v7899_v11 = vmul.f32 %v5604_v36, %v6788_v13  ;;  %10486 = vst [vmem:[#allocation176_spill] sm:$0xff] %v7905_v50  ;;  %5609 = vpow2.f32 %v717_v39  ;;  %v2289_v6 = vmul.f32 0.2, %v2273_v3 }
 0x425   :  { %5611 = vpow2.f32 %v1051_v59  ;;  %v1956_v36 = vmul.f32 0.2, %v1940_v44  ;;  %v7915_v41 = vsel %vm75_vm7, %v2304_v40, -1e+30  ;;  %v719_v45 = vmul.f32 1.442695, %v701_v35 }
 0x426   :  { %v2620_v32 = vmul.f32 0.2, %v2604_v30  ;;  %10490 = vst [vmem:[#allocation42_spill] sm:$0xff] %v7915_v41  ;;  %v1714_v1 = vmul.f32 1.442695, %v1697_v43  ;;  %v2937_v40 = vadd.f32 %v7626_v10, %v7694_v27  ;;  %v2305_v37 = vmax.f32 %v2273_v3, %v2289_v6  ;;  %v10494_v35 = vld [vmem:[#allocation83_spill] sm:$0xff] }
 0x427   :  { %5613 = vpow2.f32 %v719_v45  ;;  %v10496_v43 = vld [vmem:[#allocation87_spill] sm:$0xff]  ;;  %v10499_v3 = vld [vmem:[#allocation40_spill] sm:$0xff] }
 0x428   :  { %2339 = vmax.xlane.f32.xlu0 %v7860_v51  ;;  %2009 = vmax.xlane.f32.xlu1 %v7866_v52  ;;  %v2636_v4 = vmax.f32 %v2604_v30, %v2620_v32  ;;  %v10492_v32 = vld [vmem:[#allocation137_spill] sm:$0xff]  ;;  %5615 = vpow2.f32 %v1714_v1 }
 0x429   :  { %v1941_v28 = vadd.f32 %v7505_v25, %v10492_v32 }
 0x42a   :  { %v5606_v7 = vpop.eup %5605  ;;  %v7919_v30 = vsel %vm74_vm6, %v2636_v4, -1e+30  ;;  %v1972_v4 = vmax.f32 %v1940_v44, %v1956_v36  ;;  %v7945_v44 = vsel %vm76_vm8, %v2305_v37, -1e+30  ;;  %v2560_v36 = vpop.permute.xlu1 %2559 }
 0x42b   :  { %v5608_v42 = vpop.eup %5607  ;;  %10491 = vst [vmem:[#allocation47_spill] sm:$0xff] %v7919_v30  ;;  %v7929_v59 = vmul.f32 %v5606_v7, %v6788_v13  ;;  %v1957_v7 = vmul.f32 0.2, %v1941_v28  ;;  %10500 = vst [vmem:[#allocation20_spill] sm:$0xff] %v7945_v44  ;;  %v2605_v37 = vadd.f32 %v7703_v58, %v2560_v36 }
 0x42c   :  { %2007 = vmax.xlane.f32.xlu0 %v7878_v55  ;;  %763 = vadd.xlane.f32.xlu1 %v7873_v23  ;;  %v7926_v39 = vmul.f32 %v5608_v42, %v6826_v14  ;;  %v10497_v42 = vld [vmem:[#allocation48_spill] sm:$0xff]  ;;  %v7941_v27 = vsel %vm75_vm7, %v1972_v4, -1e+30  ;;  %v2938_v4 = vadd.f32 %v7626_v10, %v7711_v49 }
 0x42d   :  { %10493 = vst [vmem:[#allocation137_spill] sm:$0xff] %v7929_v59  ;;  %v1365_v32 = vsub.f32 %v10497_v42, %v10496_v43  ;;  %10498 = vst [vmem:[#allocation83_spill] sm:$0xff] %v7941_v27  ;;  %v10503_v42 = vld [vmem:[#allocation26_spill] sm:$0xff] }
 0x42f   :  { %v1382_v45 = vmul.f32 1.442695, %v1365_v32  ;;  %v10505_v32 = vld [vmem:[#allocation51_spill] sm:$0xff] }
 0x430   :  { %3004 = vmax.xlane.f32.xlu0 %v7888_v20  ;;  %3006 = vmax.xlane.f32.xlu1 %v7892_v57 }
 0x434   :  { %2672 = vmax.xlane.f32.xlu0 %v7905_v50  ;;  %1760 = vadd.xlane.f32.xlu1 %v7899_v11  ;;  %v5610_v50 = vpop.eup %5609 }
 0x435   :  { %v5612_v20 = vpop.eup %5611  ;;  %v7950_v1 = vmul.f32 %v5610_v50, %v6826_v14  ;;  %v10504_v50 = vld [vmem:[#allocation91_spill] sm:$0xff] }
 0x438   :  { %2343 = vmax.xlane.f32.xlu0 %v7915_v41  ;;  %2674 = vmax.xlane.f32.xlu1 %v7919_v30  ;;  %v1698_v41 = vsub.f32 %v10495_v38, %v10494_v35  ;;  %v2953_v30 = vmul.f32 0.2, %v2937_v40  ;;  %v7953_v35 = vmul.f32 %v5612_v20, %v6773_v62  ;;  %v1973_v38 = vmax.f32 %v1941_v28, %v1957_v7 }
 0x439   :  { %v1366_v20 = vsub.f32 %v10505_v32, %v10504_v50  ;;  %v2954_v7 = vmul.f32 0.2, %v2938_v4  ;;  %v10511_v32 = vld [vmem:[#allocation154_spill] sm:$0xff] }
 0x43a   :  { %v1716_v6 = vmul.f32 1.442695, %v1698_v41  ;;  %10501 = vst [vmem:[#allocation87_spill] sm:$0xff] %v7953_v35  ;;  %v2969_v43 = vmax.f32 %v2937_v40, %v2953_v30  ;;  %v10502_v41 = vld [vmem:[#allocation84_spill] sm:$0xff]  ;;  %v7966_v28 = vsel %vm76_vm8, %v1973_v38, -1e+30  ;;  %v7968_v40 = vpop.permute.xlu1 %2567  ;;  %v2606_v55 = vadd.f32 %v7703_v58, %v10511_v32 }
 0x43b   :  { %10506 = vst [vmem:[#allocation48_spill] sm:$0xff] %v7966_v28  ;;  %v2621_v30 = vmul.f32 0.2, %v2605_v37 }
 0x43c   :  { %1097 = vadd.xlane.f32.xlu0 %v7926_v39  ;;  %1428 = vadd.xlane.f32.xlu1 %v7929_v59  ;;  %5617 = vpow2.f32 %v1716_v6  ;;  %v7972_v6 = vsel %vm75_vm7, %v2969_v43, -1e+30  ;;  %v2970_v43 = vmax.f32 %v2938_v4, %v2954_v7  ;;  %v2622_v32 = vmul.f32 0.2, %v2606_v55 }
 0x43d   :  { %5619 = vpow2.f32 %v1382_v45  ;;  %10507 = vst [vmem:[#allocation84_spill] sm:$0xff] %v7972_v6  ;;  %v1384_v45 = vmul.f32 1.442695, %v1366_v20  ;;  %v2637_v57 = vmax.f32 %v2605_v37, %v2621_v30  ;;  %v10514_v20 = vld [vmem:[#allocation95_spill] sm:$0xff] }
 0x43e   :  { %v7996_v4 = vsel %vm76_vm8, %v2970_v43, -1e+30  ;;  %v10521_v43 = vld [vmem:[#allocation148_spill] sm:$0xff] }
 0x43f   :  { %10516 = vst [vmem:[#allocation51_spill] sm:$0xff] %v7996_v4  ;;  %v8000_v37 = vsel %vm75_vm7, %v2637_v57, -1e+30 }
 0x440   :  { %2011 = vmax.xlane.f32.xlu0 %v7941_v27  ;;  %2345 = vmax.xlane.f32.xlu1 %v7945_v44  ;;  %v1034_v27 = vsub.f32 %v10503_v42, %v10502_v41  ;;  %v5614_v44 = vpop.eup %5613  ;;  %v10508_v41 = vld [vmem:[#allocation133_spill] sm:$0xff] }
 0x441   :  { %v5616_v49 = vpop.eup %5615  ;;  %v2274_v42 = vadd.f32 %v7493_v15, %v10508_v41  ;;  %v7982_v50 = vmul.f32 %v5614_v44, %v6773_v62  ;;  %10517 = vst [vmem:[#allocation133_spill] sm:$0xff] %v8000_v37 }
 0x442   :  { %v1053_v36 = vmul.f32 1.442695, %v1034_v27  ;;  %v7979_v38 = vmul.f32 %v5616_v49, %v6826_v14  ;;  %v10512_v27 = vld [vmem:[#allocation85_spill] sm:$0xff] }
 0x443   :  { %10510 = vst [vmem:[#allocation91_spill] sm:$0xff] %v7982_v50  ;;  %v10515_v49 = vld [vmem:[#allocation53_spill] sm:$0xff]  ;;  %v2290_v52 = vmul.f32 0.2, %v2274_v42 }
 0x444   :  { %765 = vadd.xlane.f32.xlu0 %v7950_v1  ;;  %1099 = vadd.xlane.f32.xlu1 %v7953_v35  ;;  %10509 = vst [vmem:[#allocation26_spill] sm:$0xff] %v7979_v38  ;;  %5621 = vpow2.f32 %v1053_v36  ;;  %v1035_v41 = vsub.f32 %v10515_v49, %v10514_v20  ;;  %v1942_v20 = vadd.f32 %v7505_v25, %v10521_v43 }
 0x445   :  { %5623 = vpow2.f32 %v1384_v45  ;;  %v2306_v49 = vmax.f32 %v2274_v42, %v2290_v52  ;;  %v10527_v52 = vld [vmem:[#allocation52_spill] sm:$0xff] }
 0x446   :  { %v5618_v44 = vpop.eup %5617  ;;  %v1055_v30 = vmul.f32 1.442695, %v1035_v41  ;;  %v1958_v43 = vmul.f32 0.2, %v1942_v20 }
 0x447   :  { %v5620_v46 = vpop.eup %5619  ;;  %v8007_v45 = vmul.f32 %v5618_v44, %v6773_v62  ;;  %v10524_v44 = vld [vmem:[#allocation97_spill] sm:$0xff]  ;;  %v8028_v42 = vsel %vm77_vm10, %v2306_v49, -1e+30 }
 0x448   :  { %3008 = vmax.xlane.f32.xlu0 %v7972_v6  ;;  %2013 = vmax.xlane.f32.xlu1 %v7966_v28  ;;  %v10513_v6 = vld [vmem:[#allocation46_spill] sm:$0xff]  ;;  %v7992_v28 = vpop.permute.xlu1 %2575  ;;  %10528 = vst [vmem:[#allocation95_spill] sm:$0xff] %v8028_v42 }
 0x449   :  { %v702_v51 = vsub.f32 %v10513_v6, %v10512_v27  ;;  %v10518_v6 = vld [vmem:[#allocation129_spill] sm:$0xff]  ;;  %10519 = vst [vmem:[#allocation154_spill] sm:$0xff] %v8007_v45  ;;  %v8010_v27 = vmul.f32 %v5620_v46, %v6826_v14 }
 0x44a   :  { %v2275_v36 = vadd.f32 %v7493_v15, %v10518_v6  ;;  %v10525_v6 = vld [vmem:[#allocation55_spill] sm:$0xff] }
 0x44b   :  { %v721_v7 = vmul.f32 1.442695, %v702_v51  ;;  %10520 = vst [vmem:[#allocation85_spill] sm:$0xff] %v8010_v27  ;;  %v2638_v51 = vmax.f32 %v2606_v55, %v2622_v32  ;;  %v703_v46 = vsub.f32 %v10525_v6, %v10524_v44  ;;  %v10532_v6 = vld [vmem:[#allocation150_spill] sm:$0xff] }
 0x44c   :  { %1762 = vadd.xlane.f32.xlu0 %v7979_v38  ;;  %767 = vadd.xlane.f32.xlu1 %v7982_v50  ;;  %v8014_v57 = vpop.permute.xlu1 %2583  ;;  %v2291_v14 = vmul.f32 0.2, %v2275_v36  ;;  %v1943_v49 = vadd.f32 %v7505_v25, %v10532_v6 }
 0x44d   :  { %5625 = vpow2.f32 %v721_v7  ;;  %v8024_v55 = vsel %vm76_vm8, %v2638_v51, -1e+30  ;;  %v10529_v7 = vld [vmem:[#allocation145_spill] sm:$0xff] }
 0x44e   :  { %5627 = vpow2.f32 %v1055_v30  ;;  %v5622_v19 = vpop.eup %5621  ;;  %10526 = vst [vmem:[#allocation46_spill] sm:$0xff] %v8024_v55  ;;  %v2939_v30 = vadd.f32 %v7626_v10, %v10529_v7  ;;  %v1959_v6 = vmul.f32 0.2, %v1943_v49 }
 0x44f   :  { %v5624_v63 = vpop.eup %5623  ;;  %v8040_v51 = vmul.f32 %v5622_v19, %v10468_v26 }
 0x450   :  { %3010 = vmax.xlane.f32.xlu1 %v7996_v4  ;;  %2676 = vmax.xlane.f32.xlu0 %v8000_v37  ;;  %v10522_v4 = vld [vmem:[#allocation89_spill] sm:$0xff]  ;;  %v8037_v44 = vmul.f32 %v5624_v63, %v6773_v62  ;;  %v2955_v62 = vmul.f32 0.2, %v2939_v30 }
 0x451   :  { %v10523_v37 = vld [vmem:[#allocation49_spill] sm:$0xff]  ;;  %10531 = vst [vmem:[#allocation129_spill] sm:$0xff] %v8040_v51 }
 0x452   :  { %v1699_v41 = vsub.f32 %v10523_v37, %v10522_v4  ;;  %v723_v4 = vmul.f32 1.442695, %v703_v46  ;;  %v8032_v37 = vpop.permute.xlu1 %2587  ;;  %10530 = vst [vmem:[#allocation53_spill] sm:$0xff] %v8037_v44  ;;  %v10535_v46 = vld [vmem:[#allocation99_spill] sm:$0xff]  ;;  %v10536_v63 = vld [vmem:[#allocation57_spill] sm:$0xff] }
 0x453   :  { %v1700_v7 = vsub.f32 %v10536_v63, %v10535_v46  ;;  %v2940_v46 = vadd.f32 %v7626_v10, %v7721_v2  ;;  %v10542_v63 = vld [vmem:[#allocation90_spill] sm:$0xff] }
 0x454   :  { %1764 = vadd.xlane.f32.xlu1 %v8007_v45  ;;  %1430 = vadd.xlane.f32.xlu0 %v8010_v27  ;;  %v1718_v32 = vmul.f32 1.442695, %v1699_v41  ;;  %v2307_v41 = vmax.f32 %v2275_v36, %v2291_v14  ;;  %v1974_v45 = vmax.f32 %v1942_v20, %v1958_v43  ;;  %v10537_v14 = vld [vmem:[#allocation63_spill] sm:$0xff] }
 0x455   :  { %v1720_v43 = vmul.f32 1.442695, %v1700_v7 }
 0x456   :  { %5629 = vpow2.f32 %v1718_v32  ;;  %v8054_v36 = vsel %vm78_vm12, %v2307_v41, -1e+30  ;;  %v2971_v41 = vmax.f32 %v2939_v30, %v2955_v62 }
 0x457   :  { %5631 = vpow2.f32 %v723_v4  ;;  %v5626_v19 = vpop.eup %5625  ;;  %10538 = vst [vmem:[#allocation148_spill] sm:$0xff] %v8054_v36 }
 0x458   :  { %2678 = vmax.xlane.f32.xlu1 %v8024_v55  ;;  %2347 = vmax.xlane.f32.xlu0 %v8028_v42  ;;  %v10533_v55 = vld [vmem:[#allocation88_spill] sm:$0xff]  ;;  %v5628_v50 = vpop.eup %5627  ;;  %v8068_v4 = vmul.f32 %v5626_v19, %v10468_v26  ;;  %v8084_v2 = vsel %vm77_vm10, %v2971_v41, -1e+30 }
 0x459   :  { %v1367_v42 = vsub.f32 %v10534_v17, %v10533_v55  ;;  %v8058_v17 = vsel %vm77_vm10, %v1974_v45, -1e+30  ;;  %v8065_v32 = vmul.f32 %v5628_v50, %v7058_v16  ;;  %v2607_v45 = vadd.f32 %v7703_v58, %v7968_v40  ;;  %v10544_v50 = vld [vmem:[#allocation101_spill] sm:$0xff]  ;;  %v10545_v19 = vld [vmem:[#allocation60_spill] sm:$0xff]  ;;  %10546 = vst [vmem:[#allocation55_spill] sm:$0xff] %v8084_v2 }
 0x45a   :  { %10539 = vst [vmem:[#allocation89_spill] sm:$0xff] %v8058_v17  ;;  %10541 = vst [vmem:[#allocation97_spill] sm:$0xff] %v8068_v4 }
 0x45b   :  { %v1386_v20 = vmul.f32 1.442695, %v1367_v42  ;;  %10540 = vst [vmem:[#allocation49_spill] sm:$0xff] %v8065_v32  ;;  %v1975_v42 = vmax.f32 %v1943_v49, %v1959_v6  ;;  %v2956_v49 = vmul.f32 0.2, %v2940_v46 }
 0x45c   :  { %1432 = vadd.xlane.f32.xlu1 %v8037_v44  ;;  %1101 = vadd.xlane.f32.xlu0 %v8040_v51  ;;  %v2623_v6 = vmul.f32 0.2, %v2607_v45  ;;  %v10551_v44 = vld [vmem:[#allocation156_spill] sm:$0xff] }
 0x45d   :  { %v8050_v9 = vpop.xlane.xlu1 %1027  ;;  %5633 = vpow2.f32 %v1386_v20 }
 0x45e   :  { %5635 = vpow2.f32 %v1720_v43 }
 0x460   :  { %2349 = vmax.xlane.f32.xlu1 %v8054_v36  ;;  %2015 = vmax.xlane.f32.xlu0 %v8058_v17  ;;  %v10543_v17 = vld [vmem:[#allocation31_spill] sm:$0xff]  ;;  %v1368_v36 = vsub.f32 %v10545_v19, %v10544_v50  ;;  %v5630_v30 = vpop.eup %5629 }
 0x461   :  { %v8062_v55 = vpop.xlane.xlu1 %695  ;;  %v1036_v7 = vsub.f32 %v10543_v17, %v10542_v63  ;;  %v5632_v40 = vpop.eup %5631  ;;  %v8088_v17 = vsel %vm78_vm12, %v1975_v42, -1e+30  ;;  %v10548_v50 = vld [vmem:[#allocation135_spill] sm:$0xff]  ;;  %v2608_v42 = vadd.f32 %v7703_v58, %v10551_v44 }
 0x462   :  { %10547 = vst [vmem:[#allocation145_spill] sm:$0xff] %v8088_v17  ;;  %v1388_v43 = vmul.f32 1.442695, %v1368_v36  ;;  %v2276_v19 = vadd.f32 %v7493_v15, %v10548_v50  ;;  %v8097_v41 = vmul.f32 %v5632_v40, %v7058_v16  ;;  %v10554_v50 = vld [vmem:[#allocation100_spill] sm:$0xff] }
 0x463   :  { %v1057_v20 = vmul.f32 1.442695, %v1036_v7  ;;  %v2972_v7 = vmax.f32 %v2940_v46, %v2956_v49  ;;  %v1037_v40 = vsub.f32 %v10555_v53, %v10554_v50  ;;  %v2624_v44 = vmul.f32 0.2, %v2608_v42 }
 0x464   :  { %1103 = vadd.xlane.f32.xlu1 %v8065_v32  ;;  %769 = vadd.xlane.f32.xlu0 %v8068_v4  ;;  %10549 = vst [vmem:[#allocation150_spill] sm:$0xff] %v8097_v41  ;;  %v8100_v32 = vmul.f32 %v5630_v30, %v10468_v26  ;;  %v2639_v4 = vmax.f32 %v2607_v45, %v2623_v6  ;;  %v2292_v35 = vmul.f32 0.2, %v2276_v19  ;;  %v10559_v6 = vld [vmem:[#allocation130_spill] sm:$0xff] }
 0x465   :  { %v8080_v62 = vpop.xlane.xlu1 %697  ;;  %5637 = vpow2.f32 %v1057_v20  ;;  %v8114_v46 = vsel %vm78_vm12, %v2972_v7, -1e+30  ;;  %v1059_v53 = vmul.f32 1.442695, %v1037_v40  ;;  %v10562_v7 = vld [vmem:[#allocation139_spill] sm:$0xff] }
 0x466   :  { %10550 = vst [vmem:[#allocation88_spill] sm:$0xff] %v8100_v32  ;;  %5639 = vpow2.f32 %v1388_v43  ;;  %10557 = vst [vmem:[#allocation99_spill] sm:$0xff] %v8114_v46  ;;  %v8118_v45 = vsel %vm77_vm10, %v2639_v4, -1e+30  ;;  %v1944_v4 = vadd.f32 %v7505_v25, %v10562_v7  ;;  %v2308_v50 = vmax.f32 %v2276_v19, %v2292_v35  ;;  %v10569_v19 = vld [vmem:[#allocation58_spill] sm:$0xff] }
 0x467   :  { %v5634_v30 = vpop.eup %5633  ;;  %10558 = vst [vmem:[#allocation57_spill] sm:$0xff] %v8118_v45 }
 0x468   :  { %2017 = vmax.xlane.f32.xlu1 %v8088_v17  ;;  %3012 = vmax.xlane.f32.xlu0 %v8084_v2  ;;  %v10552_v17 = vld [vmem:[#allocation92_spill] sm:$0xff]  ;;  %v5636_v27 = vpop.eup %5635  ;;  %v8130_v43 = vmul.f32 %v5634_v30, %v10468_v26  ;;  %v1960_v7 = vmul.f32 0.2, %v1944_v4 }
 0x469   :  { %v8092_v63 = vpop.xlane.xlu1 %1692  ;;  %v10553_v2 = vld [vmem:[#allocation32_spill] sm:$0xff]  ;;  %v8127_v20 = vmul.f32 %v5636_v27, %v7058_v16  ;;  %v10566_v27 = vld [vmem:[#allocation38_spill] sm:$0xff] }
 0x46a   :  { %v704_v36 = vsub.f32 %v10553_v2, %v10552_v17  ;;  %v2277_v17 = vadd.f32 %v7493_v15, %v10559_v6  ;;  %10561 = vst [vmem:[#allocation31_spill] sm:$0xff] %v8130_v43  ;;  %v10565_v6 = vld [vmem:[#allocation102_spill] sm:$0xff] }
 0x46b   :  { %10560 = vst [vmem:[#allocation90_spill] sm:$0xff] %v8127_v20 }
 0x46c   :  { %771 = vadd.xlane.f32.xlu1 %v8097_v41  ;;  %1766 = vadd.xlane.f32.xlu0 %v8100_v32  ;;  %v725_v2 = vmul.f32 1.442695, %v704_v36  ;;  %v2640_v36 = vmax.f32 %v2608_v42, %v2624_v44  ;;  %v705_v41 = vsub.f32 %v10566_v27, %v10565_v6  ;;  %v2293_v26 = vmul.f32 0.2, %v2277_v17  ;;  %v10573_v6 = vld [vmem:[#allocation151_spill] sm:$0xff] }
 0x46d   :  { %v8110_v51 = vpop.xlane.xlu1 %1694  ;;  %v8148_v42 = vsel %vm79_vm11, %v2308_v50, -1e+30  ;;  %v1945_v27 = vadd.f32 %v7505_v25, %v10573_v6  ;;  %v2941_v50 = vadd.f32 %v7626_v10, %v7736_v0  ;;  %v10578_v6 = vld [vmem:[#allocation80_spill] sm:$0xff] }
 0x46e   :  { %10556 = vst [vmem:[#allocation29_spill] sm:$0xff] %v8110_v51  ;;  %5641 = vpow2.f32 %v725_v2  ;;  %v8144_v35 = vsel %vm78_vm12, %v2640_v36, -1e+30  ;;  %10570 = vst [vmem:[#allocation135_spill] sm:$0xff] %v8148_v42  ;;  %v2309_v36 = vmax.f32 %v2277_v17, %v2293_v26 }
 0x46f   :  { %5643 = vpow2.f32 %v1059_v53  ;;  %v5638_v30 = vpop.eup %5637  ;;  %10568 = vst [vmem:[#allocation60_spill] sm:$0xff] %v8144_v35 }
 0x470   :  { %3014 = vmax.xlane.f32.xlu1 %v8114_v46  ;;  %2680 = vmax.xlane.f32.xlu0 %v8118_v45  ;;  %v10563_v46 = vld [vmem:[#allocation96_spill] sm:$0xff]  ;;  %v10564_v45 = vld [vmem:[#allocation33_spill] sm:$0xff]  ;;  %v5640_v59 = vpop.eup %5639  ;;  %v8158_v53 = vmul.f32 %v5638_v30, %v10478_v54 }
 0x471   :  { %v8122_v49 = vpop.xlane.xlu1 %1360  ;;  %v1701_v40 = vsub.f32 %v10564_v45, %v10563_v46  ;;  %v727_v46 = vmul.f32 1.442695, %v705_v41  ;;  %v8155_v2 = vmul.f32 %v5640_v59, %v7058_v16  ;;  %v10576_v59 = vld [vmem:[#allocation108_spill] sm:$0xff]  ;;  %v8174_v16 = vsel %vm10287_vm14, %v2309_v36, -1e+30 }
 0x472   :  { %10572 = vst [vmem:[#allocation92_spill] sm:$0xff] %v8158_v53  ;;  %v10577_v30 = vld [vmem:[#allocation68_spill] sm:$0xff]  ;;  %10579 = vst [vmem:[#allocation32_spill] sm:$0xff] %v8174_v16 }
 0x473   :  { %v1722_v44 = vmul.f32 1.442695, %v1701_v40  ;;  %10571 = vst [vmem:[#allocation156_spill] sm:$0xff] %v8155_v2  ;;  %v1976_v40 = vmax.f32 %v1944_v4, %v1960_v7  ;;  %v1961_v4 = vmul.f32 0.2, %v1945_v27 }
 0x474   :  { %1768 = vadd.xlane.f32.xlu1 %v8127_v20  ;;  %1434 = vadd.xlane.f32.xlu0 %v8130_v43  ;;  %v1702_v20 = vsub.f32 %v10577_v30, %v10576_v59  ;;  %v2957_v7 = vmul.f32 0.2, %v2941_v50  ;;  %v10581_v59 = vld [vmem:[#allocation146_spill] sm:$0xff] }
 0x475   :  { %v8140_v32 = vpop.xlane.xlu1 %1362  ;;  %5645 = vpow2.f32 %v1722_v44  ;;  %v2942_v30 = vadd.f32 %v7626_v10, %v10581_v59  ;;  %v10586_v59 = vld [vmem:[#allocation110_spill] sm:$0xff] }
 0x476   :  { %10567 = vst [vmem:[#allocation101_spill] sm:$0xff] %v8140_v32  ;;  %5647 = vpow2.f32 %v727_v46  ;;  %v1724_v44 = vmul.f32 1.442695, %v1702_v20 }
 0x477   :  { %v2958_v32 = vmul.f32 0.2, %v2942_v30 }
 0x478   :  { %2682 = vmax.xlane.f32.xlu1 %v8144_v35  ;;  %2351 = vmax.xlane.f32.xlu0 %v8148_v42  ;;  %v10574_v35 = vld [vmem:[#allocation98_spill] sm:$0xff]  ;;  %v10575_v42 = vld [vmem:[#allocation35_spill] sm:$0xff]  ;;  %v5642_v17 = vpop.eup %5641 }
 0x479   :  { %v8152_v45 = vpop.xlane.xlu1 %2329  ;;  %v1369_v41 = vsub.f32 %v10575_v42, %v10574_v35  ;;  %v5644_v0 = vpop.eup %5643  ;;  %v8178_v35 = vsel %vm79_vm11, %v1976_v40, -1e+30  ;;  %v2609_v40 = vadd.f32 %v7703_v58, %v7992_v28 }
 0x47a   :  { %10580 = vst [vmem:[#allocation100_spill] sm:$0xff] %v8178_v35  ;;  %v8187_v36 = vmul.f32 %v5644_v0, %v6939_v12  ;;  %v10587_v0 = vld [vmem:[#allocation70_spill] sm:$0xff] }
 0x47b   :  { %v1390_v42 = vmul.f32 1.442695, %v1369_v41  ;;  %v2973_v41 = vmax.f32 %v2941_v50, %v2957_v7  ;;  %v1370_v43 = vsub.f32 %v10587_v0, %v10586_v59  ;;  %v2625_v28 = vmul.f32 0.2, %v2609_v40  ;;  %v10594_v59 = vld [vmem:[#allocation157_spill] sm:$0xff] }
 0x47c   :  { %1436 = vadd.xlane.f32.xlu1 %v8155_v2  ;;  %1105 = vadd.xlane.f32.xlu0 %v8158_v53  ;;  %10582 = vst [vmem:[#allocation36_spill] sm:$0xff] %v8187_v36  ;;  %v8190_v2 = vmul.f32 %v5642_v17, %v10478_v54  ;;  %v1977_v53 = vmax.f32 %v1945_v27, %v1961_v4 }
 0x47d   :  { %v8170_v26 = vpop.xlane.xlu1 %1997  ;;  %5649 = vpow2.f32 %v1390_v42  ;;  %v8204_v27 = vsel %vm79_vm11, %v2973_v41, -1e+30  ;;  %v1392_v4 = vmul.f32 1.442695, %v1370_v43  ;;  %v2974_v0 = vmax.f32 %v2942_v30, %v2958_v32  ;;  %v10597_v43 = vld [vmem:[#allocation105_spill] sm:$0xff] }
 0x47e   :  { %10583 = vst [vmem:[#allocation130_spill] sm:$0xff] %v8190_v2  ;;  %5651 = vpow2.f32 %v1724_v44  ;;  %10588 = vst [vmem:[#allocation139_spill] sm:$0xff] %v8204_v27 }
 0x47f   :  { %v5646_v17 = vpop.eup %5645 }
 0x480   :  { %2353 = vmax.xlane.f32.xlu1 %v8174_v16  ;;  %2019 = vmax.xlane.f32.xlu0 %v8178_v35  ;;  %v10584_v16 = vld [vmem:[#allocation103_spill] sm:$0xff]  ;;  %v10585_v35 = vld [vmem:[#allocation62_spill] sm:$0xff]  ;;  %v5648_v51 = vpop.eup %5647  ;;  %v8217_v44 = vmul.f32 %v5646_v17, %v10478_v54 }
 0x481   :  { %v8182_v46 = vpop.xlane.xlu1 %2994  ;;  %v1038_v20 = vsub.f32 %v10585_v35, %v10584_v16  ;;  %v8208_v16 = vsel %vm10287_vm14, %v1977_v53, -1e+30  ;;  %v10591_v35 = vld [vmem:[#allocation136_spill] sm:$0xff]  ;;  %v8220_v41 = vmul.f32 %v5648_v51, %v6939_v12  ;;  %v2610_v53 = vadd.f32 %v7703_v58, %v10594_v59 }
 0x482   :  { %10589 = vst [vmem:[#allocation96_spill] sm:$0xff] %v8208_v16  ;;  %v2278_v42 = vadd.f32 %v7493_v15, %v10591_v35  ;;  %10592 = vst [vmem:[#allocation102_spill] sm:$0xff] %v8217_v44  ;;  %v10598_v35 = vld [vmem:[#allocation65_spill] sm:$0xff] }
 0x483   :  { %v1061_v50 = vmul.f32 1.442695, %v1038_v20  ;;  %10593 = vst [vmem:[#allocation38_spill] sm:$0xff] %v8220_v41  ;;  %v2641_v20 = vmax.f32 %v2609_v40, %v2625_v28  ;;  %v706_v17 = vsub.f32 %v10598_v35, %v10597_v43  ;;  %v2626_v32 = vmul.f32 0.2, %v2610_v53 }
 0x484   :  { %1107 = vadd.xlane.f32.xlu1 %v8187_v36  ;;  %773 = vadd.xlane.f32.xlu0 %v8190_v2  ;;  %v10596_v36 = vld [vmem:[#allocation43_spill] sm:$0xff]  ;;  %v8230_v2 = vpop.xlane.xlu0 %1029  ;;  %v2294_v59 = vmul.f32 0.2, %v2278_v42 }
 0x485   :  { %v8200_v13 = vpop.xlane.xlu1 %2662  ;;  %5653 = vpow2.f32 %v1061_v50  ;;  %v8236_v30 = vsel %vm79_vm11, %v2641_v20, -1e+30 }
 0x486   :  { %5655 = vpow2.f32 %v1392_v4  ;;  %10600 = vst [vmem:[#allocation98_spill] sm:$0xff] %v8236_v30  ;;  %v10603_v4 = vld [vmem:[#allocation138_spill] sm:$0xff] }
 0x487   :  { %v2279_v43 = vadd.f32 %v7493_v15, %v10603_v4  ;;  %v10611_v4 = vld [vmem:[#allocation74_spill] sm:$0xff] }
 0x488   :  { %3016 = vmax.xlane.f32.xlu0 %v8204_v27  ;;  %2021 = vmax.xlane.f32.xlu1 %v8208_v16  ;;  %v10595_v27 = vld [vmem:[#allocation106_spill] sm:$0xff] }
 0x489   :  { %v8212_v7 = vpop.xlane.xlu1 %2333  ;;  %v1039_v16 = vsub.f32 %v10596_v36, %v10595_v27  ;;  %v8240_v36 = vsel %vm10287_vm14, %v2974_v0, -1e+30  ;;  %v729_v27 = vmul.f32 1.442695, %v706_v17  ;;  %v10609_v17 = vld [vmem:[#allocation41_spill] sm:$0xff] }
 0x48a   :  { %10590 = vst [vmem:[#allocation33_spill] sm:$0xff] %v8212_v7  ;;  %v5650_v7 = vpop.eup %5649  ;;  %10601 = vst [vmem:[#allocation35_spill] sm:$0xff] %v8240_v36 }
 0x48b   :  { %v5652_v40 = vpop.eup %5651  ;;  %v1063_v28 = vmul.f32 1.442695, %v1039_v16  ;;  %v8249_v35 = vmul.f32 %v5650_v7, %v10478_v54  ;;  %v8256_v16 = vpop.xlane.xlu0 %2331  ;;  %v10610_v7 = vld [vmem:[#allocation117_spill] sm:$0xff] }
 0x48c   :  { %1770 = vadd.xlane.f32.xlu0 %v8217_v44  ;;  %775 = vadd.xlane.f32.xlu1 %v8220_v41  ;;  %v8252_v20 = vmul.f32 %v5652_v40, %v6939_v12  ;;  %v10606_v41 = vld [vmem:[#allocation152_spill] sm:$0xff]  ;;  %10607 = vst [vmem:[#allocation103_spill] sm:$0xff] %v8256_v16  ;;  %v2642_v44 = vmax.f32 %v2610_v53, %v2626_v32 }
 0x48d   :  { %v8232_v51 = vpop.xlane.xlu1 %2001  ;;  %10604 = vst [vmem:[#allocation68_spill] sm:$0xff] %v8249_v35  ;;  %v1946_v0 = vadd.f32 %v7505_v25, %v10606_v41  ;;  %5657 = vpow2.f32 %v1063_v28  ;;  %v707_v40 = vsub.f32 %v10611_v4, %v10610_v7  ;;  %v2295_v41 = vmul.f32 0.2, %v2279_v43 }
 0x48e   :  { %10599 = vst [vmem:[#allocation151_spill] sm:$0xff] %v8232_v51  ;;  %10605 = vst [vmem:[#allocation146_spill] sm:$0xff] %v8252_v20  ;;  %5659 = vpow2.f32 %v729_v27 }
 0x48f   :  { %v1962_v16 = vmul.f32 0.2, %v1946_v0  ;;  %v8276_v28 = vpop.xlane.xlu0 %1999 }
 0x490   :  { %2684 = vmax.xlane.f32.xlu0 %v8236_v30  ;;  %3018 = vmax.xlane.f32.xlu1 %v8240_v36  ;;  %v2310_v30 = vmax.f32 %v2278_v42, %v2294_v59  ;;  %v10608_v36 = vld [vmem:[#allocation104_spill] sm:$0xff]  ;;  %v10613_v42 = vld [vmem:[#allocation67_spill] sm:$0xff]  ;;  %v8272_v59 = vsel %vm10287_vm14, %v2642_v44, -1e+30  ;;  %v2943_v44 = vadd.f32 %v7626_v10, %v7746_v21 }
 0x491   :  { %v8244_v50 = vpop.xlane.xlu1 %2998  ;;  %v1703_v51 = vsub.f32 %v10609_v17, %v10608_v36  ;;  %10615 = vst [vmem:[#allocation70_spill] sm:$0xff] %v8272_v59  ;;  %v731_v36 = vmul.f32 1.442695, %v707_v40  ;;  %v10617_v17 = vld [vmem:[#allocation141_spill] sm:$0xff]  ;;  %v10620_v40 = vld [vmem:[#allocation112_spill] sm:$0xff] }
 0x492   :  { %10602 = vst [vmem:[#allocation108_spill] sm:$0xff] %v8244_v50  ;;  %v5654_v50 = vpop.eup %5653  ;;  %v8268_v53 = vsel %vm10285_vm13, %v2310_v30, -1e+30  ;;  %v1947_v7 = vadd.f32 %v7505_v25, %v10617_v17  ;;  %v10622_v17 = vld [vmem:[#allocation119_spill] sm:$0xff]  ;;  %v2959_v21 = vmul.f32 0.2, %v2943_v44 }
 0x493   :  { %v5656_v38 = vpop.eup %5655  ;;  %10614 = vst [vmem:[#allocation110_spill] sm:$0xff] %v8268_v53  ;;  %v1726_v32 = vmul.f32 1.442695, %v1703_v51  ;;  %v8283_v30 = vmul.f32 %v5654_v50, %v10489_v33  ;;  %v1978_v51 = vmax.f32 %v1946_v0, %v1962_v16  ;;  %v10623_v50 = vld [vmem:[#allocation75_spill] sm:$0xff] }
 0x494   :  { %1438 = vadd.xlane.f32.xlu0 %v8249_v35  ;;  %1772 = vadd.xlane.f32.xlu1 %v8252_v20  ;;  %v8286_v4 = vmul.f32 %v5656_v38, %v6939_v12  ;;  %v10621_v20 = vld [vmem:[#allocation72_spill] sm:$0xff]  ;;  %v1704_v35 = vsub.f32 %v10623_v50, %v10622_v17  ;;  %v1963_v12 = vmul.f32 0.2, %v1947_v7  ;;  %v10628_v17 = vld [vmem:[#allocation147_spill] sm:$0xff] }
 0x495   :  { %v8264_v54 = vpop.xlane.xlu1 %2666  ;;  %10618 = vst [vmem:[#allocation157_spill] sm:$0xff] %v8283_v30  ;;  %5661 = vpow2.f32 %v1726_v32  ;;  %v2944_v50 = vadd.f32 %v7626_v10, %v10628_v17 }
 0x496   :  { %10612 = vst [vmem:[#allocation62_spill] sm:$0xff] %v8264_v54  ;;  %10619 = vst [vmem:[#allocation106_spill] sm:$0xff] %v8286_v4  ;;  %5663 = vpow2.f32 %v731_v36 }
 0x497   :  { %v5658_v38 = vpop.eup %5657 }
 0x498   :  { %2355 = vmax.xlane.f32.xlu0 %v8268_v53  ;;  %2686 = vmax.xlane.f32.xlu1 %v8272_v59  ;;  %v2311_v53 = vmax.f32 %v2279_v43, %v2295_v41  ;;  %v1371_v59 = vsub.f32 %v10621_v20, %v10620_v40  ;;  %v5660_v54 = vpop.eup %5659  ;;  %v8302_v43 = vsel %vm10285_vm13, %v1978_v51, -1e+30  ;;  %v1728_v41 = vmul.f32 1.442695, %v1704_v35 }
 0x499   :  { %v8278_v27 = vpop.xlane.xlu1 %2337  ;;  %10624 = vst [vmem:[#allocation43_spill] sm:$0xff] %v8302_v43  ;;  %v8313_v36 = vmul.f32 %v5660_v54, %v10489_v33  ;;  %v8316_v40 = vmul.f32 %v5658_v38, %v10499_v3  ;;  %v1979_v51 = vmax.f32 %v1947_v7, %v1963_v12  ;;  %v10631_v54 = vld [vmem:[#allocation121_spill] sm:$0xff]  ;;  %v10632_v38 = vld [vmem:[#allocation76_spill] sm:$0xff] }
 0x49a   :  { %10616 = vst [vmem:[#allocation136_spill] sm:$0xff] %v8278_v27  ;;  %v8296_v27 = vpop.xlane.xlu0 %2996  ;;  %v8306_v20 = vsel %vm10286_vm0, %v2311_v53, -1e+30  ;;  %v1394_v16 = vmul.f32 1.442695, %v1371_v59  ;;  %v2611_v53 = vadd.f32 %v7703_v58, %v8014_v57  ;;  %v2975_v59 = vmax.f32 %v2943_v44, %v2959_v21 }
 0x49b   :  { %10625 = vst [vmem:[#allocation105_spill] sm:$0xff] %v8306_v20  ;;  %10626 = vst [vmem:[#allocation65_spill] sm:$0xff] %v8313_v36  ;;  %v8334_v57 = vsel %vm10286_vm0, %v1979_v51, -1e+30  ;;  %v2960_v21 = vmul.f32 0.2, %v2944_v50 }
 0x49c   :  { %1109 = vadd.xlane.f32.xlu0 %v8283_v30  ;;  %1440 = vadd.xlane.f32.xlu1 %v8286_v4  ;;  %10627 = vst [vmem:[#allocation138_spill] sm:$0xff] %v8316_v40  ;;  %5665 = vpow2.f32 %v1394_v16  ;;  %v10630_v4 = vld [vmem:[#allocation73_spill] sm:$0xff]  ;;  %10635 = vst [vmem:[#allocation41_spill] sm:$0xff] %v8334_v57  ;;  %v10641_v30 = vld [vmem:[#allocation4_spill] sm:$0xff] }
 0x49d   :  { %v8298_v0 = vpop.xlane.xlu1 %2005  ;;  %5667 = vpow2.f32 %v1728_v41 }
 0x49f   :  { %v5662_v17 = vpop.eup %5661 }
 0x4a0   :  { %2023 = vmax.xlane.f32.xlu0 %v8302_v43  ;;  %2357 = vmax.xlane.f32.xlu1 %v8306_v20  ;;  %v10629_v43 = vld [vmem:[#allocation115_spill] sm:$0xff]  ;;  %v1372_v20 = vsub.f32 %v10632_v38, %v10631_v54  ;;  %v5664_v44 = vpop.eup %5663  ;;  %v10638_v38 = vld [vmem:[#allocation77_spill] sm:$0xff] }
 0x4a1   :  { %v8310_v32 = vpop.xlane.xlu0 %2664  ;;  %v1040_v35 = vsub.f32 %v10630_v4, %v10629_v43  ;;  %v8328_v12 = vpop.xlane.xlu1 %3002  ;;  %v2627_v4 = vmul.f32 0.2, %v2611_v53  ;;  %v8338_v43 = vsel %vm10285_vm13, %v2975_v59, -1e+30  ;;  %v10637_v54 = vld [vmem:[#allocation123_spill] sm:$0xff]  ;;  %v8354_v59 = vmul.f32 %v5664_v44, %v10499_v3 }
 0x4a2   :  { %10633 = vst [vmem:[#allocation152_spill] sm:$0xff] %v8328_v12  ;;  %10636 = vst [vmem:[#allocation117_spill] sm:$0xff] %v8338_v43  ;;  %v1396_v41 = vmul.f32 1.442695, %v1372_v20  ;;  %v8351_v12 = vmul.f32 %v5662_v17, %v10489_v33  ;;  %v10647_v17 = vld [vmem:[#allocation78_spill] sm:$0xff] }
 0x4a3   :  { %v1065_v16 = vmul.f32 1.442695, %v1040_v35  ;;  %10643 = vst [vmem:[#allocation72_spill] sm:$0xff] %v8354_v59  ;;  %v2612_v35 = vadd.f32 %v7703_v58, %v8032_v37  ;;  %v2643_v20 = vmax.f32 %v2611_v53, %v2627_v4 }
 0x4a4   :  { %777 = vadd.xlane.f32.xlu0 %v8313_v36  ;;  %1111 = vadd.xlane.f32.xlu1 %v8316_v40  ;;  %v1041_v40 = vsub.f32 %v10638_v38, %v10637_v54  ;;  %10642 = vst [vmem:[#allocation112_spill] sm:$0xff] %v8351_v12  ;;  %v10645_v54 = vld [vmem:[#allocation54_spill] sm:$0xff] }
 0x4a5   :  { %v8330_v7 = vpop.xlane.xlu0 %2335  ;;  %5669 = vpow2.f32 %v1065_v16  ;;  %v10651_v16 = vld [vmem:[#allocation118_spill] sm:$0xff] }
 0x4a6   :  { %10634 = vst [vmem:[#allocation104_spill] sm:$0xff] %v8330_v7  ;;  %v2280_v7 = vadd.f32 %v7493_v15, %v10641_v30  ;;  %5671 = vpow2.f32 %v1396_v41  ;;  %v1067_v15 = vmul.f32 1.442695, %v1041_v40  ;;  %v10646_v30 = vld [vmem:[#allocation124_spill] sm:$0xff]  ;;  %v5666_v37 = vpop.eup %5665  ;;  %v10652_v41 = vld [vmem:[#allocation66_spill] sm:$0xff] }
 0x4a8   :  { %3020 = vmax.xlane.f32.xlu0 %v8338_v43  ;;  %2025 = vmax.xlane.f32.xlu1 %v8334_v57  ;;  %v2976_v43 = vmax.f32 %v2944_v50, %v2960_v21  ;;  %v10644_v57 = vld [vmem:[#allocation107_spill] sm:$0xff]  ;;  %v2296_v53 = vmul.f32 0.2, %v2280_v7  ;;  %v5668_v50 = vpop.eup %5667  ;;  %v2628_v21 = vmul.f32 0.2, %v2612_v35  ;;  %5673 = vpow2.f32 %v1067_v15 }
 0x4a9   :  { %v8344_v36 = vpop.xlane.xlu0 %2003  ;;  %v8346_v51 = vpop.xlane.xlu1 %2670  ;;  %v708_v38 = vsub.f32 %v10645_v54, %v10644_v57  ;;  %v8370_v57 = vsel %vm10285_vm13, %v2643_v20, -1e+30  ;;  %v1706_v54 = vsub.f32 %v10652_v41, %v10651_v16  ;;  %v8385_v20 = vmul.f32 %v5666_v37, %v10489_v33  ;;  %v10658_v16 = vld [vmem:[#allocation56_spill] sm:$0xff]  ;;  %v10660_v37 = vld [vmem:[#allocation69_spill] sm:$0xff] }
 0x4aa   :  { %10639 = vst [vmem:[#allocation74_spill] sm:$0xff] %v8344_v36  ;;  %10640 = vst [vmem:[#allocation141_spill] sm:$0xff] %v8346_v51  ;;  %v709_v51 = vsub.f32 %v10647_v17, %v10646_v30  ;;  %v8374_v4 = vsel %vm10286_vm0, %v2976_v43, -1e+30  ;;  %v8388_v43 = vmul.f32 %v5668_v50, %v10499_v3  ;;  %v10659_v41 = vld [vmem:[#allocation120_spill] sm:$0xff] }
 0x4ab   :  { %10649 = vst [vmem:[#allocation75_spill] sm:$0xff] %v8370_v57  ;;  %10650 = vst [vmem:[#allocation147_spill] sm:$0xff] %v8374_v4  ;;  %v733_v40 = vmul.f32 1.442695, %v708_v38  ;;  %v10656_v38 = vld [vmem:[#allocation153_spill] sm:$0xff]  ;;  %v1374_v33 = vsub.f32 %v10660_v37, %v10659_v41  ;;  %v2945_v37 = vadd.f32 %v7626_v10, %v7761_v29 }
 0x4ac   :  { %1774 = vadd.xlane.f32.xlu0 %v8351_v12  ;;  %779 = vadd.xlane.f32.xlu1 %v8354_v59  ;;  %v735_v30 = vmul.f32 1.442695, %v709_v51  ;;  %10654 = vst [vmem:[#allocation73_spill] sm:$0xff] %v8385_v20  ;;  %10655 = vst [vmem:[#allocation121_spill] sm:$0xff] %v8388_v43  ;;  %v2312_v12 = vmax.f32 %v2280_v7, %v2296_v53  ;;  %v1732_v51 = vmul.f32 1.442695, %v1706_v54 }
 0x4ad   :  { %v8364_v44 = vpop.xlane.xlu0 %3000  ;;  %v8366_v36 = vpop.xlane.xlu1 %2341  ;;  %5675 = vpow2.f32 %v733_v40  ;;  %v1400_v40 = vmul.f32 1.442695, %v1374_v33  ;;  %v10663_v54 = vld [vmem:[#allocation128_spill] sm:$0xff]  ;;  %v10667_v33 = vld [vmem:[#allocation111_spill] sm:$0xff] }
 0x4ae   :  { %10648 = vst [vmem:[#allocation119_spill] sm:$0xff] %v8366_v36  ;;  %v10657_v36 = vld [vmem:[#allocation109_spill] sm:$0xff]  ;;  %5677 = vpow2.f32 %v735_v30  ;;  %v8404_v53 = vsel %vm10284_vm15, %v2312_v12, -1e+30  ;;  %v10664_v30 = vld [vmem:[#allocation82_spill] sm:$0xff] }
 0x4af   :  { %v1705_v15 = vsub.f32 %v10658_v16, %v10657_v36  ;;  %10661 = vst [vmem:[#allocation76_spill] sm:$0xff] %v8404_v53  ;;  %5679 = vpow2.f32 %v1732_v51  ;;  %v10668_v51 = vld [vmem:[#allocation59_spill] sm:$0xff] }
 0x4b0   :  { %2688 = vmax.xlane.f32.xlu0 %v8370_v57  ;;  %3022 = vmax.xlane.f32.xlu1 %v8374_v4  ;;  %v1948_v57 = vadd.f32 %v7505_v25, %v10656_v38  ;;  %v2644_v4 = vmax.f32 %v2612_v35, %v2628_v21  ;;  %v5670_v25 = vpop.eup %5669  ;;  %v1043_v38 = vsub.f32 %v10664_v30, %v10663_v54  ;;  %v10670_v30 = vld [vmem:[#allocation93_spill] sm:$0xff] }
 0x4b1   :  { %v8380_v17 = vpop.xlane.xlu0 %2668  ;;  %v8382_v59 = vpop.xlane.xlu1 %1095  ;;  %v1730_v21 = vmul.f32 1.442695, %v1705_v15  ;;  %v8419_v12 = vmul.f32 %v5670_v25, %v10527_v52  ;;  %v10669_v25 = vld [vmem:[#allocation140_spill] sm:$0xff] }
 0x4b2   :  { %10653 = vst [vmem:[#allocation115_spill] sm:$0xff] %v8380_v17  ;;  %v5672_v7 = vpop.eup %5671  ;;  %v1964_v35 = vmul.f32 0.2, %v1948_v57  ;;  %v8408_v36 = vsel %vm10286_vm0, %v2644_v4, -1e+30 }
 0x4b3   :  { %10662 = vst [vmem:[#allocation123_spill] sm:$0xff] %v8408_v36  ;;  %10665 = vst [vmem:[#allocation77_spill] sm:$0xff] %v8419_v12  ;;  %v8422_v4 = vmul.f32 %v5672_v7, %v10499_v3  ;;  %v5674_v15 = vpop.eup %5673  ;;  %5681 = vpow2.f32 %v1730_v21  ;;  %v1071_v54 = vmul.f32 1.442695, %v1043_v38  ;;  %v10675_v38 = vld [vmem:[#allocation61_spill] sm:$0xff] }
 0x4b4   :  { %1442 = vadd.xlane.f32.xlu0 %v8385_v20  ;;  %1776 = vadd.xlane.f32.xlu1 %v8388_v43  ;;  %v1980_v43 = vmax.f32 %v1948_v57, %v1964_v35  ;;  %5683 = vpow2.f32 %v1400_v40  ;;  %v8437_v10 = vmul.f32 %v5674_v15, %v10537_v14  ;;  %v2961_v57 = vmul.f32 0.2, %v2945_v37  ;;  %v10674_v40 = vld [vmem:[#allocation114_spill] sm:$0xff] }
 0x4b5   :  { %v8398_v50 = vpop.xlane.xlu0 %2339  ;;  %v8400_v17 = vpop.xlane.xlu1 %2009  ;;  %10666 = vst [vmem:[#allocation4_spill] sm:$0xff] %v8422_v4  ;;  %5685 = vpow2.f32 %v1071_v54  ;;  %v2613_v54 = vadd.f32 %v7703_v58, %v7631_v31 }
 0x4b6   :  { %10672 = vst [vmem:[#allocation54_spill] sm:$0xff] %v8437_v10  ;;  %v8441_v35 = vsel %vm10284_vm15, %v1980_v43, -1e+30 }
 0x4b7   :  { %v5676_v3 = vpop.eup %5675  ;;  %10673 = vst [vmem:[#allocation124_spill] sm:$0xff] %v8441_v35 }
 0x4b8   :  { %2359 = vmax.xlane.f32.xlu0 %v8404_v53  ;;  %2690 = vmax.xlane.f32.xlu1 %v8408_v36  ;;  %v1373_v53 = vsub.f32 %v10668_v51, %v10667_v33  ;;  %v711_v36 = vsub.f32 %v10670_v30, %v10669_v25  ;;  %v5678_v29 = vpop.eup %5677  ;;  %v1042_v33 = vsub.f32 %v10675_v38, %v10674_v40  ;;  %v10676_v51 = vld [vmem:[#allocation143_spill] sm:$0xff]  ;;  %v10677_v25 = vld [vmem:[#allocation86_spill] sm:$0xff]  ;;  %v10680_v38 = vld [vmem:[#allocation116_spill] sm:$0xff] }
 0x4b9   :  { %v8414_v16 = vpop.xlane.xlu0 %2007  ;;  %v8416_v41 = vpop.xlane.xlu1 %763  ;;  %v1708_v30 = vsub.f32 %v10677_v25, %v10676_v51  ;;  %v8454_v43 = vmul.f32 %v5676_v3, %v10527_v52  ;;  %v10682_v3 = vld [vmem:[#allocation144_spill] sm:$0xff] }
 0x4ba   :  { %v1398_v21 = vmul.f32 1.442695, %v1373_v53  ;;  %v739_v15 = vmul.f32 1.442695, %v711_v36  ;;  %v8457_v53 = vmul.f32 %v5678_v29, %v10537_v14  ;;  %v5680_v40 = vpop.eup %5679  ;;  %v1069_v36 = vmul.f32 1.442695, %v1042_v33 }
 0x4bb   :  { %v1736_v51 = vmul.f32 1.442695, %v1708_v30  ;;  %v1376_v29 = vsub.f32 %v10682_v3, %v7771_v48  ;;  %v10686_v33 = vld [vmem:[#allocation79_spill] sm:$0xff] }
 0x4bc   :  { %1113 = vadd.xlane.f32.xlu0 %v8419_v12  ;;  %1444 = vadd.xlane.f32.xlu1 %v8422_v4  ;;  %10679 = vst [vmem:[#allocation118_spill] sm:$0xff] %v8457_v53  ;;  %5687 = vpow2.f32 %v1398_v21  ;;  %v10685_v21 = vld [vmem:[#allocation126_spill] sm:$0xff] }
 0x4bd   :  { %v8432_v7 = vpop.xlane.xlu0 %3004  ;;  %v8434_v20 = vpop.xlane.xlu1 %3006  ;;  %5689 = vpow2.f32 %v739_v15  ;;  %v1707_v30 = vsub.f32 %v10686_v33, %v10685_v21  ;;  %v1404_v48 = vmul.f32 1.442695, %v1376_v29  ;;  %v1045_v15 = vsub.f32 %v7651_v18, %v8050_v9  ;;  %v10689_v18 = vld [vmem:[#allocation127_spill] sm:$0xff]  ;;  %v10690_v9 = vld [vmem:[#allocation81_spill] sm:$0xff] }
 0x4be   :  { %10671 = vst [vmem:[#allocation107_spill] sm:$0xff] %v8432_v7  ;;  %5691 = vpow2.f32 %v1069_v36 }
 0x4bf   :  { %5693 = vpow2.f32 %v1736_v51  ;;  %v1734_v33 = vmul.f32 1.442695, %v1707_v30  ;;  %v1375_v51 = vsub.f32 %v10690_v9, %v10689_v18  ;;  %v10694_v18 = vld [vmem:[#allocation71_spill] sm:$0xff] }
 0x4c0   :  { %2027 = vmax.xlane.f32.xlu0 %v8441_v35  ;;  %1115 = vadd.xlane.f32.xlu1 %v8437_v10  ;;  %v10681_v35 = vld [vmem:[#allocation64_spill] sm:$0xff]  ;;  %v2977_v10 = vmax.f32 %v2945_v37, %v2961_v57  ;;  %v2629_v37 = vmul.f32 0.2, %v2613_v54  ;;  %5695 = vrcp.f32 %v8382_v59  ;;  %v1075_v59 = vmul.f32 1.442695, %v1045_v15 }
 0x4c1   :  { %v8449_v4 = vpop.xlane.xlu0 %2672  ;;  %v8451_v12 = vpop.xlane.xlu1 %1760  ;;  %v710_v7 = vsub.f32 %v10681_v35, %v10680_v38  ;;  %v8472_v38 = vmul.f32 %v5680_v40, %v10537_v14  ;;  %v1402_v15 = vmul.f32 1.442695, %v1375_v51 }
 0x4c2   :  { %10678 = vst [vmem:[#allocation78_spill] sm:$0xff] %v8449_v4  ;;  %v5682_v35 = vpop.eup %5681  ;;  %v8476_v57 = vsel %vm10284_vm15, %v2977_v10, -1e+30  ;;  %v2645_v21 = vmax.f32 %v2613_v54, %v2629_v37 }
 0x4c3   :  { %10683 = vst [vmem:[#allocation66_spill] sm:$0xff] %v8472_v38  ;;  %v5684_v31 = vpop.eup %5683  ;;  %v737_v58 = vmul.f32 1.442695, %v710_v7  ;;  %10684 = vst [vmem:[#allocation153_spill] sm:$0xff] %v8476_v57  ;;  %v8488_v10 = vmul.f32 %v5682_v35, %v10527_v52 }
 0x4c4   :  { %781 = vadd.xlane.f32.xlu0 %v8454_v43  ;;  %783 = vadd.xlane.f32.xlu1 %v8457_v53  ;;  %v8491_v36 = vmul.f32 %v5684_v31, %v10537_v14  ;;  %v5686_v3 = vpop.eup %5685  ;;  %v8508_v30 = vsel %vm10284_vm15, %v2645_v21, -1e+30  ;;  %vm10962_vm15 = vmmov 0  }
 0x4c5   :  { %v8467_v25 = vpop.xlane.xlu0 %2343  ;;  %v8469_v4 = vpop.xlane.xlu1 %2674  ;;  %10687 = vst [vmem:[#allocation109_spill] sm:$0xff] %v8488_v10  ;;  %5697 = vpow2.f32 %v737_v58  ;;  %v713_v58 = vsub.f32 %v7658_v34, %v8062_v55  ;;  %v8504_v54 = vmul.f32 %v5686_v3, %v10578_v6  ;;  %10692 = vst [vmem:[#allocation69_spill] sm:$0xff] %v8508_v30  ;;  %v1710_v34 = vsub.f32 %v7674_v8, %v8092_v63  ;;  %v10697_v63 = vld [vmem:[#allocation142_spill] sm:$0xff] }
 0x4c6   :  { %10688 = vst [vmem:[#allocation56_spill] sm:$0xff] %v8491_v36  ;;  %v5688_v31 = vpop.eup %5687 }
 0x4c7   :  { %10691 = vst [vmem:[#allocation120_spill] sm:$0xff] %v8504_v54  ;;  %v5690_v37 = vpop.eup %5689  ;;  %v8520_v21 = vmul.f32 %v5688_v31, %v10527_v52 }
 0x4c8   :  { %3024 = vmax.xlane.f32.xlu0 %v8476_v57  ;;  %1780 = vadd.xlane.f32.xlu1 %v8472_v38  ;;  %v5692_v9 = vpop.eup %5691 }
 0x4c9   :  { %v1098_v40 = vpop.xlane.xlu0 %1097  ;;  %v8484_v7 = vpop.xlane.xlu1 %1428  ;;  %10695 = vst [vmem:[#allocation128_spill] sm:$0xff] %v8520_v21 }
 0x4ca   :  { %5699 = vrcp.f32 %v1098_v40  ;;  %v10693_v40 = vld [vmem:[#allocation122_spill] sm:$0xff] }
 0x4cb   :  { %5701 = vpow2.f32 %v1404_v48  ;;  %v1044_v48 = vsub.f32 %v10694_v18, %v10693_v40  ;;  %v5694_v40 = vpop.eup %5693 }
 0x4cc   :  { %1778 = vadd.xlane.f32.xlu0 %v8488_v10  ;;  %1448 = vadd.xlane.f32.xlu1 %v8491_v36  ;;  %5703 = vpow2.f32 %v1734_v33  ;;  %v743_v36 = vmul.f32 1.442695, %v713_v58  ;;  %v8523_v33 = vmul.f32 %v5690_v37, %v10578_v6  ;;  %v5696_v18 = vpop.eup %5695 }
 0x4cd   :  { %v8497_v29 = vpop.xlane.xlu0 %2011  ;;  %v8499_v35 = vpop.xlane.xlu1 %2345  ;;  %5705 = vpow2.f32 %v1075_v59  ;;  %v1073_v51 = vmul.f32 1.442695, %v1044_v48  ;;  %v10698_v59 = vld [vmem:[#allocation94_spill] sm:$0xff]  ;;  %v1378_v48 = vsub.f32 %v7690_v56, %v8122_v49  ;;  %v1143_v38 = vmul.f32 %v5696_v18, %v7844_v60 }
 0x4ce   :  { %5707 = vrcp.f32 %v8416_v41  ;;  %10696 = vst [vmem:[#allocation82_spill] sm:$0xff] %v8523_v33  ;;  %v712_v58 = vsub.f32 %v10698_v59, %v10697_v63  ;;  %v1740_v41 = vmul.f32 1.442695, %v1710_v34  ;;  %v10701_v63 = vld [vmem:[#allocation155_spill] sm:$0xff]  ;;  %v10702_v59 = vld [vmem:[#allocation125_spill] sm:$0xff]  ;;  %v2361_v49 = vsub.f32 %v7709_v22, %v8152_v45 }
 0x4cf   :  { %v5698_v8 = vpop.eup %5697  ;;  %v1709_v53 = vsub.f32 %v10702_v59, %v10701_v63  ;;  %v1408_v18 = vmul.f32 1.442695, %v1378_v48  ;;  %v10705_v22 = vld [vmem:[#allocation149_spill] sm:$0xff] }
 0x4d0   :  { %2692 = vmax.xlane.f32.xlu0 %v8508_v30  ;;  %1119 = vadd.xlane.f32.xlu1 %v8504_v54  ;;  %v741_v56 = vmul.f32 1.442695, %v712_v58  ;;  %v10706_v45 = vld [vmem:[#allocation113_spill] sm:$0xff]  ;;  %v10747_v30 = vld [vmem:[#allocation15_spill] sm:$0xff] }
 0x4d1   :  { %v766_v55 = vpop.xlane.xlu0 %765  ;;  %v8516_v3 = vpop.xlane.xlu1 %1099 }
 0x4d2   :  { %5709 = vrcp.f32 %v766_v55  ;;  %v8536_v55 = vmul.f32 %v5692_v9, %v10569_v19 }
 0x4d3   :  { %5711 = vpow2.f32 %v1402_v15 }
 0x4d4   :  { %1446 = vadd.xlane.f32.xlu0 %v8520_v21  ;;  %787 = vadd.xlane.f32.xlu1 %v8523_v33  ;;  %v5700_v37 = vpop.eup %5699  ;;  %5713 = vpow2.f32 %v743_v36  ;;  %10699 = vst [vmem:[#allocation111_spill] sm:$0xff] %v8536_v55  ;;  %v8539_v33 = vmul.f32 %v5694_v40, %v10578_v6 }
 0x4d5   :  { %v8529_v54 = vpop.xlane.xlu0 %3008  ;;  %v8531_v31 = vpop.xlane.xlu1 %2013  ;;  %v1144_v34 = vmul.f32 %v5700_v37, %v7926_v39  ;;  %5715 = vpow2.f32 %v1073_v51  ;;  %v8553_v39 = vmul.f32 %v5698_v8, %v10569_v19 }
 0x4d6   :  { %10700 = vst [vmem:[#allocation59_spill] sm:$0xff] %v8539_v33  ;;  %v5702_v15 = vpop.eup %5701  ;;  %5717 = vpow2.f32 %v1740_v41  ;;  %v1738_v41 = vmul.f32 1.442695, %v1709_v53 }
 0x4d7   :  { %v1159_v9 = vpack.c.bf16 %v1144_v34, %v1143_v38  ;;  %v5704_v60 = vpop.eup %5703  ;;  %5719 = vrcp.f32 %v8451_v12  ;;  %10703 = vst [vmem:[#allocation140_spill] sm:$0xff] %v8553_v39  ;;  %v8556_v51 = vmul.f32 %v5702_v15, %v10578_v6  ;;  %v1377_v38 = vsub.f32 %v10706_v45, %v10705_v22 }
 0x4d8   :  { %1117 = vadd.xlane.f32.xlu0 %v8536_v55  ;;  %1784 = vadd.xlane.f32.xlu1 %v8539_v33  ;;  %v5706_v37 = vpop.eup %5705  ;;  %v2377_v12 = vmul.f32 1.442695, %v2361_v49  ;;  %v2029_v34 = vsub.f32 %v7718_v24, %v8170_v26  ;;  %v8569_v53 = vmul.f32 %v5704_v60, %v10569_v19  ;;  %v10709_v24 = vld [vmem:[#allocation131_spill] sm:$0xff] }
 0x4d9   :  { %v1763_v36 = vpop.xlane.xlu0 %1762  ;;  %v8549_v40 = vpop.xlane.xlu1 %767  ;;  %10704 = vst [vmem:[#allocation93_spill] sm:$0xff] %v8556_v51  ;;  %3360 = vmatprep.mubr.bf16.mxu0 %v1159_v9  ;;  %v8572_v63 = vmul.f32 %v5706_v37, %v7642_v5  ;;  %v1406_v9 = vmul.f32 1.442695, %v1377_v38  ;;  %v1046_v26 = vsub.f32 %v10709_v24, %v8230_v2  ;;  %v10712_v38 = vld [vmem:[#allocation8_spill] sm:$0xff] }
 0x4da   :  { %v5708_v58 = vpop.eup %5707  ;;  %5721 = vrcp.f32 %v1763_v36  ;;  %10707 = vst [vmem:[#allocation114_spill] sm:$0xff] %v8569_v53  ;;  %v2045_v45 = vmul.f32 1.442695, %v2029_v34  ;;  %v10715_v34 = vld [vmem:[#allocation7_spill] sm:$0xff] }
 0x4db   :  { %5723 = vpow2.f32 %v741_v56  ;;  %10708 = vst [vmem:[#allocation61_spill] sm:$0xff] %v8572_v63  ;;  %v811_v56 = vmul.f32 %v5708_v58, %v7873_v23  ;;  %v3026_v58 = vsub.f32 %v7727_v47, %v8182_v46 }
 0x4dc   :  { %785 = vadd.xlane.f32.xlu0 %v8553_v39  ;;  %1452 = vadd.xlane.f32.xlu1 %v8556_v51  ;;  %v5710_v15 = vpop.eup %5709  ;;  %5725 = vpow2.f32 %v1408_v18 }
 0x4dd   :  { %v8562_v48 = vpop.xlane.xlu0 %2676  ;;  %v8564_v8 = vpop.xlane.xlu1 %3010  ;;  %v812_v49 = vmul.f32 %v5710_v15, %v7950_v1  ;;  %5727 = vpow2.f32 %v1738_v41 }
 0x4de   :  { %v5712_v59 = vpop.eup %5711  ;;  %5729 = vpow2.f32 %v2377_v12  ;;  %v10713_v12 = vld [vmem:[#allocation9_spill] sm:$0xff] }
 0x4df   :  { %v5714_v36 = vpop.eup %5713  ;;  %v827_v18 = vpack.c.bf16 %v812_v49, %v811_v56  ;;  %5731 = vrcp.f32 %v8484_v7  ;;  %v8584_v23 = vmul.f32 %v5712_v59, %v10569_v19  ;;  %v10714_v15 = vmul.bf16 %v10712_v38, %v10713_v12  ;;  %v10716_v59 = vld [vmem:[#allocation6_spill] sm:$0xff] }
 0x4e0   :  { %1782 = vadd.xlane.f32.xlu0 %v8569_v53  ;;  %1123 = vadd.xlane.f32.xlu1 %v8572_v63  ;;  %v5716_v22 = vpop.eup %5715  ;;  %v8589_v41 = vmul.f32 %v5714_v36, %v7642_v5  ;;  %v1077_v7 = vmul.f32 1.442695, %v1046_v26  ;;  %v10717_v56 = vmul.bf16 %v10715_v34, %v10716_v59  ;;  %v10718_v36 = vld [vmem:[#allocation160_spill] sm:$0xff]  ;;  %v10722_v63 = vld [vmem:[#allocation26_spill] sm:$0xff]  ;;  %v10743_v53 = vld [vmem:[#allocation85_spill] sm:$0xff] }
 0x4e1   :  { %v1431_v60 = vpop.xlane.xlu0 %1430  ;;  %v8580_v37 = vpop.xlane.xlu1 %1764  ;;  %10710 = vst [vmem:[#allocation143_spill] sm:$0xff] %v8584_v23  ;;  %3361 = vmatmul.mubr.bf16.vlgmr.msra.gmra.mrb[32].mxu0 %v827_v18  ;;  %v714_v24 = vsub.f32 %v10718_v36, %v8080_v62  ;;  %v3042_v18 = vmul.f32 1.442695, %v3026_v58  ;;  %v10723_v62 = vmul.bf16 %v10712_v38, %v10716_v59  ;;  %v10726_v58 = vld [vmem:[#allocation13_spill] sm:$0xff] }
 0x4e2   :  { %v5718_v1 = vpop.eup %5717  ;;  %10711 = vst [vmem:[#allocation86_spill] sm:$0xff] %v8589_v41  ;;  %5733 = vrcp.f32 %v1431_v60  ;;  %5096 = vmatpush3.bf16.msra.mxu0 %v10714_v15  ;;  %v8606_v60 = vmul.f32 %v5716_v22, %v10613_v42  ;;  %v10721_v15 = vld [vmem:[#allocation163_spill] sm:$0xff]  ;;  %v10724_v22 = vld [vmem:[#allocation29_spill] sm:$0xff]  ;;  %v10727_v36 = vmul.bf16 %v10715_v34, %v10726_v58 }
 0x4e3   :  { %v5720_v2 = vpop.eup %5719  ;;  %5735 = vpow2.f32 %v1406_v9  ;;  %5097 = vmatprep.subr.bf16.mxu0 %v10717_v56  ;;  %v8609_v9 = vmul.f32 %v5718_v1, %v7642_v5  ;;  %v2694_v56 = vsub.f32 %v10721_v15, %v8200_v13 }
 0x4e4   :  { %1450 = vadd.xlane.f32.xlu0 %v8584_v23  ;;  %791 = vadd.xlane.f32.xlu1 %v8589_v41  ;;  %v5722_v49 = vpop.eup %5721  ;;  %5737 = vpow2.f32 %v2045_v45  ;;  %10719 = vst [vmem:[#allocation116_spill] sm:$0xff] %v8606_v60  ;;  %v1808_v41 = vmul.f32 %v5720_v2, %v7899_v11  ;;  %v10725_v45 = vld [vmem:[#allocation161_spill] sm:$0xff] }
 0x4e5   :  { %v8599_v47 = vpop.xlane.xlu0 %2347  ;;  %v8601_v46 = vpop.xlane.xlu1 %2678  ;;  %10720 = vst [vmem:[#allocation64_spill] sm:$0xff] %v8609_v9  ;;  %v1809_v51 = vmul.f32 %v5722_v49, %v10722_v63  ;;  %5739 = vpow2.f32 %v1077_v7  ;;  %v1711_v1 = vsub.f32 %v10725_v45, %v10724_v22  ;;  %v745_v49 = vmul.f32 1.442695, %v714_v24  ;;  %v10729_v22 = vld [vmem:[#allocation33_spill] sm:$0xff]  ;;  %v10730_v45 = vld [vmem:[#allocation164_spill] sm:$0xff] }
 0x4e6   :  { %v5724_v26 = vpop.eup %5723  ;;  %5098 = vmatpush3.bf16.msra.mxu0 %v10723_v62  ;;  %5741 = vrcp.f32 %v8516_v3  ;;  %v2710_v62 = vmul.f32 1.442695, %v2694_v56  ;;  %v10733_v24 = vld [vmem:[#allocation101_spill] sm:$0xff]  ;;  %v10735_v56 = vld [vmem:[#allocation12_spill] sm:$0xff] }
 0x4e7   :  { %v5726_v33 = vpop.eup %5725  ;;  %5099 = vmatprep.subr.bf16.mxu0 %v10727_v36  ;;  %v1824_v11 = vpack.c.bf16 %v1809_v51, %v1808_v41  ;;  %v8629_v15 = vmul.f32 %v5724_v26, %v10613_v42  ;;  %5743 = vpow2.f32 %v3042_v18  ;;  %v10732_v41 = vmul.bf16 %v10712_v38, %v10726_v58  ;;  %v10734_v26 = vld [vmem:[#allocation162_spill] sm:$0xff]  ;;  %v10742_v23 = vld [vmem:[#allocation137_spill] sm:$0xff] }
 0x4e8   :  { %1121 = vadd.xlane.f32.xlu0 %v8606_v60  ;;  %1788 = vadd.xlane.f32.xlu1 %v8609_v9  ;;  %v5728_v2 = vpop.eup %5727  ;;  %v2363_v60 = vsub.f32 %v10730_v45, %v10729_v22  ;;  %v8634_v36 = vmul.f32 %v5726_v33, %v7642_v5  ;;  %v1742_v3 = vmul.f32 1.442695, %v1711_v1  ;;  %v1379_v18 = vsub.f32 %v10734_v26, %v10733_v24  ;;  %v10737_v22 = vld [vmem:[#allocation151_spill] sm:$0xff]  ;;  %v10738_v45 = vld [vmem:[#allocation165_spill] sm:$0xff] }
 0x4e9   :  { %v1102_v13 = vpop.xlane.xlu0 %1101  ;;  %v8625_v63 = vpop.xlane.xlu1 %1432  ;;  %10728 = vst [vmem:[#allocation144_spill] sm:$0xff] %v8629_v15  ;;  %3457 = vmatprep.mubr.bf16.mxu1 %v1824_v11  ;;  %v10736_v9 = vmul.bf16 %v10715_v34, %v10735_v56  ;;  %v8653_v1 = vmul.f32 %v5728_v2, %v10613_v42  ;;  %v10746_v2 = vld [vmem:[#allocation132_spill] sm:$0xff] }
 0x4ea   :  { %v5730_v7 = vpop.eup %5729  ;;  %10731 = vst [vmem:[#allocation126_spill] sm:$0xff] %v8634_v36  ;;  %5745 = vrcp.f32 %v1102_v13  ;;  %5100 = vmatpush3.bf16.msra.mxu0 %v10732_v41  ;;  %v2031_v41 = vsub.f32 %v10738_v45, %v10737_v22  ;;  %v10745_v22 = vld [vmem:[#allocation103_spill] sm:$0xff] }
 0x4eb   :  { %v5732_v51 = vpop.eup %5731  ;;  %5101 = vmatprep.subr.bf16.mxu0 %v10736_v9  ;;  %5747 = vpow2.f32 %v745_v49  ;;  %10739 = vst [vmem:[#allocation79_spill] sm:$0xff] %v8653_v1  ;;  %v2381_v9 = vmul.f32 1.442695, %v2363_v60  ;;  %v10744_v49 = vmul.bf16 %v10712_v38, %v10735_v56  ;;  %v2362_v45 = vsub.f32 %v10746_v2, %v10745_v22  ;;  %v10752_v2 = vld [vmem:[#allocation11_spill] sm:$0xff] }
 0x4ec   :  { %789 = vadd.xlane.f32.xlu0 %v8629_v15  ;;  %1456 = vadd.xlane.f32.xlu1 %v8634_v36  ;;  %v5734_v13 = vpop.eup %5733  ;;  %v10740_v15 = vld [vmem:[#allocation21_spill] sm:$0xff]  ;;  %5749 = vpow2.f32 %v2710_v62  ;;  %v1476_v36 = vmul.f32 %v5732_v51, %v10742_v23  ;;  %v10748_v62 = vmul.bf16 %v10715_v34, %v10747_v30  ;;  %v2049_v51 = vmul.f32 1.442695, %v2031_v41 }
 0x4ed   :  { %v8646_v33 = vpop.xlane.xlu0 %2015  ;;  %v8648_v11 = vpop.xlane.xlu1 %2349  ;;  %v8656_v24 = vmul.f32 %v5730_v7, %v10740_v15  ;;  %v1477_v39 = vmul.f32 %v5734_v13, %v10743_v53  ;;  %5751 = vpow2.f32 %v1742_v3  ;;  %v1410_v7 = vmul.f32 1.442695, %v1379_v18 }
 0x4ee   :  { %v5736_v26 = vpop.eup %5735  ;;  %5102 = vmatpush3.bf16.msra.mxu0 %v10744_v49  ;;  %5753 = vrcp.f32 %v8549_v40  ;;  %v10749_v49 = vld [vmem:[#allocation108_spill] sm:$0xff]  ;;  %v10751_v18 = vmul.bf16 %v10712_v38, %v10747_v30 }
 0x4ef   :  { %10741 = vst [vmem:[#allocation127_spill] sm:$0xff] %v8656_v24  ;;  %v5738_v55 = vpop.eup %5737  ;;  %5103 = vmatprep.subr.bf16.mxu0 %v10748_v62  ;;  %v1492_v53 = vpack.c.bf16 %v1477_v39, %v1476_v36  ;;  %5755 = vpow2.f32 %v2381_v9  ;;  %v10753_v39 = vmul.bf16 %v10752_v2, %v10713_v12  ;;  %v8682_v36 = vmul.f32 %v5736_v26, %v10613_v42 }
 0x4f0   :  { %1786 = vadd.xlane.f32.xlu0 %v8653_v1  ;;  %2425 = vadd.xlane.f32.xlu1 %v8656_v24  ;;  %v5740_v13 = vpop.eup %5739  ;;  %v10750_v1 = vld [vmem:[#allocation166_spill] sm:$0xff]  ;;  %v8685_v40 = vmul.f32 %v5738_v55, %v10740_v15  ;;  %v2379_v9 = vmul.f32 1.442695, %v2362_v45  ;;  %v10762_v24 = vld [vmem:[#allocation87_spill] sm:$0xff] }
 0x4f1   :  { %v770_v23 = vpop.xlane.xlu0 %769  ;;  %v8670_v60 = vpop.xlane.xlu1 %1103  ;;  %v3028_v22 = vsub.f32 %v10750_v1, %v10749_v49  ;;  %3458 = vmatmul.mubr.bf16.vlgmr.msra.gmra.mrb[4].mxu1 %v1492_v53  ;;  %v10755_v1 = vld [vmem:[#allocation14_spill] sm:$0xff] }
 0x4f2   :  { %v5742_v3 = vpop.eup %5741  ;;  %5757 = vrcp.f32 %v770_v23  ;;  %5104 = vmatpush3.bf16.msra.mxu0 %v10751_v18  ;;  %5160 = vmatpush3.bf16.msra.mxu1 %v10753_v39  ;;  %10754 = vst [vmem:[#allocation81_spill] sm:$0xff] %v8685_v40  ;;  %v10756_v62 = vmul.bf16 %v10715_v34, %v10755_v1  ;;  %v10757_v23 = vld [vmem:[#allocation10_spill] sm:$0xff]  ;;  %v10761_v39 = vld [vmem:[#allocation167_spill] sm:$0xff]  ;;  %v10764_v10 = vmul.bf16 %v10712_v38, %v10755_v1 }
 0x4f3   :  { %v5744_v41 = vpop.eup %5743  ;;  %5759 = vpow2.f32 %v1410_v7  ;;  %v10758_v53 = vmul.bf16 %v10757_v23, %v10716_v59  ;;  %v10759_v18 = vld [vmem:[#allocation134_spill] sm:$0xff]  ;;  %v3046_v45 = vmul.f32 1.442695, %v3028_v22  ;;  %v1145_v21 = vmul.f32 %v5742_v3, %v10762_v24 }
 0x4f4   :  { %5105 = vmatprep.subr.bf16.mxu0 %v10756_v62  ;;  %v5746_v26 = vpop.eup %5745  ;;  %v2030_v55 = vsub.f32 %v10759_v18, %v8276_v28  ;;  %5761 = vpow2.f32 %v2049_v51  ;;  %1454 = vadd.xlane.f32.xlu0 %v8682_v36  ;;  %v10760_v7 = vld [vmem:[#allocation62_spill] sm:$0xff]  ;;  %v10765_v28 = vmul.bf16 %v10752_v2, %v10716_v59  ;;  %v8712_v51 = vmul.f32 %v5740_v13, %v7508_v61 }
 0x4f5   :  { %5161 = vmatprep.subr.bf16.mxu1 %v10758_v53  ;;  %v8693_v49 = vpop.xlane.xlu0 %3012  ;;  %v8695_v12 = vpop.xlane.xlu1 %2017  ;;  %2093 = vadd.xlane.f32.xlu1 %v8685_v40  ;;  %v2696_v62 = vsub.f32 %v10761_v39, %v10760_v7  ;;  %v10763_v53 = vld [vmem:[#allocation129_spill] sm:$0xff]  ;;  %v8715_v22 = vmul.f32 %v5744_v41, %v10740_v15  ;;  %5763 = vpow2.f32 %v2379_v9  ;;  %v10767_v24 = vld [vmem:[#allocation158_spill] sm:$0xff]  ;;  %v10771_v9 = vld [vmem:[#allocation136_spill] sm:$0xff] }
 0x4f6   :  { %v1146_v57 = vmul.f32 %v5746_v26, %v10763_v53  ;;  %v5748_v42 = vpop.eup %5747  ;;  %5106 = vmatpush3.bf16.msra.mxu0 %v10764_v10  ;;  %5162 = vmatpush3.bf16.msra.mxu1 %v10765_v28  ;;  %v3027_v3 = vsub.f32 %v10767_v24, %v8296_v27  ;;  %v10768_v26 = vld [vmem:[#allocation17_spill] sm:$0xff]  ;;  %v10770_v10 = vmul.bf16 %v10757_v23, %v10726_v58  ;;  %v2047_v53 = vmul.f32 1.442695, %v2030_v55  ;;  %v10772_v28 = vld [vmem:[#allocation168_spill] sm:$0xff] }
 0x4f7   :  { %10766 = vst [vmem:[#allocation122_spill] sm:$0xff] %v8715_v22  ;;  %v5750_v18 = vpop.eup %5749  ;;  %v10769_v7 = vmul.bf16 %v10715_v34, %v10768_v26  ;;  %5765 = vrcp.f32 %v8580_v37  ;;  %v2714_v41 = vmul.f32 1.442695, %v2696_v62  ;;  %v2365_v24 = vsub.f32 %v10772_v28, %v10771_v9 }
 0x4f8   :  { %5163 = vmatprep.subr.bf16.mxu1 %v10770_v10  ;;  %v1160_v39 = vpack.c.bf16 %v1146_v57, %v1145_v21  ;;  %1125 = vadd.xlane.f32.xlu0 %v8712_v51  ;;  %v5752_v27 = vpop.eup %5751  ;;  %5767 = vpow2.f32 %v3046_v45  ;;  %v10773_v57 = vmul.bf16 %v10712_v38, %v10768_v26  ;;  %v10774_v21 = vmul.bf16 %v10752_v2, %v10726_v58  ;;  %v10777_v10 = vld [vmem:[#allocation44_spill] sm:$0xff] }
 0x4f9   :  { %5107 = vmatprep.subr.bf16.mxu0 %v10769_v7  ;;  %v1767_v59 = vpop.xlane.xlu0 %1766  ;;  %v8725_v13 = vpop.xlane.xlu1 %771  ;;  %3090 = vadd.xlane.f32.xlu1 %v8715_v22  ;;  %v8739_v37 = vmul.f32 %v5748_v42, %v7508_v61  ;;  %v8742_v55 = vmul.f32 %v5750_v18, %v10740_v15  ;;  %v3044_v62 = vmul.f32 1.442695, %v3027_v3  ;;  %v10780_v28 = vmul.bf16 %v10757_v23, %v10735_v56  ;;  %v10781_v18 = vld [vmem:[#allocation170_spill] sm:$0xff] }
 0x4fa   :  { %3368 = vmatprep.mubr.bf16.mxu0 %v1160_v39  ;;  %v5754_v7 = vpop.eup %5753  ;;  %5769 = vrcp.f32 %v1767_v59  ;;  %5108 = vmatpush3.bf16.msra.mxu0 %v10773_v57  ;;  %v2033_v39 = vsub.f32 %v10777_v10, %v8298_v0  ;;  %v10778_v59 = vld [vmem:[#allocation16_spill] sm:$0xff]  ;;  %v2695_v3 = vsub.f32 %v10781_v18, %v8310_v32  ;;  %v8769_v32 = vmul.f32 %v5752_v27, %v7508_v61  ;;  %v10787_v18 = vld [vmem:[#allocation19_spill] sm:$0xff] }
 0x4fb   :  { %5164 = vmatpush3.bf16.msra.mxu1 %v10774_v21  ;;  %10775 = vst [vmem:[#allocation71_spill] sm:$0xff] %v8739_v37  ;;  %10776 = vst [vmem:[#allocation142_spill] sm:$0xff] %v8742_v55  ;;  %v5756_v45 = vpop.eup %5755  ;;  %v10779_v9 = vmul.bf16 %v10715_v34, %v10778_v59  ;;  %5771 = vpow2.f32 %v2047_v53  ;;  %v2385_v34 = vmul.f32 1.442695, %v2365_v24  ;;  %v10782_v21 = vld [vmem:[#allocation91_spill] sm:$0xff]  ;;  %v10784_v22 = vmul.bf16 %v10712_v38, %v10778_v59  ;;  %v10789_v24 = vld [vmem:[#allocation152_spill] sm:$0xff] }
 0x4fc   :  { %5165 = vmatprep.subr.bf16.mxu1 %v10780_v28  ;;  %v5758_v57 = vpop.eup %5757  ;;  %793 = vadd.xlane.f32.xlu0 %v8739_v37  ;;  %5773 = vpow2.f32 %v2714_v41  ;;  %v813_v10 = vmul.f32 %v5754_v7, %v10782_v21  ;;  %v10785_v53 = vmul.bf16 %v10752_v2, %v10735_v56  ;;  %10786 = vst [vmem:[#allocation94_spill] sm:$0xff] %v8769_v32  ;;  %v2053_v41 = vmul.f32 1.442695, %v2033_v39  ;;  %v10790_v7 = vld [vmem:[#allocation169_spill] sm:$0xff] }
 0x4fd   :  { %5109 = vmatprep.subr.bf16.mxu0 %v10779_v9  ;;  %v8752_v58 = vpop.xlane.xlu0 %2680  ;;  %v8754_v42 = vpop.xlane.xlu1 %3014  ;;  %2758 = vadd.xlane.f32.xlu1 %v8742_v55  ;;  %v10783_v9 = vld [vmem:[#allocation97_spill] sm:$0xff]  ;;  %v8772_v55 = vmul.f32 %v5756_v45, %v10787_v18  ;;  %5775 = vpow2.f32 %v3044_v62  ;;  %v10791_v21 = vmul.bf16 %v10757_v23, %v10747_v30  ;;  %v2712_v56 = vmul.f32 1.442695, %v2695_v3  ;;  %v10792_v45 = vld [vmem:[#allocation104_spill] sm:$0xff] }
 0x4fe   :  { %v5760_v0 = vpop.eup %5759  ;;  %v814_v28 = vmul.f32 %v5758_v57, %v10783_v9  ;;  %5110 = vmatpush3.bf16.msra.mxu0 %v10784_v22  ;;  %v3030_v57 = vsub.f32 %v10790_v7, %v10789_v24  ;;  %5777 = vrcp.f32 %v8625_v63  ;;  %v10793_v62 = vld [vmem:[#allocation45_spill] sm:$0xff] }
 0x4ff   :  { %v5762_v15 = vpop.eup %5761  ;;  %5166 = vmatpush3.bf16.msra.mxu1 %v10785_v53  ;;  %10788 = vst [vmem:[#allocation155_spill] sm:$0xff] %v8772_v55  ;;  %5779 = vpow2.f32 %v2385_v34  ;;  %v2364_v39 = vsub.f32 %v10793_v62, %v10792_v45  ;;  %v8790_v3 = vmul.f32 %v5760_v0, %v7508_v61  ;;  %v10796_v34 = vmul.bf16 %v10757_v23, %v10755_v1  ;;  %v10801_v62 = vld [vmem:[#allocation154_spill] sm:$0xff] }
 0x500   :  { %5167 = vmatprep.subr.bf16.mxu1 %v10791_v21  ;;  %v828_v22 = vpack.c.bf16 %v814_v28, %v813_v10  ;;  %1790 = vadd.xlane.f32.xlu0 %v8769_v32  ;;  %v5764_v27 = vpop.eup %5763  ;;  %v10794_v10 = vmul.bf16 %v10752_v2, %v10747_v30  ;;  %v8793_v63 = vmul.f32 %v5762_v15, %v10787_v18  ;;  %v3050_v24 = vmul.f32 1.442695, %v3030_v57  ;;  %v10797_v30 = vld [vmem:[#allocation74_spill] sm:$0xff]  ;;  %v10800_v57 = vld [vmem:[#allocation172_spill] sm:$0xff] }
 0x501   :  { %v1435_v38 = vpop.xlane.xlu0 %1434  ;;  %v8779_v9 = vpop.xlane.xlu1 %1768  ;;  %2429 = vadd.xlane.f32.xlu1 %v8772_v55  ;;  %v2383_v15 = vmul.f32 1.442695, %v2364_v39  ;;  %v10803_v32 = vmul.bf16 %v10752_v2, %v10755_v1  ;;  %v10806_v39 = vld [vmem:[#allocation22_spill] sm:$0xff] }
 0x502   :  { %3369 = vmatmul.mubr.bf16.gmra.mrb[36].mxu0 %v828_v22  ;;  %v5766_v53 = vpop.eup %5765  ;;  %5781 = vrcp.f32 %v1435_v38  ;;  %10795 = vst [vmem:[#allocation125_spill] sm:$0xff] %v8793_v63  ;;  %v10798_v22 = vld [vmem:[#allocation171_spill] sm:$0xff] }
 0x503   :  { %5168 = vmatpush3.bf16.msra.mxu1 %v10794_v10  ;;  %v5768_v28 = vpop.eup %5767  ;;  %5783 = vpow2.f32 %v2053_v41  ;;  %v2032_v0 = vsub.f32 %v10798_v22, %v10797_v30  ;;  %v10799_v41 = vld [vmem:[#allocation141_spill] sm:$0xff]  ;;  %v1810_v10 = vmul.f32 %v5766_v53, %v10801_v62  ;;  %v10807_v53 = vmul.bf16 %v10757_v23, %v10768_v26 }
 0x504   :  { %5169 = vmatprep.subr.bf16.mxu1 %v10796_v34  ;;  %v5770_v38 = vpop.eup %5769  ;;  %5785 = vpow2.f32 %v2712_v56  ;;  %1458 = vadd.xlane.f32.xlu0 %v8790_v3  ;;  %v2698_v45 = vsub.f32 %v10800_v57, %v10799_v41  ;;  %v10802_v34 = vld [vmem:[#allocation88_spill] sm:$0xff]  ;;  %v10804_v56 = vld [vmem:[#allocation25_spill] sm:$0xff]  ;;  %v8817_v30 = vmul.f32 %v5768_v28, %v10787_v18  ;;  %v3029_v41 = vsub.f32 %v10806_v39, %v8364_v44  ;;  %v10808_v28 = vld [vmem:[#allocation119_spill] sm:$0xff] }
 0x505   :  { %v8798_v7 = vpop.xlane.xlu0 %2351  ;;  %v8800_v21 = vpop.xlane.xlu1 %2682  ;;  %2097 = vadd.xlane.f32.xlu1 %v8793_v63  ;;  %v1811_v55 = vmul.f32 %v5770_v38, %v10802_v34  ;;  %v8814_v37 = vmul.f32 %v5764_v27, %v10804_v56  ;;  %5787 = vpow2.f32 %v3050_v24  ;;  %v2051_v1 = vmul.f32 1.442695, %v2032_v0  ;;  %v10809_v44 = vld [vmem:[#allocation173_spill] sm:$0xff] }
 0x506   :  { %v5772_v40 = vpop.eup %5771  ;;  %10805 = vst [vmem:[#allocation149_spill] sm:$0xff] %v8817_v30  ;;  %5789 = vrcp.f32 %v8670_v60  ;;  %v2718_v27 = vmul.f32 1.442695, %v2698_v45  ;;  %v2367_v24 = vsub.f32 %v10809_v44, %v10808_v28  ;;  %v3048_v39 = vmul.f32 1.442695, %v3029_v41  ;;  %v10813_v45 = vld [vmem:[#allocation174_spill] sm:$0xff] }
 0x507   :  { %5170 = vmatpush3.bf16.msra.mxu1 %v10803_v32  ;;  %v5774_v22 = vpop.eup %5773  ;;  %v1825_v57 = vpack.c.bf16 %v1811_v55, %v1810_v10  ;;  %5791 = vpow2.f32 %v2383_v15  ;;  %v10810_v55 = vmul.bf16 %v10752_v2, %v10768_v26  ;;  %v8835_v0 = vmul.f32 %v5772_v40, %v10804_v56  ;;  %v10812_v15 = vld [vmem:[#allocation115_spill] sm:$0xff] }
 0x508   :  { %5171 = vmatprep.subr.bf16.mxu1 %v10807_v53  ;;  %2427 = vadd.xlane.f32.xlu0 %v8814_v37  ;;  %v5776_v32 = vpop.eup %5775  ;;  %v8838_v60 = vmul.f32 %v5774_v22, %v10787_v18  ;;  %v2697_v53 = vsub.f32 %v10813_v45, %v10812_v15  ;;  %v10815_v40 = vld [vmem:[#allocation27_spill] sm:$0xff]  ;;  %v2389_v41 = vmul.f32 1.442695, %v2367_v24  ;;  %v10818_v18 = vmul.bf16 %v10752_v2, %v10778_v59 }
 0x509   :  { %v1106_v38 = vpop.xlane.xlu0 %1105  ;;  %v8824_v62 = vpop.xlane.xlu1 %1436  ;;  %3094 = vadd.xlane.f32.xlu1 %v8817_v30  ;;  %3465 = vmatprep.mubr.bf16.mxu1 %v1825_v57  ;;  %v10814_v57 = vmul.bf16 %v10757_v23, %v10778_v59  ;;  %v2035_v44 = vsub.f32 %v10815_v40, %v8400_v17  ;;  %v10817_v23 = vld [vmem:[#allocation31_spill] sm:$0xff]  ;;  %v10819_v17 = vld [vmem:[#allocation50_spill] sm:$0xff] }
 0x50a   :  { %v5778_v34 = vpop.eup %5777  ;;  %5793 = vrcp.f32 %v1106_v38  ;;  %10811 = vst [vmem:[#allocation113_spill] sm:$0xff] %v8838_v60  ;;  %v10823_v59 = vld [vmem:[#allocation39_spill] sm:$0xff] }
 0x50b   :  { %5172 = vmatpush3.bf16.msra.mxu1 %v10810_v55  ;;  %v5780_v10 = vpop.eup %5779  ;;  %5795 = vpow2.f32 %v2051_v1  ;;  %v10816_v55 = vld [vmem:[#allocation53_spill] sm:$0xff]  ;;  %v8859_v1 = vmul.f32 %v5776_v32, %v10804_v56 }
 0x50c   :  { %5173 = vmatprep.subr.bf16.mxu1 %v10814_v57  ;;  %v5782_v26 = vpop.eup %5781  ;;  %2095 = vadd.xlane.f32.xlu0 %v8835_v0  ;;  %5797 = vpow2.f32 %v2718_v27  ;;  %v1478_v15 = vmul.f32 %v5778_v34, %v10816_v55  ;;  %v8862_v40 = vmul.f32 %v5780_v10, %v10819_v17  ;;  %v10821_v27 = vld [vmem:[#allocation23_spill] sm:$0xff] }
 0x50d   :  { %v8845_v38 = vpop.xlane.xlu0 %2019  ;;  %v8847_v28 = vpop.xlane.xlu1 %2353  ;;  %2762 = vadd.xlane.f32.xlu1 %v8838_v60  ;;  %v1479_v45 = vmul.f32 %v5782_v26, %v10817_v23  ;;  %5799 = vpow2.f32 %v3048_v39  ;;  %v2716_v60 = vmul.f32 1.442695, %v2697_v53  ;;  %v2366_v24 = vsub.f32 %v10821_v27, %v8398_v50  ;;  %v10828_v27 = vld [vmem:[#allocation92_spill] sm:$0xff] }
 0x50e   :  { %v5784_v22 = vpop.eup %5783  ;;  %10820 = vst [vmem:[#allocation131_spill] sm:$0xff] %v8862_v40  ;;  %v10822_v26 = vmov 0.0   ;;  %v2057_v23 = vmul.f32 1.442695, %v2035_v44  ;;  %5801 = vrcp.f32 %v8725_v13 }
 0x50f   :  { %v5786_v57 = vpop.eup %5785  ;;  %5174 = vmatpush3.bf16.msra.mxu1 %v10818_v18  ;;  %v1493_v34 = vpack.c.bf16 %v1479_v45, %v1478_v15  ;;  %5803 = vpow2.f32 %v2389_v41  ;;  %v3032_v18 = vsub.f32 %v10823_v59, %v8434_v20  ;;  %v8878_v10 = vmul.f32 %v5784_v22, %v10819_v17  ;;  %v10825_v20 = vld [vmem:[#allocation175_spill] sm:$0xff]  ;;  %v10829_v59 = vld [vmem:[#allocation24_spill] sm:$0xff] }
 0x510   :  { %5396 = vmatprep.subr.bf16.mxu1 %v10822_v26  ;;  %3092 = vadd.xlane.f32.xlu0 %v8859_v1  ;;  %v5788_v2 = vpop.eup %5787  ;;  %v8875_v32 = vmul.f32 %v5786_v57, %v10804_v56  ;;  %v2387_v13 = vmul.f32 1.442695, %v2366_v24  ;;  %v2034_v15 = vsub.f32 %v10825_v20, %v8414_v16  ;;  %v10826_v22 = vld [vmem:[#allocation47_spill] sm:$0xff]  ;;  %v10827_v57 = vld [vmem:[#allocation49_spill] sm:$0xff]  ;;  %v10832_v26 = vld [vmem:[#allocation28_spill] sm:$0xff] }
 0x511   :  { %v774_v30 = vpop.xlane.xlu0 %773  ;;  %v8866_v55 = vpop.xlane.xlu1 %1107  ;;  %2433 = vadd.xlane.f32.xlu1 %v8862_v40  ;;  %3466 = vmatmul.mubr.bf16.gmra.mrb[8].mxu1 %v1493_v34  ;;  %10824 = vst [vmem:[#allocation8_spill] sm:$0xff] %v8878_v10  ;;  %v2700_v45 = vsub.f32 %v10826_v22, %v8469_v4  ;;  %v10831_v20 = vld [vmem:[#allocation107_spill] sm:$0xff] }
 0x512   :  { %v5790_v50 = vpop.eup %5789  ;;  %5805 = vrcp.f32 %v774_v30  ;;  %v3054_v30 = vmul.f32 1.442695, %v3032_v18  ;;  %v2055_v4 = vmul.f32 1.442695, %v2034_v15 }
 0x513   :  { %v5792_v39 = vpop.eup %5791  ;;  %5807 = vpow2.f32 %v2716_v60  ;;  %v1147_v60 = vmul.f32 %v5790_v50, %v10827_v57  ;;  %v10836_v57 = vld [vmem:[#allocation78_spill] sm:$0xff] }
 0x514   :  { %v5794_v41 = vpop.eup %5793  ;;  %5809 = vpow2.f32 %v2057_v23  ;;  %2760 = vadd.xlane.f32.xlu0 %v8875_v32  ;;  %v8893_v56 = vmul.f32 %v5792_v39, %v10829_v59  ;;  %v8896_v23 = vmul.f32 %v5788_v2, %v10819_v17  ;;  %v2722_v2 = vmul.f32 1.442695, %v2700_v45  ;;  %v10833_v39 = vld [vmem:[#allocation20_spill] sm:$0xff] }
 0x515   :  { %v8880_v53 = vpop.xlane.xlu0 %3016  ;;  %v8882_v44 = vpop.xlane.xlu1 %2021  ;;  %2101 = vadd.xlane.f32.xlu1 %v8878_v10  ;;  %v1148_v24 = vmul.f32 %v5794_v41, %v10828_v27  ;;  %5811 = vpow2.f32 %v2387_v13  ;;  %v3031_v10 = vsub.f32 %v10832_v26, %v10831_v20  ;;  %v2369_v13 = vsub.f32 %v10833_v39, %v8499_v35  ;;  %v10838_v35 = vld [vmem:[#allocation48_spill] sm:$0xff] }
 0x516   :  { %v5796_v34 = vpop.eup %5795  ;;  %10830 = vst [vmem:[#allocation9_spill] sm:$0xff] %v8896_v23  ;;  %5813 = vrcp.f32 %v8779_v9 }
 0x517   :  { %v5798_v16 = vpop.eup %5797  ;;  %v1161_v40 = vpack.c.bf16 %v1148_v24, %v1147_v60  ;;  %5815 = vpow2.f32 %v3054_v30  ;;  %v8908_v26 = vmul.f32 %v5796_v34, %v10829_v59  ;;  %v3052_v22 = vmul.f32 1.442695, %v3031_v10  ;;  %v10837_v60 = vld [vmem:[#allocation176_spill] sm:$0xff]  ;;  %v10839_v10 = vld [vmem:[#allocation150_spill] sm:$0xff] }
 0x518   :  { %2431 = vadd.xlane.f32.xlu0 %v8893_v56  ;;  %v5800_v50 = vpop.eup %5799  ;;  %v8911_v15 = vmul.f32 %v5798_v16, %v10819_v17  ;;  %v2699_v27 = vsub.f32 %v10837_v60, %v10836_v57  ;;  %v2393_v16 = vmul.f32 1.442695, %v2369_v13  ;;  %v10841_v17 = vld [vmem:[#allocation34_spill] sm:$0xff] }
 0x519   :  { %v1771_v18 = vpop.xlane.xlu0 %1770  ;;  %v8900_v63 = vpop.xlane.xlu1 %775  ;;  %3098 = vadd.xlane.f32.xlu1 %v8896_v23  ;;  %3376 = vmatprep.mubr.bf16.mxu0 %v1161_v40  ;;  %10834 = vst [vmem:[#allocation7_spill] sm:$0xff] %v8908_v26  ;;  %v2037_v40 = vsub.f32 %v10838_v35, %v8531_v31  ;;  %v8926_v60 = vmul.f32 %v5800_v50, %v10829_v59  ;;  %v10843_v35 = vld [vmem:[#allocation42_spill] sm:$0xff] }
 0x51a   :  { %v5802_v41 = vpop.eup %5801  ;;  %5817 = vrcp.f32 %v1771_v18  ;;  %10835 = vst [vmem:[#allocation6_spill] sm:$0xff] %v8911_v15  ;;  %v10840_v18 = vld [vmem:[#allocation130_spill] sm:$0xff]  ;;  %v2720_v31 = vmul.f32 1.442695, %v2699_v27  ;;  %v2368_v23 = vsub.f32 %v10843_v35, %v8467_v25 }
 0x51b   :  { %v5804_v9 = vpop.eup %5803  ;;  %5819 = vpow2.f32 %v2055_v4  ;;  %v815_v20 = vmul.f32 %v5802_v41, %v10839_v10  ;;  %v2061_v13 = vmul.f32 1.442695, %v2037_v40  ;;  %v10844_v41 = vld [vmem:[#allocation51_spill] sm:$0xff]  ;;  %v10850_v35 = vld [vmem:[#allocation30_spill] sm:$0xff] }
 0x51c   :  { %v5806_v45 = vpop.eup %5805  ;;  %2099 = vadd.xlane.f32.xlu0 %v8908_v26  ;;  %5821 = vpow2.f32 %v2722_v2  ;;  %v8929_v4 = vmul.f32 %v5804_v9, %v10841_v17  ;;  %v3034_v9 = vsub.f32 %v10844_v41, %v8564_v8 }
 0x51d   :  { %v8915_v24 = vpop.xlane.xlu0 %2684  ;;  %v8917_v30 = vpop.xlane.xlu1 %3018  ;;  %2766 = vadd.xlane.f32.xlu1 %v8911_v15  ;;  %v816_v39 = vmul.f32 %v5806_v45, %v10840_v18  ;;  %5823 = vpow2.f32 %v3052_v22  ;;  %v10848_v18 = vld [vmem:[#allocation90_spill] sm:$0xff] }
 0x51e   :  { %v5808_v34 = vpop.eup %5807  ;;  %10842 = vst [vmem:[#allocation160_spill] sm:$0xff] %v8929_v4  ;;  %5825 = vrcp.f32 %v8824_v62  ;;  %v2391_v62 = vmul.f32 1.442695, %v2368_v23  ;;  %v10849_v23 = vld [vmem:[#allocation102_spill] sm:$0xff] }
 0x51f   :  { %v5810_v57 = vpop.eup %5809  ;;  %v829_v26 = vpack.c.bf16 %v816_v39, %v815_v20  ;;  %5827 = vpow2.f32 %v2393_v16  ;;  %v8941_v25 = vmul.f32 %v5808_v34, %v10829_v59  ;;  %v10846_v20 = vld [vmem:[#allocation83_spill] sm:$0xff] }
 0x520   :  { %3096 = vadd.xlane.f32.xlu0 %v8926_v60  ;;  %v5812_v50 = vpop.eup %5811  ;;  %v8944_v27 = vmul.f32 %v5810_v57, %v10841_v17  ;;  %v2036_v8 = vsub.f32 %v10846_v20, %v8497_v29 }
 0x521   :  { %v1439_v15 = vpop.xlane.xlu0 %1438  ;;  %v8933_v2 = vpop.xlane.xlu1 %1772  ;;  %2437 = vadd.xlane.f32.xlu1 %v8929_v4  ;;  %3377 = vmatmul.mubr.bf16.gmra.mrb[40].mxu0 %v829_v26  ;;  %v3058_v26 = vmul.f32 1.442695, %v3034_v9  ;;  %v8959_v41 = vmul.f32 %v5812_v50, %v10850_v35 }
 0x522   :  { %v5814_v22 = vpop.eup %5813  ;;  %5829 = vrcp.f32 %v1439_v15  ;;  %10845 = vst [vmem:[#allocation163_spill] sm:$0xff] %v8944_v27  ;;  %v10847_v15 = vld [vmem:[#allocation46_spill] sm:$0xff] }
 0x523   :  { %v5816_v45 = vpop.eup %5815  ;;  %5831 = vpow2.f32 %v2720_v31  ;;  %v2702_v34 = vsub.f32 %v10847_v15, %v8601_v46  ;;  %v1812_v39 = vmul.f32 %v5814_v22, %v10848_v18  ;;  %v2059_v46 = vmul.f32 1.442695, %v2036_v8  ;;  %v10855_v18 = vld [vmem:[#allocation133_spill] sm:$0xff] }
 0x524   :  { %v5818_v16 = vpop.eup %5817  ;;  %5833 = vpow2.f32 %v2061_v13  ;;  %2764 = vadd.xlane.f32.xlu0 %v8941_v25  ;;  %v8962_v59 = vmul.f32 %v5816_v45, %v10841_v17  ;;  %v10852_v13 = vld [vmem:[#allocation84_spill] sm:$0xff] }
 0x525   :  { %v8946_v40 = vpop.xlane.xlu0 %2355  ;;  %v8948_v10 = vpop.xlane.xlu1 %2686  ;;  %2105 = vadd.xlane.f32.xlu1 %v8944_v27  ;;  %v1813_v57 = vmul.f32 %v5818_v16, %v10849_v23  ;;  %5835 = vpow2.f32 %v2391_v62  ;;  %v3033_v20 = vsub.f32 %v10852_v13, %v8529_v54  ;;  %v2726_v22 = vmul.f32 1.442695, %v2702_v34  ;;  %v10853_v45 = vld [vmem:[#allocation148_spill] sm:$0xff] }
 0x526   :  { %v5820_v31 = vpop.eup %5819  ;;  %10851 = vst [vmem:[#allocation26_spill] sm:$0xff] %v8962_v59  ;;  %5837 = vrcp.f32 %v8866_v55  ;;  %v2371_v62 = vsub.f32 %v10853_v45, %v8648_v11  ;;  %v10856_v11 = vld [vmem:[#allocation145_spill] sm:$0xff] }
 0x527   :  { %v5822_v29 = vpop.eup %5821  ;;  %v1826_v27 = vpack.c.bf16 %v1813_v57, %v1812_v39  ;;  %5839 = vpow2.f32 %v3058_v26  ;;  %v8974_v54 = vmul.f32 %v5820_v31, %v10850_v35  ;;  %v3056_v15 = vmul.f32 1.442695, %v3033_v20  ;;  %v10858_v20 = vld [vmem:[#allocation68_spill] sm:$0xff] }
 0x528   :  { %2435 = vadd.xlane.f32.xlu0 %v8959_v41  ;;  %v5824_v50 = vpop.eup %5823  ;;  %v8977_v8 = vmul.f32 %v5822_v29, %v10841_v17  ;;  %v2701_v39 = vsub.f32 %v10855_v18, %v8562_v48  ;;  %v2397_v31 = vmul.f32 1.442695, %v2371_v62  ;;  %v10857_v29 = vld [vmem:[#allocation156_spill] sm:$0xff] }
 0x529   :  { %v1110_v9 = vpop.xlane.xlu0 %1109  ;;  %v8966_v4 = vpop.xlane.xlu1 %1440  ;;  %3102 = vadd.xlane.f32.xlu1 %v8962_v59  ;;  %3473 = vmatprep.mubr.bf16.mxu1 %v1826_v27  ;;  %v2039_v27 = vsub.f32 %v10856_v11, %v8695_v12  ;;  %v8992_v45 = vmul.f32 %v5824_v50, %v10850_v35  ;;  %v10859_v18 = vld [vmem:[#allocation40_spill] sm:$0xff]  ;;  %v10861_v11 = vld [vmem:[#allocation95_spill] sm:$0xff] }
 0x52a   :  { %v5826_v16 = vpop.eup %5825  ;;  %5841 = vrcp.f32 %v1110_v9  ;;  %10854 = vst [vmem:[#allocation29_spill] sm:$0xff] %v8977_v8  ;;  %v2724_v12 = vmul.f32 1.442695, %v2701_v39  ;;  %v2370_v17 = vsub.f32 %v10861_v11, %v8599_v47  ;;  %v10868_v11 = vld [vmem:[#allocation37_spill] sm:$0xff] }
 0x52b   :  { %v5828_v55 = vpop.eup %5827  ;;  %5843 = vpow2.f32 %v2059_v46  ;;  %v1480_v13 = vmul.f32 %v5826_v16, %v10857_v29  ;;  %v2065_v62 = vmul.f32 1.442695, %v2039_v27  ;;  %v10862_v16 = vld [vmem:[#allocation99_spill] sm:$0xff] }
 0x52c   :  { %v5830_v34 = vpop.eup %5829  ;;  %2103 = vadd.xlane.f32.xlu0 %v8974_v54  ;;  %5845 = vpow2.f32 %v2726_v22  ;;  %v8995_v46 = vmul.f32 %v5828_v55, %v10859_v18  ;;  %v3036_v55 = vsub.f32 %v10862_v16, %v8754_v42 }
 0x52d   :  { %v8981_v23 = vpop.xlane.xlu0 %2023  ;;  %v8983_v26 = vpop.xlane.xlu1 %2357  ;;  %2770 = vadd.xlane.f32.xlu1 %v8977_v8  ;;  %v1481_v48 = vmul.f32 %v5830_v34, %v10858_v20  ;;  %5847 = vpow2.f32 %v3056_v15  ;;  %v10866_v20 = vld [vmem:[#allocation36_spill] sm:$0xff] }
 0x52e   :  { %v5832_v57 = vpop.eup %5831  ;;  %10860 = vst [vmem:[#allocation161_spill] sm:$0xff] %v8995_v46  ;;  %5849 = vrcp.f32 %v8900_v63  ;;  %v2395_v63 = vmul.f32 1.442695, %v2370_v17  ;;  %v10867_v17 = vld [vmem:[#allocation157_spill] sm:$0xff] }
 0x52f   :  { %v5834_v9 = vpop.eup %5833  ;;  %v1494_v59 = vpack.c.bf16 %v1481_v48, %v1480_v13  ;;  %5851 = vpow2.f32 %v2397_v31  ;;  %v9007_v47 = vmul.f32 %v5832_v57, %v10850_v35  ;;  %v10864_v13 = vld [vmem:[#allocation89_spill] sm:$0xff] }
 0x530   :  { %3100 = vadd.xlane.f32.xlu0 %v8992_v45  ;;  %v5836_v50 = vpop.eup %5835  ;;  %v9010_v39 = vmul.f32 %v5834_v9, %v10859_v18  ;;  %v2038_v42 = vsub.f32 %v10864_v13, %v8646_v33 }
 0x531   :  { %v778_v8 = vpop.xlane.xlu0 %777  ;;  %v8999_v22 = vpop.xlane.xlu1 %1111  ;;  %2441 = vadd.xlane.f32.xlu1 %v8995_v46  ;;  %3474 = vmatmul.mubr.bf16.gmra.mrb[12].mxu1 %v1494_v59  ;;  %v3062_v59 = vmul.f32 1.442695, %v3036_v55  ;;  %v9025_v16 = vmul.f32 %v5836_v50, %v10868_v11 }
 0x532   :  { %v5838_v15 = vpop.eup %5837  ;;  %5853 = vrcp.f32 %v778_v8  ;;  %10863 = vst [vmem:[#allocation13_spill] sm:$0xff] %v9010_v39  ;;  %v10865_v8 = vld [vmem:[#allocation60_spill] sm:$0xff] }
 0x533   :  { %v5840_v34 = vpop.eup %5839  ;;  %5855 = vpow2.f32 %v2724_v12  ;;  %v2704_v57 = vsub.f32 %v10865_v8, %v8800_v21  ;;  %v1149_v48 = vmul.f32 %v5838_v15, %v10866_v20  ;;  %v2063_v21 = vmul.f32 1.442695, %v2038_v42  ;;  %v10872_v20 = vld [vmem:[#allocation57_spill] sm:$0xff] }
 0x534   :  { %v5842_v31 = vpop.eup %5841  ;;  %5857 = vpow2.f32 %v2065_v62  ;;  %2768 = vadd.xlane.f32.xlu0 %v9007_v47  ;;  %v9028_v35 = vmul.f32 %v5840_v34, %v10859_v18  ;;  %v10869_v62 = vld [vmem:[#allocation55_spill] sm:$0xff]  ;;  %v10870_v34 = vld [vmem:[#allocation32_spill] sm:$0xff] }
 0x535   :  { %v9012_v27 = vpop.xlane.xlu0 %3020  ;;  %v9014_v29 = vpop.xlane.xlu1 %2025  ;;  %2109 = vadd.xlane.f32.xlu1 %v9010_v39  ;;  %v1150_v9 = vmul.f32 %v5842_v31, %v10867_v17  ;;  %5859 = vpow2.f32 %v2395_v63  ;;  %v3035_v13 = vsub.f32 %v10869_v62, %v8693_v49  ;;  %v2730_v15 = vmul.f32 1.442695, %v2704_v57 }
 0x536   :  { %v5844_v12 = vpop.eup %5843  ;;  %5861 = vrcp.f32 %v8933_v2  ;;  %v2373_v63 = vsub.f32 %v10870_v34, %v8847_v28  ;;  %v10873_v28 = vld [vmem:[#allocation96_spill] sm:$0xff] }
 0x537   :  { %v5846_v33 = vpop.eup %5845  ;;  %v1162_v39 = vpack.c.bf16 %v1150_v9, %v1149_v48  ;;  %5863 = vpow2.f32 %v3062_v59  ;;  %v9040_v49 = vmul.f32 %v5844_v12, %v10868_v11  ;;  %v3060_v8 = vmul.f32 1.442695, %v3035_v13  ;;  %v10875_v13 = vld [vmem:[#allocation65_spill] sm:$0xff] }
 0x538   :  { %2439 = vadd.xlane.f32.xlu0 %v9025_v16  ;;  %v5848_v50 = vpop.eup %5847  ;;  %v9043_v42 = vmul.f32 %v5846_v33, %v10859_v18  ;;  %v2703_v48 = vsub.f32 %v10872_v20, %v8752_v58  ;;  %v2401_v12 = vmul.f32 1.442695, %v2373_v63  ;;  %v10874_v33 = vld [vmem:[#allocation38_spill] sm:$0xff]  ;;  %v10876_v20 = vld [vmem:[#allocation135_spill] sm:$0xff] }
 0x539   :  { %v1775_v55 = vpop.xlane.xlu0 %1774  ;;  %v9032_v46 = vpop.xlane.xlu1 %779  ;;  %3106 = vadd.xlane.f32.xlu1 %v9028_v35  ;;  %3384 = vmatprep.mubr.bf16.mxu0 %v1162_v39  ;;  %v2041_v39 = vsub.f32 %v10873_v28, %v8882_v44  ;;  %v9058_v34 = vmul.f32 %v5848_v50, %v10868_v11  ;;  %v2372_v28 = vsub.f32 %v10876_v20, %v8798_v7 }
 0x53a   :  { %v5850_v31 = vpop.eup %5849  ;;  %5865 = vrcp.f32 %v1775_v55  ;;  %10871 = vst [vmem:[#allocation33_spill] sm:$0xff] %v9043_v42  ;;  %v2728_v44 = vmul.f32 1.442695, %v2703_v48 }
 0x53b   :  { %v5852_v2 = vpop.eup %5851  ;;  %5867 = vpow2.f32 %v2063_v21  ;;  %v817_v62 = vmul.f32 %v5850_v31, %v10874_v33  ;;  %v2069_v63 = vmul.f32 1.442695, %v2041_v39  ;;  %v10877_v31 = vld [vmem:[#allocation35_spill] sm:$0xff] }
 0x53c   :  { %v5854_v57 = vpop.eup %5853  ;;  %2107 = vadd.xlane.f32.xlu0 %v9040_v49  ;;  %5869 = vpow2.f32 %v2730_v15  ;;  %v9061_v21 = vmul.f32 %v5852_v2, %v10537_v14  ;;  %v3038_v2 = vsub.f32 %v10877_v31, %v8917_v30 }
 0x53d   :  { %v9047_v17 = vpop.xlane.xlu0 %2688  ;;  %v9049_v59 = vpop.xlane.xlu1 %3022  ;;  %2774 = vadd.xlane.f32.xlu1 %v9043_v42  ;;  %v818_v58 = vmul.f32 %v5854_v57, %v10875_v13  ;;  %5871 = vpow2.f32 %v3060_v8  ;;  %v10881_v13 = vld [vmem:[#allocation146_spill] sm:$0xff] }
 0x53e   :  { %v5856_v9 = vpop.eup %5855  ;;  %5873 = vrcp.f32 %v8966_v4  ;;  %v2399_v4 = vmul.f32 1.442695, %v2372_v28  ;;  %v10883_v28 = vld [vmem:[#allocation139_spill] sm:$0xff] }
 0x53f   :  { %v5858_v55 = vpop.eup %5857  ;;  %v830_v42 = vpack.c.bf16 %v818_v58, %v817_v62  ;;  %5875 = vpow2.f32 %v2401_v12  ;;  %v9073_v7 = vmul.f32 %v5856_v9, %v10868_v11  ;;  %v10879_v62 = vld [vmem:[#allocation100_spill] sm:$0xff]  ;;  %v3037_v31 = vsub.f32 %v10883_v28, %v8880_v53 }
 0x540   :  { %3104 = vadd.xlane.f32.xlu0 %v9058_v34  ;;  %v5860_v50 = vpop.eup %5859  ;;  %v9076_v48 = vmul.f32 %v5858_v55, %v10537_v14  ;;  %v2040_v30 = vsub.f32 %v10879_v62, %v8845_v38  ;;  %v10882_v55 = vld [vmem:[#allocation112_spill] sm:$0xff] }
 0x541   :  { %v1443_v18 = vpop.xlane.xlu0 %1442  ;;  %v9065_v15 = vpop.xlane.xlu1 %1776  ;;  %2445 = vadd.xlane.f32.xlu1 %v9061_v21  ;;  %3385 = vmatmul.mubr.bf16.gmra.mrb[44].mxu0 %v830_v42  ;;  %v10880_v42 = vld [vmem:[#allocation70_spill] sm:$0xff]  ;;  %v9093_v11 = vmul.f32 %v5860_v50, %v10527_v52 }
 0x542   :  { %v5862_v8 = vpop.eup %5861  ;;  %5877 = vrcp.f32 %v1443_v18  ;;  %10878 = vst [vmem:[#allocation164_spill] sm:$0xff] %v9076_v48  ;;  %v3066_v18 = vmul.f32 1.442695, %v3038_v2  ;;  %v2706_v9 = vsub.f32 %v10880_v42, %v8948_v10  ;;  %v2067_v10 = vmul.f32 1.442695, %v2040_v30 }
 0x543   :  { %v5864_v57 = vpop.eup %5863  ;;  %5879 = vpow2.f32 %v2728_v44  ;;  %v1814_v58 = vmul.f32 %v5862_v8, %v10881_v13  ;;  %v10884_v8 = vld [vmem:[#allocation105_spill] sm:$0xff] }
 0x544   :  { %v5866_v12 = vpop.eup %5865  ;;  %5881 = vpow2.f32 %v2069_v63  ;;  %2772 = vadd.xlane.f32.xlu0 %v9073_v7  ;;  %v9096_v38 = vmul.f32 %v5864_v57, %v10537_v14  ;;  %v2734_v50 = vmul.f32 1.442695, %v2706_v9 }
 0x545   :  { %v9078_v39 = vpop.xlane.xlu0 %2359  ;;  %v9080_v33 = vpop.xlane.xlu1 %2690  ;;  %2113 = vadd.xlane.f32.xlu1 %v9076_v48  ;;  %v1815_v44 = vmul.f32 %v5866_v12, %v10882_v55  ;;  %5883 = vpow2.f32 %v2399_v4  ;;  %v2375_v12 = vsub.f32 %v10884_v8, %v8983_v26  ;;  %v3064_v4 = vmul.f32 1.442695, %v3037_v31  ;;  %v10887_v31 = vld [vmem:[#allocation106_spill] sm:$0xff] }
 0x546   :  { %v5868_v20 = vpop.eup %5867  ;;  %5885 = vrcp.f32 %v8999_v22 }
 0x547   :  { %v5870_v63 = vpop.eup %5869  ;;  %v1827_v62 = vpack.c.bf16 %v1815_v44, %v1814_v58  ;;  %5887 = vpow2.f32 %v3066_v18  ;;  %v9106_v42 = vmul.f32 %v5868_v20, %v10527_v52  ;;  %v10885_v18 = vld [vmem:[#allocation98_spill] sm:$0xff]  ;;  %v2405_v55 = vmul.f32 1.442695, %v2375_v12  ;;  %v10886_v20 = vld [vmem:[#allocation41_spill] sm:$0xff] }
 0x548   :  { %2443 = vadd.xlane.f32.xlu0 %v9093_v11  ;;  %v5872_v53 = vpop.eup %5871  ;;  %v9109_v30 = vmul.f32 %v5870_v63, %v10537_v14  ;;  %v2705_v9 = vsub.f32 %v10885_v18, %v8915_v24  ;;  %v2043_v28 = vsub.f32 %v10886_v20, %v9014_v29 }
 0x549   :  { %v1114_v2 = vpop.xlane.xlu0 %1113  ;;  %v9098_v48 = vpop.xlane.xlu1 %1444  ;;  %3110 = vadd.xlane.f32.xlu1 %v9096_v38  ;;  %3481 = vmatprep.mubr.bf16.mxu1 %v1827_v62  ;;  %v9126_v24 = vmul.f32 %v5872_v53, %v10527_v52 }
 0x54a   :  { %v5874_v57 = vpop.eup %5873  ;;  %5889 = vrcp.f32 %v1114_v2  ;;  %v10888_v2 = vld [vmem:[#allocation73_spill] sm:$0xff]  ;;  %v2073_v53 = vmul.f32 1.442695, %v2043_v28 }
 0x54b   :  { %v5876_v26 = vpop.eup %5875  ;;  %5891 = vpow2.f32 %v2067_v10  ;;  %v1482_v63 = vmul.f32 %v5874_v57, %v10887_v31  ;;  %v10889_v10 = vld [vmem:[#allocation110_spill] sm:$0xff]  ;;  %v2732_v57 = vmul.f32 1.442695, %v2705_v9 }
 0x54c   :  { %v5878_v58 = vpop.eup %5877  ;;  %2111 = vadd.xlane.f32.xlu0 %v9106_v42  ;;  %5893 = vpow2.f32 %v2734_v50  ;;  %v2374_v14 = vsub.f32 %v10889_v10, %v8946_v40  ;;  %v9129_v12 = vmul.f32 %v5876_v26, %v10578_v6 }
 0x54d   :  { %v9111_v13 = vpop.xlane.xlu0 %2027  ;;  %v9113_v22 = vpop.xlane.xlu1 %1115  ;;  %2778 = vadd.xlane.f32.xlu1 %v9109_v30  ;;  %v1483_v62 = vmul.f32 %v5878_v58, %v10888_v2  ;;  %5895 = vpow2.f32 %v3064_v4  ;;  %v10890_v58 = vld [vmem:[#allocation147_spill] sm:$0xff] }
 0x54e   :  { %v5880_v44 = vpop.eup %5879  ;;  %5897 = vrcp.f32 %v9032_v46  ;;  %v3040_v4 = vsub.f32 %v10890_v58, %v9049_v59  ;;  %v2403_v20 = vmul.f32 1.442695, %v2374_v14  ;;  %v10891_v2 = vld [vmem:[#allocation43_spill] sm:$0xff] }
 0x54f   :  { %v5882_v8 = vpop.eup %5881  ;;  %v1495_v18 = vpack.c.bf16 %v1483_v62, %v1482_v63  ;;  %5899 = vpow2.f32 %v2405_v55  ;;  %v9139_v46 = vmul.f32 %v5880_v44, %v10527_v52  ;;  %v2042_v28 = vsub.f32 %v10891_v2, %v8981_v23  ;;  %v10892_v14 = vld [vmem:[#allocation123_spill] sm:$0xff] }
 0x550   :  { %3108 = vadd.xlane.f32.xlu0 %v9126_v24  ;;  %v5884_v40 = vpop.eup %5883  ;;  %v9142_v31 = vmul.f32 %v5882_v8, %v10578_v6  ;;  %v3070_v62 = vmul.f32 1.442695, %v3040_v4  ;;  %v2708_v44 = vsub.f32 %v10892_v14, %v9080_v33  ;;  %v10893_v8 = vld [vmem:[#allocation138_spill] sm:$0xff] }
 0x551   :  { %v782_v50 = vpop.xlane.xlu0 %781  ;;  %v9132_v29 = vpop.xlane.xlu1 %783  ;;  %2449 = vadd.xlane.f32.xlu1 %v9129_v12  ;;  %3482 = vmatmul.mubr.bf16.gmra.mrb[16].mxu1 %v1495_v18  ;;  %v2071_v14 = vmul.f32 1.442695, %v2042_v28 }
 0x552   :  { %5901 = vrcp.f32 %v782_v50  ;;  %v5886_v26 = vpop.eup %5885  ;;  %v10894_v50 = vld [vmem:[#allocation77_spill] sm:$0xff] }
 0x553   :  { %v5888_v9 = vpop.eup %5887  ;;  %5903 = vpow2.f32 %v2732_v57  ;;  %v1151_v10 = vmul.f32 %v5886_v26, %v10893_v8  ;;  %v9157_v57 = vmul.f32 %v5884_v40, %v10569_v19  ;;  %v10896_v26 = vld [vmem:[#allocation117_spill] sm:$0xff] }
 0x554   :  { %v5890_v63 = vpop.eup %5889  ;;  %2776 = vadd.xlane.f32.xlu0 %v9139_v46  ;;  %5905 = vpow2.f32 %v2073_v53  ;;  %v9160_v23 = vmul.f32 %v5888_v9, %v10578_v6 }
 0x555   :  { %v9144_v55 = vpop.xlane.xlu0 %3024  ;;  %v9146_v59 = vpop.xlane.xlu1 %1780  ;;  %2117 = vadd.xlane.f32.xlu1 %v9142_v31  ;;  %v1152_v18 = vmul.f32 %v5890_v63, %v10894_v50  ;;  %5907 = vpow2.f32 %v2403_v20  ;;  %v3039_v63 = vsub.f32 %v10896_v26, %v9012_v27  ;;  %v2738_v20 = vmul.f32 1.442695, %v2708_v44  ;;  %v10898_v44 = vld [vmem:[#allocation72_spill] sm:$0xff] }
 0x556   :  { %v5892_v58 = vpop.eup %5891  ;;  %10895 = vst [vmem:[#allocation101_spill] sm:$0xff] %v9160_v23  ;;  %5909 = vrcp.f32 %v9065_v15 }
 0x557   :  { %v5894_v4 = vpop.eup %5893  ;;  %v1163_v53 = vpack.c.bf16 %v1152_v18, %v1151_v10  ;;  %5911 = vpow2.f32 %v3070_v62  ;;  %v9170_v15 = vmul.f32 %v5892_v58, %v10569_v19  ;;  %v3068_v62 = vmul.f32 1.442695, %v3039_v63  ;;  %v10899_v58 = vld [vmem:[#allocation75_spill] sm:$0xff] }
 0x558   :  { %v5896_v33 = vpop.eup %5895  ;;  %2447 = vadd.xlane.f32.xlu0 %v9157_v57  ;;  %v9173_v8 = vmul.f32 %v5894_v4, %v10578_v6 }
 0x559   :  { %v1779_v2 = vpop.xlane.xlu0 %1778  ;;  %v9163_v52 = vpop.xlane.xlu1 %1448  ;;  %3114 = vadd.xlane.f32.xlu1 %v9160_v23  ;;  %3392 = vmatprep.mubr.bf16.mxu0 %v1163_v53  ;;  %v9186_v53 = vmul.f32 %v5896_v33, %v10569_v19  ;;  %v10901_v33 = vld [vmem:[#allocation76_spill] sm:$0xff]  ;;  %v10914_v23 = vld [vmem:[#allocation111_spill] sm:$0xff] }
 0x55a   :  { %v5898_v40 = vpop.eup %5897  ;;  %5913 = vrcp.f32 %v1779_v2  ;;  %10897 = vst [vmem:[#allocation162_spill] sm:$0xff] %v9173_v8  ;;  %v2707_v2 = vsub.f32 %v10899_v58, %v9047_v17 }
 0x55b   :  { %v5900_v9 = vpop.eup %5899  ;;  %5915 = vpow2.f32 %v2071_v14  ;;  %v819_v50 = vmul.f32 %v5898_v40, %v10898_v44 }
 0x55c   :  { %v5902_v28 = vpop.eup %5901  ;;  %2115 = vadd.xlane.f32.xlu0 %v9170_v15  ;;  %5917 = vpow2.f32 %v2738_v20  ;;  %v9189_v26 = vmul.f32 %v5900_v9, %v7642_v5  ;;  %v2736_v17 = vmul.f32 1.442695, %v2707_v2  ;;  %v2376_v20 = vsub.f32 %v10901_v33, %v9078_v39  ;;  %v10905_v2 = vld [vmem:[#allocation124_spill] sm:$0xff] }
 0x55d   :  { %v9175_v10 = vpop.xlane.xlu0 %2692  ;;  %v9177_v27 = vpop.xlane.xlu1 %1119  ;;  %2782 = vadd.xlane.f32.xlu1 %v9173_v8  ;;  %v820_v18 = vmul.f32 %v5902_v28, %v8454_v43  ;;  %5919 = vrcp.f32 %v9098_v48 }
 0x55e   :  { %v5904_v4 = vpop.eup %5903  ;;  %10900 = vst [vmem:[#allocation12_spill] sm:$0xff] %v9189_v26  ;;  %5921 = vpow2.f32 %v3068_v62 }
 0x55f   :  { %v831_v14 = vpack.c.bf16 %v820_v18, %v819_v50  ;;  %v5906_v63 = vpop.eup %5905  ;;  %v9200_v48 = vmul.f32 %v5904_v4, %v10569_v19  ;;  %v10904_v18 = vld [vmem:[#allocation109_spill] sm:$0xff]  ;;  %v2044_v4 = vsub.f32 %v10905_v2, %v9111_v13 }
 0x560   :  { %v5908_v40 = vpop.eup %5907  ;;  %3112 = vadd.xlane.f32.xlu0 %v9186_v53  ;;  %v9203_v28 = vmul.f32 %v5906_v63, %v7642_v5  ;;  %v10906_v63 = vld [vmem:[#allocation67_spill] sm:$0xff]  ;;  %v10912_v2 = vld [vmem:[#allocation69_spill] sm:$0xff] }
 0x561   :  { %v1447_v6 = vpop.xlane.xlu0 %1446  ;;  %v9192_v8 = vpop.xlane.xlu1 %787  ;;  %2453 = vadd.xlane.f32.xlu1 %v9189_v26  ;;  %3393 = vmatmul.mubr.bf16.gmra.mrb[48].mxu0 %v831_v14  ;;  %v9215_v33 = vmul.f32 %v5908_v40, %v10906_v63 }
 0x562   :  { %v5910_v43 = vpop.eup %5909  ;;  %5923 = vrcp.f32 %v1447_v6  ;;  %10902 = vst [vmem:[#allocation151_spill] sm:$0xff] %v9203_v28  ;;  %v10903_v6 = vld [vmem:[#allocation121_spill] sm:$0xff] }
 0x563   :  { %v5912_v9 = vpop.eup %5911  ;;  %5925 = vrcp.f32 %v9113_v22  ;;  %v1816_v39 = vmul.f32 %v5910_v43, %v10903_v6  ;;  %v2407_v22 = vmul.f32 1.442695, %v2376_v20 }
 0x564   :  { %v5914_v62 = vpop.eup %5913  ;;  %2780 = vadd.xlane.f32.xlu0 %v9200_v48  ;;  %v9218_v19 = vmul.f32 %v5912_v9, %v7642_v5 }
 0x565   :  { %v1118_v44 = vpop.xlane.xlu0 %1117  ;;  %v9205_v50 = vpop.xlane.xlu1 %1784  ;;  %2121 = vadd.xlane.f32.xlu1 %v9203_v28  ;;  %v1817_v58 = vmul.f32 %v5914_v62, %v10904_v18 }
 0x566   :  { %5927 = vrcp.f32 %v1118_v44  ;;  %v5916_v14 = vpop.eup %5915  ;;  %10907 = vst [vmem:[#allocation165_spill] sm:$0xff] %v9218_v19 }
 0x567   :  { %5929 = vpow2.f32 %v2736_v17  ;;  %v1828_v28 = vpack.c.bf16 %v1817_v58, %v1816_v39  ;;  %v5918_v44 = vpop.eup %5917  ;;  %v2075_v17 = vmul.f32 1.442695, %v2044_v4  ;;  %v9228_v9 = vmul.f32 %v5916_v14, %v10906_v63  ;;  %v10911_v58 = vld [vmem:[#allocation128_spill] sm:$0xff] }
 0x568   :  { %5931 = vrcp.f32 %v9132_v29  ;;  %2451 = vadd.xlane.f32.xlu0 %v9215_v33  ;;  %v5920_v13 = vpop.eup %5919  ;;  %v10908_v29 = vld [vmem:[#allocation153_spill] sm:$0xff]  ;;  %v9231_v62 = vmul.f32 %v5918_v44, %v7642_v5  ;;  %v2709_v4 = vsub.f32 %v10912_v2, %v9175_v10 }
 0x569   :  { %v786_v26 = vpop.xlane.xlu0 %785  ;;  %v9220_v43 = vpop.xlane.xlu1 %1452  ;;  %3118 = vadd.xlane.f32.xlu1 %v9218_v19  ;;  %v3041_v40 = vsub.f32 %v10908_v29, %v9144_v55  ;;  %3489 = vmatprep.mubr.bf16.mxu1 %v1828_v28  ;;  %v10910_v55 = vld [vmem:[#allocation4_spill] sm:$0xff] }
 0x56a   :  { %5933 = vrcp.f32 %v786_v26  ;;  %v5922_v20 = vpop.eup %5921  ;;  %10909 = vst [vmem:[#allocation137_spill] sm:$0xff] %v9231_v62  ;;  %v1484_v28 = vmul.f32 %v5920_v13, %v10910_v55  ;;  %v2740_v10 = vmul.f32 1.442695, %v2709_v4 }
 0x56b   :  { %5935 = vpow2.f32 %v2407_v22  ;;  %v3072_v22 = vmul.f32 1.442695, %v3041_v40  ;;  %v9243_v44 = vmul.f32 %v5922_v20, %v10906_v63 }
 0x56c   :  { %5937 = vrcp.f32 %v9146_v59  ;;  %v5924_v6 = vpop.eup %5923  ;;  %2119 = vadd.xlane.f32.xlu0 %v9228_v9 }
 0x56d   :  { %v1783_v39 = vpop.xlane.xlu0 %1782  ;;  %v9233_v18 = vpop.xlane.xlu1 %1123  ;;  %2786 = vadd.xlane.f32.xlu1 %v9231_v62  ;;  %v1485_v59 = vmul.f32 %v5924_v6, %v10911_v58  ;;  %v10913_v62 = vld [vmem:[#allocation54_spill] sm:$0xff] }
 0x56e   :  { %v5926_v26 = vpop.eup %5925  ;;  %5939 = vrcp.f32 %v1783_v39 }
 0x56f   :  { %5941 = vpow2.f32 %v2075_v17  ;;  %v1496_v29 = vpack.c.bf16 %v1485_v59, %v1484_v28  ;;  %v1153_v39 = vmul.f32 %v5926_v26, %v10913_v62  ;;  %v10916_v28 = vld [vmem:[#allocation140_spill] sm:$0xff] }
 0x570   :  { %v5928_v14 = vpop.eup %5927  ;;  %5943 = vrcp.f32 %v9163_v52  ;;  %3116 = vadd.xlane.f32.xlu0 %v9243_v44 }
 0x571   :  { %v5930_v5 = vpop.eup %5929  ;;  %v1451_v19 = vpop.xlane.xlu0 %1450  ;;  %v1154_v13 = vmul.f32 %v5928_v14, %v10914_v23  ;;  %3490 = vmatmul.mubr.bf16.gmra.mrb[20].mxu1 %v1496_v29  ;;  %v10915_v23 = vld [vmem:[#allocation118_spill] sm:$0xff] }
 0x572   :  { %v5932_v55 = vpop.eup %5931  ;;  %5945 = vrcp.f32 %v1451_v19  ;;  %v9248_v17 = vpop.xlane.xlu1 %791  ;;  %v9252_v20 = vmul.f32 %v5930_v5, %v10906_v63  ;;  %v10917_v14 = vld [vmem:[#allocation66_spill] sm:$0xff] }
 0x573   :  { %5947 = vpow2.f32 %v3072_v22  ;;  %v1164_v52 = vpack.c.bf16 %v1154_v13, %v1153_v39  ;;  %v821_v26 = vmul.f32 %v5932_v55, %v10915_v23  ;;  %v10918_v39 = vld [vmem:[#allocation114_spill] sm:$0xff]  ;;  %v10919_v23 = vld [vmem:[#allocation56_spill] sm:$0xff] }
 0x574   :  { %v5934_v40 = vpop.eup %5933  ;;  %5949 = vrcp.f32 %v9177_v27  ;;  %2784 = vadd.xlane.f32.xlu0 %v9252_v20 }
 0x575   :  { %v5936_v6 = vpop.eup %5935  ;;  %v1122_v62 = vpop.xlane.xlu0 %1121  ;;  %3400 = vmatprep.mubr.bf16.mxu0 %v1164_v52  ;;  %v822_v58 = vmul.f32 %v5934_v40, %v10916_v28  ;;  %v10920_v28 = vld [vmem:[#allocation143_spill] sm:$0xff] }
 0x576   :  { %v5938_v19 = vpop.eup %5937  ;;  %5951 = vrcp.f32 %v1122_v62  ;;  %v9257_v59 = vpop.xlane.xlu1 %1788  ;;  %v9261_v5 = vmul.f32 %v5936_v6, %v7508_v61 }
 0x577   :  { %5953 = vpow2.f32 %v2740_v10  ;;  %v832_v22 = vpack.c.bf16 %v822_v58, %v821_v26  ;;  %v1818_v29 = vmul.f32 %v5938_v19, %v10917_v14 }
 0x578   :  { %v5940_v2 = vpop.eup %5939  ;;  %5955 = vrcp.f32 %v9192_v8  ;;  %2455 = vadd.xlane.f32.xlu0 %v9261_v5 }
 0x579   :  { %v5942_v27 = vpop.eup %5941  ;;  %v790_v4 = vpop.xlane.xlu0 %789  ;;  %3401 = vmatmul.mubr.bf16.gmra.mrb[52].mxu0 %v832_v22  ;;  %v1819_v13 = vmul.f32 %v5940_v2, %v10918_v39  ;;  %v10922_v39 = vld [vmem:[#allocation116_spill] sm:$0xff] }
 0x57a   :  { %v5944_v55 = vpop.eup %5943  ;;  %5957 = vrcp.f32 %v790_v4  ;;  %v1457_v52 = vpop.xlane.xlu1 %1456  ;;  %v9268_v8 = vmul.f32 %v5942_v27, %v7508_v61  ;;  %v10921_v27 = vld [vmem:[#allocation120_spill] sm:$0xff] }
 0x57b   :  { %v1829_v10 = vpack.c.bf16 %v1819_v13, %v1818_v29  ;;  %5959 = vrcp.f32 %v9205_v50  ;;  %v1486_v26 = vmul.f32 %v5944_v55, %v10919_v23 }
 0x57c   :  { %v5946_v40 = vpop.eup %5945  ;;  %2123 = vadd.xlane.f32.xlu0 %v9268_v8 }
 0x57d   :  { %v5948_v6 = vpop.eup %5947  ;;  %v1787_v62 = vpop.xlane.xlu0 %1786  ;;  %3497 = vmatprep.mubr.bf16.mxu1 %v1829_v10  ;;  %v1487_v58 = vmul.f32 %v5946_v40, %v10920_v28 }
 0x57e   :  { %v5950_v19 = vpop.eup %5949  ;;  %5961 = vrcp.f32 %v1787_v62  ;;  %v2426_v22 = vpop.xlane.xlu1 %2425  ;;  %v9274_v14 = vmul.f32 %v5948_v6, %v7508_v61  ;;  %v10923_v6 = vld [vmem:[#allocation82_spill] sm:$0xff] }
 0x57f   :  { %v1497_v2 = vpack.c.bf16 %v1487_v58, %v1486_v26  ;;  %v1155_v29 = vmul.f32 %v5950_v19, %v10921_v27  ;;  %5963 = vrcp.f32 %v9220_v43  ;;  %v10924_v58 = vld [vmem:[#allocation144_spill] sm:$0xff] }
 0x580   :  { %v5952_v4 = vpop.eup %5951  ;;  %3120 = vadd.xlane.f32.xlu0 %v9274_v14 }
 0x581   :  { %v5954_v50 = vpop.eup %5953  ;;  %3498 = vmatmul.mubr.bf16.gmra.mrb[24].mxu1 %v1497_v2  ;;  %v1156_v13 = vmul.f32 %v5952_v4, %v10922_v39  ;;  %v1455_v55 = vpop.xlane.xlu0 %1454 }
 0x582   :  { %v5956_v10 = vpop.eup %5955  ;;  %v2094_v40 = vpop.xlane.xlu1 %2093  ;;  %5965 = vrcp.f32 %v1455_v55  ;;  %v9281_v26 = vmul.f32 %v5954_v50, %v7508_v61  ;;  %v10926_v50 = vld [vmem:[#allocation79_spill] sm:$0xff] }
 0x583   :  { %v1165_v62 = vpack.c.bf16 %v1156_v13, %v1155_v29  ;;  %v823_v28 = vmul.f32 %v5956_v10, %v10923_v6  ;;  %5967 = vrcp.f32 %v9233_v18  ;;  %v10925_v29 = vld [vmem:[#allocation59_spill] sm:$0xff] }
 0x584   :  { %v5958_v23 = vpop.eup %5957  ;;  %2788 = vadd.xlane.f32.xlu0 %v9281_v26 }
 0x585   :  { %3408 = vmatprep.mubr.bf16.mxu0 %v1165_v62  ;;  %v824_v19 = vmul.f32 %v5958_v23, %v10924_v58  ;;  %v5960_v2 = vpop.eup %5959  ;;  %v1126_v43 = vpop.xlane.xlu0 %1125 }
 0x586   :  { %v3091_v4 = vpop.xlane.xlu1 %3090  ;;  %5969 = vrcp.f32 %v1126_v43  ;;  %v1820_v13 = vmul.f32 %v5960_v2, %v10925_v29 }
 0x587   :  { %v833_v27 = vpack.c.bf16 %v824_v19, %v823_v28  ;;  %5971 = vrcp.f32 %v9248_v17  ;;  %v10927_v19 = vld [vmem:[#allocation93_spill] sm:$0xff] }
 0x588   :  { %v5962_v39 = vpop.eup %5961 }
 0x589   :  { %3409 = vmatmul.mubr.bf16.gmra.mrb[56].mxu0 %v833_v27  ;;  %v1821_v55 = vmul.f32 %v5962_v39, %v10926_v50  ;;  %v794_v10 = vpop.xlane.xlu0 %793  ;;  %v5964_v6 = vpop.eup %5963  ;;  %v10928_v50 = vld [vmem:[#allocation61_spill] sm:$0xff] }
 0x58a   :  { %v2759_v62 = vpop.xlane.xlu1 %2758  ;;  %5973 = vrcp.f32 %v794_v10  ;;  %v1488_v43 = vmul.f32 %v5964_v6, %v10927_v19  ;;  %v10930_v19 = vld [vmem:[#allocation71_spill] sm:$0xff] }
 0x58b   :  { %v1830_v23 = vpack.c.bf16 %v1821_v55, %v1820_v13  ;;  %5975 = vrcp.f32 %v9257_v59 }
 0x58c   :  { %v5966_v18 = vpop.eup %5965 }
 0x58d   :  { %3505 = vmatprep.mubr.bf16.mxu1 %v1830_v23  ;;  %v1791_v58 = vpop.xlane.xlu0 %1790  ;;  %v1489_v27 = vmul.f32 %v5966_v18, %v8682_v36  ;;  %v5968_v2 = vpop.eup %5967  ;;  %v10929_v18 = vld [vmem:[#allocation86_spill] sm:$0xff] }
 0x58e   :  { %v2430_v28 = vpop.xlane.xlu1 %2429  ;;  %5977 = vrcp.f32 %v1791_v58  ;;  %v1157_v55 = vmul.f32 %v5968_v2, %v10928_v50  ;;  %v10932_v50 = vld [vmem:[#allocation94_spill] sm:$0xff] }
 0x58f   :  { %v1498_v39 = vpack.c.bf16 %v1489_v27, %v1488_v43  ;;  %5979 = vrcp.f32 %v1457_v52 }
 0x590   :  { %v5970_v29 = vpop.eup %5969 }
 0x591   :  { %v1459_v17 = vpop.xlane.xlu0 %1458  ;;  %3506 = vmatmul.mubr.bf16.gmra.mrb[28].mxu1 %v1498_v39  ;;  %v1158_v10 = vmul.f32 %v5970_v29, %v8712_v51  ;;  %v5972_v23 = vpop.eup %5971  ;;  %v10931_v29 = vld [vmem:[#allocation64_spill] sm:$0xff] }
 0x592   :  { %v2098_v13 = vpop.xlane.xlu1 %2097  ;;  %5981 = vrcp.f32 %v1459_v17  ;;  %v825_v58 = vmul.f32 %v5972_v23, %v10929_v18  ;;  %v10933_v18 = vld [vmem:[#allocation126_spill] sm:$0xff] }
 0x593   :  { %v1166_v59 = vpack.c.bf16 %v1158_v10, %v1157_v55  ;;  %5983 = vrcp.f32 %v2426_v22 }
 0x594   :  { %v5974_v61 = vpop.eup %5973 }
 0x595   :  { %v2428_v6 = vpop.xlane.xlu0 %2427  ;;  %3416 = vmatprep.mubr.bf16.mxu0 %v1166_v59  ;;  %v826_v43 = vmul.f32 %v5974_v61, %v10930_v19  ;;  %v5976_v52 = vpop.eup %5975 }
 0x596   :  { %v3095_v36 = vpop.xlane.xlu1 %3094  ;;  %5985 = vrcp.f32 %v2428_v6  ;;  %v1822_v17 = vmul.f32 %v5976_v52, %v10931_v29 }
 0x597   :  { %v834_v27 = vpack.c.bf16 %v826_v43, %v825_v58  ;;  %5987 = vrcp.f32 %v2094_v40 }
 0x598   :  { %v5978_v39 = vpop.eup %5977 }
 0x599   :  { %v2096_v2 = vpop.xlane.xlu0 %2095  ;;  %3417 = vmatmul.mubr.bf16.gmra.mrb[60].mxu0 %v834_v27  ;;  %v1823_v55 = vmul.f32 %v5978_v39, %v10932_v50  ;;  %v5980_v22 = vpop.eup %5979  ;;  %v10934_v39 = vld [vmem:[#allocation127_spill] sm:$0xff] }
 0x59a   :  { %v2763_v51 = vpop.xlane.xlu1 %2762  ;;  %5989 = vrcp.f32 %v2096_v2  ;;  %v1490_v6 = vmul.f32 %v5980_v22, %v10933_v18 }
 0x59b   :  { %v1831_v10 = vpack.c.bf16 %v1823_v55, %v1822_v17  ;;  %5991 = vrcp.f32 %v3091_v4  ;;  %v10935_v55 = vld [vmem:[#allocation81_spill] sm:$0xff] }
 0x59c   :  { %v5982_v59 = vpop.eup %5981 }
 0x59d   :  { %v3093_v23 = vpop.xlane.xlu0 %3092  ;;  %3513 = vmatprep.mubr.bf16.mxu1 %v1831_v10  ;;  %v1491_v58 = vmul.f32 %v5982_v59, %v8790_v3  ;;  %v5984_v40 = vpop.eup %5983 }
 0x59e   :  { %v2434_v61 = vpop.xlane.xlu1 %2433  ;;  %5993 = vrcp.f32 %v3093_v23  ;;  %v2473_v2 = vmul.f32 %v5984_v40, %v10934_v39 }
 0x59f   :  { %v1499_v19 = vpack.c.bf16 %v1491_v58, %v1490_v6  ;;  %5995 = vrcp.f32 %v2759_v62  ;;  %v10936_v58 = vld [vmem:[#allocation122_spill] sm:$0xff] }
 0x5a0   :  { %v5986_v43 = vpop.eup %5985 }
 0x5a1   :  { %v2761_v52 = vpop.xlane.xlu0 %2760  ;;  %3514 = vmatmul.mubr.bf16.gmra.mrb[32].mxu1 %v1499_v19  ;;  %v2474_v29 = vmul.f32 %v5986_v43, %v8814_v37  ;;  %v5988_v4 = vpop.eup %5987 }
 0x5a2   :  { %v2102_v27 = vpop.xlane.xlu1 %2101  ;;  %5997 = vrcp.f32 %v2761_v52  ;;  %v2141_v22 = vmul.f32 %v5988_v4, %v10935_v55  ;;  %v10937_v52 = vld [vmem:[#allocation142_spill] sm:$0xff] }
 0x5a3   :  { %v2489_v17 = vpack.c.bf16 %v2474_v29, %v2473_v2  ;;  %5999 = vrcp.f32 %v2430_v28 }
 0x5a4   :  { %v5990_v50 = vpop.eup %5989 }
 0x5a5   :  { %v2142_v3 = vmul.f32 %v5990_v50, %v8835_v0  ;;  %v2432_v10 = vpop.xlane.xlu0 %2431  ;;  %3554 = vmatprep.mubr.bf16.mxu0 %v2489_v17  ;;  %v5992_v62 = vpop.eup %5991 }
 0x5a6   :  { %v3099_v59 = vpop.xlane.xlu1 %3098  ;;  %6001 = vrcp.f32 %v2432_v10  ;;  %v3138_v40 = vmul.f32 %v5992_v62, %v10936_v58  ;;  %v10939_v58 = vld [vmem:[#allocation125_spill] sm:$0xff] }
 0x5a7   :  { %v2157_v23 = vpack.c.bf16 %v2142_v3, %v2141_v22  ;;  %6003 = vrcp.f32 %v2098_v13  ;;  %v10938_v22 = vld [vmem:[#allocation155_spill] sm:$0xff] }
 0x5a8   :  { %v5994_v18 = vpop.eup %5993 }
 0x5a9   :  { %v2100_v6 = vpop.xlane.xlu0 %2099  ;;  %3555 = vmatmul.mubr.bf16.vlgmr.msra.gmra.mrb[64].mxu0 %v2157_v23  ;;  %v3139_v28 = vmul.f32 %v5994_v18, %v8859_v1  ;;  %v5996_v19 = vpop.eup %5995 }
 0x5aa   :  { %v9305_v37 = vpop.xlane.xlu1 %2766  ;;  %6005 = vrcp.f32 %v2100_v6  ;;  %v2806_v39 = vmul.f32 %v5996_v19, %v10937_v52 }
 0x5ab   :  { %v3154_v43 = vpack.c.bf16 %v3139_v28, %v3138_v40  ;;  %6007 = vrcp.f32 %v3095_v36 }
 0x5ac   :  { %v5998_v0 = vpop.eup %5997 }
 0x5ad   :  { %v2807_v2 = vmul.f32 %v5998_v0, %v8875_v32  ;;  %v3097_v29 = vpop.xlane.xlu0 %3096  ;;  %3651 = vmatprep.mubr.bf16.mxu1 %v3154_v43  ;;  %v6000_v4 = vpop.eup %5999 }
 0x5ae   :  { %v2438_v13 = vpop.xlane.xlu1 %2437  ;;  %6009 = vrcp.f32 %v3097_v29  ;;  %v2475_v3 = vmul.f32 %v6000_v4, %v10938_v22  ;;  %v10941_v4 = vld [vmem:[#allocation149_spill] sm:$0xff] }
 0x5af   :  { %v2822_v17 = vpack.c.bf16 %v2807_v2, %v2806_v39  ;;  %6011 = vrcp.f32 %v2763_v51  ;;  %v10940_v51 = vld [vmem:[#allocation7_spill] sm:$0xff] }
 0x5b0   :  { %v6002_v50 = vpop.eup %6001 }
 0x5b1   :  { %v2765_v55 = vpop.xlane.xlu0 %2764  ;;  %3652 = vmatmul.mubr.bf16.vlgmr.msra.gmra.mrb[36].mxu1 %v2822_v17  ;;  %v2476_v36 = vmul.f32 %v6002_v50, %v8893_v56  ;;  %v6004_v10 = vpop.eup %6003 }
 0x5b2   :  { %v9311_v1 = vpop.xlane.xlu1 %2105  ;;  %6013 = vrcp.f32 %v2765_v55  ;;  %v2143_v40 = vmul.f32 %v6004_v10, %v10939_v58 }
 0x5b3   :  { %v2490_v62 = vpack.c.bf16 %v2476_v36, %v2475_v3  ;;  %6015 = vrcp.f32 %v2434_v61 }
 0x5b4   :  { %v6006_v32 = vpop.eup %6005  ;;  %v4983_v23 = vpop.f32.mrb[32].mxu0 }
 0x5b5   :  { %v2436_v18 = vpop.xlane.xlu0 %2435  ;;  %v4984_v6 = vpop.f32.mrb[33].mxu0  ;;  %3562 = vmatprep.mubr.bf16.mxu0 %v2490_v62  ;;  %v2144_v28 = vmul.f32 %v6006_v32, %v10940_v51  ;;  %v10942_v62 = vld [vmem:[#allocation113_spill] sm:$0xff] }
 0x5b6   :  { %v6008_v19 = vpop.eup %6007  ;;  %6017 = vrcp.f32 %v2436_v18  ;;  %v4985_v43 = vadd.f32 %v4984_v6, %v4983_v23  ;;  %v9317_v0 = vpop.xlane.xlu1 %3102 }
 0x5b7   :  { %v4986_v52 = vpop.f32.mrb[34].mxu0  ;;  %v2158_v39 = vpack.c.bf16 %v2144_v28, %v2143_v40  ;;  %6019 = vrcp.f32 %v2102_v27  ;;  %v3140_v17 = vmul.f32 %v6008_v19, %v10941_v4  ;;  %v10943_v40 = vld [vmem:[#allocation131_spill] sm:$0xff] }
 0x5b8   :  { %v4987_v56 = vpop.f32.mrb[35].mxu0  ;;  %v6010_v2 = vpop.eup %6009 }
 0x5b9   :  { %v4988_v29 = vadd.f32 %v4987_v56, %v4986_v52  ;;  %v2104_v61 = vpop.xlane.xlu0 %2103  ;;  %3563 = vmatmul.mubr.bf16.gmra.mrb[68].mxu0 %v2158_v39  ;;  %v3141_v50 = vmul.f32 %v6010_v2, %v8926_v60  ;;  %v6012_v55 = vpop.eup %6011 }
 0x5ba   :  { %6021 = vrcp.f32 %v2104_v61  ;;  %v9321_v22 = vpop.xlane.xlu1 %2770  ;;  %v2808_v32 = vmul.f32 %v6012_v55, %v10942_v62  ;;  %v10944_v61 = vld [vmem:[#allocation8_spill] sm:$0xff] }
 0x5bb   :  { %v3155_v3 = vpack.c.bf16 %v3141_v50, %v3140_v17  ;;  %6023 = vrcp.f32 %v3099_v59 }
 0x5bc   :  { %v6014_v36 = vpop.eup %6013 }
 0x5bd   :  { %v3101_v10 = vpop.xlane.xlu0 %3100  ;;  %3659 = vmatprep.mubr.bf16.mxu1 %v3155_v3  ;;  %v2809_v27 = vmul.f32 %v6014_v36, %v8941_v25  ;;  %v6016_v23 = vpop.eup %6015  ;;  %v9335_v25 = vld [vmem:[%s9984_s9] ss:$0 sm:$0xff] }
 0x5be   :  { %6025 = vrcp.f32 %v3101_v10  ;;  %v9325_v18 = vpop.xlane.xlu1 %2441  ;;  %v2477_v51 = vmul.f32 %v6016_v23, %v10943_v40  ;;  %v3363_v50 = vadd.f32 %v4985_v43, %v9335_v25 }
 0x5bf   :  { %v2823_v6 = vpack.c.bf16 %v2809_v27, %v2808_v32  ;;  %6027 = vrcp.f32 %v9305_v37 }
 0x5c0   :  { %v6018_v58 = vpop.eup %6017 }
 0x5c1   :  { %v2769_v60 = vpop.xlane.xlu0 %2768  ;;  %3660 = vmatmul.mubr.bf16.gmra.mrb[40].mxu1 %v2823_v6  ;;  %v2478_v59 = vmul.f32 %v6018_v58, %v8959_v41  ;;  %v6020_v28 = vpop.eup %6019 }
 0x5c2   :  { %6029 = vrcp.f32 %v2769_v60  ;;  %v9330_v19 = vpop.xlane.xlu1 %2109  ;;  %v2145_v4 = vmul.f32 %v6020_v28, %v10944_v61 }
 0x5c3   :  { %v2491_v52 = vpack.c.bf16 %v2478_v59, %v2477_v51  ;;  %6031 = vrcp.f32 %v2438_v13  ;;  %v3366_v13 = vadd.f32 %v4988_v29, %v9335_v25  ;;  %v10946_v29 = vld [vmem:[#allocation6_spill] sm:$0xff] }
 0x5c4   :  { %v6022_v56 = vpop.eup %6021  ;;  %v5047_v39 = vpop.f32.mrb[4].mxu1 }
 0x5c5   :  { %v2440_v37 = vpop.xlane.xlu0 %2439  ;;  %v5048_v2 = vpop.f32.mrb[5].mxu1  ;;  %3570 = vmatprep.mubr.bf16.mxu0 %v2491_v52  ;;  %v2146_v41 = vmul.f32 %v6022_v56, %v8974_v54  ;;  %v10945_v54 = vld [vmem:[#allocation9_spill] sm:$0xff] }
 0x5c6   :  { %v6024_v17 = vpop.eup %6023  ;;  %6033 = vrcp.f32 %v2440_v37  ;;  %v5049_v55 = vadd.f32 %v5048_v2, %v5047_v39  ;;  %v9340_v3 = vpop.xlane.xlu1 %3106 }
 0x5c7   :  { %v5050_v36 = vpop.f32.mrb[6].mxu1  ;;  %v2159_v62 = vpack.c.bf16 %v2146_v41, %v2145_v4  ;;  %6035 = vrcp.f32 %v9311_v1  ;;  %v3142_v58 = vmul.f32 %v6024_v17, %v10945_v54  ;;  %v10947_v4 = vld [vmem:[#allocation160_spill] sm:$0xff] }
 0x5c8   :  { %v5051_v10 = vpop.f32.mrb[7].mxu1  ;;  %v6026_v32 = vpop.eup %6025  ;;  %v9344_v27 = vadd.f32 %v5049_v55, %v3363_v50 }
 0x5c9   :  { %v5052_v23 = vadd.f32 %v5051_v10, %v5050_v36  ;;  %v2108_v6 = vpop.xlane.xlu0 %2107  ;;  %3571 = vmatmul.mubr.bf16.gmra.mrb[72].mxu0 %v2159_v62  ;;  %v3143_v43 = vmul.f32 %v6026_v32, %v8992_v45  ;;  %v6028_v60 = vpop.eup %6027  ;;  %v10948_v32 = vld [vmem:[#allocation163_spill] sm:$0xff] }
 0x5ca   :  { %6037 = vrcp.f32 %v2108_v6  ;;  %v2775_v51 = vpop.xlane.xlu1 %2774  ;;  %v2810_v52 = vmul.f32 %v6028_v60, %v10946_v29 }
 0x5cb   :  { %v9348_v40 = vadd.f32 %v5052_v23, %v3366_v13  ;;  %v3156_v59 = vpack.c.bf16 %v3143_v43, %v3142_v58  ;;  %6039 = vrcp.f32 %v9317_v0 }
 0x5cc   :  { %v6030_v28 = vpop.eup %6029 }
 0x5cd   :  { %v3105_v1 = vpop.xlane.xlu0 %3104  ;;  %3667 = vmatprep.mubr.bf16.mxu1 %v3156_v59  ;;  %v2811_v56 = vmul.f32 %v6030_v28, %v9007_v47  ;;  %v6032_v39 = vpop.eup %6031  ;;  %v10949_v28 = vld [vmem:[#allocation26_spill] sm:$0xff] }
 0x5ce   :  { %6041 = vrcp.f32 %v3105_v1  ;;  %v2446_v37 = vpop.xlane.xlu1 %2445  ;;  %v2479_v41 = vmul.f32 %v6032_v39, %v10947_v4 }
 0x5cf   :  { %v2824_v2 = vpack.c.bf16 %v2811_v56, %v2810_v52  ;;  %6043 = vrcp.f32 %v9321_v22 }
 0x5d0   :  { %v6034_v45 = vpop.eup %6033 }
 0x5d1   :  { %v2773_v61 = vpop.xlane.xlu0 %2772  ;;  %3668 = vmatmul.mubr.bf16.gmra.mrb[44].mxu1 %v2824_v2  ;;  %v2480_v17 = vmul.f32 %v6034_v45, %v9025_v16  ;;  %v6036_v0 = vpop.eup %6035  ;;  %v10950_v45 = vld [vmem:[#allocation29_spill] sm:$0xff] }
 0x5d2   :  { %6045 = vrcp.f32 %v2773_v61  ;;  %v2114_v50 = vpop.xlane.xlu1 %2113  ;;  %v2147_v13 = vmul.f32 %v6036_v0, %v10948_v32 }
 0x5d3   :  { %v2492_v55 = vpack.c.bf16 %v2480_v17, %v2479_v41  ;;  %6047 = vrcp.f32 %v9325_v18 }
 0x5d4   :  { %v6038_v36 = vpop.eup %6037 }
 0x5d5   :  { %v4989_v47 = vpop.f32.mrb[36].mxu0  ;;  %v2444_v10 = vpop.xlane.xlu0 %2443  ;;  %3578 = vmatprep.mubr.bf16.mxu0 %v2492_v55  ;;  %v2148_v22 = vmul.f32 %v6038_v36, %v9040_v49 }
 0x5d6   :  { %v4990_v62 = vpop.f32.mrb[37].mxu0  ;;  %v6040_v23 = vpop.eup %6039  ;;  %6049 = vrcp.f32 %v2444_v10 }
 0x5d7   :  { %v4991_v6 = vadd.f32 %v4990_v62, %v4989_v47  ;;  %v9359_v54 = vpop.xlane.xlu1 %3110  ;;  %v4992_v16 = vpop.f32.mrb[38].mxu0  ;;  %v2160_v43 = vpack.c.bf16 %v2148_v22, %v2147_v13  ;;  %6051 = vrcp.f32 %v9330_v19  ;;  %v3144_v1 = vmul.f32 %v6040_v23, %v10949_v28  ;;  %v10952_v22 = vld [vmem:[#allocation13_spill] sm:$0xff] }
 0x5d8   :  { %v4993_v58 = vpop.f32.mrb[39].mxu0  ;;  %v6042_v60 = vpop.eup %6041 }
 0x5d9   :  { %v4994_v18 = vadd.f32 %v4993_v58, %v4992_v16  ;;  %v2112_v59 = vpop.xlane.xlu0 %2111  ;;  %3579 = vmatmul.mubr.bf16.gmra.mrb[76].mxu0 %v2160_v43  ;;  %v3145_v29 = vmul.f32 %v6042_v60, %v9058_v34  ;;  %v6044_v52 = vpop.eup %6043  ;;  %v10951_v34 = vld [vmem:[#allocation161_spill] sm:$0xff]  ;;  %v3371_v58 = vadd.f32 %v4991_v6, %v9335_v25 }
 0x5da   :  { %6053 = vrcp.f32 %v2112_v59  ;;  %v2812_v61 = vmul.f32 %v6044_v52, %v10950_v45 }
 0x5db   :  { %v3157_v49 = vpack.c.bf16 %v3145_v29, %v3144_v1  ;;  %6055 = vrcp.f32 %v9340_v3  ;;  %v2779_v39 = vpop.xlane.xlu1 %2778 }
 0x5dc   :  { %v6046_v56 = vpop.eup %6045 }
 0x5dd   :  { %v3109_v2 = vpop.xlane.xlu0 %3108  ;;  %3675 = vmatprep.mubr.bf16.mxu1 %v3157_v49  ;;  %v2813_v19 = vmul.f32 %v6046_v56, %v9073_v7  ;;  %v6048_v4 = vpop.eup %6047 }
 0x5de   :  { %6057 = vrcp.f32 %v3109_v2  ;;  %v2481_v55 = vmul.f32 %v6048_v4, %v10951_v34 }
 0x5df   :  { %v2825_v41 = vpack.c.bf16 %v2813_v19, %v2812_v61  ;;  %6059 = vrcp.f32 %v2775_v51  ;;  %v2450_v3 = vpop.xlane.xlu1 %2449 }
 0x5e0   :  { %v6050_v17 = vpop.eup %6049 }
 0x5e1   :  { %v2777_v0 = vpop.xlane.xlu0 %2776  ;;  %3676 = vmatmul.mubr.bf16.gmra.mrb[48].mxu1 %v2825_v41  ;;  %v2482_v36 = vmul.f32 %v6050_v17, %v9093_v11  ;;  %v6052_v47 = vpop.eup %6051 }
 0x5e2   :  { %6061 = vrcp.f32 %v2777_v0  ;;  %v2149_v23 = vmul.f32 %v6052_v47, %v10952_v22 }
 0x5e3   :  { %v2493_v10 = vpack.c.bf16 %v2482_v36, %v2481_v55  ;;  %6063 = vrcp.f32 %v2446_v37  ;;  %v3374_v37 = vadd.f32 %v4994_v18, %v9335_v25  ;;  %v2118_v1 = vpop.xlane.xlu1 %2117  ;;  %v10953_v18 = vld [vmem:[#allocation33_spill] sm:$0xff] }
 0x5e4   :  { %v6054_v62 = vpop.eup %6053  ;;  %v5053_v32 = vpop.f32.mrb[8].mxu1 }
 0x5e5   :  { %v2448_v13 = vpop.xlane.xlu0 %2447  ;;  %v5054_v7 = vpop.f32.mrb[9].mxu1  ;;  %3586 = vmatprep.mubr.bf16.mxu0 %v2493_v10  ;;  %v2150_v51 = vmul.f32 %v6054_v62, %v9106_v42 }
 0x5e6   :  { %v6056_v16 = vpop.eup %6055  ;;  %6065 = vrcp.f32 %v2448_v13  ;;  %v5055_v43 = vadd.f32 %v5054_v7, %v5053_v32  ;;  %v5056_v11 = vpop.f32.mrb[10].mxu1  ;;  %v10954_v13 = vld [vmem:[#allocation164_spill] sm:$0xff] }
 0x5e7   :  { %v5057_v60 = vpop.f32.mrb[11].mxu1  ;;  %v2161_v59 = vpack.c.bf16 %v2150_v51, %v2149_v23  ;;  %6067 = vrcp.f32 %v2114_v50  ;;  %v3146_v42 = vmul.f32 %v6056_v16, %v9028_v35  ;;  %v3115_v17 = vpop.xlane.xlu1 %3114 }
 0x5e8   :  { %v6058_v28 = vpop.eup %6057  ;;  %v9373_v29 = vadd.f32 %v5055_v43, %v3371_v58  ;;  %v5058_v52 = vadd.f32 %v5057_v60, %v5056_v11 }
 0x5e9   :  { %v2116_v49 = vpop.xlane.xlu0 %2115  ;;  %3587 = vmatmul.mubr.bf16.gmra.mrb[80].mxu0 %v2161_v59  ;;  %v3147_v56 = vmul.f32 %v6058_v28, %v9126_v24  ;;  %v6060_v6 = vpop.eup %6059 }
 0x5ea   :  { %v9377_v2 = vadd.f32 %v5058_v52, %v3374_v37  ;;  %6069 = vrcp.f32 %v2116_v49  ;;  %v2814_v19 = vmul.f32 %v6060_v6, %v10953_v18 }
 0x5eb   :  { %v3158_v45 = vpack.c.bf16 %v3147_v56, %v3146_v42  ;;  %6071 = vrcp.f32 %v9359_v54  ;;  %v2783_v10 = vpop.xlane.xlu1 %2782 }
 0x5ec   :  { %v6062_v61 = vpop.eup %6061 }
 0x5ed   :  { %v3113_v50 = vpop.xlane.xlu0 %3112  ;;  %3683 = vmatprep.mubr.bf16.mxu1 %v3158_v45  ;;  %v2815_v4 = vmul.f32 %v6062_v61, %v9139_v46  ;;  %v6064_v41 = vpop.eup %6063 }
 0x5ee   :  { %6073 = vrcp.f32 %v3113_v50  ;;  %v2483_v34 = vmul.f32 %v6064_v41, %v9061_v21 }
 0x5ef   :  { %v2826_v35 = vpack.c.bf16 %v2815_v4, %v2814_v19  ;;  %6075 = vrcp.f32 %v2779_v39  ;;  %v2454_v59 = vpop.xlane.xlu1 %2453 }
 0x5f0   :  { %v6066_v0 = vpop.eup %6065 }
 0x5f1   :  { %v2781_v24 = vpop.xlane.xlu0 %2780  ;;  %3684 = vmatmul.mubr.bf16.gmra.mrb[52].mxu1 %v2826_v35  ;;  %v2484_v55 = vmul.f32 %v6066_v0, %v9157_v57  ;;  %v6068_v36 = vpop.eup %6067 }
 0x5f2   :  { %6077 = vrcp.f32 %v2781_v24  ;;  %v2151_v7 = vmul.f32 %v6068_v36, %v10954_v13 }
 0x5f3   :  { %v2494_v54 = vpack.c.bf16 %v2484_v55, %v2483_v34  ;;  %6079 = vrcp.f32 %v2450_v3 }
 0x5f4   :  { %v6070_v47 = vpop.eup %6069  ;;  %v4995_v62 = vpop.f32.mrb[40].mxu0 }
 0x5f5   :  { %v2452_v46 = vpop.xlane.xlu0 %2451  ;;  %v4996_v32 = vpop.f32.mrb[41].mxu0  ;;  %3594 = vmatprep.mubr.bf16.mxu0 %v2494_v54  ;;  %v2152_v39 = vmul.f32 %v6070_v47, %v9170_v15 }
 0x5f6   :  { %v6072_v22 = vpop.eup %6071  ;;  %6081 = vrcp.f32 %v2452_v46  ;;  %v4997_v23 = vadd.f32 %v4996_v32, %v4995_v62  ;;  %v4998_v21 = vpop.f32.mrb[42].mxu0 }
 0x5f7   :  { %v4999_v51 = vpop.f32.mrb[43].mxu0  ;;  %v2162_v57 = vpack.c.bf16 %v2152_v39, %v2151_v7  ;;  %6083 = vrcp.f32 %v2118_v1  ;;  %v3148_v3 = vmul.f32 %v6072_v22, %v9096_v38  ;;  %v2122_v38 = vpop.xlane.xlu1 %2121 }
 0x5f8   :  { %v6074_v16 = vpop.eup %6073  ;;  %v5000_v58 = vadd.f32 %v4999_v51, %v4998_v21  ;;  %v3379_v35 = vadd.f32 %v4997_v23, %v9335_v25  ;;  %v10956_v23 = vld [vmem:[#allocation162_spill] sm:$0xff] }
 0x5f9   :  { %v2120_v43 = vpop.xlane.xlu0 %2119  ;;  %3595 = vmatmul.mubr.bf16.gmra.mrb[84].mxu0 %v2162_v57  ;;  %v3149_v11 = vmul.f32 %v6074_v16, %v9186_v53  ;;  %v6076_v60 = vpop.eup %6075 }
 0x5fa   :  { %6085 = vrcp.f32 %v2120_v43  ;;  %v2816_v52 = vmul.f32 %v6076_v60, %v9109_v30  ;;  %v3382_v36 = vadd.f32 %v5000_v58, %v9335_v25 }
 0x5fb   :  { %v3159_v28 = vpack.c.bf16 %v3149_v11, %v3148_v3  ;;  %6087 = vrcp.f32 %v3115_v17  ;;  %v10957_v3 = vld [vmem:[#allocation12_spill] sm:$0xff] }
 0x5fc   :  { %v6078_v15 = vpop.eup %6077 }
 0x5fd   :  { %v3117_v37 = vpop.xlane.xlu0 %3116  ;;  %3691 = vmatprep.mubr.bf16.mxu1 %v3159_v28  ;;  %v2817_v49 = vmul.f32 %v6078_v15, %v9200_v48  ;;  %v6080_v1 = vpop.eup %6079 }
 0x5fe   :  { %6089 = vrcp.f32 %v3117_v37  ;;  %v2485_v53 = vmul.f32 %v6080_v1, %v9129_v12  ;;  %v5584_v37 = vld [vmem:[%s9985_s6 + $0x8] sm:$0xff]  }
 0x5ff   :  { %v2827_v42 = vpack.c.bf16 %v2817_v49, %v2816_v52  ;;  %6091 = vrcp.f32 %v2783_v10  ;;  %v10958_v49 = vld [vmem:[#allocation151_spill] sm:$0xff] }
 0x600   :  { %v6082_v56 = vpop.eup %6081 }
 0x601   :  { %v2785_v6 = vpop.xlane.xlu0 %2784  ;;  %3692 = vmatmul.mubr.bf16.gmra.mrb[56].mxu1 %v2827_v42  ;;  %v2486_v45 = vmul.f32 %v6082_v56, %v9215_v33  ;;  %v6084_v61 = vpop.eup %6083 }
 0x602   :  { %6093 = vrcp.f32 %v2785_v6  ;;  %v2153_v4 = vmul.f32 %v6084_v61, %v9142_v31  ;;  %v3119_v33 = vpop.xlane.xlu1 %3118  ;;  %v10955_v31 = vld [vmem:[#allocation101_spill] sm:$0xff] }
 0x603   :  { %v2495_v50 = vpack.c.bf16 %v2486_v45, %v2485_v53  ;;  %6095 = vrcp.f32 %v2454_v59 }
 0x604   :  { %v6086_v18 = vpop.eup %6085  ;;  %v5059_v30 = vpop.f32.mrb[12].mxu1 }
 0x605   :  { %v2456_v19 = vpop.xlane.xlu0 %2455  ;;  %v5060_v48 = vpop.f32.mrb[13].mxu1  ;;  %3602 = vmatprep.mubr.bf16.mxu0 %v2495_v50  ;;  %v2154_v41 = vmul.f32 %v6086_v18, %v9228_v9  ;;  %v5585_v50 = vld [vmem:[%s9985_s6 + $0x10] sm:$0xff]   ;;  %v10959_v18 = vld [vmem:[#allocation165_spill] sm:$0xff] }
 0x606   :  { %v6088_v17 = vpop.eup %6087  ;;  %6097 = vrcp.f32 %v2456_v19  ;;  %v5061_v12 = vadd.f32 %v5060_v48, %v5059_v30  ;;  %v5062_v0 = vpop.f32.mrb[14].mxu1 }
 0x607   :  { %v5063_v24 = vpop.f32.mrb[15].mxu1  ;;  %v2163_v34 = vpack.c.bf16 %v2154_v41, %v2153_v4  ;;  %6099 = vrcp.f32 %v2122_v38  ;;  %v3150_v9 = vmul.f32 %v6088_v17, %v10955_v31  ;;  %v2787_v39 = vpop.xlane.xlu1 %2786  ;;  %v5586_v41 = vld [vmem:[%s9985_s6 + $0x18] sm:$0xff]   ;;  %v10960_v17 = vld [vmem:[#allocation137_spill] sm:$0xff] }
 0x608   :  { %v6090_v55 = vpop.eup %6089  ;;  %v9396_v54 = vadd.f32 %v5061_v12, %v3379_v35  ;;  %v5064_v47 = vadd.f32 %v5063_v24, %v5062_v0 }
 0x609   :  { %v2124_v10 = vpop.xlane.xlu0 %2123  ;;  %3603 = vmatmul.mubr.bf16.gmra.mrb[88].mxu0 %v2163_v34  ;;  %v3151_v62 = vmul.f32 %v6090_v55, %v9243_v44  ;;  %v6092_v46 = vpop.eup %6091  ;;  %v5583_v44 = vld [vmem:[%s9985_s6] sm:$0xff]   ;;  %v5588_v34 = vld [vmem:[%s9985_s6 + $0x28] sm:$0xff]  }
 0x60a   :  { %v9400_v32 = vadd.f32 %v5064_v47, %v3382_v36  ;;  %6101 = vrcp.f32 %v2124_v10  ;;  %v2818_v21 = vmul.f32 %v6092_v46, %v10956_v23  ;;  %5364 = vmatprep.subr.bf16.mxu0 %v5583_v44  ;;  %v5589_v46 = vld [vmem:[%s9985_s6 + $0x30] sm:$0xff]  }
 0x60b   :  { %v3160_v13 = vpack.c.bf16 %v3151_v62, %v3150_v9  ;;  %6103 = vrcp.f32 %v3119_v33  ;;  %5365 = vmatpush3.bf16.msra.mxu0 %v5583_v44  ;;  %v10961_v33 = vmov 0.0  }
 0x60c   :  { %v6094_v7 = vpop.eup %6093  ;;  %5366 = vmatprep.subr.bf16.mxu0 %v5584_v37 }
 0x60d   :  { %v3121_v22 = vpop.xlane.xlu0 %3120  ;;  %3699 = vmatprep.mubr.bf16.mxu1 %v3160_v13  ;;  %v2819_v51 = vmul.f32 %v6094_v7, %v9252_v20  ;;  %v6096_v57 = vpop.eup %6095  ;;  %v5590_v7 = vld [vmem:[%s9985_s6 + $0x38] sm:$0xff]  }
 0x60e   :  { %6105 = vrcp.f32 %v3121_v22  ;;  %v2487_v11 = vmul.f32 %v6096_v57, %v10957_v3 }
 0x60f   :  { %v2828_v16 = vpack.c.bf16 %v2819_v51, %v2818_v21  ;;  %6107 = vrcp.f32 %v2787_v39  ;;  %5367 = vmatpush3.bf16.msra.mxu0 %v5584_v37 }
 0x610   :  { %v6098_v58 = vpop.eup %6097  ;;  %5368 = vmatprep.subr.bf16.mxu0 %v5585_v50 }
 0x611   :  { %v2789_v43 = vpop.xlane.xlu0 %2788  ;;  %3700 = vmatmul.mubr.bf16.gmra.mrb[60].mxu1 %v2828_v16  ;;  %v2488_v60 = vmul.f32 %v6098_v58, %v9261_v5  ;;  %v6100_v59 = vpop.eup %6099 }
 0x612   :  { %6109 = vrcp.f32 %v2789_v43  ;;  %v2155_v1 = vmul.f32 %v6100_v59, %v10958_v49 }
 0x613   :  { %v2496_v28 = vpack.c.bf16 %v2488_v60, %v2487_v11  ;;  %5369 = vmatpush3.bf16.msra.mxu0 %v5585_v50 }
 0x614   :  { %v6102_v20 = vpop.eup %6101  ;;  %v5001_v15 = vpop.f32.mrb[44].mxu0  ;;  %5370 = vmatprep.subr.bf16.mxu0 %v5586_v41 }
 0x615   :  { %v5002_v52 = vpop.f32.mrb[45].mxu0  ;;  %3610 = vmatprep.mubr.bf16.mxu0 %v2496_v28  ;;  %v2156_v42 = vmul.f32 %v6102_v20, %v9268_v8  ;;  %v6104_v56 = vpop.eup %6103 }
 0x616   :  { %v5003_v38 = vadd.f32 %v5002_v52, %v5001_v15  ;;  %v5004_v5 = vpop.f32.mrb[46].mxu0  ;;  %v3152_v30 = vmul.f32 %v6104_v56, %v10959_v18 }
 0x617   :  { %v5005_v6 = vpop.f32.mrb[47].mxu0  ;;  %v2164_v53 = vpack.c.bf16 %v2156_v42, %v2155_v1  ;;  %5371 = vmatpush3.bf16.msra.mxu0 %v5586_v41 }
 0x618   :  { %v6106_v45 = vpop.eup %6105  ;;  %v5006_v61 = vadd.f32 %v5005_v6, %v5004_v5 }
 0x619   :  { %3611 = vmatmul.mubr.bf16.gmra.mrb[92].mxu0 %v2164_v53  ;;  %v3153_v19 = vmul.f32 %v6106_v45, %v9274_v14  ;;  %v6108_v48 = vpop.eup %6107  ;;  %v5587_v14 = vld [vmem:[%s9985_s6 + $0x20] sm:$0xff]  }
 0x61a   :  { %v2820_v35 = vmul.f32 %v6108_v48, %v10960_v17  ;;  %5372 = vmatprep.subr.bf16.mxu0 %v5587_v14  ;;  %v3390_v31 = vadd.f32 %v5006_v61, %v9335_v25 }
 0x61b   :  { %v3161_v8 = vpack.c.bf16 %v3153_v19, %v3152_v30  ;;  %5373 = vmatpush3.bf16.msra.mxu0 %v5587_v14 }
 0x61c   :  { %v6110_v4 = vpop.eup %6109  ;;  %5374 = vmatprep.subr.bf16.mxu0 %v5588_v34 }
 0x61d   :  { %3707 = vmatprep.mubr.bf16.mxu1 %v3161_v8  ;;  %v2821_v12 = vmul.f32 %v6110_v4, %v9281_v26  ;;  %v3387_v26 = vadd.f32 %v5003_v38, %v9335_v25 }
 0x61f   :  { %v2829_v0 = vpack.c.bf16 %v2821_v12, %v2820_v35  ;;  %5375 = vmatpush3.bf16.msra.mxu0 %v5588_v34 }
 0x620   :  { %5376 = vmatprep.subr.bf16.mxu0 %v5589_v46 }
 0x621   :  { %3708 = vmatmul.mubr.bf16.gmra.mrb[64].mxu1 %v2829_v0 }
 0x622   :  { %5412 = vmatprep.mubr.msk.bf16.mxu1 %vm10962_vm15, %v10961_v33 }
 0x623   :  { %5377 = vmatpush3.bf16.msra.mxu0 %v5589_v46 }
 0x624   :  { %v5065_v24 = vpop.f32.mrb[16].mxu1  ;;  %5378 = vmatprep.subr.bf16.mxu0 %v5590_v7 }
 0x625   :  { %v5066_v55 = vpop.f32.mrb[17].mxu1 }
 0x626   :  { %v5067_v36 = vadd.f32 %v5066_v55, %v5065_v24  ;;  %v5068_v47 = vpop.f32.mrb[18].mxu1 }
 0x627   :  { %v5069_v10 = vpop.f32.mrb[19].mxu1  ;;  %5379 = vmatpush3.bf16.msra.mxu0 %v5590_v7 }
 0x628   :  { %v9434_v9 = vadd.f32 %v5067_v36, %v3387_v26  ;;  %v5070_v62 = vadd.f32 %v5069_v10, %v5068_v47 }
 0x62a   :  { %v9439_v13 = vadd.f32 %v5070_v62, %v3390_v31 }
 0x634   :  { %v5007_v39 = vpop.f32.mrb[48].mxu0 }
 0x635   :  { %v5008_v22 = vpop.f32.mrb[49].mxu0 }
 0x636   :  { %v5009_v23 = vadd.f32 %v5008_v22, %v5007_v39  ;;  %v5010_v21 = vpop.f32.mrb[50].mxu0 }
 0x637   :  { %v5011_v51 = vpop.f32.mrb[51].mxu0 }
 0x638   :  { %v5012_v57 = vadd.f32 %v5011_v51, %v5010_v21  ;;  %v3395_v44 = vadd.f32 %v5009_v23, %v9335_v25 }
 0x63a   :  { %v3398_v60 = vadd.f32 %v5012_v57, %v9335_v25 }
 0x644   :  { %v5071_v16 = vpop.f32.mrb[20].mxu1 }
 0x645   :  { %v5072_v58 = vpop.f32.mrb[21].mxu1 }
 0x646   :  { %v5073_v43 = vadd.f32 %v5072_v58, %v5071_v16  ;;  %v5074_v3 = vpop.f32.mrb[22].mxu1 }
 0x647   :  { %v5075_v11 = vpop.f32.mrb[23].mxu1 }
 0x648   :  { %v9446_v59 = vadd.f32 %v5073_v43, %v3395_v44  ;;  %v5076_v28 = vadd.f32 %v5075_v11, %v5074_v3  ;;  %v9469_v3 = vld [vmem:[%s9986_s8] sm:$0xff]  }
 0x649   :  { %5416 = vmatprep.subr.bf16.mxu0 %v9469_v3 }
 0x64a   :  { %v9448_v20 = vadd.f32 %v5076_v28, %v3398_v60 }
 0x64c   :  { %v5013_v15 = vpop.f32.mrb[52].mxu0 }
 0x64d   :  { %v5014_v37 = vpop.f32.mrb[53].mxu0 }
 0x64e   :  { %v5015_v52 = vadd.f32 %v5014_v37, %v5013_v15  ;;  %v5016_v49 = vpop.f32.mrb[54].mxu0 }
 0x64f   :  { %v5017_v1 = vpop.f32.mrb[55].mxu0 }
 0x650   :  { %v5018_v42 = vadd.f32 %v5017_v1, %v5016_v49  ;;  %v3403_v5 = vadd.f32 %v5015_v52, %v9335_v25 }
 0x652   :  { %v3406_v61 = vadd.f32 %v5018_v42, %v9335_v25 }
 0x654   :  { %v5077_v56 = vpop.f32.mrb[24].mxu1 }
 0x655   :  { %v5078_v38 = vpop.f32.mrb[25].mxu1 }
 0x656   :  { %v5079_v6 = vadd.f32 %v5078_v38, %v5077_v56  ;;  %v5080_v53 = vpop.f32.mrb[26].mxu1 }
 0x657   :  { %v5081_v45 = vpop.f32.mrb[27].mxu1 }
 0x658   :  { %v9452_v50 = vadd.f32 %v5079_v6, %v3403_v5  ;;  %v5082_v18 = vadd.f32 %v5081_v45, %v5080_v53 }
 0x65a   :  { %v9454_v30 = vadd.f32 %v5082_v18, %v3406_v61 }
 0x65c   :  { %v5019_v19 = vpop.f32.mrb[56].mxu0 }
 0x65d   :  { %v5020_v48 = vpop.f32.mrb[57].mxu0 }
 0x65e   :  { %v5021_v8 = vadd.f32 %v5020_v48, %v5019_v19  ;;  %v5022_v4 = vpop.f32.mrb[58].mxu0 }
 0x65f   :  { %v5023_v41 = vpop.f32.mrb[59].mxu0 }
 0x660   :  { %v5024_v17 = vadd.f32 %v5023_v41, %v5022_v4  ;;  %v3411_v0 = vadd.f32 %v5021_v8, %v9335_v25 }
 0x662   :  { %v3414_v55 = vadd.f32 %v5024_v17, %v9335_v25 }
 0x664   :  { %v5083_v35 = vpop.f32.mrb[28].mxu1 }
 0x665   :  { %v5084_v12 = vpop.f32.mrb[29].mxu1 }
 0x666   :  { %v5085_v14 = vadd.f32 %v5084_v12, %v5083_v35  ;;  %v5086_v24 = vpop.f32.mrb[30].mxu1 }
 0x667   :  { %v5087_v34 = vpop.f32.mrb[31].mxu1 }
 0x668   :  { %v9458_v26 = vadd.f32 %v5085_v14, %v3411_v0  ;;  %v5088_v36 = vadd.f32 %v5087_v34, %v5086_v24 }
 0x66a   :  { %v9460_v47 = vadd.f32 %v5088_v36, %v3414_v55 }
 0x66c   :  { %v5025_v10 = vpop.f32.mrb[60].mxu0 }
 0x66d   :  { %v5026_v31 = vpop.f32.mrb[61].mxu0 }
 0x66e   :  { %v5027_v62 = vadd.f32 %v5026_v31, %v5025_v10  ;;  %v5028_v46 = vpop.f32.mrb[62].mxu0 }
 0x66f   :  { %v5029_v7 = vpop.f32.mrb[63].mxu0 }
 0x670   :  { %v5030_v39 = vadd.f32 %v5029_v7, %v5028_v46  ;;  %v3419_v21 = vadd.f32 %v5027_v62, %v9335_v25 }
 0x672   :  { %v3422_v58 = vadd.f32 %v5030_v39, %v9335_v25 }
 0x674   :  { %v5089_v22 = vpop.f32.mrb[32].mxu1 }
 0x675   :  { %v5090_v23 = vpop.f32.mrb[33].mxu1 }
 0x676   :  { %v5091_v51 = vadd.f32 %v5090_v23, %v5089_v22  ;;  %v5092_v57 = vpop.f32.mrb[34].mxu1 }
 0x677   :  { %v5093_v16 = vpop.f32.mrb[35].mxu1 }
 0x678   :  { %v9464_v44 = vadd.f32 %v5091_v51, %v3419_v21  ;;  %v5094_v43 = vadd.f32 %v5093_v16, %v5092_v57 }
 0x67a   :  { %v9471_v11 = vadd.f32 %v5094_v43, %v3422_v58 }
 0x67c   :  { %v5111_v60 = vpop.f32.mrb[64].mxu0 }
 0x67d   :  { %v5112_v28 = vpop.f32.mrb[65].mxu0 }
 0x67e   :  { %v5113_v15 = vadd.f32 %v5112_v28, %v5111_v60  ;;  %v5114_v37 = vpop.f32.mrb[66].mxu0 }
 0x67f   :  { %v5115_v52 = vpop.f32.mrb[67].mxu0 }
 0x680   :  { %v3557_v49 = vadd.f32 %v5113_v15, %v9344_v27  ;;  %v5116_v25 = vadd.f32 %v5115_v52, %v5114_v37 }
 0x682   :  { %v3560_v1 = vadd.f32 %v5116_v25, %v9348_v40 }
 0x684   :  { %v5175_v42 = vpop.f32.mrb[36].mxu1 }
 0x685   :  { %v5176_v56 = vpop.f32.mrb[37].mxu1 }
 0x686   :  { %v5177_v38 = vadd.f32 %v5176_v56, %v5175_v42  ;;  %v5178_v5 = vpop.f32.mrb[38].mxu1 }
 0x687   :  { %v5179_v6 = vpop.f32.mrb[39].mxu1 }
 0x688   :  { %v3654_v53 = vadd.f32 %v5177_v38, %v3557_v49  ;;  %v5180_v45 = vadd.f32 %v5179_v6, %v5178_v5 }
 0x68a   :  { %v3732_v61 = vmin.f32 %v3654_v53, 0.0  ;;  %v3657_v18 = vadd.f32 %v5180_v45, %v3560_v1  ;;  %vm3716_vm15 = vcmp.gt.f32.partialorder %v3654_v53, 0.0 }
 0x68c   :  { %v3748_v19 = vmul.f32 1.442695, %v3732_v61  ;;  %v3733_v48 = vmin.f32 %v3657_v18, 0.0  ;;  %v5117_v8 = vpop.f32.mrb[68].mxu0  ;;  %vm3717_vm13 = vcmp.gt.f32.partialorder %v3657_v18, 0.0 }
 0x68d   :  { %v5118_v4 = vpop.f32.mrb[69].mxu0 }
 0x68e   :  { %6111 = vpow2.f32 %v3748_v19  ;;  %v3750_v41 = vmul.f32 1.442695, %v3733_v48  ;;  %v5119_v17 = vadd.f32 %v5118_v4, %v5117_v8  ;;  %v5120_v27 = vpop.f32.mrb[70].mxu0 }
 0x68f   :  { %v5121_v35 = vpop.f32.mrb[71].mxu0 }
 0x690   :  { %6113 = vpow2.f32 %v3750_v41  ;;  %v3565_v40 = vadd.f32 %v5119_v17, %v9373_v29  ;;  %v5122_v12 = vadd.f32 %v5121_v35, %v5120_v27 }
 0x692   :  { %v3568_v0 = vadd.f32 %v5122_v12, %v9377_v2 }
 0x694   :  { %v5181_v14 = vpop.f32.mrb[40].mxu1 }
 0x695   :  { %v5182_v24 = vpop.f32.mrb[41].mxu1 }
 0x696   :  { %v5183_v34 = vadd.f32 %v5182_v24, %v5181_v14  ;;  %v5184_v55 = vpop.f32.mrb[42].mxu1 }
 0x697   :  { %v5185_v36 = vpop.f32.mrb[43].mxu1 }
 0x698   :  { %v6112_v10 = vpop.eup %6111  ;;  %v3662_v31 = vadd.f32 %v5183_v34, %v3565_v40  ;;  %v5186_v62 = vadd.f32 %v5185_v36, %v5184_v55  ;;  %v5593_v36 = vld [vmem:[%s9986_s8 + $0x10] sm:$0xff]  }
 0x699   :  { %v4854_v46 = vadd.f32 -1.0, %v6112_v10 }
 0x69a   :  { %v6114_v7 = vpop.eup %6113  ;;  %v3734_v39 = vmin.f32 %v3662_v31, 0.0  ;;  %v3665_v22 = vadd.f32 %v5186_v62, %v3568_v0  ;;  %v5592_v0 = vld [vmem:[%s9986_s8 + $0x8] sm:$0xff]  }
 0x69b   :  { %v4855_v23 = vadd.f32 -1.0, %v6114_v7  ;;  %v3796_v2 = vsel %vm3716_vm15, %v3654_v53, %v4854_v46  ;;  %v5594_v46 = vld [vmem:[%s9986_s8 + $0x18] sm:$0xff]  }
 0x69c   :  { %v3752_v21 = vmul.f32 1.442695, %v3734_v39  ;;  %v3735_v29 = vmin.f32 %v3665_v22, 0.0  ;;  %v5123_v51 = vpop.f32.mrb[72].mxu0  ;;  %vm3719_vm15 = vcmp.gt.f32.partialorder %v3665_v22, 0.0 }
 0x69d   :  { %v5124_v57 = vpop.f32.mrb[73].mxu0  ;;  %v3797_v16 = vsel %vm3717_vm13, %v3657_v18, %v4855_v23  ;;  %vm3718_vm13 = vcmp.gt.f32.partialorder %v3662_v31, 0.0 }
 0x69e   :  { %6115 = vpow2.f32 %v3752_v21  ;;  %v3754_v58 = vmul.f32 1.442695, %v3735_v29  ;;  %v5125_v43 = vadd.f32 %v5124_v57, %v5123_v51  ;;  %v5126_v60 = vpop.f32.mrb[74].mxu0  ;;  %v9478_v28 = vpack.c.bf16 %v3797_v16, %v3796_v2  ;;  %v5595_v51 = vld [vmem:[%s9986_s8 + $0x20] sm:$0xff]  }
 0x69f   :  { %v5127_v15 = vpop.f32.mrb[75].mxu0 }
 0x6a0   :  { %6117 = vpow2.f32 %v3754_v58  ;;  %v3573_v37 = vadd.f32 %v5125_v43, %v9396_v54  ;;  %v5128_v52 = vadd.f32 %v5127_v15, %v5126_v60  ;;  %5380 = vmatprep.mubr.bf16.mxu0 %v9478_v28  ;;  %5397 = vmatpush3.bf16.xpose.msra.mxu1 %v9478_v28 }
 0x6a1   :  { %5398 = vmatprep.subr.bf16.mxu1 %v10961_v33 }
 0x6a2   :  { %v3576_v49 = vadd.f32 %v5128_v52, %v9400_v32 }
 0x6a4   :  { %v5187_v25 = vpop.f32.mrb[44].mxu1 }
 0x6a5   :  { %v5188_v1 = vpop.f32.mrb[45].mxu1 }
 0x6a6   :  { %v5189_v42 = vadd.f32 %v5188_v1, %v5187_v25  ;;  %v5190_v56 = vpop.f32.mrb[46].mxu1  ;;  %v5596_v1 = vld [vmem:[%s9986_s8 + $0x28] sm:$0xff]  }
 0x6a7   :  { %v5191_v38 = vpop.f32.mrb[47].mxu1 }
 0x6a8   :  { %v6116_v5 = vpop.eup %6115  ;;  %v3670_v6 = vadd.f32 %v5189_v42, %v3573_v37  ;;  %v5192_v53 = vadd.f32 %v5191_v38, %v5190_v56 }
 0x6a9   :  { %v4856_v45 = vadd.f32 -1.0, %v6116_v5 }
 0x6aa   :  { %v6118_v61 = vpop.eup %6117  ;;  %v3736_v54 = vmin.f32 %v3670_v6, 0.0  ;;  %v3673_v18 = vadd.f32 %v5192_v53, %v3576_v49 }
 0x6ab   :  { %v4857_v19 = vadd.f32 -1.0, %v6118_v61  ;;  %v3798_v41 = vsel %vm3718_vm13, %v3662_v31, %v4856_v45  ;;  %vm3720_vm13 = vcmp.gt.f32.partialorder %v3670_v6, 0.0 }
 0x6ac   :  { %v3756_v48 = vmul.f32 1.442695, %v3736_v54  ;;  %v3737_v8 = vmin.f32 %v3673_v18, 0.0  ;;  %v5129_v4 = vpop.f32.mrb[76].mxu0  ;;  %v5598_v54 = vld [vmem:[%s9986_s8 + $0x38] sm:$0xff]  }
 0x6ad   :  { %v3799_v32 = vsel %vm3719_vm15, %v3665_v22, %v4857_v19  ;;  %v5130_v17 = vpop.f32.mrb[77].mxu0  ;;  %vm3721_vm15 = vcmp.gt.f32.partialorder %v3673_v18, 0.0 }
 0x6ae   :  { %v9485_v27 = vpack.c.bf16 %v3799_v32, %v3798_v41  ;;  %6119 = vpow2.f32 %v3756_v48  ;;  %v3758_v35 = vmul.f32 1.442695, %v3737_v8  ;;  %v5131_v40 = vadd.f32 %v5130_v17, %v5129_v4  ;;  %v5132_v12 = vpop.f32.mrb[78].mxu0 }
 0x6af   :  { %v5133_v14 = vpop.f32.mrb[79].mxu0 }
 0x6b0   :  { %6121 = vpow2.f32 %v3758_v35  ;;  %v3581_v24 = vadd.f32 %v5131_v40, %v9434_v9  ;;  %v5134_v34 = vadd.f32 %v5133_v14, %v5132_v12  ;;  %5381 = vmatmul.mubr.bf16.vlgmr.msra.gmra.mrb[96].mxu0 %v9485_v27  ;;  %5399 = vmatpush3.bf16.xpose.msra.mxu1 %v9485_v27 }
 0x6b1   :  { %5400 = vmatprep.subr.bf16.mxu1 %v10961_v33  ;;  %5417 = vmatpush3.bf16.msra.mxu0 %v9469_v3 }
 0x6b2   :  { %v3584_v55 = vadd.f32 %v5134_v34, %v9439_v13  ;;  %5418 = vmatprep.subr.bf16.mxu0 %v5592_v0 }
 0x6b4   :  { %v5193_v10 = vpop.f32.mrb[48].mxu1 }
 0x6b5   :  { %v5194_v31 = vpop.f32.mrb[49].mxu1  ;;  %5419 = vmatpush3.bf16.msra.mxu0 %v5592_v0 }
 0x6b6   :  { %v5195_v9 = vadd.f32 %v5194_v31, %v5193_v10  ;;  %v5196_v62 = vpop.f32.mrb[50].mxu1  ;;  %5420 = vmatprep.subr.bf16.mxu0 %v5593_v36 }
 0x6b7   :  { %v5197_v7 = vpop.f32.mrb[51].mxu1 }
 0x6b8   :  { %v6120_v39 = vpop.eup %6119  ;;  %v3678_v3 = vadd.f32 %v5195_v9, %v3581_v24  ;;  %v5198_v22 = vadd.f32 %v5197_v7, %v5196_v62 }
 0x6b9   :  { %v4858_v13 = vadd.f32 -1.0, %v6120_v39  ;;  %5421 = vmatpush3.bf16.msra.mxu0 %v5593_v36 }
 0x6ba   :  { %v6122_v23 = vpop.eup %6121  ;;  %v3738_v21 = vmin.f32 %v3678_v3, 0.0  ;;  %v3681_v29 = vadd.f32 %v5198_v22, %v3584_v55  ;;  %5422 = vmatprep.subr.bf16.mxu0 %v5594_v46 }
 0x6bb   :  { %v4859_v57 = vadd.f32 -1.0, %v6122_v23  ;;  %v3800_v60 = vsel %vm3720_vm13, %v3670_v6, %v4858_v13  ;;  %v5597_v6 = vld [vmem:[%s9986_s8 + $0x30] sm:$0xff]   ;;  %vm3722_vm13 = vcmp.gt.f32.partialorder %v3678_v3, 0.0 }
 0x6bc   :  { %v3760_v2 = vmul.f32 1.442695, %v3738_v21  ;;  %v3739_v16 = vmin.f32 %v3681_v29, 0.0  ;;  %v5135_v58 = vpop.f32.mrb[80].mxu0 }
 0x6bd   :  { %v5136_v43 = vpop.f32.mrb[81].mxu0  ;;  %v3801_v15 = vsel %vm3721_vm15, %v3673_v18, %v4859_v57  ;;  %5423 = vmatpush3.bf16.msra.mxu0 %v5594_v46  ;;  %vm3723_vm15 = vcmp.gt.f32.partialorder %v3681_v29, 0.0 }
 0x6be   :  { %6123 = vpow2.f32 %v3760_v2  ;;  %v3762_v37 = vmul.f32 1.442695, %v3739_v16  ;;  %v5137_v52 = vadd.f32 %v5136_v43, %v5135_v58  ;;  %v5138_v49 = vpop.f32.mrb[82].mxu0  ;;  %v9505_v25 = vpack.c.bf16 %v3801_v15, %v3800_v60  ;;  %5424 = vmatprep.subr.bf16.mxu0 %v5595_v51 }
 0x6bf   :  { %v5139_v42 = vpop.f32.mrb[83].mxu0 }
 0x6c0   :  { %6125 = vpow2.f32 %v3762_v37  ;;  %v3589_v56 = vadd.f32 %v5137_v52, %v9446_v59  ;;  %v5140_v38 = vadd.f32 %v5139_v42, %v5138_v49  ;;  %5384 = vmatprep.mubr.bf16.mxu0 %v9505_v25  ;;  %5401 = vmatpush3.bf16.xpose.msra.mxu1 %v9505_v25 }
 0x6c1   :  { %5402 = vmatprep.subr.bf16.mxu1 %v10961_v33  ;;  %5425 = vmatpush3.bf16.msra.mxu0 %v5595_v51 }
 0x6c2   :  { %v3592_v5 = vadd.f32 %v5140_v38, %v9448_v20  ;;  %5426 = vmatprep.subr.bf16.mxu0 %v5596_v1 }
 0x6c4   :  { %v5199_v53 = vpop.f32.mrb[52].mxu1 }
 0x6c5   :  { %v5200_v45 = vpop.f32.mrb[53].mxu1  ;;  %5427 = vmatpush3.bf16.msra.mxu0 %v5596_v1 }
 0x6c6   :  { %v5201_v61 = vadd.f32 %v5200_v45, %v5199_v53  ;;  %v5202_v59 = vpop.f32.mrb[54].mxu1  ;;  %5428 = vmatprep.subr.bf16.mxu0 %v5597_v6 }
 0x6c7   :  { %v5203_v18 = vpop.f32.mrb[55].mxu1 }
 0x6c8   :  { %v6124_v19 = vpop.eup %6123  ;;  %v3686_v48 = vadd.f32 %v5201_v61, %v3589_v56  ;;  %v5204_v8 = vadd.f32 %v5203_v18, %v5202_v59 }
 0x6c9   :  { %v4860_v20 = vadd.f32 -1.0, %v6124_v19  ;;  %5429 = vmatpush3.bf16.msra.mxu0 %v5597_v6 }
 0x6ca   :  { %v6126_v4 = vpop.eup %6125  ;;  %v3740_v41 = vmin.f32 %v3686_v48, 0.0  ;;  %v3689_v32 = vadd.f32 %v5204_v8, %v3592_v5  ;;  %5430 = vmatprep.subr.bf16.mxu0 %v5598_v54 }
 0x6cb   :  { %v4861_v17 = vadd.f32 -1.0, %v6126_v4  ;;  %v3802_v14 = vsel %vm3722_vm13, %v3678_v3, %v4860_v20  ;;  %vm3724_vm13 = vcmp.gt.f32.partialorder %v3686_v48, 0.0 }
 0x6cc   :  { %v3764_v35 = vmul.f32 1.442695, %v3740_v41  ;;  %v3741_v40 = vmin.f32 %v3689_v32, 0.0  ;;  %v5141_v12 = vpop.f32.mrb[84].mxu0 }
 0x6cd   :  { %v5142_v0 = vpop.f32.mrb[85].mxu0  ;;  %v3803_v24 = vsel %vm3723_vm15, %v3681_v29, %v4861_v17  ;;  %5431 = vmatpush3.bf16.msra.mxu0 %v5598_v54  ;;  %vm3725_vm15 = vcmp.gt.f32.partialorder %v3689_v32, 0.0 }
 0x6ce   :  { %6127 = vpow2.f32 %v3764_v35  ;;  %v3766_v34 = vmul.f32 1.442695, %v3741_v40  ;;  %v5143_v55 = vadd.f32 %v5142_v0, %v5141_v12  ;;  %v5144_v36 = vpop.f32.mrb[86].mxu0  ;;  %v9521_v10 = vpack.c.bf16 %v3803_v24, %v3802_v14 }
 0x6cf   :  { %v5145_v31 = vpop.f32.mrb[87].mxu0 }
 0x6d0   :  { %6129 = vpow2.f32 %v3766_v34  ;;  %v3597_v9 = vadd.f32 %v5143_v55, %v9452_v50  ;;  %v5146_v62 = vadd.f32 %v5145_v31, %v5144_v36  ;;  %5385 = vmatmul.mubr.bf16.gmra.mrb[100].mxu0 %v9521_v10  ;;  %5403 = vmatpush3.bf16.xpose.msra.mxu1 %v9521_v10 }
 0x6d1   :  { %5404 = vmatprep.subr.bf16.mxu1 %v10961_v33 }
 0x6d2   :  { %v3600_v46 = vadd.f32 %v5146_v62, %v9454_v30 }
 0x6d4   :  { %v5205_v7 = vpop.f32.mrb[56].mxu1 }
 0x6d5   :  { %v5206_v39 = vpop.f32.mrb[57].mxu1 }
 0x6d6   :  { %v5207_v3 = vadd.f32 %v5206_v39, %v5205_v7  ;;  %v5208_v22 = vpop.f32.mrb[58].mxu1 }
 0x6d7   :  { %v5209_v13 = vpop.f32.mrb[59].mxu1 }
 0x6d8   :  { %v6128_v23 = vpop.eup %6127  ;;  %v3694_v21 = vadd.f32 %v5207_v3, %v3597_v9  ;;  %v5210_v29 = vadd.f32 %v5209_v13, %v5208_v22 }
 0x6d9   :  { %v4862_v51 = vadd.f32 -1.0, %v6128_v23 }
 0x6da   :  { %v6130_v57 = vpop.eup %6129  ;;  %v3742_v50 = vmin.f32 %v3694_v21, 0.0  ;;  %v3697_v2 = vadd.f32 %v5210_v29, %v3600_v46 }
 0x6db   :  { %v4863_v16 = vadd.f32 -1.0, %v6130_v57  ;;  %v3804_v30 = vsel %vm3724_vm13, %v3686_v48, %v4862_v51  ;;  %vm3726_vm13 = vcmp.gt.f32.partialorder %v3694_v21, 0.0 }
 0x6dc   :  { %v3768_v58 = vmul.f32 1.442695, %v3742_v50  ;;  %v3743_v43 = vmin.f32 %v3697_v2, 0.0  ;;  %v5147_v60 = vpop.f32.mrb[88].mxu0 }
 0x6dd   :  { %v5148_v15 = vpop.f32.mrb[89].mxu0  ;;  %v3805_v37 = vsel %vm3725_vm15, %v3689_v32, %v4863_v16  ;;  %vm3727_vm15 = vcmp.gt.f32.partialorder %v3697_v2, 0.0 }
 0x6de   :  { %6131 = vpow2.f32 %v3768_v58  ;;  %v3770_v52 = vmul.f32 1.442695, %v3743_v43  ;;  %v5149_v49 = vadd.f32 %v5148_v15, %v5147_v60  ;;  %v5150_v1 = vpop.f32.mrb[90].mxu0  ;;  %v9528_v42 = vpack.c.bf16 %v3805_v37, %v3804_v30 }
 0x6df   :  { %v5151_v56 = vpop.f32.mrb[91].mxu0 }
 0x6e0   :  { %6133 = vpow2.f32 %v3770_v52  ;;  %v3605_v38 = vadd.f32 %v5149_v49, %v9458_v26  ;;  %v5152_v5 = vadd.f32 %v5151_v56, %v5150_v1  ;;  %5388 = vmatprep.mubr.bf16.mxu0 %v9528_v42  ;;  %5405 = vmatpush3.bf16.xpose.msra.mxu1 %v9528_v42  ;;  %v3989_v56 = vld [vmem:[%s9987_s7] sm:$0xf] }
 0x6e1   :  { %5406 = vmatprep.subr.bf16.mxu1 %v10961_v33 }
 0x6e2   :  { %v3608_v6 = vadd.f32 %v5152_v5, %v9460_v47 }
 0x6e4   :  { %v5211_v53 = vpop.f32.mrb[60].mxu1 }
 0x6e5   :  { %v5212_v45 = vpop.f32.mrb[61].mxu1 }
 0x6e6   :  { %v5213_v61 = vadd.f32 %v5212_v45, %v5211_v53  ;;  %v5214_v59 = vpop.f32.mrb[62].mxu1 }
 0x6e7   :  { %v5215_v54 = vpop.f32.mrb[63].mxu1 }
 0x6e8   :  { %v6132_v18 = vpop.eup %6131  ;;  %v3702_v19 = vadd.f32 %v5213_v61, %v3605_v38  ;;  %v5216_v48 = vadd.f32 %v5215_v54, %v5214_v59 }
 0x6e9   :  { %v4864_v8 = vadd.f32 -1.0, %v6132_v18 }
 0x6ea   :  { %v6134_v20 = vpop.eup %6133  ;;  %v3744_v26 = vmin.f32 %v3702_v19, 0.0  ;;  %v3705_v4 = vadd.f32 %v5216_v48, %v3608_v6 }
 0x6eb   :  { %v4865_v41 = vadd.f32 -1.0, %v6134_v20  ;;  %v3806_v47 = vsel %vm3726_vm13, %v3694_v21, %v4864_v8  ;;  %vm3728_vm13 = vcmp.gt.f32.partialorder %v3702_v19, 0.0 }
 0x6ec   :  { %v3772_v32 = vmul.f32 1.442695, %v3744_v26  ;;  %v3745_v17 = vmin.f32 %v3705_v4, 0.0  ;;  %v5153_v35 = vpop.f32.mrb[92].mxu0 }
 0x6ed   :  { %v5154_v40 = vpop.f32.mrb[93].mxu0  ;;  %v3807_v12 = vsel %vm3727_vm15, %v3697_v2, %v4865_v41  ;;  %vm3729_vm15 = vcmp.gt.f32.partialorder %v3705_v4, 0.0 }
 0x6ee   :  { %6135 = vpow2.f32 %v3772_v32  ;;  %v3774_v0 = vmul.f32 1.442695, %v3745_v17  ;;  %v5155_v14 = vadd.f32 %v5154_v40, %v5153_v35  ;;  %v5156_v24 = vpop.f32.mrb[94].mxu0  ;;  %v3817_v34 = vpack.c.bf16 %v3807_v12, %v3806_v47 }
 0x6ef   :  { %v5157_v55 = vpop.f32.mrb[95].mxu0 }
 0x6f0   :  { %6137 = vpow2.f32 %v3774_v0  ;;  %v3613_v36 = vadd.f32 %v5155_v14, %v9464_v44  ;;  %v5158_v31 = vadd.f32 %v5157_v55, %v5156_v24  ;;  %5389 = vmatmul.mubr.bf16.gmra.mrb[104].mxu0 %v3817_v34  ;;  %5407 = vmatpush3.bf16.xpose.msra.mxu1 %v3817_v34 }
 0x6f1   :  { %5408 = vmatprep.subr.bf16.mxu1 %v10961_v33 }
 0x6f2   :  { %v3616_v9 = vadd.f32 %v5158_v31, %v9471_v11 }
 0x6f4   :  { %v5217_v62 = vpop.f32.mrb[64].mxu1 }
 0x6f5   :  { %v5218_v46 = vpop.f32.mrb[65].mxu1 }
 0x6f6   :  { %v5219_v7 = vadd.f32 %v5218_v46, %v5217_v62  ;;  %v5220_v39 = vpop.f32.mrb[66].mxu1 }
 0x6f7   :  { %v5221_v3 = vpop.f32.mrb[67].mxu1 }
 0x6f8   :  { %v6136_v22 = vpop.eup %6135  ;;  %v3710_v13 = vadd.f32 %v5219_v7, %v3613_v36  ;;  %v5222_v23 = vadd.f32 %v5221_v3, %v5220_v39 }
 0x6f9   :  { %v4866_v21 = vadd.f32 -1.0, %v6136_v22 }
 0x6fa   :  { %v6138_v29 = vpop.eup %6137  ;;  %v3746_v51 = vmin.f32 %v3710_v13, 0.0  ;;  %v3713_v57 = vadd.f32 %v5222_v23, %v3616_v9  ;;  %vm3730_vm0 = vcmp.gt.f32.partialorder %v3710_v13, 0.0 }
 0x6fb   :  { %v4867_v44 = vadd.f32 -1.0, %v6138_v29  ;;  %v3808_v16 = vsel %vm3728_vm13, %v3702_v19, %v4866_v21  ;;  %v10963_v21 = vld [vmem:[#allocation5_spill] sm:$0xff] }
 0x6fc   :  { %v3776_v50 = vmul.f32 1.442695, %v3746_v51  ;;  %v3747_v2 = vmin.f32 %v3713_v57, 0.0  ;;  %vm3731_vm14 = vcmp.gt.f32.partialorder %v3713_v57, 0.0 }
 0x6fd   :  { %v3809_v58 = vsel %vm3729_vm15, %v3705_v4, %v4867_v44 }
 0x6fe   :  { %6139 = vpow2.f32 %v3776_v50  ;;  %v3778_v11 = vmul.f32 1.442695, %v3747_v2  ;;  %v3818_v43 = vpack.c.bf16 %v3809_v58, %v3808_v16 }
 0x700   :  { %6141 = vpow2.f32 %v3778_v11  ;;  %5392 = vmatprep.mubr.bf16.mxu0 %v3818_v43  ;;  %5409 = vmatpush3.bf16.xpose.msra.mxu1 %v3818_v43 }
 0x701   :  { %5410 = vmatprep.subr.bf16.mxu1 %v10961_v33 }
 0x708   :  { %v6140_v60 = vpop.eup %6139 }
 0x709   :  { %v4868_v15 = vadd.f32 -1.0, %v6140_v60 }
 0x70a   :  { %v6142_v30 = vpop.eup %6141 }
 0x70b   :  { %v4869_v37 = vadd.f32 -1.0, %v6142_v30  ;;  %v3810_v52 = vsel %vm3730_vm0, %v3710_v13, %v4868_v15  ;;  %v10964_v30 = vld [vmem:[#allocation21_spill] sm:$0xff] }
 0x70d   :  { %v3811_v49 = vsel %vm3731_vm14, %v3713_v57, %v4869_v37 }
 0x70e   :  { %v3819_v1 = vpack.c.bf16 %v3811_v49, %v3810_v52 }
 0x710   :  { %5393 = vmatmul.mubr.bf16.gmra.mrb[108].mxu0 %v3819_v1  ;;  %5411 = vmatpush3.bf16.xpose.msra.mxu1 %v3819_v1 }
 0x711   :  { %5432 = vmatprep.mubr.bf16.mxu0 %v9478_v28 }
 0x717   :  { %5413 = vmatmul.mubr.bf16.vlgmr.msra.gmra.mrb[68].mxu1 %v3989_v56  ;;  %v10965_v56 = vld [vmem:[#allocation25_spill] sm:$0xff] }
 0x718   :  { %5433 = vmatmul.mubr.bf16.vlgmr.msra.gmra.mrb[112].mxu0 %v9485_v27 }
 0x719   :  { %5436 = vmatprep.mubr.bf16.mxu0 %v9505_v25 }
 0x720   :  { %5437 = vmatmul.mubr.bf16.gmra.mrb[116].mxu0 %v9521_v10 }
 0x721   :  { %5440 = vmatprep.mubr.bf16.mxu0 %v9528_v42 }
 0x728   :  { %5441 = vmatmul.mubr.bf16.gmra.mrb[120].mxu0 %v3817_v34 }
 0x729   :  { %5444 = vmatprep.mubr.bf16.mxu0 %v3818_v43 }
 0x730   :  { %5445 = vmatmul.mubr.bf16.gmra.mrb[124].mxu0 %v3819_v1 }
 0x783   :  { %v5382_v33 = vpop.f32.mrb[96].mxu0 }
 0x784   :  { %v3918_v38 = vpop.f32.mrb[97].mxu0 }
 0x785   :  { %v5383_v5 = vpop.f32.mrb[98].mxu0 }
 0x786   :  { %v3982_v28 = vpack.c.bf16 %v5383_v5, %v5382_v33  ;;  %v3921_v6 = vpop.f32.mrb[99].mxu0  ;;  %v10966_v5 = vld [vmem:[#allocation19_spill] sm:$0xff] }
 0x787   :  { %v3981_v53 = vpack.c.bf16 %v3921_v6, %v3918_v38 }
 0x789   :  { %5448 = vmatprep.subr.bf16.mxu1 %v3981_v53 }
 0x78a   :  { %5449 = vmatpush3.bf16.msra.mxu1 %v3981_v53 }
 0x78b   :  { %5450 = vmatprep.subr.bf16.mxu1 %v3982_v28 }
 0x78e   :  { %5451 = vmatpush3.bf16.msra.mxu1 %v3982_v28 }
 0x7a3   :  { %v5386_v27 = vpop.f32.mrb[100].mxu0 }
 0x7a4   :  { %v3934_v45 = vpop.f32.mrb[101].mxu0 }
 0x7a5   :  { %v5387_v25 = vpop.f32.mrb[102].mxu0 }
 0x7a6   :  { %v3984_v61 = vpack.c.bf16 %v5387_v25, %v5386_v27  ;;  %v3937_v10 = vpop.f32.mrb[103].mxu0  ;;  %v10967_v25 = vld [vmem:[#allocation24_spill] sm:$0xff] }
 0x7a7   :  { %v3983_v59 = vpack.c.bf16 %v3937_v10, %v3934_v45 }
 0x7a9   :  { %5452 = vmatprep.subr.bf16.mxu1 %v3983_v59 }
 0x7aa   :  { %5453 = vmatpush3.bf16.msra.mxu1 %v3983_v59 }
 0x7ab   :  { %5454 = vmatprep.subr.bf16.mxu1 %v3984_v61 }
 0x7ae   :  { %5455 = vmatpush3.bf16.msra.mxu1 %v3984_v61 }
 0x7c3   :  { %v5390_v42 = vpop.f32.mrb[104].mxu0 }
 0x7c4   :  { %v3950_v54 = vpop.f32.mrb[105].mxu0 }
 0x7c5   :  { %v5391_v18 = vpop.f32.mrb[106].mxu0 }
 0x7c6   :  { %v3986_v19 = vpack.c.bf16 %v5391_v18, %v5390_v42  ;;  %v3953_v48 = vpop.f32.mrb[107].mxu0  ;;  %v10968_v18 = vld [vmem:[#allocation50_spill] sm:$0xff] }
 0x7c7   :  { %v3985_v8 = vpack.c.bf16 %v3953_v48, %v3950_v54 }
 0x7c9   :  { %5456 = vmatprep.subr.bf16.mxu1 %v3985_v8 }
 0x7ca   :  { %5457 = vmatpush3.bf16.msra.mxu1 %v3985_v8 }
 0x7cb   :  { %5458 = vmatprep.subr.bf16.mxu1 %v3986_v19 }
 0x7ce   :  { %5459 = vmatpush3.bf16.msra.mxu1 %v3986_v19 }
 0x7e3   :  { %v5394_v20 = vpop.f32.mrb[108].mxu0 }
 0x7e4   :  { %v3966_v26 = vpop.f32.mrb[109].mxu0 }
 0x7e5   :  { %v5395_v4 = vpop.f32.mrb[110].mxu0 }
 0x7e6   :  { %v3988_v41 = vpack.c.bf16 %v5395_v4, %v5394_v20  ;;  %v3969_v32 = vpop.f32.mrb[111].mxu0 }
 0x7e7   :  { %v3987_v17 = vpack.c.bf16 %v3969_v32, %v3966_v26 }
 0x7e9   :  { %5460 = vmatprep.subr.bf16.mxu1 %v3987_v17 }
 0x7ea   :  { %5461 = vmatpush3.bf16.msra.mxu1 %v3987_v17  ;;  %v4024_v35 = vpop.f32.mrb[68].mxu1 }
 0x7eb   :  { %v5434_v40 = vpop.f32.mrb[112].mxu0  ;;  %5462 = vmatprep.subr.bf16.mxu1 %v3988_v41  ;;  %v5414_v47 = vpop.f32.mrb[69].mxu1  ;;  %v9548_v29 = vrot.slane %v4024_v35, %v10963_v21 }
 0x7ec   :  { %v4128_v12 = vpop.f32.mrb[113].mxu0  ;;  %v4027_v0 = vpop.f32.mrb[70].mxu1 }
 0x7ed   :  { %4193 = vperm.xlu1 %5558, %v4128_v12   ;;  %v5435_v14 = vpop.f32.mrb[114].mxu0  ;;  %v5415_v24 = vpop.f32.mrb[71].mxu1 }
 0x7ee   :  { %v4131_v34 = vpop.f32.mrb[115].mxu0  ;;  %5463 = vmatpush3.bf16.msra.mxu1 %v3988_v41  ;;  %v10969_v41 = vld [vmem:[#allocation30_spill] sm:$0xff] }
 0x7ef   :  { %4198 = vperm.xlu0 %5557, %v4131_v34  }
 0x7f1   :  { %4203 = vperm.xlu1 %5558, %v5434_v40  }
 0x7f3   :  { %v5438_v55 = vpop.f32.mrb[116].mxu0 }
 0x7f4   :  { %v4144_v36 = vpop.f32.mrb[117].mxu0 }
 0x7f5   :  { %4208 = vperm.xlu1 %5558, %v5435_v14   ;;  %v5439_v31 = vpop.f32.mrb[118].mxu0  ;;  %v10970_v14 = vld [vmem:[#allocation34_spill] sm:$0xff] }
 0x7f6   :  { %v4147_v9 = vpop.f32.mrb[119].mxu0 }
 0x7f9   :  { %4213 = vperm.xlu1 %5558, %v4144_v36  }
 0x7fb   :  { %v5442_v62 = vpop.f32.mrb[120].mxu0 }
 0x7fc   :  { %4243 = vperm.xlu0 %5557, %v5442_v62   ;;  %v4160_v46 = vpop.f32.mrb[121].mxu0 }
 0x7fd   :  { %4218 = vperm.xlu1 %5558, %v4147_v9   ;;  %v5443_v7 = vpop.f32.mrb[122].mxu0 }
 0x7fe   :  { %v4163_v39 = vpop.f32.mrb[123].mxu0 }
 0x801   :  { %4223 = vperm.xlu1 %5558, %v5438_v55  }
 0x803   :  { %v5446_v3 = vpop.f32.mrb[124].mxu0 }
 0x804   :  { %v4176_v22 = vpop.f32.mrb[125].mxu0 }
 0x805   :  { %4228 = vperm.xlu1 %5558, %v5439_v31   ;;  %4253 = vperm.xlu0 %5557, %v4176_v22   ;;  %v5447_v13 = vpop.f32.mrb[126].mxu0 }
 0x806   :  { %v4179_v23 = vpop.f32.mrb[127].mxu0 }
 0x809   :  { %4233 = vperm.xlu1 %5558, %v4160_v46   ;;  %4263 = vperm.xlu0 %5557, %v5446_v3   ;;  %v10971_v46 = vld [vmem:[#allocation37_spill] sm:$0xff] }
 0x80d   :  { %4238 = vperm.xlu1 %5558, %v4163_v39  }
 0x811   :  { %4248 = vperm.xlu1 %5558, %v5443_v7  }
 0x815   :  { %4258 = vperm.xlu1 %5558, %v4179_v23  }
 0x819   :  { %4268 = vperm.xlu1 %5558, %v5447_v13  }
 0x86c   :  { %v4194_v51 = vpop.permute.xlu1 %4193 }
 0x86d   :  { %v4275_v57 = vadd.f32 %v9548_v29, %v4194_v51 }
 0x86e   :  { %v4199_v44 = vpop.permute.xlu0 %4198 }
 0x86f   :  { %v4291_v50 = vmul.f32 0.2, %v4275_v57  ;;  %v4276_v2 = vadd.f32 %v9548_v29, %v4199_v44 }
 0x870   :  { %v4204_v16 = vpop.permute.xlu1 %4203 }
 0x871   :  { %v4307_v58 = vmax.f32 %v4275_v57, %v4291_v50  ;;  %v4292_v11 = vmul.f32 0.2, %v4276_v2  ;;  %v4277_v43 = vadd.f32 %v9548_v29, %v4204_v16  ;;  %v10972_v50 = vld [vmem:[#allocation40_spill] sm:$0xff] }
 0x873   :  { %v4308_v60 = vmax.f32 %v4276_v2, %v4292_v11  ;;  %v4293_v15 = vmul.f32 0.2, %v4277_v43  ;;  %v9555_v37 = vsel %vm68_vm2, %v4307_v58, -1e+30  ;;  %vm10980_vm2 = vcmp.gt.f32.partialorder %v10906_v63, 0.0 }
 0x874   :  { %v4209_v52 = vpop.permute.xlu1 %4208  ;;  %4339 = vmax.xlane.f32.xlu0 %v9555_v37 }
 0x875   :  { %v4309_v49 = vmax.f32 %v4277_v43, %v4293_v15  ;;  %v4278_v1 = vadd.f32 %v9548_v29, %v4209_v52  ;;  %v9561_v33 = vsel %vm69_vm4, %v4308_v60, -1e+30  ;;  %v10973_v43 = vld [vmem:[#allocation63_spill] sm:$0xff] }
 0x876   :  { %4341 = vmax.xlane.f32.xlu1 %v9561_v33 }
 0x877   :  { %v4294_v38 = vmul.f32 0.2, %v4278_v1  ;;  %v9566_v28 = vsel %vm70_vm1, %v4309_v49, -1e+30 }
 0x878   :  { %v4214_v6 = vpop.permute.xlu1 %4213  ;;  %4343 = vmax.xlane.f32.xlu0 %v9566_v28 }
 0x879   :  { %v4310_v53 = vmax.f32 %v4278_v1, %v4294_v38  ;;  %v4279_v27 = vadd.f32 %v9548_v29, %v4214_v6  ;;  %v10974_v1 = vld [vmem:[#allocation52_spill] sm:$0xff] }
 0x87b   :  { %v4295_v45 = vmul.f32 0.2, %v4279_v27  ;;  %v9572_v61 = vsel %vm71_vm3, %v4310_v53, -1e+30  ;;  %v4244_v26 = vpop.permute.xlu0 %4243 }
 0x87c   :  { %v4219_v10 = vpop.permute.xlu1 %4218  ;;  %4345 = vmax.xlane.f32.xlu0 %v9572_v61  ;;  %v4285_v47 = vadd.f32 %v9548_v29, %v4244_v26 }
 0x87d   :  { %v4311_v59 = vmax.f32 %v4279_v27, %v4295_v45  ;;  %v4280_v42 = vadd.f32 %v9548_v29, %v4219_v10 }
 0x87e   :  { %v4301_v31 = vmul.f32 0.2, %v4285_v47 }
 0x87f   :  { %v4296_v54 = vmul.f32 0.2, %v4280_v42  ;;  %v9578_v19 = vsel %vm72_vm9, %v4311_v59, -1e+30  ;;  %v10975_v59 = vld [vmem:[#allocation58_spill] sm:$0xff] }
 0x880   :  { %v4224_v48 = vpop.permute.xlu1 %4223  ;;  %4347 = vmax.xlane.f32.xlu1 %v9578_v19  ;;  %v4317_v23 = vmax.f32 %v4285_v47, %v4301_v31 }
 0x881   :  { %v4312_v8 = vmax.f32 %v4280_v42, %v4296_v54  ;;  %v4281_v20 = vadd.f32 %v9548_v29, %v4224_v48  ;;  %v10976_v54 = vld [vmem:[#allocation80_spill] sm:$0xff] }
 0x882   :  { %v9611_v60 = vsel %vm78_vm12, %v4317_v23, -1e+30  ;;  %vm10977_vm0 = vcmp.gt.f32.partialorder %v10976_v54, 0.0 }
 0x883   :  { %v4297_v4 = vmul.f32 0.2, %v4281_v20  ;;  %v9584_v32 = vsel %vm73_vm5, %v4312_v8, -1e+30 }
 0x884   :  { %v4229_v17 = vpop.permute.xlu1 %4228  ;;  %4349 = vmax.xlane.f32.xlu0 %v9584_v32  ;;  %v4254_v12 = vpop.permute.xlu0 %4253 }
 0x885   :  { %v4313_v35 = vmax.f32 %v4281_v20, %v4297_v4  ;;  %v4282_v40 = vadd.f32 %v9548_v29, %v4229_v17  ;;  %v4287_v9 = vadd.f32 %v9548_v29, %v4254_v12  ;;  %v10978_v17 = vld [vmem:[#allocation159_spill] sm:$0xff]  ;;  %v10981_v12 = vld [vmem:[#allocation18_spill] sm:$0xff] }
 0x886   :  { %vm10979_vm1 = vcmp.gt.f32.partialorder %v10978_v17, 0.0  ;;  %vm10982_vm3 = vcmp.gt.f32.partialorder %v10981_v12, 0.0 }
 0x887   :  { %v4298_v0 = vmul.f32 0.2, %v4282_v40  ;;  %v9591_v24 = vsel %vm74_vm6, %v4313_v35, -1e+30  ;;  %v4303_v51 = vmul.f32 0.2, %v4287_v9 }
 0x888   :  { %v4234_v34 = vpop.permute.xlu1 %4233  ;;  %4351 = vmax.xlane.f32.xlu1 %v9591_v24  ;;  %v4264_v39 = vpop.permute.xlu0 %4263 }
 0x889   :  { %v4314_v55 = vmax.f32 %v4282_v40, %v4298_v0  ;;  %v4283_v36 = vadd.f32 %v9548_v29, %v4234_v34  ;;  %v4289_v57 = vadd.f32 %v9548_v29, %v4264_v39  ;;  %v4319_v15 = vmax.f32 %v4287_v9, %v4303_v51 }
 0x88b   :  { %v4299_v62 = vmul.f32 0.2, %v4283_v36  ;;  %v9598_v7 = vsel %vm75_vm7, %v4314_v55, -1e+30  ;;  %v4305_v52 = vmul.f32 0.2, %v4289_v57 }
 0x88c   :  { %v4239_v3 = vpop.permute.xlu1 %4238  ;;  %4353 = vmax.xlane.f32.xlu0 %v9598_v7  ;;  %v9626_v48 = vsel %vm10977_vm0, %v4319_v15, -1e+30 }
 0x88d   :  { %v4315_v22 = vmax.f32 %v4283_v36, %v4299_v62  ;;  %v4284_v13 = vadd.f32 %v9548_v29, %v4239_v3  ;;  %v4321_v45 = vmax.f32 %v4289_v57, %v4305_v52 }
 0x88f   :  { %v4300_v44 = vmul.f32 0.2, %v4284_v13  ;;  %v9605_v2 = vsel %vm76_vm8, %v4315_v22, -1e+30  ;;  %v9633_v35 = vsel %vm10979_vm1, %v4321_v45, -1e+30 }
 0x890   :  { %v4249_v16 = vpop.permute.xlu1 %4248  ;;  %4355 = vmax.xlane.f32.xlu1 %v9605_v2 }
 0x891   :  { %v4316_v58 = vmax.f32 %v4284_v13, %v4300_v44  ;;  %v4286_v11 = vadd.f32 %v9548_v29, %v4249_v16 }
 0x893   :  { %v4302_v49 = vmul.f32 0.2, %v4286_v11  ;;  %v9615_v38 = vsel %vm77_vm10, %v4316_v58, -1e+30 }
 0x894   :  { %4357 = vmax.xlane.f32.xlu0 %v9615_v38  ;;  %4359 = vmax.xlane.f32.xlu1 %v9611_v60  ;;  %v4259_v6 = vpop.permute.xlu1 %4258 }
 0x895   :  { %v4318_v53 = vmax.f32 %v4286_v11, %v4302_v49  ;;  %v4288_v27 = vadd.f32 %v9548_v29, %v4259_v6 }
 0x897   :  { %v4304_v10 = vmul.f32 0.2, %v4288_v27  ;;  %v9622_v42 = vsel %vm79_vm11, %v4318_v53, -1e+30 }
 0x898   :  { %4361 = vmax.xlane.f32.xlu0 %v9622_v42  ;;  %4363 = vmax.xlane.f32.xlu1 %v9626_v48  ;;  %v4269_v8 = vpop.permute.xlu1 %4268 }
 0x899   :  { %v4320_v20 = vmax.f32 %v4288_v27, %v4304_v10  ;;  %v4290_v26 = vadd.f32 %v9548_v29, %v4269_v8 }
 0x89b   :  { %v4306_v4 = vmul.f32 0.2, %v4290_v26  ;;  %v9637_v40 = vsel %vm10980_vm2, %v4320_v20, -1e+30 }
 0x89c   :  { %4367 = vmax.xlane.f32.xlu1 %v9633_v35  ;;  %4365 = vmax.xlane.f32.xlu0 %v9637_v40 }
 0x89d   :  { %v4322_v47 = vmax.f32 %v4290_v26, %v4306_v4 }
 0x89f   :  { %v9643_v0 = vsel %vm10982_vm3, %v4322_v47, -1e+30 }
 0x8a0   :  { %4369 = vmax.xlane.f32.xlu0 %v9643_v0 }
 0x901   :  { %v4340_v29 = vpop.xlane.xlu0 %4339 }
 0x902   :  { %v4371_v34 = vsub.f32 %v9555_v37, %v4340_v29 }
 0x903   :  { %v4342_v55 = vpop.xlane.xlu1 %4341 }
 0x904   :  { %v4387_v36 = vmul.f32 1.442695, %v4371_v34  ;;  %v4372_v31 = vsub.f32 %v9561_v33, %v4342_v55 }
 0x905   :  { %v4344_v9 = vpop.xlane.xlu0 %4343 }
 0x906   :  { %6143 = vpow2.f32 %v4387_v36  ;;  %v4389_v62 = vmul.f32 1.442695, %v4372_v31  ;;  %v4373_v39 = vsub.f32 %v9566_v28, %v4344_v9 }
 0x908   :  { %6145 = vpow2.f32 %v4389_v62  ;;  %v4391_v3 = vmul.f32 1.442695, %v4373_v39 }
 0x909   :  { %v4346_v22 = vpop.xlane.xlu0 %4345 }
 0x90a   :  { %6147 = vpow2.f32 %v4391_v3  ;;  %v4374_v13 = vsub.f32 %v9572_v61, %v4346_v22 }
 0x90c   :  { %v4393_v23 = vmul.f32 1.442695, %v4374_v13 }
 0x90d   :  { %v4348_v51 = vpop.xlane.xlu1 %4347 }
 0x90e   :  { %6149 = vpow2.f32 %v4393_v23  ;;  %v4375_v37 = vsub.f32 %v9578_v19, %v4348_v51 }
 0x910   :  { %v6144_v57 = vpop.eup %6143  ;;  %v4395_v44 = vmul.f32 1.442695, %v4375_v37 }
 0x911   :  { %v4350_v16 = vpop.xlane.xlu0 %4349  ;;  %v9652_v33 = vmul.f32 %v6144_v57, %v10964_v30 }
 0x912   :  { %v6146_v58 = vpop.eup %6145  ;;  %6151 = vpow2.f32 %v4395_v44  ;;  %v4376_v28 = vsub.f32 %v9584_v32, %v4350_v16 }
 0x913   :  { %4435 = vadd.xlane.f32.xlu1 %v9652_v33  ;;  %v9657_v11 = vmul.f32 %v6146_v58, %v10965_v56 }
 0x914   :  { %v6148_v61 = vpop.eup %6147  ;;  %v4397_v15 = vmul.f32 1.442695, %v4376_v28 }
 0x915   :  { %4437 = vadd.xlane.f32.xlu0 %v9657_v11  ;;  %v4352_v19 = vpop.xlane.xlu1 %4351  ;;  %v9661_v52 = vmul.f32 %v6148_v61, %v10966_v5 }
 0x916   :  { %6153 = vpow2.f32 %v4397_v15  ;;  %v4377_v30 = vsub.f32 %v9591_v24, %v4352_v19 }
 0x917   :  { %4439 = vadd.xlane.f32.xlu1 %v9661_v52 }
 0x918   :  { %v6150_v49 = vpop.eup %6149  ;;  %v4399_v32 = vmul.f32 1.442695, %v4377_v30 }
 0x919   :  { %v4354_v6 = vpop.xlane.xlu0 %4353  ;;  %v9666_v53 = vmul.f32 %v6150_v49, %v10967_v25 }
 0x91a   :  { %6155 = vpow2.f32 %v4399_v32  ;;  %v4378_v56 = vsub.f32 %v9598_v7, %v4354_v6 }
 0x91b   :  { %4441 = vadd.xlane.f32.xlu0 %v9666_v53 }
 0x91c   :  { %v6152_v27 = vpop.eup %6151  ;;  %v4401_v45 = vmul.f32 1.442695, %v4378_v56 }
 0x91d   :  { %v4356_v5 = vpop.xlane.xlu1 %4355  ;;  %v9671_v10 = vmul.f32 %v6152_v27, %v10968_v18 }
 0x91e   :  { %6157 = vpow2.f32 %v4401_v45  ;;  %v4379_v24 = vsub.f32 %v9605_v2, %v4356_v5 }
 0x91f   :  { %4443 = vadd.xlane.f32.xlu1 %v9671_v10 }
 0x920   :  { %v6154_v8 = vpop.eup %6153  ;;  %v4403_v20 = vmul.f32 1.442695, %v4379_v24 }
 0x921   :  { %v4358_v25 = vpop.xlane.xlu0 %4357  ;;  %v4360_v26 = vpop.xlane.xlu1 %4359  ;;  %v9676_v4 = vmul.f32 %v6154_v8, %v10969_v41 }
 0x922   :  { %6159 = vpow2.f32 %v4403_v20  ;;  %v4380_v7 = vsub.f32 %v9615_v38, %v4358_v25  ;;  %v4381_v47 = vsub.f32 %v9611_v60, %v4360_v26 }
 0x923   :  { %4445 = vadd.xlane.f32.xlu0 %v9676_v4 }
 0x924   :  { %v6156_v18 = vpop.eup %6155  ;;  %v4405_v29 = vmul.f32 1.442695, %v4380_v7  ;;  %v4407_v34 = vmul.f32 1.442695, %v4381_v47 }
 0x925   :  { %v4362_v2 = vpop.xlane.xlu0 %4361  ;;  %v4364_v55 = vpop.xlane.xlu1 %4363  ;;  %v9682_v36 = vmul.f32 %v6156_v18, %v10970_v14 }
 0x926   :  { %6161 = vpow2.f32 %v4405_v29  ;;  %v4382_v31 = vsub.f32 %v9622_v42, %v4362_v2  ;;  %v4383_v41 = vsub.f32 %v9626_v48, %v4364_v55 }
 0x927   :  { %6163 = vpow2.f32 %v4407_v34  ;;  %4447 = vadd.xlane.f32.xlu1 %v9682_v36 }
 0x928   :  { %v6158_v38 = vpop.eup %6157  ;;  %v4409_v60 = vmul.f32 1.442695, %v4382_v31  ;;  %v4411_v9 = vmul.f32 1.442695, %v4383_v41 }
 0x929   :  { %v4366_v62 = vpop.xlane.xlu0 %4365  ;;  %v4368_v39 = vpop.xlane.xlu1 %4367  ;;  %v9688_v3 = vmul.f32 %v6158_v38, %v10971_v46 }
 0x92a   :  { %6165 = vpow2.f32 %v4409_v60  ;;  %v4384_v14 = vsub.f32 %v9637_v40, %v4366_v62  ;;  %v4385_v22 = vsub.f32 %v9633_v35, %v4368_v39 }
 0x92b   :  { %6167 = vpow2.f32 %v4411_v9  ;;  %4449 = vadd.xlane.f32.xlu0 %v9688_v3 }
 0x92c   :  { %v6160_v42 = vpop.eup %6159  ;;  %v4413_v48 = vmul.f32 1.442695, %v4384_v14  ;;  %v4415_v13 = vmul.f32 1.442695, %v4385_v22 }
 0x92d   :  { %v4370_v23 = vpop.xlane.xlu0 %4369  ;;  %v9694_v51 = vmul.f32 %v6160_v42, %v10972_v50 }
 0x92e   :  { %6169 = vpow2.f32 %v4413_v48  ;;  %v4386_v37 = vsub.f32 %v9643_v0, %v4370_v23 }
 0x92f   :  { %6171 = vpow2.f32 %v4415_v13  ;;  %4451 = vadd.xlane.f32.xlu1 %v9694_v51 }
 0x930   :  { %v6162_v46 = vpop.eup %6161  ;;  %v4417_v40 = vmul.f32 1.442695, %v4386_v37 }
 0x931   :  { %v6164_v57 = vpop.eup %6163  ;;  %v9699_v35 = vmul.f32 %v6162_v46, %v10974_v1 }
 0x932   :  { %6173 = vpow2.f32 %v4417_v40  ;;  %v9702_v44 = vmul.f32 %v6164_v57, %v10973_v43 }
 0x933   :  { %4453 = vadd.xlane.f32.xlu0 %v9699_v35 }
 0x934   :  { %v6166_v50 = vpop.eup %6165  ;;  %4455 = vadd.xlane.f32.xlu1 %v9702_v44 }
 0x935   :  { %v6168_v16 = vpop.eup %6167  ;;  %v9707_v0 = vmul.f32 %v6166_v50, %v10975_v59 }
 0x936   :  { %v9710_v58 = vmul.f32 %v6168_v16, %v10976_v54 }
 0x937   :  { %4457 = vadd.xlane.f32.xlu0 %v9707_v0 }
 0x938   :  { %v6170_v1 = vpop.eup %6169  ;;  %4459 = vadd.xlane.f32.xlu1 %v9710_v58 }
 0x939   :  { %v6172_v28 = vpop.eup %6171  ;;  %v9715_v43 = vmul.f32 %v6170_v1, %v10906_v63 }
 0x93a   :  { %v9718_v61 = vmul.f32 %v6172_v28, %v10978_v17 }
 0x93b   :  { %4461 = vadd.xlane.f32.xlu0 %v9715_v43 }
 0x93c   :  { %v6174_v15 = vpop.eup %6173  ;;  %4463 = vadd.xlane.f32.xlu1 %v9718_v61 }
 0x93d   :  { %v9723_v59 = vmul.f32 %v6174_v15, %v10981_v12 }
 0x93f   :  { %4465 = vadd.xlane.f32.xlu0 %v9723_v59 }
 0x9a0   :  { %v4436_v54 = vpop.xlane.xlu1 %4435 }
 0x9a1   :  { %6175 = vrcp.f32 %v4436_v54 }
 0x9a2   :  { %v4438_v19 = vpop.xlane.xlu0 %4437 }
 0x9a3   :  { %6177 = vrcp.f32 %v4438_v19 }
 0x9a4   :  { %v4440_v30 = vpop.xlane.xlu1 %4439 }
 0x9a5   :  { %6179 = vrcp.f32 %v4440_v30 }
 0x9a8   :  { %v4442_v63 = vpop.xlane.xlu0 %4441 }
 0x9a9   :  { %6181 = vrcp.f32 %v4442_v63 }
 0x9ab   :  { %v6176_v17 = vpop.eup %6175 }
 0x9ac   :  { %v4444_v49 = vpop.xlane.xlu1 %4443  ;;  %v4483_v6 = vmul.f32 %v6176_v17, %v9652_v33 }
 0x9ad   :  { %v6178_v32 = vpop.eup %6177  ;;  %6183 = vrcp.f32 %v4444_v49 }
 0x9ae   :  { %v4484_v56 = vmul.f32 %v6178_v32, %v9657_v11 }
 0x9af   :  { %v6180_v45 = vpop.eup %6179 }
 0x9b0   :  { %v4446_v12 = vpop.xlane.xlu0 %4445  ;;  %v4499_v27 = vpack.c.bf16 %v4484_v56, %v4483_v6  ;;  %v4485_v8 = vmul.f32 %v6180_v45, %v9661_v52 }
 0x9b1   :  { %6185 = vrcp.f32 %v4446_v12 }
 0x9b2   :  { %5464 = vmatprep.mubr.bf16.mxu1 %v4499_v27 }
 0x9b3   :  { %v6182_v5 = vpop.eup %6181 }
 0x9b4   :  { %v4448_v24 = vpop.xlane.xlu1 %4447  ;;  %v4486_v20 = vmul.f32 %v6182_v5, %v9666_v53 }
 0x9b5   :  { %6187 = vrcp.f32 %v4448_v24 }
 0x9b6   :  { %v4500_v25 = vpack.c.bf16 %v4486_v20, %v4485_v8 }
 0x9b7   :  { %v6184_v7 = vpop.eup %6183 }
 0x9b8   :  { %v4450_v26 = vpop.xlane.xlu0 %4449  ;;  %5465 = vmatmul.mubr.bf16.vlgmr.msra.gmra.mrb[72].mxu1 %v4500_v25  ;;  %v4487_v47 = vmul.f32 %v6184_v7, %v9671_v10 }
 0x9b9   :  { %6189 = vrcp.f32 %v4450_v26 }
 0x9bb   :  { %v6186_v33 = vpop.eup %6185 }
 0x9bc   :  { %v4452_v11 = vpop.xlane.xlu1 %4451  ;;  %v4488_v18 = vmul.f32 %v6186_v33, %v9676_v4 }
 0x9bd   :  { %6191 = vrcp.f32 %v4452_v11 }
 0x9be   :  { %v4501_v29 = vpack.c.bf16 %v4488_v18, %v4487_v47 }
 0x9bf   :  { %v6188_v2 = vpop.eup %6187 }
 0x9c0   :  { %v4454_v34 = vpop.xlane.xlu0 %4453  ;;  %5468 = vmatprep.mubr.bf16.mxu1 %v4501_v29  ;;  %v4489_v31 = vmul.f32 %v6188_v2, %v9682_v36 }
 0x9c1   :  { %6193 = vrcp.f32 %v4454_v34  ;;  %v4456_v52 = vpop.xlane.xlu1 %4455 }
 0x9c2   :  { %6195 = vrcp.f32 %v4456_v52 }
 0x9c3   :  { %v6190_v53 = vpop.eup %6189 }
 0x9c4   :  { %v4458_v55 = vpop.xlane.xlu0 %4457  ;;  %v4490_v41 = vmul.f32 %v6190_v53, %v9688_v3 }
 0x9c5   :  { %6197 = vrcp.f32 %v4458_v55  ;;  %v4460_v38 = vpop.xlane.xlu1 %4459 }
 0x9c6   :  { %v4502_v60 = vpack.c.bf16 %v4490_v41, %v4489_v31  ;;  %6199 = vrcp.f32 %v4460_v38 }
 0x9c7   :  { %v6192_v4 = vpop.eup %6191 }
 0x9c8   :  { %v4462_v10 = vpop.xlane.xlu0 %4461  ;;  %5469 = vmatmul.mubr.bf16.gmra.mrb[76].mxu1 %v4502_v60  ;;  %v4491_v14 = vmul.f32 %v6192_v4, %v9694_v51 }
 0x9c9   :  { %6201 = vrcp.f32 %v4462_v10  ;;  %v4464_v9 = vpop.xlane.xlu1 %4463 }
 0x9ca   :  { %6203 = vrcp.f32 %v4464_v9 }
 0x9cb   :  { %v6194_v62 = vpop.eup %6193 }
 0x9cc   :  { %v4466_v39 = vpop.xlane.xlu0 %4465  ;;  %v4492_v22 = vmul.f32 %v6194_v62, %v9699_v35  ;;  %v6196_v42 = vpop.eup %6195 }
 0x9cd   :  { %6205 = vrcp.f32 %v4466_v39  ;;  %v4493_v48 = vmul.f32 %v6196_v42, %v9702_v44  ;;  %v4609_v44 = vld [vmem:[%s9984_s9 + $0x2] sm:$0x1] }
 0x9ce   :  { %v4503_v36 = vpack.c.bf16 %v4492_v22, %v4491_v14  ;;  %vm4610_vm4 = vcmp.gt.f32.partialorder %v4609_v44, 0.0 }
 0x9cf   :  { %v6198_v3 = vpop.eup %6197 }
 0x9d0   :  { %5472 = vmatprep.mubr.bf16.mxu1 %v4503_v36  ;;  %v4494_v13 = vmul.f32 %v6198_v3, %v9707_v0  ;;  %v6200_v23 = vpop.eup %6199  ;;  %v10983_v0 = vmov 0  }
 0x9d1   :  { %v4495_v40 = vmul.f32 %v6200_v23, %v9710_v58  ;;  %v4611_v15 = vsel %vm4610_vm4, 1, %v10983_v0 }
 0x9d2   :  { %v4504_v37 = vpack.c.bf16 %v4494_v13, %v4493_v48  ;;  %v4615_v58 = vrot.slane %v4611_v15, %v10963_v21 }
 0x9d3   :  { %v6202_v46 = vpop.eup %6201 }
 0x9d4   :  { %5473 = vmatmul.mubr.bf16.gmra.mrb[80].mxu1 %v4504_v37  ;;  %v4496_v57 = vmul.f32 %v6202_v46, %v9715_v43  ;;  %v6204_v51 = vpop.eup %6203  ;;  %v4886_v43 = vld [vmem:[%s9984_s9 + $0x1] ss:$0 sm:$0xff]  ;;  %vm9750_vm5 = vcmp.eq.s32.totalorder %v4615_v58, 1 }
 0x9d5   :  { %v4497_v16 = vmul.f32 %v6204_v51, %v9718_v61 }
 0x9d6   :  { %v4505_v50 = vpack.c.bf16 %v4496_v57, %v4495_v40 }
 0x9d7   :  { %v6206_v35 = vpop.eup %6205 }
 0x9d8   :  { %5476 = vmatprep.mubr.bf16.mxu1 %v4505_v50  ;;  %v4498_v1 = vmul.f32 %v6206_v35, %v9723_v59 }
 0x9da   :  { %v4506_v28 = vpack.c.bf16 %v4498_v1, %v4497_v16 }
 0x9dc   :  { %5477 = vmatmul.mubr.bf16.gmra.mrb[84].mxu1 %v4506_v28 }
 0xa8b   :  { %v5466_v54 = vpop.f32.mrb[72].mxu1 }
 0xa8c   :  { %v4546_v59 = vpop.f32.mrb[73].mxu1  ;;  %v4555_v17 = vadd.f32 %v5466_v54, %v4886_v43 }
 0xa8d   :  { %v4547_v19 = vadd.f32 %v4886_v43, %v4546_v59  ;;  %v5467_v30 = vpop.f32.mrb[74].mxu1 }
 0xa8e   :  { %v4549_v63 = vpop.f32.mrb[75].mxu1  ;;  %v4558_v21 = vadd.f32 %v5467_v30, %v4886_v43  ;;  %v9766_v56 = vsel %vm9750_vm5, %v4555_v17, -1e+30 }
 0xa8f   :  { %v4550_v49 = vadd.f32 %v4886_v43, %v4549_v63  ;;  %v9756_v32 = vsel %vm9750_vm5, %v4547_v19, -1e+30 }
 0xa90   :  { %4633 = vmax.xlane.f32.xlu1 %v9756_v32  ;;  %v9771_v12 = vsel %vm9750_vm5, %v4558_v21, -1e+30 }
 0xa91   :  { %v9761_v6 = vsel %vm9750_vm5, %v4550_v49, -1e+30 }
 0xa92   :  { %4635 = vmax.xlane.f32.xlu0 %v9761_v6 }
 0xa94   :  { %4637 = vmax.xlane.f32.xlu1 %v9766_v56 }
 0xa96   :  { %4639 = vmax.xlane.f32.xlu0 %v9771_v12 }
 0xa9b   :  { %v5470_v27 = vpop.f32.mrb[76].mxu1 }
 0xa9c   :  { %v4562_v45 = vpop.f32.mrb[77].mxu1  ;;  %v4571_v20 = vadd.f32 %v5470_v27, %v4886_v43 }
 0xa9d   :  { %v4563_v5 = vadd.f32 %v4886_v43, %v4562_v45  ;;  %v5471_v24 = vpop.f32.mrb[78].mxu1 }
 0xa9e   :  { %v4565_v8 = vpop.f32.mrb[79].mxu1  ;;  %v4574_v7 = vadd.f32 %v5471_v24, %v4886_v43  ;;  %v9786_v11 = vsel %vm9750_vm5, %v4571_v20, -1e+30 }
 0xa9f   :  { %v4566_v25 = vadd.f32 %v4886_v43, %v4565_v8  ;;  %v9776_v26 = vsel %vm9750_vm5, %v4563_v5, -1e+30 }
 0xaa0   :  { %4641 = vmax.xlane.f32.xlu1 %v9776_v26  ;;  %v9791_v47 = vsel %vm9750_vm5, %v4574_v7, -1e+30 }
 0xaa1   :  { %v9781_v33 = vsel %vm9750_vm5, %v4566_v25, -1e+30 }
 0xaa2   :  { %4643 = vmax.xlane.f32.xlu0 %v9781_v33 }
 0xaa4   :  { %4645 = vmax.xlane.f32.xlu1 %v9786_v11 }
 0xaa6   :  { %4647 = vmax.xlane.f32.xlu0 %v9791_v47 }
 0xaa7   :  { %v5474_v18 = vpop.f32.mrb[80].mxu1 }
 0xaa8   :  { %v4578_v29 = vpop.f32.mrb[81].mxu1  ;;  %v4587_v53 = vadd.f32 %v5474_v18, %v4886_v43 }
 0xaa9   :  { %v4579_v34 = vadd.f32 %v4886_v43, %v4578_v29  ;;  %v5475_v2 = vpop.f32.mrb[82].mxu1 }
 0xaaa   :  { %v4581_v52 = vpop.f32.mrb[83].mxu1  ;;  %v4590_v41 = vadd.f32 %v5475_v2, %v4886_v43  ;;  %v9806_v10 = vsel %vm9750_vm5, %v4587_v53, -1e+30 }
 0xaab   :  { %v4582_v55 = vadd.f32 %v4886_v43, %v4581_v52  ;;  %v9796_v31 = vsel %vm9750_vm5, %v4579_v34, -1e+30 }
 0xaac   :  { %4649 = vmax.xlane.f32.xlu1 %v9796_v31  ;;  %v9811_v39 = vsel %vm9750_vm5, %v4590_v41, -1e+30 }
 0xaad   :  { %v9801_v38 = vsel %vm9750_vm5, %v4582_v55, -1e+30 }
 0xaae   :  { %4651 = vmax.xlane.f32.xlu0 %v9801_v38 }
 0xaaf   :  { %v5478_v60 = vpop.f32.mrb[84].mxu1 }
 0xab0   :  { %v4594_v4 = vpop.f32.mrb[85].mxu1  ;;  %4653 = vmax.xlane.f32.xlu1 %v9806_v10  ;;  %v4603_v22 = vadd.f32 %v5478_v60, %v4886_v43 }
 0xab1   :  { %v4595_v9 = vadd.f32 %v4886_v43, %v4594_v4  ;;  %v5479_v62 = vpop.f32.mrb[86].mxu1 }
 0xab2   :  { %v4597_v14 = vpop.f32.mrb[87].mxu1  ;;  %4655 = vmax.xlane.f32.xlu0 %v9811_v39  ;;  %v4606_v3 = vadd.f32 %v5479_v62, %v4886_v43  ;;  %v9826_v13 = vsel %vm9750_vm5, %v4603_v22, -1e+30 }
 0xab3   :  { %v4598_v42 = vadd.f32 %v4886_v43, %v4597_v14  ;;  %v9816_v36 = vsel %vm9750_vm5, %v4595_v9, -1e+30 }
 0xab4   :  { %4657 = vmax.xlane.f32.xlu1 %v9816_v36  ;;  %v9831_v23 = vsel %vm9750_vm5, %v4606_v3, -1e+30 }
 0xab5   :  { %v9821_v48 = vsel %vm9750_vm5, %v4598_v42, -1e+30 }
 0xab6   :  { %4659 = vmax.xlane.f32.xlu0 %v9821_v48 }
 0xab8   :  { %4661 = vmax.xlane.f32.xlu1 %v9826_v13 }
 0xaba   :  { %4663 = vmax.xlane.f32.xlu0 %v9831_v23 }
 0xb1d   :  { %v9834_v37 = vpop.xlane.xlu1 %4633 }
 0xb1e   :  { %v4665_v46 = vsub.f32 %v9756_v32, %v9834_v37 }
 0xb1f   :  { %v9838_v40 = vpop.xlane.xlu0 %4635 }
 0xb20   :  { %v4681_v57 = vmul.f32 1.442695, %v4665_v46  ;;  %v4666_v51 = vsub.f32 %v9761_v6, %v9838_v40 }
 0xb21   :  { %v9842_v50 = vpop.xlane.xlu1 %4637 }
 0xb22   :  { %6207 = vpow2.f32 %v4681_v57  ;;  %v4683_v35 = vmul.f32 1.442695, %v4666_v51  ;;  %v4667_v16 = vsub.f32 %v9766_v56, %v9842_v50 }
 0xb23   :  { %v9846_v1 = vpop.xlane.xlu0 %4639 }
 0xb24   :  { %6209 = vpow2.f32 %v4683_v35  ;;  %v4685_v28 = vmul.f32 1.442695, %v4667_v16  ;;  %v4668_v44 = vsub.f32 %v9771_v12, %v9846_v1 }
 0xb26   :  { %6211 = vpow2.f32 %v4685_v28  ;;  %v4687_v0 = vmul.f32 1.442695, %v4668_v44 }
 0xb28   :  { %6213 = vpow2.f32 %v4687_v0 }
 0xb2c   :  { %v6208_v15 = vpop.eup %6207 }
 0xb2d   :  { %4713 = vadd.xlane.f32.xlu1 %v6208_v15  ;;  %v9850_v58 = vpop.xlane.xlu1 %4641 }
 0xb2e   :  { %v6210_v43 = vpop.eup %6209  ;;  %v4669_v54 = vsub.f32 %v9776_v26, %v9850_v58 }
 0xb2f   :  { %4715 = vadd.xlane.f32.xlu0 %v6210_v43  ;;  %v9854_v61 = vpop.xlane.xlu0 %4643 }
 0xb30   :  { %v6212_v59 = vpop.eup %6211  ;;  %v4689_v19 = vmul.f32 1.442695, %v4669_v54  ;;  %v4670_v30 = vsub.f32 %v9781_v33, %v9854_v61 }
 0xb31   :  { %4717 = vadd.xlane.f32.xlu1 %v6212_v59  ;;  %v9858_v63 = vpop.xlane.xlu1 %4645 }
 0xb32   :  { %v6214_v17 = vpop.eup %6213  ;;  %6215 = vpow2.f32 %v4689_v19  ;;  %v4691_v49 = vmul.f32 1.442695, %v4670_v30  ;;  %v4671_v21 = vsub.f32 %v9786_v11, %v9858_v63 }
 0xb33   :  { %4719 = vadd.xlane.f32.xlu0 %v6214_v17  ;;  %v9862_v27 = vpop.xlane.xlu0 %4647 }
 0xb34   :  { %6217 = vpow2.f32 %v4691_v49  ;;  %v4693_v45 = vmul.f32 1.442695, %v4671_v21  ;;  %v4672_v5 = vsub.f32 %v9791_v47, %v9862_v27 }
 0xb36   :  { %6219 = vpow2.f32 %v4693_v45  ;;  %v4695_v24 = vmul.f32 1.442695, %v4672_v5 }
 0xb38   :  { %6221 = vpow2.f32 %v4695_v24 }
 0xb39   :  { %v9866_v8 = vpop.xlane.xlu1 %4649 }
 0xb3a   :  { %v4673_v20 = vsub.f32 %v9796_v31, %v9866_v8 }
 0xb3b   :  { %v9870_v25 = vpop.xlane.xlu0 %4651 }
 0xb3c   :  { %v6216_v7 = vpop.eup %6215  ;;  %v4697_v18 = vmul.f32 1.442695, %v4673_v20  ;;  %v4674_v29 = vsub.f32 %v9801_v38, %v9870_v25 }
 0xb3d   :  { %4721 = vadd.xlane.f32.xlu1 %v6216_v7  ;;  %v9874_v34 = vpop.xlane.xlu1 %4653 }
 0xb3e   :  { %v6218_v2 = vpop.eup %6217  ;;  %6223 = vpow2.f32 %v4697_v18  ;;  %v4699_v52 = vmul.f32 1.442695, %v4674_v29  ;;  %v4675_v53 = vsub.f32 %v9806_v10, %v9874_v34 }
 0xb3f   :  { %4723 = vadd.xlane.f32.xlu0 %v6218_v2  ;;  %v9878_v55 = vpop.xlane.xlu0 %4655 }
 0xb40   :  { %v6220_v41 = vpop.eup %6219  ;;  %6225 = vpow2.f32 %v4699_v52  ;;  %v4701_v60 = vmul.f32 1.442695, %v4675_v53  ;;  %v4676_v4 = vsub.f32 %v9811_v39, %v9878_v55 }
 0xb41   :  { %4725 = vadd.xlane.f32.xlu1 %v6220_v41  ;;  %v9882_v9 = vpop.xlane.xlu1 %4657 }
 0xb42   :  { %v6222_v62 = vpop.eup %6221  ;;  %6227 = vpow2.f32 %v4701_v60  ;;  %v4703_v14 = vmul.f32 1.442695, %v4676_v4  ;;  %v4677_v22 = vsub.f32 %v9816_v36, %v9882_v9 }
 0xb43   :  { %4727 = vadd.xlane.f32.xlu0 %v6222_v62  ;;  %v9886_v42 = vpop.xlane.xlu0 %4659 }
 0xb44   :  { %6229 = vpow2.f32 %v4703_v14  ;;  %v4705_v3 = vmul.f32 1.442695, %v4677_v22  ;;  %v4678_v46 = vsub.f32 %v9821_v48, %v9886_v42 }
 0xb45   :  { %v9890_v57 = vpop.xlane.xlu1 %4661 }
 0xb46   :  { %6231 = vpow2.f32 %v4705_v3  ;;  %v4707_v51 = vmul.f32 1.442695, %v4678_v46  ;;  %v4679_v35 = vsub.f32 %v9826_v13, %v9890_v57 }
 0xb47   :  { %v9894_v16 = vpop.xlane.xlu0 %4663 }
 0xb48   :  { %v6224_v28 = vpop.eup %6223  ;;  %6233 = vpow2.f32 %v4707_v51  ;;  %v4709_v44 = vmul.f32 1.442695, %v4679_v35  ;;  %v4680_v0 = vsub.f32 %v9831_v23, %v9894_v16 }
 0xb49   :  { %4729 = vadd.xlane.f32.xlu1 %v6224_v28 }
 0xb4a   :  { %v6226_v15 = vpop.eup %6225  ;;  %6235 = vpow2.f32 %v4709_v44  ;;  %v4711_v43 = vmul.f32 1.442695, %v4680_v0 }
 0xb4b   :  { %4731 = vadd.xlane.f32.xlu0 %v6226_v15 }
 0xb4c   :  { %v6228_v54 = vpop.eup %6227  ;;  %6237 = vpow2.f32 %v4711_v43 }
 0xb4d   :  { %4733 = vadd.xlane.f32.xlu1 %v6228_v54 }
 0xb4e   :  { %v6230_v59 = vpop.eup %6229 }
 0xb4f   :  { %4735 = vadd.xlane.f32.xlu0 %v6230_v59 }
 0xb50   :  { %v6232_v19 = vpop.eup %6231 }
 0xb51   :  { %4737 = vadd.xlane.f32.xlu1 %v6232_v19 }
 0xb52   :  { %v6234_v30 = vpop.eup %6233 }
 0xb53   :  { %4739 = vadd.xlane.f32.xlu0 %v6234_v30 }
 0xb54   :  { %v6236_v17 = vpop.eup %6235 }
 0xb55   :  { %4741 = vadd.xlane.f32.xlu1 %v6236_v17 }
 0xb56   :  { %v6238_v49 = vpop.eup %6237 }
 0xb57   :  { %4743 = vadd.xlane.f32.xlu0 %v6238_v49 }
 0xbba   :  { %v4714_v21 = vpop.xlane.xlu1 %4713 }
 0xbbb   :  { %6239 = vlog2.f32 %v4714_v21 }
 0xbbc   :  { %v4716_v45 = vpop.xlane.xlu0 %4715 }
 0xbbd   :  { %6241 = vlog2.f32 %v4716_v45 }
 0xbbe   :  { %v4718_v5 = vpop.xlane.xlu1 %4717 }
 0xbbf   :  { %6243 = vlog2.f32 %v4718_v5 }
 0xbc0   :  { %v4720_v24 = vpop.xlane.xlu0 %4719 }
 0xbc1   :  { %6245 = vlog2.f32 %v4720_v24 }
 0xbc5   :  { %v6240_v20 = vpop.eup %6239 }
 0xbc6   :  { %v4746_v7 = vmul.f32 0.6931472, %v6240_v20 }
 0xbc7   :  { %v6242_v18 = vpop.eup %6241 }
 0xbc8   :  { %v4777_v29 = vadd.f32 %v4746_v7, %v9834_v37  ;;  %v4748_v2 = vmul.f32 0.6931472, %v6242_v18 }
 0xbc9   :  { %v6244_v52 = vpop.eup %6243 }
 0xbca   :  { %v4793_v53 = vsub.f32 %v9756_v32, %v4777_v29  ;;  %v4778_v41 = vadd.f32 %v4748_v2, %v9838_v40  ;;  %v4750_v60 = vmul.f32 0.6931472, %v6244_v52  ;;  %v4722_v4 = vpop.xlane.xlu1 %4721 }
 0xbcb   :  { %v6246_v62 = vpop.eup %6245  ;;  %6247 = vlog2.f32 %v4722_v4 }
 0xbcc   :  { %4809 = vst [vmem:[%s9988_s10] sm:$0xff] %v4793_v53  ;;  %v4794_v14 = vsub.f32 %v9761_v6, %v4778_v41  ;;  %v4779_v22 = vadd.f32 %v4750_v60, %v9842_v50  ;;  %v4752_v3 = vmul.f32 0.6931472, %v6246_v62  ;;  %v4724_v37 = vpop.xlane.xlu0 %4723 }
 0xbcd   :  { %6249 = vlog2.f32 %v4724_v37 }
 0xbce   :  { %4810 = vst [vmem:[%s9988_s10 + $0x8] sm:$0xff] %v4794_v14  ;;  %v4795_v32 = vsub.f32 %v9766_v56, %v4779_v22  ;;  %v4780_v40 = vadd.f32 %v4752_v3, %v9846_v1  ;;  %v4726_v46 = vpop.xlane.xlu1 %4725 }
 0xbcf   :  { %6251 = vlog2.f32 %v4726_v46 }
 0xbd0   :  { %4811 = vst [vmem:[%s9988_s10 + $0x10] sm:$0xff] %v4795_v32  ;;  %v4796_v6 = vsub.f32 %v9771_v12, %v4780_v40  ;;  %v4728_v50 = vpop.xlane.xlu0 %4727 }
 0xbd1   :  { %6253 = vlog2.f32 %v4728_v50 }
 0xbd2   :  { %4812 = vst [vmem:[%s9988_s10 + $0x18] sm:$0xff] %v4796_v6 }
 0xbd5   :  { %v6248_v51 = vpop.eup %6247 }
 0xbd6   :  { %v4754_v35 = vmul.f32 0.6931472, %v6248_v51  ;;  %v4730_v28 = vpop.xlane.xlu1 %4729 }
 0xbd7   :  { %v6250_v56 = vpop.eup %6249  ;;  %6255 = vlog2.f32 %v4730_v28 }
 0xbd8   :  { %v4781_v1 = vadd.f32 %v4754_v35, %v9850_v58  ;;  %v4756_v44 = vmul.f32 0.6931472, %v6250_v56  ;;  %v4732_v0 = vpop.xlane.xlu0 %4731 }
 0xbd9   :  { %v6252_v15 = vpop.eup %6251  ;;  %6257 = vlog2.f32 %v4732_v0 }
 0xbda   :  { %v4797_v43 = vsub.f32 %v9776_v26, %v4781_v1  ;;  %v4782_v12 = vadd.f32 %v4756_v44, %v9854_v61  ;;  %v4758_v54 = vmul.f32 0.6931472, %v6252_v15  ;;  %v4734_v59 = vpop.xlane.xlu1 %4733 }
 0xbdb   :  { %v6254_v19 = vpop.eup %6253  ;;  %6259 = vlog2.f32 %v4734_v59 }
 0xbdc   :  { %4813 = vst [vmem:[%s9988_s10 + $0x20] sm:$0xff] %v4797_v43  ;;  %v4798_v30 = vsub.f32 %v9781_v33, %v4782_v12  ;;  %v4783_v58 = vadd.f32 %v4758_v54, %v9858_v63  ;;  %v4760_v17 = vmul.f32 0.6931472, %v6254_v19  ;;  %v4736_v49 = vpop.xlane.xlu0 %4735 }
 0xbdd   :  { %6261 = vlog2.f32 %v4736_v49 }
 0xbde   :  { %4814 = vst [vmem:[%s9988_s10 + $0x28] sm:$0xff] %v4798_v30  ;;  %v4799_v26 = vsub.f32 %v9786_v11, %v4783_v58  ;;  %v4784_v61 = vadd.f32 %v4760_v17, %v9862_v27  ;;  %v4738_v21 = vpop.xlane.xlu1 %4737 }
 0xbdf   :  { %6263 = vlog2.f32 %v4738_v21 }
 0xbe0   :  { %4815 = vst [vmem:[%s9988_s10 + $0x30] sm:$0xff] %v4799_v26  ;;  %v4800_v33 = vsub.f32 %v9791_v47, %v4784_v61  ;;  %v4740_v63 = vpop.xlane.xlu0 %4739 }
 0xbe1   :  { %v6256_v45 = vpop.eup %6255  ;;  %6265 = vlog2.f32 %v4740_v63 }
 0xbe2   :  { %4816 = vst [vmem:[%s9988_s10 + $0x38] sm:$0xff] %v4800_v33  ;;  %v4762_v5 = vmul.f32 0.6931472, %v6256_v45  ;;  %v4742_v24 = vpop.xlane.xlu1 %4741 }
 0xbe3   :  { %v6258_v11 = vpop.eup %6257  ;;  %6267 = vlog2.f32 %v4742_v24 }
 0xbe4   :  { %v4785_v27 = vadd.f32 %v4762_v5, %v9866_v8  ;;  %v4764_v20 = vmul.f32 0.6931472, %v6258_v11  ;;  %v4744_v7 = vpop.xlane.xlu0 %4743 }
 0xbe5   :  { %v6260_v18 = vpop.eup %6259  ;;  %6269 = vlog2.f32 %v4744_v7 }
 0xbe6   :  { %v4801_v29 = vsub.f32 %v9796_v31, %v4785_v27  ;;  %v4786_v47 = vadd.f32 %v4764_v20, %v9870_v25  ;;  %v4766_v2 = vmul.f32 0.6931472, %v6260_v18 }
 0xbe7   :  { %v6262_v52 = vpop.eup %6261 }
 0xbe8   :  { %4817 = vst [vmem:[%s9988_s10 + $0x40] sm:$0xff] %v4801_v29  ;;  %v4802_v53 = vsub.f32 %v9801_v38, %v4786_v47  ;;  %v4787_v41 = vadd.f32 %v4766_v2, %v9874_v34  ;;  %v4768_v60 = vmul.f32 0.6931472, %v6262_v52 }
 0xbe9   :  { %v6264_v8 = vpop.eup %6263 }
 0xbea   :  { %4818 = vst [vmem:[%s9988_s10 + $0x48] sm:$0xff] %v4802_v53  ;;  %v4803_v31 = vsub.f32 %v9806_v10, %v4787_v41  ;;  %v4788_v25 = vadd.f32 %v4768_v60, %v9878_v55  ;;  %v4770_v4 = vmul.f32 0.6931472, %v6264_v8 }
 0xbeb   :  { %v6266_v62 = vpop.eup %6265 }
 0xbec   :  { %4819 = vst [vmem:[%s9988_s10 + $0x50] sm:$0xff] %v4803_v31  ;;  %v4804_v38 = vsub.f32 %v9811_v39, %v4788_v25  ;;  %v4789_v34 = vadd.f32 %v4770_v4, %v9882_v9  ;;  %v4772_v14 = vmul.f32 0.6931472, %v6266_v62 }
 0xbed   :  { %v6268_v22 = vpop.eup %6267 }
 0xbee   :  { %4820 = vst [vmem:[%s9988_s10 + $0x58] sm:$0xff] %v4804_v38  ;;  %v4805_v10 = vsub.f32 %v9816_v36, %v4789_v34  ;;  %v4790_v55 = vadd.f32 %v4772_v14, %v9886_v42  ;;  %v4774_v3 = vmul.f32 0.6931472, %v6268_v22 }
 0xbef   :  { %v6270_v37 = vpop.eup %6269 }
 0xbf0   :  { %4821 = vst [vmem:[%s9988_s10 + $0x60] sm:$0xff] %v4805_v10  ;;  %v4806_v39 = vsub.f32 %v9821_v48, %v4790_v55  ;;  %v4791_v9 = vadd.f32 %v4774_v3, %v9890_v57  ;;  %v4776_v32 = vmul.f32 0.6931472, %v6270_v37 }
 0xbf2   :  { %4822 = vst [vmem:[%s9988_s10 + $0x68] sm:$0xff] %v4806_v39  ;;  %v4807_v40 = vsub.f32 %v9826_v13, %v4791_v9  ;;  %v4792_v36 = vadd.f32 %v4776_v32, %v9894_v16 }
 0xbf4   :  { %4823 = vst [vmem:[%s9988_s10 + $0x70] sm:$0xff] %v4807_v40  ;;  %v4808_v42 = vsub.f32 %v9831_v23, %v4792_v36 }
 0xbf6   :  { %4824 = vst [vmem:[%s9988_s10 + $0x78] sm:$0xff] %v4808_v42 }

</bundles_post_ra>
